<compile_context>
chip_gen: v7x
topology: tpu7x:2x2x1
jax: 0.10.0
libtpu: 0.0.40
codegen_flags: <defaults>
</compile_context>

<pallas_src>
import numpy as np
import jax
import jax.numpy as jnp
from jax.experimental import pallas as pl
from jax.experimental.pallas import tpu as pltpu

K = 3          # conv kernel size
H_IN = 9       # input spatial size (9 -> 7 -> 5)
H1 = 7         # conv1 output spatial
H2 = 5         # conv2 output spatial
C1 = 32        # conv1 channels
C2 = 64        # conv2 channels
F1 = 128       # fc1 features
NCLS = 10      # classes
PAD_OUT = 128  # fc2 output padded to a full lane width

NPIX = H_IN * H_IN            # 81
NF1 = H1 * H1 * C1            # 1568   conv1 features, (i,j,c) order
NF2 = H2 * H2 * C2            # 1600   conv2 features, (i,j,c) order


# ---------------------------------------------------------------------------
# Fused forward kernel (one grid step = one batch tile; pure matmul chain)
# ---------------------------------------------------------------------------
def fused_net_kernel(x_ref, w1_ref, b1_ref, w2_ref, b2_ref,
                     wf1_ref, bf1_ref, wf2_ref, bf2_ref, out_ref):
    # ---- conv1 (densified operator) + ReLU ----
    x = x_ref[...].astype(jnp.bfloat16)                          # (TB, 81)
    h1 = jnp.dot(x, w1_ref[...], preferred_element_type=jnp.float32)
    h1 = jnp.maximum(h1 + b1_ref[...], 0.0)                      # (TB, 1568) f32

    # ---- conv2 (densified operator) + ReLU ----
    h2 = jnp.dot(h1.astype(jnp.bfloat16), w2_ref[...],
                 preferred_element_type=jnp.float32)
    h2 = jnp.maximum(h2 + b2_ref[...], 0.0)                      # (TB, 1600) f32

    # ---- fc1 + ReLU ----
    h3 = jnp.dot(h2.astype(jnp.bfloat16), wf1_ref[...],
                 preferred_element_type=jnp.float32)
    h3 = jnp.maximum(h3 + bf1_ref[...], 0.0)                     # (TB, 128) f32

    # ---- fc2 (padded to 128 lanes) + log_softmax, all in f32 ----
    z = jnp.dot(h3.astype(jnp.bfloat16), wf2_ref[...],
                preferred_element_type=jnp.float32) + bf2_ref[...]  # (TB, 128)
    m = jnp.max(z, axis=-1, keepdims=True)       # padded lanes hold ~-1e30
    s = z - m
    lse = jnp.log(jnp.sum(jnp.exp(s), axis=-1, keepdims=True))   # padded exp -> 0
    out_ref[...] = s - lse


# ---------------------------------------------------------------------------
# One-time (outside the traced forward) weight re-layout, PyTorch -> kernel
# ---------------------------------------------------------------------------
def _conv_to_dense(w, h_in, w_in):
    """Dense matrix D such that, for x flattened as (i*w_in + j)*c_in + c,
    x_flat @ D equals the VALID conv output flattened as
    (oi*w_out + oj)*c_out + c_out_idx.  w is (c_out, c_in, kh, kw)."""
    w = np.asarray(w, np.float32)
    c_out, c_in, kh, kw = w.shape
    h_out, w_out = h_in - kh + 1, w_in - kw + 1
    wt = np.transpose(w, (2, 3, 1, 0))                    # (kh, kw, c_in, c_out)
    D = np.zeros((h_in * w_in * c_in, h_out * w_out * c_out), np.float32)
    for oi in range(h_out):
        for oj in range(w_out):
            col0 = (oi * w_out + oj) * c_out
            for ki in range(kh):
                for kj in range(kw):
                    row0 = ((oi + ki) * w_in + (oj + kj)) * c_in
                    D[row0:row0 + c_in, col0:col0 + c_out] = wt[ki, kj]
    return D


def prepare_params(params):
    w1, b1, w2, b2, fw1, fb1, fw2, fb2 = params
    # conv1 (32,1,3,3) -> dense (81, 1568), output feature order (i, j, c).
    w1d = jnp.asarray(_conv_to_dense(w1, H_IN, H_IN), jnp.bfloat16)
    b1d = jnp.tile(jnp.asarray(b1, jnp.float32), H1 * H1).reshape(1, NF1)
    # conv2 (64,32,3,3) -> dense (1568, 1600), same (i, j, c) ordering.
    w2d = jnp.asarray(_conv_to_dense(w2, H1, H1), jnp.bfloat16)
    b2d = jnp.tile(jnp.asarray(b2, jnp.float32), H2 * H2).reshape(1, NF2)
    # fc1 (128,1600): torch cols are c*25 + i*5 + j; re-order rows to (i,j,c)
    # to match the kernel's flatten order; bf16 for the MXU.
    wf1p = jnp.asarray(fw1, jnp.float32).reshape(F1, C2, H2, H2)
    wf1p = jnp.transpose(wf1p, (2, 3, 1, 0)).reshape(NF2, F1).astype(jnp.bfloat16)
    bf1p = jnp.asarray(fb1, jnp.float32).reshape(1, F1)
    # fc2 (10,128) -> (128,10), zero-padded to 128 output columns (lane-dense
    # store); padded bias = -1e30 so log_softmax ignores the padded lanes.
    wf2p = jnp.zeros((F1, PAD_OUT), jnp.float32)
    wf2p = wf2p.at[:, :NCLS].set(jnp.asarray(fw2, jnp.float32).T).astype(jnp.bfloat16)
    bf2p = jnp.full((1, PAD_OUT), -1e30, jnp.float32)
    bf2p = bf2p.at[0, :NCLS].set(jnp.asarray(fb2, jnp.float32))
    return (w1d, b1d, w2d, b2d, wf1p, bf1p, wf2p, bf2p)


def _pick_tb(n):
    # Large batch tiles amortize the ~0.35us/step grid overhead and give every
    # matmul a big M.  Cap at 256 so batches >= 512 still get >= 2 grid steps
    # (lets the "parallel" batch axis shard across v7x's two TensorCores)
    # while staying well inside v7x's 64 MiB VMEM; on v5e/v6e (1 TC, 128 MiB)
    # the largest divisor tile / single block is simply taken.
    for tb in (256, 128, 64, 32, 16, 8):
        if n % tb == 0:
            return tb
    return n   # odd / tiny batch: single whole-batch block


# ---------------------------------------------------------------------------
# Forward wrapper
# ---------------------------------------------------------------------------
def net_forward(x, prepared_params):
    w1d, b1d, w2d, b2d, wf1, bf1, wf2, bf2 = prepared_params
    N, C, H, W = x.shape
    assert C == 1 and H == H_IN and W == H_IN, (C, H, W)
    xf = x.reshape(N, NPIX)                    # (N, 81), row-major (i*9 + j)

    TB = _pick_tb(N)
    grid = (N // TB,)

    out_pad = pl.pallas_call(
        fused_net_kernel,
        out_shape=jax.ShapeDtypeStruct((N, PAD_OUT), jnp.float32),
        grid=grid,
        in_specs=[
            pl.BlockSpec((TB, NPIX),     lambda b: (b, 0)),
            pl.BlockSpec((NPIX, NF1),    lambda b: (0, 0)),
            pl.BlockSpec((1, NF1),       lambda b: (0, 0)),
            pl.BlockSpec((NF1, NF2),     lambda b: (0, 0)),
            pl.BlockSpec((1, NF2),       lambda b: (0, 0)),
            pl.BlockSpec((NF2, F1),      lambda b: (0, 0)),
            pl.BlockSpec((1, F1),        lambda b: (0, 0)),
            pl.BlockSpec((F1, PAD_OUT),  lambda b: (0, 0)),
            pl.BlockSpec((1, PAD_OUT),   lambda b: (0, 0)),
        ],
        out_specs=pl.BlockSpec((TB, PAD_OUT), lambda b: (b, 0)),
        compiler_params=pltpu.CompilerParams(
            dimension_semantics=("parallel",),
            vmem_limit_bytes=32 * 1024 * 1024,
        ),
    )(xf, w1d, b1d, w2d, b2d, wf1, bf1, wf2, bf2)
    return out_pad[:, :NCLS]                   # drop the padded lanes


# ---------------------------------------------------------------------------
# Pure-JAX reference (PyTorch semantics) and parameter init
# ---------------------------------------------------------------------------
def net_reference(x, params):
    w1, b1, w2, b2, fw1, fb1, fw2, fb2 = params
    dn = ('NCHW', 'OIHW', 'NCHW')
    y = jax.lax.conv_general_dilated(x, w1, (1, 1), 'VALID', dimension_numbers=dn)
    y = jax.nn.relu(y + b1.reshape(1, -1, 1, 1))
    y = jax.lax.conv_general_dilated(y, w2, (1, 1), 'VALID', dimension_numbers=dn)
    y = jax.nn.relu(y + b2.reshape(1, -1, 1, 1))
    y = y.reshape(y.shape[0], -1)                            # torch .view(-1, 1600)
    y = jax.nn.relu(y @ fw1.T + fb1)
    y = y @ fw2.T + fb2
    return jax.nn.log_softmax(y, axis=-1)


def init_params(key):
    ks = jax.random.split(key, 8)
    w1 = jax.random.normal(ks[0], (C1, 1, K, K), jnp.float32) * 0.1
    b1 = jax.random.normal(ks[1], (C1,), jnp.float32) * 0.1
    w2 = jax.random.normal(ks[2], (C2, C1, K, K), jnp.float32) * 0.05
    b2 = jax.random.normal(ks[3], (C2,), jnp.float32) * 0.05
    fw1 = jax.random.normal(ks[4], (F1, C2 * H2 * H2), jnp.float32) * 0.02
    fb1 = jax.random.normal(ks[5], (F1,), jnp.float32) * 0.02
    fw2 = jax.random.normal(ks[6], (NCLS, F1), jnp.float32) * 0.05
    fb2 = jax.random.normal(ks[7], (NCLS,), jnp.float32) * 0.05
    return (w1, b1, w2, b2, fw1, fb1, fw2, fb2)


if __name__ == "__main__":
    key = jax.random.PRNGKey(0)
    k_x, k_p = jax.random.split(key)

    N = 64  # 9x9 input so two valid 3x3 convs -> 5x5 -> 64*5*5 for fc1
    x = jax.random.normal(k_x, (N, 1, H_IN, H_IN), jnp.float32)
    raw_params = init_params(k_p)
    params = prepare_params(raw_params)   # one-time offline re-layout / bf16

    fwd = jax.jit(net_forward)
    out = jax.block_until_ready(fwd(x, params))

    assert out.shape == (N, NCLS), out.shape
    # log_softmax rows must exponentiate-sum to ~1 (computed in f32 in-kernel)
    row_sums = jnp.sum(jnp.exp(out), axis=1)
    assert bool(jnp.all(jnp.abs(row_sums - 1.0) < 1e-3)), row_sums

    # Compare against a pure-JAX f32 reference (bf16 MXU inputs -> loose tol).
    ref = net_reference(x, raw_params)
    max_err = float(jnp.max(jnp.abs(out - ref)))
    assert max_err < 3e-2, f"max abs err vs reference: {max_err}"

    print("KERNEL_OK")
</pallas_src>

<mosaic_0001>
module attributes {stable_mosaic.version = 11 : i64} {
  func.func @fused_net_kernel(%arg0: i32, %arg1: memref<64x81xf32, #tpu.memory_space<vmem>>, %arg2: memref<81x1568xbf16, #tpu.memory_space<vmem>>, %arg3: memref<1x1568xf32, #tpu.memory_space<vmem>>, %arg4: memref<1568x1600xbf16, #tpu.memory_space<vmem>>, %arg5: memref<1x1600xf32, #tpu.memory_space<vmem>>, %arg6: memref<1600x128xbf16, #tpu.memory_space<vmem>>, %arg7: memref<1x128xf32, #tpu.memory_space<vmem>>, %arg8: memref<128x128xbf16, #tpu.memory_space<vmem>>, %arg9: memref<1x128xf32, #tpu.memory_space<vmem>>, %arg10: memref<64x128xf32, #tpu.memory_space<vmem>>) attributes {dimension_semantics = [#tpu.dimension_semantics<parallel>], iteration_bounds = array<i64: 1>, scalar_prefetch = 0 : i64, scratch_operands = 0 : i64, tpu.core_type = #tpu.core_type<tc>, window_params = [{transform_indices = @transform_0, window_bounds = array<i64: 64, 81>}, {pipeline_mode = #tpu.pipeline_mode<synchronous>, transform_indices = @transform_1, window_bounds = array<i64: 81, 1568>}, {pipeline_mode = #tpu.pipeline_mode<synchronous>, transform_indices = @transform_2, window_bounds = array<i64: 1, 1568>}, {pipeline_mode = #tpu.pipeline_mode<synchronous>, transform_indices = @transform_3, window_bounds = array<i64: 1568, 1600>}, {pipeline_mode = #tpu.pipeline_mode<synchronous>, transform_indices = @transform_4, window_bounds = array<i64: 1, 1600>}, {pipeline_mode = #tpu.pipeline_mode<synchronous>, transform_indices = @transform_5, window_bounds = array<i64: 1600, 128>}, {pipeline_mode = #tpu.pipeline_mode<synchronous>, transform_indices = @transform_6, window_bounds = array<i64: 1, 128>}, {pipeline_mode = #tpu.pipeline_mode<synchronous>, transform_indices = @transform_7, window_bounds = array<i64: 128, 128>}, {pipeline_mode = #tpu.pipeline_mode<synchronous>, transform_indices = @transform_8, window_bounds = array<i64: 1, 128>}, {transform_indices = @transform_9, window_bounds = array<i64: 64, 128>}]} {
    %c0 = arith.constant 0 : index
    %c0_0 = arith.constant 0 : index
    %0 = vector.load %arg1[%c0, %c0_0] : memref<64x81xf32, #tpu.memory_space<vmem>>, vector<64x81xf32>
    %1 = arith.truncf %0 : vector<64x81xf32> to vector<64x81xbf16>
    %c0_1 = arith.constant 0 : index
    %c0_2 = arith.constant 0 : index
    %2 = vector.load %arg2[%c0_1, %c0_2] : memref<81x1568xbf16, #tpu.memory_space<vmem>>, vector<81x1568xbf16>
    %cst = arith.constant dense<0.000000e+00> : vector<64x1568xf32>
    %3 = tpu.matmul %1, %2, %cst {dimension_numbers = #tpu.dot_dimension_numbers<[1], [0], [0], [1], [0, 0, 1, 1], [], []>} : vector<64x81xbf16>, vector<81x1568xbf16>, vector<64x1568xf32> -> vector<64x1568xf32>
    %c0_3 = arith.constant 0 : index
    %c0_4 = arith.constant 0 : index
    %4 = vector.load %arg3[%c0_3, %c0_4] : memref<1x1568xf32, #tpu.memory_space<vmem>>, vector<1x1568xf32>
    %5 = vector.broadcast %4 : vector<1x1568xf32> to vector<64x1568xf32>
    %6 = arith.addf %3, %5 : vector<64x1568xf32>
    %cst_5 = arith.constant 0.000000e+00 : f32
    %7 = vector.broadcast %cst_5 : f32 to vector<64x1568xf32>
    %8 = arith.maximumf %6, %7 : vector<64x1568xf32>
    %9 = arith.truncf %8 : vector<64x1568xf32> to vector<64x1568xbf16>
    %c0_6 = arith.constant 0 : index
    %c0_7 = arith.constant 0 : index
    %10 = vector.load %arg4[%c0_6, %c0_7] : memref<1568x1600xbf16, #tpu.memory_space<vmem>>, vector<1568x1600xbf16>
    %cst_8 = arith.constant dense<0.000000e+00> : vector<64x1600xf32>
    %11 = tpu.matmul %9, %10, %cst_8 {dimension_numbers = #tpu.dot_dimension_numbers<[1], [0], [0], [1], [0, 0, 1, 1], [], []>} : vector<64x1568xbf16>, vector<1568x1600xbf16>, vector<64x1600xf32> -> vector<64x1600xf32>
    %c0_9 = arith.constant 0 : index
    %c0_10 = arith.constant 0 : index
    %12 = vector.load %arg5[%c0_9, %c0_10] : memref<1x1600xf32, #tpu.memory_space<vmem>>, vector<1x1600xf32>
    %13 = vector.broadcast %12 : vector<1x1600xf32> to vector<64x1600xf32>
    %14 = arith.addf %11, %13 : vector<64x1600xf32>
    %cst_11 = arith.constant 0.000000e+00 : f32
    %15 = vector.broadcast %cst_11 : f32 to vector<64x1600xf32>
    %16 = arith.maximumf %14, %15 : vector<64x1600xf32>
    %17 = arith.truncf %16 : vector<64x1600xf32> to vector<64x1600xbf16>
    %c0_12 = arith.constant 0 : index
    %c0_13 = arith.constant 0 : index
    %18 = vector.load %arg6[%c0_12, %c0_13] : memref<1600x128xbf16, #tpu.memory_space<vmem>>, vector<1600x128xbf16>
    %cst_14 = arith.constant dense<0.000000e+00> : vector<64x128xf32>
    %19 = tpu.matmul %17, %18, %cst_14 {dimension_numbers = #tpu.dot_dimension_numbers<[1], [0], [0], [1], [0, 0, 1, 1], [], []>} : vector<64x1600xbf16>, vector<1600x128xbf16>, vector<64x128xf32> -> vector<64x128xf32>
    %c0_15 = arith.constant 0 : index
    %c0_16 = arith.constant 0 : index
    %20 = vector.load %arg7[%c0_15, %c0_16] : memref<1x128xf32, #tpu.memory_space<vmem>>, vector<1x128xf32>
    %21 = vector.broadcast %20 : vector<1x128xf32> to vector<64x128xf32>
    %22 = arith.addf %19, %21 : vector<64x128xf32>
    %cst_17 = arith.constant 0.000000e+00 : f32
    %23 = vector.broadcast %cst_17 : f32 to vector<64x128xf32>
    %24 = arith.maximumf %22, %23 : vector<64x128xf32>
    %25 = arith.truncf %24 : vector<64x128xf32> to vector<64x128xbf16>
    %c0_18 = arith.constant 0 : index
    %c0_19 = arith.constant 0 : index
    %26 = vector.load %arg8[%c0_18, %c0_19] : memref<128x128xbf16, #tpu.memory_space<vmem>>, vector<128x128xbf16>
    %cst_20 = arith.constant dense<0.000000e+00> : vector<64x128xf32>
    %27 = tpu.matmul %25, %26, %cst_20 {dimension_numbers = #tpu.dot_dimension_numbers<[1], [0], [0], [1], [0, 0, 1, 1], [], []>} : vector<64x128xbf16>, vector<128x128xbf16>, vector<64x128xf32> -> vector<64x128xf32>
    %c0_21 = arith.constant 0 : index
    %c0_22 = arith.constant 0 : index
    %28 = vector.load %arg9[%c0_21, %c0_22] : memref<1x128xf32, #tpu.memory_space<vmem>>, vector<1x128xf32>
    %29 = vector.broadcast %28 : vector<1x128xf32> to vector<64x128xf32>
    %30 = arith.addf %27, %29 : vector<64x128xf32>
    %cst_23 = arith.constant dense<0xFF800000> : vector<64xf32>
    %31 = vector.multi_reduction <maximumf>, %30, %cst_23 [1] : vector<64x128xf32> to vector<64xf32>
    %32 = vector.shape_cast %31 : vector<64xf32> to vector<64x1xf32>
    %33 = vector.broadcast %32 : vector<64x1xf32> to vector<64x128xf32>
    %34 = arith.subf %30, %33 : vector<64x128xf32>
    %35 = math.exp %34 : vector<64x128xf32>
    %cst_24 = arith.constant dense<0.000000e+00> : vector<64xf32>
    %36 = vector.multi_reduction <add>, %35, %cst_24 [1] : vector<64x128xf32> to vector<64xf32>
    %37 = vector.shape_cast %36 : vector<64xf32> to vector<64x1xf32>
    %38 = math.log %37 : vector<64x1xf32>
    %39 = vector.broadcast %38 : vector<64x1xf32> to vector<64x128xf32>
    %40 = arith.subf %34, %39 : vector<64x128xf32>
    %c0_25 = arith.constant 0 : index
    %c0_26 = arith.constant 0 : index
    %41 = vector.load %arg10[%c0_25, %c0_26] : memref<64x128xf32, #tpu.memory_space<vmem>>, vector<64x128xf32>
    tpu.vector_store %arg10[%c0_25, %c0_26], %40 {strides = array<i32>} : memref<64x128xf32, #tpu.memory_space<vmem>>, vector<64x128xf32>,
    return
  }
  func.func @transform_0(%arg0: i32) -> (i32, i32) {
    %c0_i32 = arith.constant 0 : i32
    %c0_i32_0 = arith.constant 0 : i32
    return %arg0, %c0_i32 : i32, i32
  }
  func.func @transform_1(%arg0: i32) -> (i32, i32) {
    %c0_i32 = arith.constant 0 : i32
    %c0_i32_0 = arith.constant 0 : i32
    %c0_i32_1 = arith.constant 0 : i32
    return %c0_i32, %c0_i32_0 : i32, i32
  }
  func.func @transform_2(%arg0: i32) -> (i32, i32) {
    %c0_i32 = arith.constant 0 : i32
    %c0_i32_0 = arith.constant 0 : i32
    %c0_i32_1 = arith.constant 0 : i32
    return %c0_i32, %c0_i32_0 : i32, i32
  }
  func.func @transform_3(%arg0: i32) -> (i32, i32) {
    %c0_i32 = arith.constant 0 : i32
    %c0_i32_0 = arith.constant 0 : i32
    %c0_i32_1 = arith.constant 0 : i32
    return %c0_i32, %c0_i32_0 : i32, i32
  }
  func.func @transform_4(%arg0: i32) -> (i32, i32) {
    %c0_i32 = arith.constant 0 : i32
    %c0_i32_0 = arith.constant 0 : i32
    %c0_i32_1 = arith.constant 0 : i32
    return %c0_i32, %c0_i32_0 : i32, i32
  }
  func.func @transform_5(%arg0: i32) -> (i32, i32) {
    %c0_i32 = arith.constant 0 : i32
    %c0_i32_0 = arith.constant 0 : i32
    %c0_i32_1 = arith.constant 0 : i32
    return %c0_i32, %c0_i32_0 : i32, i32
  }
  func.func @transform_6(%arg0: i32) -> (i32, i32) {
    %c0_i32 = arith.constant 0 : i32
    %c0_i32_0 = arith.constant 0 : i32
    %c0_i32_1 = arith.constant 0 : i32
    return %c0_i32, %c0_i32_0 : i32, i32
  }
  func.func @transform_7(%arg0: i32) -> (i32, i32) {
    %c0_i32 = arith.constant 0 : i32
    %c0_i32_0 = arith.constant 0 : i32
    %c0_i32_1 = arith.constant 0 : i32
    return %c0_i32, %c0_i32_0 : i32, i32
  }
  func.func @transform_8(%arg0: i32) -> (i32, i32) {
    %c0_i32 = arith.constant 0 : i32
    %c0_i32_0 = arith.constant 0 : i32
    %c0_i32_1 = arith.constant 0 : i32
    return %c0_i32, %c0_i32_0 : i32, i32
  }
  func.func @transform_9(%arg0: i32) -> (i32, i32) {
    %c0_i32 = arith.constant 0 : i32
    %c0_i32_0 = arith.constant 0 : i32
    return %arg0, %c0_i32 : i32, i32
  }
}

</mosaic_0001>

<bundles_post_ra>
// kernel: net_forward.1
= control target key start
LH: loop header
LB: loop body
LE: loop exit
PB: predicated region body
PF: predicated region fallthrough
CT: control target
= control target key end

     0   :  { %14 = vsyncpa [#allocation3], 0  ;;  %s20937_s0 = inlined_call_operand.vmem [shape: f32[64,81], index: 0, kind: input, shape index: {}]   ;;  %s20938_s1 = inlined_call_operand.hbm [shape: bf16[81,1568], index: 1, kind: input, shape index: {}]   ;;  %s20939_s2 = inlined_call_operand.hbm [shape: f32[1,1568], index: 2, kind: input, shape index: {}]   ;;  %s20940_s3 = inlined_call_operand.hbm [shape: bf16[1568,1600], index: 3, kind: input, shape index: {}]   ;;  %s20941_s4 = inlined_call_operand.hbm [shape: f32[1,1600], index: 4, kind: input, shape index: {}]   ;;  %s20942_s5 = inlined_call_operand.hbm [shape: bf16[1600,128], index: 5, kind: input, shape index: {}]   ;;  %s20943_s6 = inlined_call_operand.hbm [shape: f32[1,128], index: 6, kind: input, shape index: {}]   ;;  %s20944_s7 = inlined_call_operand.hbm [shape: bf16[128,128], index: 7, kind: input, shape index: {}]   ;;  %s20945_s8 = inlined_call_operand.hbm [shape: f32[1,128], index: 8, kind: input, shape index: {}]   ;;  %s20946_s9 = inlined_call_operand.vmem [shape: f32[64,128], index: 9, kind: output, shape index: {}]  }
   0x1   :  { %15 = vsyncpa [#allocation5], 0 }
   0x2   :  { %16 = vsyncpa [#allocation8], 0 }
   0x3   :  { %17 = vsyncpa [#allocation11], 0 }
   0x4   :  { %18 = vsyncpa [#allocation14], 0  ;;  %s19580_s30 = smov [#allocation4]   ;;  %s19581_s11 = smov [#allocation7]  }
   0x5   :  { %s39_s10 = sshll.u32 %s19580_s30, 4  ;;  %s61_s12 = sshll.u32 %s19581_s11, 4  ;;  %s40_s10 = int_to_ptr.vmem [resolvable:$true] %s39_s10  ;;  %s62_s12 = int_to_ptr.vmem [resolvable:$true] %s61_s12 }
   0x6   :  { %s19394_s15 = scalar_lea.hbm %s20939_s2, 208 }
   0x7   :  { %p19395_p0 = scmp.ne.s32.totalorder %s20939_s2, %s19394_s15  ;;  %p19398_p1 = scmp.lt.u32.totalorder %s19394_s15, %s20939_s2 }
   0x9   :  { %p19400_p2 = pnand %p19398_p1, %p19395_p0 }
   0xb   :  { %19403 = shalt.err (!%p19400_p2)
}
   0xc   :  { %s19404_s20 = scalar_lea.vmem %s40_s10, 208  ;;  %s19408_s21 = scalar_lea.vmem %s40_s10, 224 }
   0xd   :  { %p19405_p3 = scmp.ne.s32.totalorder %s40_s10, %s19404_s20  ;;  %p19409_p4 = scmp.lt.s32.totalorder %s40_s10, %s40_s10 }
   0xe   :  { %p19410_p5 = scmp.lt.s32.totalorder %s19408_s21, %s19404_s20 }
  0x10   :  { %p19411_p6 = por %p19410_p5, %p19409_p4 }
  0x12   :  { %p19412_p7 = pnand %p19411_p6, %p19405_p3 }
  0x14   :  { %19415 = shalt.err (!%p19412_p7)
}
  0x15   :  { %42 = dma.hbm_to_vmem [thread:$0]  %s20939_s2, 208, %s40_s10, [#allocation5]  }
  0x16   :  { %s19416_s26 = scalar_lea.hbm %s20941_s4, 208 }
  0x17   :  { %p19417_p8 = scmp.ne.s32.totalorder %s20941_s4, %s19416_s26  ;;  %p19420_p9 = scmp.lt.u32.totalorder %s19416_s26, %s20941_s4 }
  0x19   :  { %p19422_p10 = pnand %p19420_p9, %p19417_p8 }
  0x1b   :  { %19425 = shalt.err (!%p19422_p10)
}
  0x1c   :  { %s19426_s11 = scalar_lea.vmem %s62_s12, 208  ;;  %s19430_s13 = scalar_lea.vmem %s62_s12, 224 }
  0x1d   :  { %p19427_p11 = scmp.ne.s32.totalorder %s62_s12, %s19426_s11  ;;  %p19431_p12 = scmp.lt.s32.totalorder %s62_s12, %s62_s12 }
  0x1e   :  { %p19432_p13 = scmp.lt.s32.totalorder %s19430_s13, %s19426_s11 }
  0x20   :  { %p19433_p0 = por %p19432_p13, %p19431_p12 }
  0x22   :  { %p19434_p1 = pnand %p19433_p0, %p19427_p11 }
  0x24   :  { %19437 = shalt.err (!%p19434_p1)
}
  0x25   :  { %64 = dma.hbm_to_vmem [thread:$0]  %s20941_s4, 208, %s62_s12, [#allocation8]  }
  0x26   :  { %s19582_s14 = smov [#allocation10]   ;;  %s19583_s16 = smov [#allocation2]  }
  0x27   :  { %s83_s15 = sshll.u32 %s19582_s14, 4  ;;  %s26_s17 = sshll.u32 %s19583_s16, 4  ;;  %s84_s15 = int_to_ptr.vmem [resolvable:$true] %s83_s15  ;;  %s19667_s17 = int_to_ptr.vmem [resolvable:$true] %s26_s17 }
  0x28   :  { %s19438_s20 = scalar_lea.hbm %s20943_s6, 16 }
  0x29   :  { %p19439_p2 = scmp.ne.s32.totalorder %s20943_s6, %s19438_s20  ;;  %p19442_p3 = scmp.lt.u32.totalorder %s19438_s20, %s20943_s6 }
  0x2b   :  { %p19444_p4 = pnand %p19442_p3, %p19439_p2 }
  0x2d   :  { %19447 = shalt.err (!%p19444_p4)
}
  0x2e   :  { %s19448_s4 = scalar_lea.vmem %s84_s15, 16  ;;  %s19452_s12 = scalar_lea.vmem %s84_s15, 32 }
  0x2f   :  { %p19449_p5 = scmp.ne.s32.totalorder %s84_s15, %s19448_s4  ;;  %p19453_p6 = scmp.lt.s32.totalorder %s84_s15, %s84_s15 }
  0x30   :  { %p19454_p7 = scmp.lt.s32.totalorder %s19452_s12, %s19448_s4 }
  0x32   :  { %p19455_p8 = por %p19454_p7, %p19453_p6 }
  0x34   :  { %p19456_p9 = pnand %p19455_p8, %p19449_p5 }
  0x36   :  { %19459 = shalt.err (!%p19456_p9)
}
  0x37   :  { %86 = dma.hbm_to_vmem [thread:$0]  %s20943_s6, 16, %s84_s15, [#allocation11]  }
  0x38   :  { %s19460_s29 = scalar_lea.hbm %s20938_s1, 9152 }
  0x39   :  { %p19461_p10 = scmp.ne.s32.totalorder %s20938_s1, %s19460_s29  ;;  %p19464_p11 = scmp.lt.u32.totalorder %s19460_s29, %s20938_s1 }
  0x3b   :  { %p19466_p12 = pnand %p19464_p11, %p19461_p10 }
  0x3d   :  { %19469 = shalt.err (!%p19466_p12)
}
  0x3e   :  { %s19470_s10 = scalar_lea.vmem %s19667_s17, 9152  ;;  %p19475_p0 = scmp.lt.s32.totalorder %s19667_s17, %s19667_s17 }
  0x3f   :  { %p19471_p13 = scmp.ne.s32.totalorder %s19667_s17, %s19470_s10  ;;  %p19476_p1 = scmp.lt.s32.totalorder %s19470_s10, %s19470_s10 }
  0x41   :  { %p19477_p2 = por %p19476_p1, %p19475_p0 }
  0x43   :  { %p19478_p3 = pnand %p19477_p2, %p19471_p13 }
  0x45   :  { %19481 = shalt.err (!%p19478_p3)
}
  0x46   :  { %s19584_s6 = smov 832   ;;  %s19585_s14 = smov 52  }
  0x47   :  { %32 = dma.hbm_to_vmem [thread:$0]  %s20938_s1, 9152, %s19667_s17, [#allocation3], %s19584_s6, %s19584_s6, %s19585_s14  }
  0x48   :  { %s19586_s18 = smov [#allocation6]   ;;  %s19587_s20 = smov [#allocation9]  }
  0x49   :  { %s48_s19 = sshll.u32 %s19586_s18, 4  ;;  %s70_s21 = sshll.u32 %s19587_s20, 4  ;;  %s49_s19 = int_to_ptr.vmem [resolvable:$true] %s48_s19  ;;  %s19698_s21 = int_to_ptr.vmem [resolvable:$true] %s70_s21 }
  0x4a   :  { %s19482_s24 = scalar_lea.hbm %s20940_s3, 163072 }
  0x4b   :  { %p19483_p4 = scmp.ne.s32.totalorder %s20940_s3, %s19482_s24  ;;  %p19486_p5 = scmp.lt.u32.totalorder %s19482_s24, %s20940_s3 }
  0x4d   :  { %p19488_p6 = pnand %p19486_p5, %p19483_p4 }
  0x4f   :  { %19491 = shalt.err (!%p19488_p6)
}
  0x50   :  { %s19492_s1 = scalar_lea.vmem %s49_s19, 163072  ;;  %p19497_p8 = scmp.lt.s32.totalorder %s49_s19, %s49_s19 }
  0x51   :  { %p19493_p7 = scmp.ne.s32.totalorder %s49_s19, %s19492_s1  ;;  %p19498_p9 = scmp.lt.s32.totalorder %s19492_s1, %s19492_s1 }
  0x53   :  { %p19499_p10 = por %p19498_p9, %p19497_p8 }
  0x55   :  { %p19500_p11 = pnand %p19499_p10, %p19493_p7 }
  0x57   :  { %19503 = shalt.err (!%p19500_p11)
}
  0x58   :  { %54 = dma.hbm_to_vmem [thread:$0]  %s20940_s3, 163072, %s49_s19, [#allocation5], %s19584_s6, %s19584_s6, %s19585_s14  }
  0x59   :  { %s19504_s30 = scalar_lea.hbm %s20942_s5, 12800 }
  0x5a   :  { %p19505_p12 = scmp.ne.s32.totalorder %s20942_s5, %s19504_s30  ;;  %p19508_p13 = scmp.lt.u32.totalorder %s19504_s30, %s20942_s5 }
  0x5c   :  { %p19510_p0 = pnand %p19508_p13, %p19505_p12 }
  0x5e   :  { %19513 = shalt.err (!%p19510_p0)
}
  0x5f   :  { %s19514_s15 = scalar_lea.vmem %s19698_s21, 12800  ;;  %p19519_p2 = scmp.lt.s32.totalorder %s19698_s21, %s19698_s21 }
  0x60   :  { %p19515_p1 = scmp.ne.s32.totalorder %s19698_s21, %s19514_s15  ;;  %p19520_p3 = scmp.lt.s32.totalorder %s19514_s15, %s19514_s15 }
  0x62   :  { %p19521_p4 = por %p19520_p3, %p19519_p2 }
  0x64   :  { %p19522_p5 = pnand %p19521_p4, %p19515_p1 }
  0x66   :  { %19525 = shalt.err (!%p19522_p5)
}
  0x67   :  { %s19588_s3 = smov 64   ;;  %s19589_s6 = smov 4  }
  0x68   :  { %76 = dma.hbm_to_vmem [thread:$0]  %s20942_s5, 12800, %s19698_s21, [#allocation8], %s19588_s3, %s19588_s3, %s19589_s6  }
  0x69   :  { %s19590_s18 = smov [#allocation12]   ;;  %s19591_s20 = smov [#allocation13]  }
  0x6a   :  { %s92_s19 = sshll.u32 %s19590_s18, 4  ;;  %s105_s22 = sshll.u32 %s19591_s20, 4  ;;  %s93_s19 = int_to_ptr.vmem [resolvable:$true] %s92_s19  ;;  %s106_s22 = int_to_ptr.vmem [resolvable:$true] %s105_s22 }
  0x6b   :  { %s19526_s4 = scalar_lea.hbm %s20944_s7, 1024 }
  0x6c   :  { %p19527_p6 = scmp.ne.s32.totalorder %s20944_s7, %s19526_s4  ;;  %p19530_p7 = scmp.lt.u32.totalorder %s19526_s4, %s20944_s7 }
  0x6e   :  { %p19532_p8 = pnand %p19530_p7, %p19527_p6 }
  0x70   :  { %19535 = shalt.err (!%p19532_p8)
}
  0x71   :  { %s19536_s5 = scalar_lea.vmem %s93_s19, 1024  ;;  %p19541_p10 = scmp.lt.s32.totalorder %s93_s19, %s93_s19 }
  0x72   :  { %p19537_p9 = scmp.ne.s32.totalorder %s93_s19, %s19536_s5  ;;  %p19542_p11 = scmp.lt.s32.totalorder %s19536_s5, %s19536_s5 }
  0x74   :  { %p19543_p12 = por %p19542_p11, %p19541_p10 }
  0x76   :  { %p19544_p13 = pnand %p19543_p12, %p19537_p9 }
  0x78   :  { %19547 = shalt.err (!%p19544_p13)
}
  0x79   :  { %98 = dma.hbm_to_vmem [thread:$0]  %s20944_s7, 1024, %s93_s19, [#allocation11], %s19588_s3, %s19588_s3, %s19589_s6  }
  0x7a   :  { %s19548_s29 = scalar_lea.hbm %s20945_s8, 16 }
  0x7b   :  { %p19549_p0 = scmp.ne.s32.totalorder %s20945_s8, %s19548_s29  ;;  %p19552_p1 = scmp.lt.u32.totalorder %s19548_s29, %s20945_s8 }
  0x7d   :  { %p19554_p2 = pnand %p19552_p1, %p19549_p0 }
  0x7f   :  { %19557 = shalt.err (!%p19554_p2)
}
  0x80   :  { %s19558_s10 = scalar_lea.vmem %s106_s22, 16  ;;  %s19562_s15 = scalar_lea.vmem %s106_s22, 32 }
  0x81   :  { %p19559_p3 = scmp.ne.s32.totalorder %s106_s22, %s19558_s10  ;;  %p19563_p4 = scmp.lt.s32.totalorder %s106_s22, %s106_s22 }
  0x82   :  { %p19564_p5 = scmp.lt.s32.totalorder %s19562_s15, %s19558_s10 }
  0x84   :  { %p19565_p6 = por %p19564_p5, %p19563_p4 }
  0x86   :  { %p19566_p7 = pnand %p19565_p6, %p19559_p3 }
  0x88   :  { %19569 = shalt.err (!%p19566_p7)
}
  0x89   :  { %108 = dma.hbm_to_vmem [thread:$0]  %s20945_s8, 16, %s106_s22, [#allocation14]  }
  0x8a   :  { %19570 = dma.done.wait [#allocation3], 9152  }
  0x8b   :  { %19571 = vsyncadd [#allocation3], 4294958144 }
  0x8c   :  { %19572 = dma.done.wait [#allocation5], 163280  }
  0x8d   :  { %19573 = vsyncadd [#allocation5], 4294804016 }
  0x8e   :  { %19574 = dma.done.wait [#allocation8], 13008  }
  0x8f   :  { %19575 = vsyncadd [#allocation8], 4294954288 }
  0x90   :  { %19576 = dma.done.wait [#allocation11], 1040  }
  0x91   :  { %19577 = vsyncadd [#allocation11], 4294966256 }
  0x92   :  { %19578 = dma.done.wait [#allocation14], 16  }
  0x93   :  { %19579 = vsyncadd [#allocation14], 4294967280  ;;  %v20950_v0 = vmov 0   ;;  %v17283_v1 = vld [vmem:[#allocation2 + $0x4] ss:$52 sps:$4 sm:$0xff]   ;;  %vm668_vm0 = vcmask 1040384  }
  0x94   :  { %742 = vmatprep.mubr.bf16.mxu0 %v20950_v0  ;;  %815 = vmatprep.mubr.bf16.mxu1 %v20950_v0  ;;  %v17285_v2 = vld [vmem:[#allocation2] ss:$52 sps:$4 sm:$0xff]   ;;  %v17288_v4 = vld [vmem:[#allocation2 + $0x68] ss:$52 sps:$4 sm:$0xff]   ;;  %v17291_v6 = vld [vmem:[#allocation2 + $0xd0] ss:$52 sps:$4 sm:$0xff]  }
  0x95   :  { %710 = vmatprep.subr.bf16.mxu0 %v17283_v1  ;;  %v17286_v3 = vld [vmem:[#allocation2 + $0x6c] ss:$52 sps:$4 sm:$0xff]   ;;  %v17289_v5 = vld [vmem:[#allocation2 + $0xd4] ss:$52 sps:$4 sm:$0xff]   ;;  %v17292_v7 = vld [vmem:[#allocation2 + $0x13c] ss:$52 sps:$4 sm:$0xff]  }
  0x96   :  { %711 = vmatpush1.bf16.msra.mxu0 %v17285_v2  ;;  %v216_v8 = vld [vmem:[#allocation2 + $0x208] sm:$0x11]  ;;  %v17295_v13 = vld [vmem:[#allocation2 + $0x1a4] ss:$52 sps:$4 sm:$0xff]   ;;  %v19756_v16 = vsel %vm668_vm0, 65535, %v20950_v0  ;;  %vm655_vm1 = vcmask 662528  }
  0x97   :  { %712 = vmatprep.subr.bf16.mxu0 %v17286_v3  ;;  %v17300_v9 = vld [vmem:[#allocation2 + $0xc] ss:$52 sps:$4 sm:$0xff]   ;;  %v17302_v10 = vld [vmem:[#allocation2 + $0x8] ss:$52 sps:$4 sm:$0xff]   ;;  %v14554_v14 = vcombine.high %v216_v8, %v216_v8  ;;  %v17305_v15 = vld [vmem:[#allocation2 + $0x70] ss:$52 sps:$4 sm:$0xff]   ;;  %v14553_v19 = vcombine.low %v216_v8, %v216_v8 }
  0x98   :  { %v17303_v11 = vld [vmem:[#allocation2 + $0x74] ss:$52 sps:$4 sm:$0xff]   ;;  %v17294_v12 = vld [vmem:[#allocation2 + $0x138] ss:$52 sps:$4 sm:$0xff]   ;;  %783 = vmatprep.subr.bf16.mxu1 %v17300_v9  ;;  %v17306_v17 = vld [vmem:[#allocation2 + $0xdc] ss:$52 sps:$4 sm:$0xff]  }
  0x99   :  { %784 = vmatpush1.bf16.msra.mxu1 %v17302_v10  ;;  %v17297_v18 = vld [vmem:[#allocation2 + $0x1a0] ss:$52 sps:$4 sm:$0xff]   ;;  %v675_v20 = vand.u32 %v14554_v14, %v19756_v16  ;;  %v17308_v21 = vld [vmem:[#allocation2 + $0xd8] ss:$52 sps:$4 sm:$0xff]   ;;  %v672_v25 = vand.u32 %v14553_v19, %v19756_v16  ;;  %v17317_v32 = vld [vmem:[#allocation2 + $0x10] ss:$52 sps:$4 sm:$0xff]  }
  0x9a   :  { %713 = vmatpush1.bf16.msra.mxu0 %v17288_v4  ;;  %785 = vmatprep.subr.bf16.mxu1 %v17303_v11  ;;  %v134_v22 = vld [vmem:[%s20937_s0] sm:$0xff]  ;;  %v217_v24 = vld [vmem:[#allocation2 + $0x210] sm:$0x11]  ;;  %v135_v26 = vld [vmem:[%s20937_s0 + $0x8] sm:$0xff]  ;;  %vm9278_vm2 = vcmask 261120   ;;  %vm13775_vm3 = vcmask 523264  }
  0x9b   :  { %714 = vmatprep.subr.bf16.mxu0 %v17289_v5  ;;  %v17309_v23 = vld [vmem:[#allocation2 + $0x144] ss:$52 sps:$4 sm:$0xff]   ;;  %v17311_v27 = vld [vmem:[#allocation2 + $0x140] ss:$52 sps:$4 sm:$0xff]   ;;  %v14556_v30 = vcombine.high %v217_v24, %v217_v24  ;;  %v19766_v31 = vpack.c.bf16 %v135_v26, %v134_v22  ;;  %v17314_v33 = vld [vmem:[#allocation2 + $0x1a8] ss:$52 sps:$4 sm:$0xff]   ;;  %v14555_v34 = vcombine.low %v217_v24, %v217_v24 }
  0x9c   :  { %v17319_v28 = vld [vmem:[#allocation2 + $0x14] ss:$52 sps:$4 sm:$0xff]   ;;  %v17312_v29 = vld [vmem:[#allocation2 + $0x1ac] ss:$52 sps:$4 sm:$0xff]   ;;  %v17322_v35 = vld [vmem:[#allocation2 + $0x7c] ss:$52 sps:$4 sm:$0xff]  }
  0x9d   :  { %786 = vmatpush1.bf16.msra.mxu1 %v17305_v15  ;;  %v681_v36 = vand.u32 %v14556_v30, %v19756_v16  ;;  %v136_v37 = vld [vmem:[%s20937_s0 + $0x10] sm:$0xff]  ;;  %v137_v38 = vld [vmem:[%s20937_s0 + $0x18] sm:$0xff]  ;;  %v678_v40 = vand.u32 %v14555_v34, %v19756_v16  ;;  %v17328_v45 = vld [vmem:[#allocation2 + $0x14c] ss:$52 sps:$4 sm:$0xff]  }
  0x9e   :  { %715 = vmatpush1.bf16.msra.mxu0 %v17291_v6  ;;  %787 = vmatprep.subr.bf16.mxu1 %v17306_v17  ;;  %v17320_v39 = vld [vmem:[#allocation2 + $0x78] ss:$52 sps:$4 sm:$0xff]   ;;  %v17336_v42 = vld [vmem:[#allocation2 + $0x1c] ss:$52 sps:$4 sm:$0xff]   ;;  %v19779_v43 = vpack.c.bf16 %v137_v38, %v136_v37  ;;  %v17323_v44 = vld [vmem:[#allocation2 + $0xe0] ss:$52 sps:$4 sm:$0xff]  }
  0x9f   :  { %716 = vmatprep.subr.bf16.mxu0 %v17292_v7  ;;  %v17325_v41 = vld [vmem:[#allocation2 + $0xe4] ss:$52 sps:$4 sm:$0xff]   ;;  %v139_v50 = vld [vmem:[%s20937_s0 + $0x28] sm:$0xff]  ;;  %v17337_v54 = vld [vmem:[#allocation2 + $0x80] ss:$52 sps:$4 sm:$0xff]  }
  0xa0   :  { %v218_v46 = vld [vmem:[#allocation2 + $0x218] sm:$0x11]  ;;  %v138_v49 = vld [vmem:[%s20937_s0 + $0x20] sm:$0xff]  ;;  %v17331_v52 = vld [vmem:[#allocation2 + $0x1b4] ss:$52 sps:$4 sm:$0xff]  }
  0xa1   :  { %788 = vmatpush1.bf16.msra.mxu1 %v17308_v21  ;;  %v17334_v47 = vld [vmem:[#allocation2 + $0x18] ss:$52 sps:$4 sm:$0xff]   ;;  %v17326_v51 = vld [vmem:[#allocation2 + $0x148] ss:$52 sps:$4 sm:$0xff]   ;;  %v14558_v53 = vcombine.high %v218_v46, %v218_v46  ;;  %v19793_v55 = vpack.c.bf16 %v139_v50, %v138_v49  ;;  %v17329_v57 = vld [vmem:[#allocation2 + $0x1b0] ss:$52 sps:$4 sm:$0xff]   ;;  %v14557_v58 = vcombine.low %v218_v46, %v218_v46 }
  0xa2   :  { %717 = vmatpush1.bf16.msra.mxu0 %v17294_v12  ;;  %789 = vmatprep.subr.bf16.mxu1 %v17309_v23  ;;  %v17339_v48 = vld [vmem:[#allocation2 + $0x84] ss:$52 sps:$4 sm:$0xff]   ;;  %v17345_v56 = vld [vmem:[#allocation2 + $0xec] ss:$52 sps:$4 sm:$0xff]   ;;  %v140_v59 = vld [vmem:[%s20937_s0 + $0x30] sm:$0xff] }
  0xa3   :  { %718 = vmatprep.subr.bf16.mxu0 %v17295_v13  ;;  %v687_v60 = vand.u32 %v14558_v53, %v19756_v16  ;;  %v17343_v61 = vld [vmem:[#allocation2 + $0xe8] ss:$52 sps:$4 sm:$0xff]   ;;  %v219_v1 = vld [vmem:[#allocation2 + $0x220] sm:$0x11]  ;;  %v684_v2 = vand.u32 %v14557_v58, %v19756_v16  ;;  %v17358_v8 = vld [vmem:[#allocation2 + $0x1b8] ss:$52 sps:$4 sm:$0xff]  }
  0xa4   :  { %v141_v62 = vld [vmem:[%s20937_s0 + $0x38] sm:$0xff]  ;;  %v17351_v63 = vld [vmem:[#allocation2 + $0x154] ss:$52 sps:$4 sm:$0xff]   ;;  %v17349_v4 = vld [vmem:[#allocation2 + $0x150] ss:$52 sps:$4 sm:$0xff]   ;;  %v14560_v7 = vcombine.high %v219_v1, %v219_v1  ;;  %v14559_v9 = vcombine.low %v219_v1, %v219_v1 }
  0xa5   :  { %790 = vmatpush1.bf16.msra.mxu1 %v17311_v27  ;;  %v17342_v3 = vld [vmem:[#allocation2 + $0x24] ss:$52 sps:$4 sm:$0xff]   ;;  %v19809_v5 = vpack.c.bf16 %v141_v62, %v140_v59  ;;  %v17360_v6 = vld [vmem:[#allocation2 + $0x1bc] ss:$52 sps:$4 sm:$0xff]   ;;  %v17370_v12 = vld [vmem:[#allocation2 + $0x2c] ss:$52 sps:$4 sm:$0xff]  }
  0xa6   :  { %719 = vmatpush1.bf16.msra.mxu0 %v17297_v18  ;;  %791 = vmatprep.subr.bf16.mxu1 %v17312_v29  ;;  %v693_v10 = vand.u32 %v14560_v7, %v19756_v16  ;;  %v690_v11 = vand.u32 %v14559_v9, %v19756_v16  ;;  %v17340_v13 = vld [vmem:[#allocation2 + $0x20] ss:$52 sps:$4 sm:$0xff]   ;;  %v17346_v15 = vld [vmem:[#allocation2 + $0x88] ss:$52 sps:$4 sm:$0xff]   ;;  %v17352_v18 = vld [vmem:[#allocation2 + $0xf0] ss:$52 sps:$4 sm:$0xff]  }
  0xa7   :  { %720 = vmatprep.subr.bf16.mxu0 %v675_v20  ;;  %v17348_v14 = vld [vmem:[#allocation2 + $0x8c] ss:$52 sps:$4 sm:$0xff]   ;;  %v17354_v17 = vld [vmem:[#allocation2 + $0xf4] ss:$52 sps:$4 sm:$0xff]   ;;  %v17357_v19 = vld [vmem:[#allocation2 + $0x15c] ss:$52 sps:$4 sm:$0xff]  }
  0xa8   :  { %v17368_v20 = vld [vmem:[#allocation2 + $0x28] ss:$52 sps:$4 sm:$0xff]   ;;  %v17355_v23 = vld [vmem:[#allocation2 + $0x158] ss:$52 sps:$4 sm:$0xff]   ;;  %v221_v34 = vld [vmem:[#allocation2 + $0x230] sm:$0x11] }
  0xa9   :  { %792 = vmatpush1.bf16.msra.mxu1 %v17314_v33  ;;  %v220_v21 = vld [vmem:[#allocation2 + $0x228] sm:$0x11]  ;;  %v17363_v24 = vld [vmem:[#allocation2 + $0x1c4] ss:$52 sps:$4 sm:$0xff]   ;;  %v17377_v27 = vld [vmem:[#allocation2 + $0xfc] ss:$52 sps:$4 sm:$0xff]  }
  0xaa   :  { %721 = vmatpush1.bf16.msra.mxu0 %v672_v25  ;;  %793 = vmatprep.subr.bf16.mxu1 %v681_v36  ;;  %v17373_v22 = vld [vmem:[#allocation2 + $0x94] ss:$52 sps:$4 sm:$0xff]   ;;  %v17371_v25 = vld [vmem:[#allocation2 + $0x90] ss:$52 sps:$4 sm:$0xff]   ;;  %v14562_v26 = vcombine.high %v220_v21, %v220_v21  ;;  %v14561_v29 = vcombine.low %v220_v21, %v220_v21  ;;  %v17386_v38 = vld [vmem:[#allocation2 + $0x1cc] ss:$52 sps:$4 sm:$0xff]  }
  0xab   :  { %856 = vmatprep.subr.bf16.mxu0 %v17319_v28  ;;  %v17361_v28 = vld [vmem:[#allocation2 + $0x1c0] ss:$52 sps:$4 sm:$0xff]   ;;  %v17382_v33 = vld [vmem:[#allocation2 + $0x164] ss:$52 sps:$4 sm:$0xff]  }
  0xac   :  { %v699_v30 = vand.u32 %v14562_v26, %v19756_v16  ;;  %v17374_v36 = vld [vmem:[#allocation2 + $0x30] ss:$52 sps:$4 sm:$0xff]   ;;  %v17380_v37 = vld [vmem:[#allocation2 + $0x160] ss:$52 sps:$4 sm:$0xff]   ;;  %v17378_v46 = vld [vmem:[#allocation2 + $0x98] ss:$52 sps:$4 sm:$0xff]  }
  0xad   :  { %14566 = vmatmul.mubr.msk.bf16.vlgmr.msra.gmra.mrb[0].mxu0 %vm655_vm1, %v19766_v31  ;;  %794 = vmatpush1.bf16.msra.mxu1 %v678_v40  ;;  %v17384_v40 = vld [vmem:[#allocation2 + $0x1c8] ss:$52 sps:$4 sm:$0xff]   ;;  %v17433_v9 = vld [vmem:[#allocation6 + $0x2d8] ss:$52 sps:$4 sm:$0xff]  }
  0xae   :  { %752 = vmatprep.mubr.bf16.mxu0 %v20950_v0  ;;  %857 = vmatpush1.bf16.msra.mxu0 %v17317_v32  ;;  %v17375_v32 = vld [vmem:[#allocation2 + $0xf8] ss:$52 sps:$4 sm:$0xff]   ;;  %v17397_v53 = vld [vmem:[#allocation6 + $0x68] ss:$52 sps:$4 sm:$0xff]  }
  0xaf   :  { %858 = vmatprep.subr.bf16.mxu0 %v17322_v35  ;;  %929 = vmatprep.subr.bf16.mxu1 %v17336_v42  ;;  %v696_v35 = vand.u32 %v14561_v29, %v19756_v16  ;;  %v17391_v49 = vld [vmem:[#allocation6] ss:$52 sps:$4 sm:$0xff]   ;;  %v17411_v58 = vld [vmem:[#allocation6 + $0x13c] ss:$52 sps:$4 sm:$0xff]  }
  0xb0   :  { %14570 = vmatmul.mubr.msk.bf16.vlgmr.msra.gmra.mrb[0].mxu1 %vm655_vm1, %v19766_v31  ;;  %v17399_v50 = vld [vmem:[#allocation6 + $0x6c] ss:$52 sps:$4 sm:$0xff]   ;;  %v17421_v1 = vld [vmem:[#allocation6 + $0x208] ss:$52 sps:$4 sm:$0xff]  }
  0xb1   :  { %825 = vmatprep.mubr.bf16.mxu1 %v20950_v0  ;;  %930 = vmatpush1.bf16.msra.mxu1 %v17334_v47  ;;  %v17379_v47 = vld [vmem:[#allocation2 + $0x100] ss:$52 sps:$4 sm:$0xff]   ;;  %v17408_v7 = vld [vmem:[#allocation6 + $0xdc] ss:$52 sps:$4 sm:$0xff]  }
  0xb2   :  { %859 = vmatpush1.bf16.msra.mxu0 %v17320_v39  ;;  %931 = vmatprep.subr.bf16.mxu1 %v17339_v48  ;;  %v14564_v39 = vcombine.high %v221_v34, %v221_v34  ;;  %v17383_v48 = vld [vmem:[#allocation2 + $0x168] ss:$52 sps:$4 sm:$0xff]  }
  0xb3   :  { %860 = vmatprep.subr.bf16.mxu0 %v17325_v41  ;;  %v14563_v41 = vcombine.low %v221_v34, %v221_v34  ;;  %v17396_v59 = vld [vmem:[#allocation6 + $0xc] ss:$52 sps:$4 sm:$0xff]   ;;  %v17432_v21 = vld [vmem:[#allocation6 + $0x27c] ss:$52 sps:$4 sm:$0xff]   ;;  %v17477_v34 = vld [vmem:[#allocation6 + $0x5b4] ss:$52 sps:$4 sm:$0xff]  }
  0xb4   :  { %v705_v42 = vand.u32 %v14564_v39, %v19756_v16  ;;  %v17423_v62 = vld [vmem:[#allocation6 + $0x20c] ss:$52 sps:$4 sm:$0xff]  }
  0xb5   :  { %14567 = vmatmul.mubr.msk.bf16.gmra.mrb[4].mxu0 %vm655_vm1, %v19779_v43  ;;  %932 = vmatpush1.bf16.msra.mxu1 %v17337_v54  ;;  %v17405_v54 = vld [vmem:[#allocation6 + $0xd4] ss:$52 sps:$4 sm:$0xff]   ;;  %v17471_v29 = vld [vmem:[#allocation6 + $0x54c] ss:$52 sps:$4 sm:$0xff]  }
  0xb6   :  { %762 = vmatprep.mubr.bf16.mxu0 %v20950_v0  ;;  %861 = vmatpush1.bf16.msra.mxu0 %v17323_v44  ;;  %v702_v44 = vand.u32 %v14563_v41, %v19756_v16  ;;  %v17436_v26 = vld [vmem:[#allocation6 + $0x2e0] ss:$52 sps:$4 sm:$0xff]   ;;  %v17454_v39 = vld [vmem:[#allocation6 + $0x418] ss:$52 sps:$4 sm:$0xff]  }
  0xb7   :  { %862 = vmatprep.subr.bf16.mxu0 %v17328_v45  ;;  %933 = vmatprep.subr.bf16.mxu1 %v17345_v56  ;;  %v17393_v45 = vld [vmem:[#allocation6 + $0x4] ss:$52 sps:$4 sm:$0xff]  }
  0xb8   :  { %14571 = vmatmul.mubr.msk.bf16.gmra.mrb[4].mxu1 %vm655_vm1, %v19779_v43  ;;  %v17403_v56 = vld [vmem:[#allocation6 + $0xd0] ss:$52 sps:$4 sm:$0xff]  }
  0xb9   :  { %835 = vmatprep.mubr.bf16.mxu1 %v20950_v0  ;;  %934 = vmatpush1.bf16.msra.mxu1 %v17343_v61  ;;  %v17415_v61 = vld [vmem:[#allocation6 + $0x1a0] ss:$52 sps:$4 sm:$0xff]   ;;  %v17462_v41 = vld [vmem:[#allocation6 + $0x484] ss:$52 sps:$4 sm:$0xff]  }
  0xba   :  { %863 = vmatpush1.bf16.msra.mxu0 %v17326_v51  ;;  %935 = vmatprep.subr.bf16.mxu1 %v17351_v63  ;;  %v17387_v51 = vld [vmem:[#allocation2 + $0x1d0] ss:$52 sps:$4 sm:$0xff]  }
  0xbb   :  { %864 = vmatprep.subr.bf16.mxu0 %v17331_v52  ;;  %v17390_v52 = vld [vmem:[#allocation2 + $0x238] ss:$0 sps:$4 sm:$0x11]   ;;  %v17394_v63 = vld [vmem:[#allocation6 + $0x8] ss:$52 sps:$4 sm:$0xff]  }
  0xbd   :  { %14568 = vmatmul.mubr.msk.bf16.gmra.mrb[8].mxu0 %vm655_vm1, %v19793_v55  ;;  %936 = vmatpush1.bf16.msra.mxu1 %v17349_v4  ;;  %v17400_v4 = vld [vmem:[#allocation6 + $0x70] ss:$52 sps:$4 sm:$0xff]  }
  0xbe   :  { %772 = vmatprep.mubr.bf16.mxu0 %v20950_v0  ;;  %865 = vmatpush1.bf16.msra.mxu0 %v17329_v57  ;;  %v708_v57 = vand.u32 %v17390_v52, %v19756_v16  ;;  %v17417_v16 = vld [vmem:[#allocation6 + $0x1a4] ss:$52 sps:$4 sm:$0xff]   ;;  %v17484_v52 = vld [vmem:[#allocation6 + $0x620] ss:$52 sps:$4 sm:$0xff]  }
  0xbf   :  { %866 = vmatprep.subr.bf16.mxu0 %v687_v60  ;;  %937 = vmatprep.subr.bf16.mxu1 %v17360_v6  ;;  %v17409_v60 = vld [vmem:[#allocation6 + $0x138] ss:$52 sps:$4 sm:$0xff]   ;;  %v17427_v6 = vld [vmem:[#allocation6 + $0x270] ss:$52 sps:$4 sm:$0xff]  }
  0xc0   :  { %14572 = vmatmul.mubr.msk.bf16.gmra.mrb[8].mxu1 %vm655_vm1, %v19793_v55 }
  0xc1   :  { %845 = vmatprep.mubr.bf16.mxu1 %v20950_v0  ;;  %938 = vmatpush1.bf16.msra.mxu1 %v17358_v8  ;;  %v17406_v8 = vld [vmem:[#allocation6 + $0xd8] ss:$52 sps:$4 sm:$0xff]  }
  0xc2   :  { %867 = vmatpush1.bf16.msra.mxu0 %v684_v2  ;;  %939 = vmatprep.subr.bf16.mxu1 %v693_v10  ;;  %v17402_v2 = vld [vmem:[#allocation6 + $0x74] ss:$52 sps:$4 sm:$0xff]   ;;  %v17414_v10 = vld [vmem:[#allocation6 + $0x144] ss:$52 sps:$4 sm:$0xff]  }
  0xc3   :  { %1002 = vmatprep.subr.bf16.mxu0 %v17342_v3  ;;  %v17429_v3 = vld [vmem:[#allocation6 + $0x274] ss:$52 sps:$4 sm:$0xff]  }
  0xc5   :  { %14569 = vmatmul.mubr.msk.bf16.gmra.mrb[12].mxu0 %vm655_vm1, %v19809_v5  ;;  %940 = vmatpush1.bf16.msra.mxu1 %v690_v11  ;;  %v17441_v11 = vld [vmem:[#allocation6 + $0x344] ss:$52 sps:$4 sm:$0xff]  }
  0xc6   :  { %888 = vmatprep.mubr.bf16.mxu0 %v20950_v0  ;;  %1075 = vmatprep.subr.bf16.mxu1 %v17370_v12  ;;  %v17439_v12 = vld [vmem:[#allocation6 + $0x340] ss:$52 sps:$4 sm:$0xff]  }
  0xc8   :  { %14573 = vmatmul.mubr.msk.bf16.gmra.mrb[12].mxu1 %vm655_vm1, %v19809_v5 }
  0xc9   :  { %961 = vmatprep.mubr.bf16.mxu1 %v20950_v0 }
  0xcd   :  { %14574 = vmatmul.mubr.msk.bf16.vlgmr.msra.gmra.mrb[16].mxu0 %vm655_vm1, %v19766_v31 }
  0xce   :  { %898 = vmatprep.mubr.bf16.mxu0 %v20950_v0  ;;  %1003 = vmatpush1.bf16.msra.mxu0 %v17340_v13  ;;  %v17420_v13 = vld [vmem:[#allocation6 + $0x1ac] ss:$52 sps:$4 sm:$0xff]  }
  0xcf   :  { %1004 = vmatprep.subr.bf16.mxu0 %v17348_v14  ;;  %v17447_v14 = vld [vmem:[#allocation6 + $0x3ac] ss:$52 sps:$4 sm:$0xff]  }
  0xd0   :  { %14578 = vmatmul.mubr.msk.bf16.vlgmr.msra.gmra.mrb[16].mxu1 %vm655_vm1, %v19766_v31 }
  0xd1   :  { %1076 = vmatpush1.bf16.msra.mxu1 %v17368_v20  ;;  %971 = vmatprep.mubr.bf16.mxu1 %v20950_v0  ;;  %v17451_v20 = vld [vmem:[#allocation6 + $0x410] ss:$52 sps:$4 sm:$0xff]  }
  0xd2   :  { %1005 = vmatpush1.bf16.msra.mxu0 %v17346_v15  ;;  %1077 = vmatprep.subr.bf16.mxu1 %v17373_v22  ;;  %v17445_v15 = vld [vmem:[#allocation6 + $0x3a8] ss:$52 sps:$4 sm:$0xff]  }
  0xd3   :  { %1006 = vmatprep.subr.bf16.mxu0 %v17354_v17  ;;  %v17426_v17 = vld [vmem:[#allocation6 + $0x214] ss:$52 sps:$4 sm:$0xff]   ;;  %v17459_v22 = vld [vmem:[#allocation6 + $0x47c] ss:$52 sps:$4 sm:$0xff]  }
  0xd5   :  { %14575 = vmatmul.mubr.msk.bf16.gmra.mrb[20].mxu0 %vm655_vm1, %v19779_v43  ;;  %1078 = vmatpush1.bf16.msra.mxu1 %v17371_v25  ;;  %v17465_v25 = vld [vmem:[#allocation6 + $0x4e4] ss:$52 sps:$4 sm:$0xff]  }
  0xd6   :  { %908 = vmatprep.mubr.bf16.mxu0 %v20950_v0  ;;  %1007 = vmatpush1.bf16.msra.mxu0 %v17352_v18  ;;  %v17453_v18 = vld [vmem:[#allocation6 + $0x414] ss:$52 sps:$4 sm:$0xff]  }
  0xd7   :  { %1008 = vmatprep.subr.bf16.mxu0 %v17357_v19  ;;  %1079 = vmatprep.subr.bf16.mxu1 %v17377_v27  ;;  %v17424_v19 = vld [vmem:[#allocation6 + $0x210] ss:$52 sps:$4 sm:$0xff]   ;;  %v17463_v27 = vld [vmem:[#allocation6 + $0x4e0] ss:$52 sps:$4 sm:$0xff]  }
  0xd8   :  { %14579 = vmatmul.mubr.msk.bf16.gmra.mrb[20].mxu1 %vm655_vm1, %v19779_v43 }
  0xd9   :  { %981 = vmatprep.mubr.bf16.mxu1 %v20950_v0  ;;  %1080 = vmatpush1.bf16.msra.mxu1 %v17375_v32  ;;  %v17469_v32 = vld [vmem:[#allocation6 + $0x548] ss:$52 sps:$4 sm:$0xff]  }
  0xda   :  { %1009 = vmatpush1.bf16.msra.mxu0 %v17355_v23  ;;  %1081 = vmatprep.subr.bf16.mxu1 %v17382_v33  ;;  %v17430_v23 = vld [vmem:[#allocation6 + $0x278] ss:$52 sps:$4 sm:$0xff]   ;;  %v17450_v33 = vld [vmem:[#allocation6 + $0x3b4] ss:$52 sps:$4 sm:$0xff]  }
  0xdb   :  { %1010 = vmatprep.subr.bf16.mxu0 %v17363_v24  ;;  %v17438_v24 = vld [vmem:[#allocation6 + $0x2e4] ss:$52 sps:$4 sm:$0xff]  }
  0xdd   :  { %14576 = vmatmul.mubr.msk.bf16.gmra.mrb[24].mxu0 %vm655_vm1, %v19793_v55  ;;  %1082 = vmatpush1.bf16.msra.mxu1 %v17380_v37  ;;  %v17456_v37 = vld [vmem:[#allocation6 + $0x41c] ss:$52 sps:$4 sm:$0xff]  }
  0xde   :  { %918 = vmatprep.mubr.bf16.mxu0 %v20950_v0  ;;  %1011 = vmatpush1.bf16.msra.mxu0 %v17361_v28  ;;  %v17444_v28 = vld [vmem:[#allocation6 + $0x34c] ss:$52 sps:$4 sm:$0xff]  }
  0xdf   :  { %1012 = vmatprep.subr.bf16.mxu0 %v699_v30  ;;  %1083 = vmatprep.subr.bf16.mxu1 %v17386_v38  ;;  %v17442_v30 = vld [vmem:[#allocation6 + $0x348] ss:$52 sps:$4 sm:$0xff]  }
  0xe0   :  { %14580 = vmatmul.mubr.msk.bf16.gmra.mrb[24].mxu1 %vm655_vm1, %v19793_v55  ;;  %v17483_v38 = vld [vmem:[#allocation6 + $0x61c] ss:$52 sps:$4 sm:$0xff]  }
  0xe1   :  { %991 = vmatprep.mubr.bf16.mxu1 %v20950_v0  ;;  %1084 = vmatpush1.bf16.msra.mxu1 %v17384_v40  ;;  %v17481_v40 = vld [vmem:[#allocation6 + $0x618] ss:$52 sps:$4 sm:$0xff]  }
  0xe2   :  { %1013 = vmatpush1.bf16.msra.mxu0 %v696_v35  ;;  %1085 = vmatprep.subr.bf16.mxu1 %v705_v42  ;;  %v17448_v35 = vld [vmem:[#allocation6 + $0x3b0] ss:$52 sps:$4 sm:$0xff]  }
  0xe3   :  { %16526 = vmatprep.subr.bf16.mxu0 %v17374_v36  ;;  %v17489_v42 = vld [vmem:[#allocation6 + $0x684] ss:$52 sps:$4 sm:$0xff]  }
  0xe5   :  { %14577 = vmatmul.mubr.msk.bf16.gmra.mrb[28].mxu0 %vm655_vm1, %v19809_v5  ;;  %1086 = vmatpush1.bf16.msra.mxu1 %v702_v44  ;;  %v17460_v44 = vld [vmem:[#allocation6 + $0x480] ss:$52 sps:$4 sm:$0xff]  }
  0xe6   :  { %1034 = vmatprep.mubr.bf16.mxu0 %v20950_v0  ;;  %9291 = vmatprep.subr.bf16.mxu1 %v17393_v45  ;;  %v17468_v45 = vld [vmem:[#allocation6 + $0x4ec] ss:$52 sps:$4 sm:$0xff]  }
  0xe8   :  { %14581 = vmatmul.mubr.msk.bf16.gmra.mrb[28].mxu1 %vm655_vm1, %v19809_v5 }
  0xe9   :  { %1107 = vmatprep.mubr.bf16.mxu1 %v20950_v0 }
  0xed   :  { %14582 = vmatmul.mubr.msk.bf16.vlgmr.msra.gmra.mrb[32].mxu0 %vm655_vm1, %v19766_v31 }
  0xee   :  { %1044 = vmatprep.mubr.bf16.mxu0 %v20950_v0  ;;  %16527 = vmatpush3.bf16.msra.mxu0 %v17374_v36  ;;  %v17475_v36 = vld [vmem:[#allocation6 + $0x5b0] ss:$52 sps:$4 sm:$0xff]  }
  0xef   :  { %16528 = vmatprep.subr.bf16.mxu0 %v17378_v46 }
  0xf0   :  { %14586 = vmatmul.mubr.msk.bf16.vlgmr.msra.gmra.mrb[32].mxu1 %vm655_vm1, %v19766_v31 }
  0xf1   :  { %9292 = vmatpush1.bf16.msra.mxu1 %v17391_v49  ;;  %1117 = vmatprep.mubr.bf16.mxu1 %v20950_v0  ;;  %v17480_v49 = vld [vmem:[#allocation6 + $0x5bc] ss:$52 sps:$4 sm:$0xff]  }
  0xf2   :  { %16529 = vmatpush3.bf16.msra.mxu0 %v17378_v46  ;;  %9293 = vmatprep.subr.bf16.mxu1 %v17399_v50  ;;  %v17466_v46 = vld [vmem:[#allocation6 + $0x4e8] ss:$52 sps:$4 sm:$0xff]   ;;  %v17478_v50 = vld [vmem:[#allocation6 + $0x5b8] ss:$52 sps:$4 sm:$0xff]  }
  0xf3   :  { %16530 = vmatprep.subr.bf16.mxu0 %v17379_v47 }
  0xf5   :  { %14583 = vmatmul.mubr.msk.bf16.gmra.mrb[36].mxu0 %vm655_vm1, %v19779_v43  ;;  %9294 = vmatpush1.bf16.msra.mxu1 %v17397_v53  ;;  %v17492_v53 = vld [vmem:[#allocation6 + $0x68c] ss:$52 sps:$4 sm:$0xff]  }
  0xf6   :  { %1054 = vmatprep.mubr.bf16.mxu0 %v20950_v0  ;;  %16531 = vmatpush3.bf16.msra.mxu0 %v17379_v47  ;;  %v17474_v47 = vld [vmem:[#allocation6 + $0x554] ss:$52 sps:$4 sm:$0xff]  }
  0xf7   :  { %16532 = vmatprep.subr.bf16.mxu0 %v17383_v48  ;;  %9295 = vmatprep.subr.bf16.mxu1 %v17405_v54  ;;  %v227_v54 = vlaneseq }
  0xf8   :  { %14587 = vmatmul.mubr.msk.bf16.gmra.mrb[36].mxu1 %vm655_vm1, %v19779_v43 }
  0xf9   :  { %9296 = vmatpush1.bf16.msra.mxu1 %v17403_v56  ;;  %1127 = vmatprep.mubr.bf16.mxu1 %v20950_v0  ;;  %v19881_v56 = vshrl.u32 %v227_v54, 7 }
  0xfa   :  { %16533 = vmatpush3.bf16.msra.mxu0 %v17383_v48  ;;  %9297 = vmatprep.subr.bf16.mxu1 %v17411_v58  ;;  %v17472_v48 = vld [vmem:[#allocation6 + $0x550] ss:$52 sps:$4 sm:$0xff]  }
  0xfb   :  { %16534 = vmatprep.subr.bf16.mxu0 %v17387_v51  ;;  %21033 = vst [vmem:[#allocation20_spill] sm:$0xff] %v19881_v56  ;;  %v19886_v58 = vsub.s32 0, %v19881_v56 }
  0xfd   :  { %14584 = vmatmul.mubr.msk.bf16.gmra.mrb[40].mxu0 %vm655_vm1, %v19793_v55  ;;  %9298 = vmatpush1.bf16.msra.mxu1 %v17409_v60  ;;  %21034 = vst [vmem:[#allocation21_spill] sm:$0xff] %v19886_v58 }
  0xfe   :  { %1064 = vmatprep.mubr.bf16.mxu0 %v20950_v0  ;;  %16535 = vmatpush3.bf16.msra.mxu0 %v17387_v51  ;;  %v17486_v51 = vld [vmem:[#allocation6 + $0x624] ss:$52 sps:$4 sm:$0xff]  }
  0xff   :  { %16536 = vmatprep.subr.bf16.mxu0 %v708_v57  ;;  %9299 = vmatprep.subr.bf16.mxu1 %v17417_v16 }
 0x100   :  { %14588 = vmatmul.mubr.msk.bf16.gmra.mrb[40].mxu1 %vm655_vm1, %v19793_v55 }
 0x101   :  { %9300 = vmatpush1.bf16.msra.mxu1 %v17415_v61  ;;  %1137 = vmatprep.mubr.bf16.mxu1 %v20950_v0 }
 0x102   :  { %16537 = vmatpush3.bf16.msra.mxu0 %v708_v57  ;;  %9301 = vmatprep.subr.bf16.mxu1 %v17423_v62  ;;  %v19883_v57 = vld [vmem:[#allocation4] sm:$0xff] }
 0x103   :  { %9802 = vmatprep.subr.bf16.mxu0 %v17396_v59  ;;  %v19889_v59 = vsub.s32 1, %v19881_v56  ;;  %v19893_v60 = vrot.slane %v19883_v57, %v19886_v58 }
 0x105   :  { %14585 = vmatmul.mubr.msk.bf16.gmra.mrb[44].mxu0 %vm655_vm1, %v19809_v5  ;;  %9302 = vmatpush1.bf16.msra.mxu1 %v17421_v1  ;;  %21035 = vst [vmem:[#allocation22_spill] sm:$0xff] %v19889_v59  ;;  %v19897_v16 = vrot.slane %v19883_v57, %v19889_v59 }
 0x106   :  { %16538 = vmatprep.mubr.msk.bf16.mxu0 %vm655_vm1, %v19766_v31  ;;  %9303 = vmatprep.subr.bf16.mxu1 %v17429_v3  ;;  %v17435_v31 = vld [vmem:[#allocation6 + $0x2dc] ss:$52 sps:$4 sm:$0xff]   ;;  %v19902_v3 = vsub.s32 2, %v19881_v56 }
 0x108   :  { %14589 = vmatmul.mubr.msk.bf16.gmra.mrb[44].mxu1 %vm655_vm1, %v19809_v5  ;;  %21036 = vst [vmem:[#allocation23_spill] sm:$0xff] %v19902_v3 }
 0x109   :  { %9304 = vmatpush1.bf16.msra.mxu1 %v17427_v6 }
 0x10a   :  { %9305 = vmatprep.subr.bf16.mxu1 %v17435_v31 }
 0x10d   :  { %16539 = vmatmul.mubr.msk.bf16.vlgmr.msra.gmra.mrb[48].mxu0 %vm655_vm1, %v19779_v43  ;;  %v17412_v43 = vld [vmem:[#allocation6 + $0x140] ss:$52 sps:$4 sm:$0xff]   ;;  %9306 = vmatpush1.bf16.msra.mxu1 %v17433_v9 }
 0x10e   :  { %9803 = vmatpush1.bf16.msra.mxu0 %v17394_v63  ;;  %16542 = vmatprep.mubr.msk.bf16.mxu0 %vm655_vm1, %v19793_v55  ;;  %v17418_v55 = vld [vmem:[#allocation6 + $0x1a8] ss:$52 sps:$4 sm:$0xff]  }
 0x10f   :  { %9804 = vmatprep.subr.bf16.mxu0 %v17402_v2  ;;  %9307 = vmatprep.subr.bf16.mxu1 %v17441_v11 }
 0x111   :  { %9308 = vmatpush1.bf16.msra.mxu1 %v17439_v12  ;;  %v19911_v12 = vrot.slane %v19883_v57, %v19902_v3 }
 0x112   :  { %9805 = vmatpush1.bf16.msra.mxu0 %v17400_v4  ;;  %9309 = vmatprep.subr.bf16.mxu1 %v17447_v14 }
 0x113   :  { %9806 = vmatprep.subr.bf16.mxu0 %v17408_v7  ;;  %v19906_v7 = vsub.s32 3, %v19881_v56 }
 0x115   :  { %16543 = vmatmul.mubr.msk.bf16.gmra.mrb[52].mxu0 %vm655_vm1, %v19809_v5  ;;  %9310 = vmatpush1.bf16.msra.mxu1 %v17445_v15  ;;  %v17457_v5 = vld [vmem:[#allocation6 + $0x478] ss:$52 sps:$4 sm:$0xff]   ;;  %21037 = vst [vmem:[#allocation24_spill] sm:$0xff] %v19906_v7  ;;  %v19917_v14 = vrot.slane %v19883_v57, %v19906_v7  ;;  %v17490_v15 = vld [vmem:[#allocation6 + $0x688] ss:$52 sps:$4 sm:$0xff]  }
 0x116   :  { %9807 = vmatpush1.bf16.msra.mxu0 %v17406_v8  ;;  %9311 = vmatprep.subr.bf16.mxu1 %v17453_v18  ;;  %v17495_v18 = vld [vmem:[#allocation6 + $0x6ec] ss:$52 sps:$4 sm:$0xff]  }
 0x117   :  { %9808 = vmatprep.subr.bf16.mxu0 %v17414_v10 }
 0x119   :  { %9312 = vmatpush1.bf16.msra.mxu1 %v17451_v20 }
 0x11a   :  { %9809 = vmatpush1.bf16.msra.mxu0 %v17412_v43  ;;  %9313 = vmatprep.subr.bf16.mxu1 %v17459_v22  ;;  %v17487_v43 = vld [vmem:[#allocation6 + $0x680] ss:$52 sps:$4 sm:$0xff]  }
 0x11b   :  { %9810 = vmatprep.subr.bf16.mxu0 %v17420_v13 }
 0x11d   :  { %9314 = vmatpush1.bf16.msra.mxu1 %v17457_v5  ;;  %v17496_v5 = vld [vmem:[#allocation6 + $0x6f0] ss:$52 sps:$4 sm:$0xff]  }
 0x11e   :  { %9811 = vmatpush1.bf16.msra.mxu0 %v17418_v55  ;;  %9315 = vmatprep.subr.bf16.mxu1 %v17465_v25 }
 0x11f   :  { %9812 = vmatprep.subr.bf16.mxu0 %v17426_v17 }
 0x121   :  { %9316 = vmatpush1.bf16.msra.mxu1 %v17463_v27 }
 0x122   :  { %9813 = vmatpush1.bf16.msra.mxu0 %v17424_v19  ;;  %9317 = vmatprep.subr.bf16.mxu1 %v17471_v29  ;;  %v17498_v19 = vld [vmem:[#allocation6 + $0x6f4] ss:$52 sps:$4 sm:$0xff]  }
 0x123   :  { %9814 = vmatprep.subr.bf16.mxu0 %v17432_v21 }
 0x125   :  { %9318 = vmatpush1.bf16.msra.mxu1 %v17469_v32 }
 0x126   :  { %9815 = vmatpush1.bf16.msra.mxu0 %v17430_v23  ;;  %9319 = vmatprep.subr.bf16.mxu1 %v17477_v34  ;;  %v17493_v23 = vld [vmem:[#allocation6 + $0x6e8] ss:$52 sps:$4 sm:$0xff]  }
 0x127   :  { %9816 = vmatprep.subr.bf16.mxu0 %v17438_v24 }
 0x129   :  { %9320 = vmatpush1.bf16.msra.mxu1 %v17475_v36 }
 0x12a   :  { %9817 = vmatpush1.bf16.msra.mxu0 %v17436_v26  ;;  %9321 = vmatprep.subr.bf16.mxu1 %v17483_v38 }
 0x12b   :  { %9818 = vmatprep.subr.bf16.mxu0 %v17444_v28 }
 0x12d   :  { %9322 = vmatpush1.bf16.msra.mxu1 %v17481_v40  ;;  %v17504_v40 = vld [vmem:[#allocation6 + $0x75c] ss:$52 sps:$4 sm:$0xff]  }
 0x12e   :  { %9819 = vmatpush1.bf16.msra.mxu0 %v17442_v30  ;;  %9364 = vmatprep.subr.bf16.mxu1 %v17489_v42 }
 0x12f   :  { %9820 = vmatprep.subr.bf16.mxu0 %v17450_v33 }
 0x132   :  { %9821 = vmatpush1.bf16.msra.mxu0 %v17448_v35 }
 0x133   :  { %9822 = vmatprep.subr.bf16.mxu0 %v17456_v37 }
 0x136   :  { %9823 = vmatpush1.bf16.msra.mxu0 %v17454_v39  ;;  %v17501_v39 = vld [vmem:[#allocation6 + $0x754] ss:$52 sps:$4 sm:$0xff]  }
 0x137   :  { %9824 = vmatprep.subr.bf16.mxu0 %v17462_v41 }
 0x13a   :  { %9825 = vmatpush1.bf16.msra.mxu0 %v17460_v44 }
 0x13b   :  { %9826 = vmatprep.subr.bf16.mxu0 %v17468_v45  ;;  %v17499_v45 = vld [vmem:[#allocation6 + $0x750] ss:$52 sps:$4 sm:$0xff]  }
 0x13e   :  { %9827 = vmatpush1.bf16.msra.mxu0 %v17466_v46  ;;  %v17502_v46 = vld [vmem:[#allocation6 + $0x758] ss:$52 sps:$4 sm:$0xff]  }
 0x13f   :  { %9828 = vmatprep.subr.bf16.mxu0 %v17474_v47 }
 0x142   :  { %9829 = vmatpush1.bf16.msra.mxu0 %v17472_v48 }
 0x143   :  { %9830 = vmatprep.subr.bf16.mxu0 %v17480_v49  ;;  %v17507_v49 = vld [vmem:[#allocation6 + $0x7bc] ss:$52 sps:$4 sm:$0xff]  }
 0x146   :  { %9831 = vmatpush1.bf16.msra.mxu0 %v17478_v50  ;;  %v17510_v50 = vld [vmem:[#allocation6 + $0x7c4] ss:$52 sps:$4 sm:$0xff]  }
 0x147   :  { %9832 = vmatprep.subr.bf16.mxu0 %v17486_v51 }
 0x14a   :  { %9833 = vmatpush1.bf16.msra.mxu0 %v17484_v52 }
 0x14b   :  { %9875 = vmatprep.subr.bf16.mxu0 %v17492_v53 }
 0x180   :  { %v744_v61 = vpop.f32.mrb[0].mxu0 }
 0x181   :  { %v745_v62 = vadd.f32 %v744_v61, %v19893_v60  ;;  %v746_v63 = vpop.f32.mrb[1].mxu0 }
 0x182   :  { %v747_v1 = vadd.f32 %v746_v63, %v19897_v16  ;;  %v748_v2 = vpop.f32.mrb[2].mxu0 }
 0x183   :  { %v749_v4 = vadd.f32 %v748_v2, %v19893_v60  ;;  %v750_v6 = vpop.f32.mrb[3].mxu0  ;;  %v1213_v8 = vmax.f32 %v745_v62, 0.0  ;;  %v817_v22 = vpop.f32.mrb[0].mxu1 }
 0x184   :  { %v751_v31 = vadd.f32 %v750_v6, %v19897_v16  ;;  %v1214_v10 = vmax.f32 %v747_v1, 0.0  ;;  %v818_v26 = vadd.f32 %v817_v22, %v19911_v12  ;;  %v819_v27 = vpop.f32.mrb[1].mxu1 }
 0x185   :  { %v1226_v9 = vmax.f32 %v749_v4, 0.0  ;;  %v820_v32 = vadd.f32 %v819_v27, %v19917_v14  ;;  %v821_v33 = vpop.f32.mrb[2].mxu1 }
 0x186   :  { %v1227_v11 = vmax.f32 %v751_v31, 0.0  ;;  %v1215_v36 = vmax.f32 %v818_v26, 0.0  ;;  %v822_v37 = vadd.f32 %v821_v33, %v19911_v12  ;;  %v823_v38 = vpop.f32.mrb[3].mxu1  ;;  %v17519_v33 = vld [vmem:[#allocation6 + $0x88c] ss:$52 sps:$4 sm:$0xff]  }
 0x187   :  { %v19913_v13 = vpack.c.bf16 %v1226_v9, %v1213_v8  ;;  %v1216_v42 = vmax.f32 %v820_v32, 0.0  ;;  %v824_v44 = vadd.f32 %v823_v38, %v19917_v14  ;;  %v17505_v9 = vld [vmem:[#allocation6 + $0x7b8] ss:$52 sps:$4 sm:$0xff]  }
 0x188   :  { %v19919_v55 = vpack.c.bf16 %v1227_v11, %v1214_v10  ;;  %v754_v17 = vpop.f32.mrb[4].mxu0  ;;  %v1228_v48 = vmax.f32 %v822_v37, 0.0 }
 0x189   :  { %v755_v20 = vadd.f32 %v754_v17, %v19893_v60  ;;  %v756_v21 = vpop.f32.mrb[5].mxu0  ;;  %v1229_v52 = vmax.f32 %v824_v44, 0.0 }
 0x18a   :  { %9323 = vmatprep.mubr.bf16.mxu1 %v19919_v55  ;;  %9834 = vmatprep.mubr.bf16.mxu0 %v19919_v55  ;;  %v757_v24 = vadd.f32 %v756_v21, %v19897_v16  ;;  %v758_v25 = vpop.f32.mrb[6].mxu0  ;;  %v19937_v61 = vpack.c.bf16 %v1228_v48, %v1215_v36 }
 0x18b   :  { %9324 = vmatmul.mubr.bf16.vlgmr.msra.gmra.mrb[48].mxu1 %v19913_v13  ;;  %9835 = vmatmul.mubr.bf16.vlgmr.msra.gmra.mrb[56].mxu0 %v19913_v13  ;;  %v1239_v28 = vmax.f32 %v755_v20, 0.0  ;;  %v759_v29 = vadd.f32 %v758_v25, %v19893_v60  ;;  %v760_v30 = vpop.f32.mrb[7].mxu0  ;;  %v19940_v1 = vpack.c.bf16 %v1229_v52, %v1216_v42  ;;  %v827_v2 = vpop.f32.mrb[4].mxu1  ;;  %v17517_v52 = vld [vmem:[#allocation6 + $0x888] ss:$52 sps:$4 sm:$0xff]  }
 0x18c   :  { %9365 = vmatpush1.bf16.msra.mxu1 %v17487_v43  ;;  %9876 = vmatpush1.bf16.msra.mxu0 %v17490_v15  ;;  %v1240_v34 = vmax.f32 %v757_v24, 0.0  ;;  %v761_v35 = vadd.f32 %v760_v30, %v19897_v16  ;;  %21039 = vst [vmem:[#allocation26_spill] sm:$0xff] %v19937_v61  ;;  %v828_v31 = vadd.f32 %v827_v2, %v19911_v12  ;;  %v829_v8 = vpop.f32.mrb[5].mxu1  ;;  %v17516_v24 = vld [vmem:[#allocation6 + $0x82c] ss:$52 sps:$4 sm:$0xff]  }
 0x18d   :  { %9366 = vmatprep.subr.bf16.mxu1 %v17495_v18  ;;  %9877 = vmatprep.subr.bf16.mxu0 %v17498_v19  ;;  %v1252_v41 = vmax.f32 %v759_v29, 0.0  ;;  %21040 = vst [vmem:[#allocation27_spill] sm:$0xff] %v19940_v1  ;;  %v830_v15 = vadd.f32 %v829_v8, %v19917_v14  ;;  %v831_v17 = vpop.f32.mrb[6].mxu1  ;;  %v17508_v18 = vld [vmem:[#allocation6 + $0x7c0] ss:$52 sps:$4 sm:$0xff]  }
 0x18e   :  { %v1253_v47 = vmax.f32 %v761_v35, 0.0  ;;  %v1241_v21 = vmax.f32 %v828_v31, 0.0  ;;  %v832_v22 = vadd.f32 %v831_v17, %v19911_v12  ;;  %v17514_v29 = vld [vmem:[#allocation6 + $0x828] ss:$52 sps:$4 sm:$0xff]  }
 0x18f   :  { %v19933_v51 = vpack.c.bf16 %v1252_v41, %v1239_v28  ;;  %v1242_v26 = vmax.f32 %v830_v15, 0.0  ;;  %v17511_v28 = vld [vmem:[#allocation6 + $0x820] ss:$52 sps:$4 sm:$0xff]  }
 0x190   :  { %9367 = vmatpush1.bf16.msra.mxu1 %v17493_v23  ;;  %9878 = vmatpush1.bf16.msra.mxu0 %v17496_v5  ;;  %v19935_v53 = vpack.c.bf16 %v1253_v47, %v1240_v34  ;;  %v764_v54 = vpop.f32.mrb[8].mxu0  ;;  %v833_v23 = vpop.f32.mrb[7].mxu1  ;;  %v17513_v5 = vld [vmem:[#allocation6 + $0x824] ss:$52 sps:$4 sm:$0xff]   ;;  %v1254_v32 = vmax.f32 %v832_v22, 0.0 }
 0x191   :  { %21038 = vst [vmem:[#allocation25_spill] sm:$0xff] %v19933_v51  ;;  %9368 = vmatprep.subr.bf16.mxu1 %v17501_v39  ;;  %9879 = vmatprep.subr.bf16.mxu0 %v17504_v40  ;;  %v765_v62 = vadd.f32 %v764_v54, %v19893_v60  ;;  %v766_v63 = vpop.f32.mrb[9].mxu0  ;;  %v834_v27 = vadd.f32 %v833_v23, %v19917_v14  ;;  %v17522_v34 = vld [vmem:[#allocation6 + $0x894] ss:$52 sps:$4 sm:$0xff]  }
 0x192   :  { %v767_v4 = vadd.f32 %v766_v63, %v19897_v16  ;;  %v768_v6 = vpop.f32.mrb[10].mxu0  ;;  %9333 = vmatprep.mubr.bf16.mxu1 %v19935_v53  ;;  %9844 = vmatprep.mubr.bf16.mxu0 %v19935_v53  ;;  %v19957_v39 = vpack.c.bf16 %v1254_v32, %v1241_v21  ;;  %v17526_v21 = vld [vmem:[#allocation6 + $0x8f8] ss:$52 sps:$4 sm:$0xff]  }
 0x193   :  { %v1265_v10 = vmax.f32 %v765_v62, 0.0  ;;  %v769_v11 = vadd.f32 %v768_v6, %v19893_v60  ;;  %v770_v43 = vpop.f32.mrb[11].mxu0  ;;  %9334 = vmatmul.mubr.bf16.gmra.mrb[52].mxu1 %v19933_v51  ;;  %9845 = vmatmul.mubr.bf16.gmra.mrb[60].mxu0 %v19933_v51  ;;  %v1255_v36 = vmax.f32 %v834_v27, 0.0  ;;  %v837_v44 = vpop.f32.mrb[8].mxu1  ;;  %v17520_v6 = vld [vmem:[#allocation6 + $0x890] ss:$52 sps:$4 sm:$0xff]  }
 0x194   :  { %9369 = vmatpush1.bf16.msra.mxu1 %v17499_v45  ;;  %9880 = vmatpush1.bf16.msra.mxu0 %v17502_v46  ;;  %v1266_v19 = vmax.f32 %v767_v4, 0.0  ;;  %v771_v20 = vadd.f32 %v770_v43, %v19897_v16  ;;  %21043 = vst [vmem:[#allocation30_spill] sm:$0xff] %v19957_v39  ;;  %v19963_v45 = vsub.s32 4, %v19881_v56  ;;  %v838_v48 = vadd.f32 %v837_v44, %v19911_v12  ;;  %v17528_v43 = vld [vmem:[#allocation6 + $0x8fc] ss:$52 sps:$4 sm:$0xff]  }
 0x195   :  { %9370 = vmatprep.subr.bf16.mxu1 %v17507_v49  ;;  %9881 = vmatprep.subr.bf16.mxu0 %v17510_v50  ;;  %v1278_v25 = vmax.f32 %v769_v11, 0.0  ;;  %v19960_v42 = vpack.c.bf16 %v1255_v36, %v1242_v26  ;;  %v839_v49 = vpop.f32.mrb[9].mxu1  ;;  %v20948_v50 = vsub.s32 5, %v19881_v56  ;;  %v17529_v36 = vld [vmem:[#allocation6 + $0x958] ss:$52 sps:$4 sm:$0xff]  }
 0x196   :  { %v1279_v30 = vmax.f32 %v771_v20, 0.0  ;;  %21045 = vst [vmem:[#allocation32_spill] sm:$0xff] %v19963_v45  ;;  %v840_v2 = vadd.f32 %v839_v49, %v19917_v14  ;;  %v841_v4 = vpop.f32.mrb[10].mxu1  ;;  %v17523_v20 = vld [vmem:[#allocation6 + $0x8f0] ss:$52 sps:$4 sm:$0xff]  }
 0x197   :  { %v19953_v35 = vpack.c.bf16 %v1278_v25, %v1265_v10  ;;  %21044 = vst [vmem:[#allocation31_spill] sm:$0xff] %v19960_v42  ;;  %v842_v10 = vadd.f32 %v841_v4, %v19911_v12  ;;  %v843_v11 = vpop.f32.mrb[11].mxu1  ;;  %v19984_v23 = vrot.slane %v19883_v57, %v20948_v50 }
 0x198   :  { %9371 = vmatpush1.bf16.msra.mxu1 %v17505_v9  ;;  %9882 = vmatpush1.bf16.msra.mxu0 %v17508_v18  ;;  %v19955_v37 = vpack.c.bf16 %v1279_v30, %v1266_v19  ;;  %v774_v38 = vpop.f32.mrb[12].mxu0  ;;  %v1267_v9 = vmax.f32 %v838_v48, 0.0  ;;  %v1268_v17 = vmax.f32 %v840_v2, 0.0  ;;  %v844_v18 = vadd.f32 %v843_v11, %v19917_v14 }
 0x199   :  { %21041 = vst [vmem:[#allocation28_spill] sm:$0xff] %v19953_v35  ;;  %9372 = vmatprep.subr.bf16.mxu1 %v17513_v5  ;;  %9883 = vmatprep.subr.bf16.mxu0 %v17516_v24  ;;  %v775_v40 = vadd.f32 %v774_v38, %v19893_v60  ;;  %v776_v41 = vpop.f32.mrb[13].mxu0  ;;  %v19979_v19 = vrot.slane %v19883_v57, %v19963_v45  ;;  %v17531_v5 = vld [vmem:[#allocation6 + $0x95c] ss:$52 sps:$4 sm:$0xff]   ;;  %v17534_v24 = vld [vmem:[#allocation6 + $0x964] ss:$52 sps:$4 sm:$0xff]  }
 0x19a   :  { %21042 = vst [vmem:[#allocation29_spill] sm:$0xff] %v19955_v37  ;;  %v777_v46 = vadd.f32 %v776_v41, %v19897_v16  ;;  %v778_v47 = vpop.f32.mrb[14].mxu0  ;;  %9343 = vmatprep.mubr.bf16.mxu1 %v19955_v37  ;;  %9854 = vmatprep.mubr.bf16.mxu0 %v19955_v37  ;;  %v1281_v26 = vmax.f32 %v844_v18, 0.0 }
 0x19b   :  { %v1291_v54 = vmax.f32 %v775_v40, 0.0  ;;  %v779_v62 = vadd.f32 %v778_v47, %v19893_v60  ;;  %v780_v63 = vpop.f32.mrb[15].mxu0  ;;  %9344 = vmatmul.mubr.bf16.gmra.mrb[56].mxu1 %v19953_v35  ;;  %9855 = vmatmul.mubr.bf16.gmra.mrb[64].mxu0 %v19953_v35  ;;  %v17525_v60 = vld [vmem:[#allocation6 + $0x8f4] ss:$52 sps:$4 sm:$0xff]   ;;  %v847_v32 = vpop.f32.mrb[12].mxu1 }
 0x19c   :  { %9373 = vmatpush1.bf16.msra.mxu1 %v17511_v28  ;;  %9884 = vmatpush1.bf16.msra.mxu0 %v17514_v29  ;;  %v1292_v31 = vmax.f32 %v777_v46, 0.0  ;;  %v781_v8 = vadd.f32 %v780_v63, %v19897_v16  ;;  %v1280_v16 = vmax.f32 %v842_v10, 0.0  ;;  %v19992_v30 = vpack.c.bf16 %v1281_v26, %v1268_v17  ;;  %v849_v40 = vpop.f32.mrb[13].mxu1  ;;  %v17532_v63 = vld [vmem:[#allocation6 + $0x960] ss:$52 sps:$4 sm:$0xff]  }
 0x19d   :  { %9374 = vmatprep.subr.bf16.mxu1 %v17519_v33  ;;  %9885 = vmatprep.subr.bf16.mxu0 %v17522_v34  ;;  %v1304_v15 = vmax.f32 %v779_v62, 0.0  ;;  %v848_v38 = vadd.f32 %v847_v32, %v19911_v12  ;;  %v20949_v46 = vsub.s32 6, %v19881_v56  ;;  %v850_v47 = vadd.f32 %v849_v40, %v19917_v14  ;;  %v851_v48 = vpop.f32.mrb[14].mxu1  ;;  %v17540_v10 = vld [vmem:[#allocation6 + $0x9cc] ss:$52 sps:$4 sm:$0xff]  }
 0x19e   :  { %v1305_v22 = vmax.f32 %v781_v8, 0.0  ;;  %v19990_v28 = vpack.c.bf16 %v1280_v16, %v1267_v9  ;;  %21049 = vst [vmem:[#allocation36_spill] sm:$0xff] %v19992_v30  ;;  %v20947_v62 = vsub.s32 7, %v19881_v56  ;;  %v852_v4 = vadd.f32 %v851_v48, %v19911_v12  ;;  %v17537_v9 = vld [vmem:[#allocation6 + $0x9c4] ss:$52 sps:$4 sm:$0xff]  }
 0x19f   :  { %v19986_v25 = vpack.c.bf16 %v1304_v15, %v1291_v54  ;;  %v1293_v2 = vmax.f32 %v848_v38, 0.0  ;;  %v1294_v11 = vmax.f32 %v850_v47, 0.0  ;;  %v17535_v15 = vld [vmem:[#allocation6 + $0x9c0] ss:$52 sps:$4 sm:$0xff]   ;;  %v17538_v17 = vld [vmem:[#allocation6 + $0x9c8] ss:$52 sps:$4 sm:$0xff]  }
 0x1a0   :  { %9375 = vmatpush1.bf16.msra.mxu1 %v17517_v52  ;;  %9886 = vmatpush1.bf16.msra.mxu0 %v17520_v6  ;;  %v19988_v27 = vpack.c.bf16 %v1305_v22, %v1292_v31  ;;  %21048 = vst [vmem:[#allocation35_spill] sm:$0xff] %v19990_v28  ;;  %v890_v29 = vpop.f32.mrb[16].mxu0  ;;  %v853_v6 = vpop.f32.mrb[15].mxu1  ;;  %v1306_v18 = vmax.f32 %v852_v4, 0.0  ;;  %v17543_v26 = vld [vmem:[#allocation6 + $0xa2c] ss:$52 sps:$4 sm:$0xff]  }
 0x1a1   :  { %21046 = vst [vmem:[#allocation33_spill] sm:$0xff] %v19986_v25  ;;  %9376 = vmatprep.subr.bf16.mxu1 %v17525_v60  ;;  %9887 = vmatprep.subr.bf16.mxu0 %v17528_v43  ;;  %v891_v33 = vadd.f32 %v890_v29, %v19979_v19  ;;  %v892_v34 = vpop.f32.mrb[17].mxu0  ;;  %v854_v60 = vadd.f32 %v853_v6, %v19917_v14  ;;  %v17546_v29 = vld [vmem:[#allocation6 + $0xa34] ss:$52 sps:$4 sm:$0xff]  }
 0x1a2   :  { %21047 = vst [vmem:[#allocation34_spill] sm:$0xff] %v19988_v27  ;;  %9353 = vmatprep.mubr.bf16.mxu1 %v19988_v27  ;;  %9864 = vmatprep.mubr.bf16.mxu0 %v19988_v27  ;;  %v893_v41 = vadd.f32 %v892_v34, %v19984_v23  ;;  %v894_v44 = vpop.f32.mrb[18].mxu0  ;;  %v20020_v14 = vrot.slane %v19883_v57, %v20947_v62  ;;  %v17541_v40 = vld [vmem:[#allocation6 + $0xa28] ss:$52 sps:$4 sm:$0xff]   ;;  %v17583_v56 = vld [vmem:[#allocation6 + $0xd00] ss:$52 sps:$4 sm:$0xff]  }
 0x1a3   :  { %9354 = vmatmul.mubr.bf16.gmra.mrb[60].mxu1 %v19986_v25  ;;  %9865 = vmatmul.mubr.bf16.gmra.mrb[68].mxu0 %v19986_v25  ;;  %v1217_v49 = vmax.f32 %v891_v33, 0.0  ;;  %v895_v52 = vadd.f32 %v894_v44, %v19979_v19  ;;  %v896_v54 = vpop.f32.mrb[19].mxu0  ;;  %v20022_v16 = vpack.c.bf16 %v1306_v18, %v1293_v2  ;;  %v963_v38 = vpop.f32.mrb[16].mxu1  ;;  %v17547_v18 = vld [vmem:[#allocation6 + $0xa90] ss:$52 sps:$4 sm:$0xff]  }
 0x1a4   :  { %9377 = vmatpush1.bf16.msra.mxu1 %v17523_v20  ;;  %9888 = vmatpush1.bf16.msra.mxu0 %v17526_v21  ;;  %v1218_v31 = vmax.f32 %v893_v41, 0.0  ;;  %v897_v8 = vadd.f32 %v896_v54, %v19984_v23  ;;  %v20013_v20 = vrot.slane %v19883_v57, %v20949_v46  ;;  %v1307_v21 = vmax.f32 %v854_v60, 0.0  ;;  %v17544_v57 = vld [vmem:[#allocation6 + $0xa30] ss:$52 sps:$4 sm:$0xff]   ;;  %v965_v47 = vpop.f32.mrb[17].mxu1 }
 0x1a5   :  { %9378 = vmatprep.subr.bf16.mxu1 %v17531_v5  ;;  %9889 = vmatprep.subr.bf16.mxu0 %v17534_v24  ;;  %v1230_v43 = vmax.f32 %v895_v52, 0.0  ;;  %21051 = vst [vmem:[#allocation38_spill] sm:$0xff] %v20022_v16  ;;  %v966_v54 = vadd.f32 %v965_v47, %v20020_v14 }
 0x1a6   :  { %9396 = vmatprep.mubr.bf16.mxu1 %v19940_v1  ;;  %9907 = vmatprep.mubr.bf16.mxu0 %v19940_v1  ;;  %v1231_v12 = vmax.f32 %v897_v8, 0.0  ;;  %v20026_v32 = vpack.c.bf16 %v1307_v21, %v1294_v11  ;;  %v964_v44 = vadd.f32 %v963_v38, %v20013_v20  ;;  %v17558_v38 = vld [vmem:[#allocation6 + $0xb04] ss:$52 sps:$4 sm:$0xff]  }
 0x1a7   :  { %v20015_v22 = vpack.c.bf16 %v1230_v43, %v1217_v49  ;;  %v1220_v60 = vmax.f32 %v966_v54, 0.0 }
 0x1a8   :  { %9379 = vmatpush1.bf16.msra.mxu1 %v17529_v36  ;;  %9890 = vmatpush1.bf16.msra.mxu0 %v17532_v63  ;;  %v20024_v5 = vpack.c.bf16 %v1231_v12, %v1218_v31  ;;  %v900_v24 = vpop.f32.mrb[20].mxu0  ;;  %21053 = vst [vmem:[#allocation40_spill] sm:$0xff] %v20026_v32  ;;  %v967_v63 = vpop.f32.mrb[18].mxu1  ;;  %v1219_v6 = vmax.f32 %v964_v44, 0.0  ;;  %v17550_v12 = vld [vmem:[#allocation6 + $0xa98] ss:$52 sps:$4 sm:$0xff]  }
 0x1a9   :  { %21050 = vst [vmem:[#allocation37_spill] sm:$0xff] %v20015_v22  ;;  %9380 = vmatprep.subr.bf16.mxu1 %v17537_v9  ;;  %9891 = vmatprep.subr.bf16.mxu0 %v17540_v10  ;;  %v901_v33 = vadd.f32 %v900_v24, %v19979_v19  ;;  %v902_v34 = vpop.f32.mrb[21].mxu0  ;;  %v968_v31 = vadd.f32 %v967_v63, %v20013_v20  ;;  %v969_v8 = vpop.f32.mrb[19].mxu1  ;;  %v17549_v9 = vld [vmem:[#allocation6 + $0xa94] ss:$52 sps:$4 sm:$0xff]  }
 0x1aa   :  { %21052 = vst [vmem:[#allocation39_spill] sm:$0xff] %v20024_v5  ;;  %v903_v36 = vadd.f32 %v902_v34, %v19984_v23  ;;  %v904_v41 = vpop.f32.mrb[22].mxu0  ;;  %v17552_v10 = vld [vmem:[#allocation6 + $0xa9c] ss:$52 sps:$4 sm:$0xff]   ;;  %v970_v43 = vadd.f32 %v969_v8, %v20020_v14 }
 0x1ab   :  { %v1243_v48 = vmax.f32 %v901_v33, 0.0  ;;  %v905_v49 = vadd.f32 %v904_v41, %v19979_v19  ;;  %v906_v52 = vpop.f32.mrb[23].mxu0  ;;  %v973_v47 = vpop.f32.mrb[20].mxu1 }
 0x1ac   :  { %9381 = vmatpush1.bf16.msra.mxu1 %v17535_v15  ;;  %9892 = vmatpush1.bf16.msra.mxu0 %v17538_v17  ;;  %v1244_v2 = vmax.f32 %v903_v36, 0.0  ;;  %v907_v4 = vadd.f32 %v906_v52, %v19984_v23  ;;  %v1232_v15 = vmax.f32 %v968_v31, 0.0  ;;  %v1233_v24 = vmax.f32 %v970_v43, 0.0  ;;  %v975_v54 = vpop.f32.mrb[21].mxu1  ;;  %v17561_v43 = vld [vmem:[#allocation6 + $0xb64] ss:$52 sps:$4 sm:$0xff]  }
 0x1ad   :  { %9382 = vmatprep.subr.bf16.mxu1 %v17543_v26  ;;  %9893 = vmatprep.subr.bf16.mxu0 %v17546_v29  ;;  %v1256_v11 = vmax.f32 %v905_v49, 0.0  ;;  %v17555_v29 = vld [vmem:[#allocation6 + $0xafc] ss:$52 sps:$4 sm:$0xff]   ;;  %v17556_v49 = vld [vmem:[#allocation6 + $0xb00] ss:$52 sps:$4 sm:$0xff]   ;;  %v974_v52 = vadd.f32 %v973_v47, %v20013_v20  ;;  %v977_v31 = vpop.f32.mrb[22].mxu1 }
 0x1ae   :  { %v1257_v21 = vmax.f32 %v907_v4, 0.0  ;;  %v20040_v26 = vpack.c.bf16 %v1232_v15, %v1219_v6  ;;  %v20043_v44 = vpack.c.bf16 %v1233_v24, %v1220_v60  ;;  %v976_v6 = vadd.f32 %v975_v54, %v20020_v14  ;;  %v979_v60 = vpop.f32.mrb[23].mxu1  ;;  %v17570_v54 = vld [vmem:[#allocation6 + $0xbd4] ss:$52 sps:$4 sm:$0xff]  }
 0x1af   :  { %v20036_v17 = vpack.c.bf16 %v1256_v11, %v1243_v48  ;;  %v17553_v48 = vld [vmem:[#allocation6 + $0xaf8] ss:$52 sps:$4 sm:$0xff]   ;;  %v978_v11 = vadd.f32 %v977_v31, %v20013_v20 }
 0x1b0   :  { %9383 = vmatpush1.bf16.msra.mxu1 %v17541_v40  ;;  %9894 = vmatpush1.bf16.msra.mxu0 %v17544_v57  ;;  %v20038_v33 = vpack.c.bf16 %v1257_v21, %v1244_v2  ;;  %v910_v34 = vpop.f32.mrb[24].mxu0  ;;  %21056 = vst [vmem:[#allocation43_spill] sm:$0xff] %v20043_v44  ;;  %v17564_v21 = vld [vmem:[#allocation6 + $0xb6c] ss:$52 sps:$4 sm:$0xff]   ;;  %v1246_v24 = vmax.f32 %v976_v6, 0.0 }
 0x1b1   :  { %21054 = vst [vmem:[#allocation41_spill] sm:$0xff] %v20036_v17  ;;  %9384 = vmatprep.subr.bf16.mxu1 %v17549_v9  ;;  %9895 = vmatprep.subr.bf16.mxu0 %v17552_v10  ;;  %v911_v36 = vadd.f32 %v910_v34, %v19979_v19  ;;  %v912_v41 = vpop.f32.mrb[25].mxu0  ;;  %v1245_v10 = vmax.f32 %v974_v52, 0.0  ;;  %v980_v34 = vadd.f32 %v979_v60, %v20020_v14 }
 0x1b2   :  { %21055 = vst [vmem:[#allocation42_spill] sm:$0xff] %v20038_v33  ;;  %v913_v40 = vadd.f32 %v912_v41, %v19984_v23  ;;  %v914_v57 = vpop.f32.mrb[26].mxu0  ;;  %v17562_v41 = vld [vmem:[#allocation6 + $0xb68] ss:$52 sps:$4 sm:$0xff]  }
 0x1b3   :  { %v1269_v63 = vmax.f32 %v911_v36, 0.0  ;;  %v915_v2 = vadd.f32 %v914_v57, %v19979_v19  ;;  %v916_v4 = vpop.f32.mrb[27].mxu0  ;;  %v17559_v36 = vld [vmem:[#allocation6 + $0xb60] ss:$52 sps:$4 sm:$0xff]   ;;  %v983_v31 = vpop.f32.mrb[24].mxu1 }
 0x1b4   :  { %9385 = vmatpush1.bf16.msra.mxu1 %v17547_v18  ;;  %9896 = vmatpush1.bf16.msra.mxu0 %v17550_v12  ;;  %v1270_v8 = vmax.f32 %v913_v40, 0.0  ;;  %v917_v9 = vadd.f32 %v916_v4, %v19984_v23  ;;  %v1258_v18 = vmax.f32 %v978_v11, 0.0  ;;  %v1259_v40 = vmax.f32 %v980_v34, 0.0  ;;  %v985_v11 = vpop.f32.mrb[25].mxu1 }
 0x1b5   :  { %9386 = vmatprep.subr.bf16.mxu1 %v17555_v29  ;;  %9897 = vmatprep.subr.bf16.mxu0 %v17558_v38  ;;  %v1282_v15 = vmax.f32 %v915_v2, 0.0  ;;  %v17567_v38 = vld [vmem:[#allocation6 + $0xbcc] ss:$52 sps:$4 sm:$0xff]   ;;  %v987_v34 = vpop.f32.mrb[26].mxu1 }
 0x1b6   :  { %v1283_v47 = vmax.f32 %v917_v9, 0.0  ;;  %v20056_v29 = vpack.c.bf16 %v1258_v18, %v1245_v10  ;;  %v20059_v6 = vpack.c.bf16 %v1259_v40, %v1246_v24  ;;  %v17568_v9 = vld [vmem:[#allocation6 + $0xbd0] ss:$52 sps:$4 sm:$0xff]   ;;  %v984_v10 = vadd.f32 %v983_v31, %v20013_v20 }
 0x1b7   :  { %v20052_v12 = vpack.c.bf16 %v1282_v15, %v1269_v63  ;;  %v17565_v63 = vld [vmem:[#allocation6 + $0xbc8] ss:$52 sps:$4 sm:$0xff]   ;;  %v986_v15 = vadd.f32 %v985_v11, %v20020_v14  ;;  %v988_v40 = vadd.f32 %v987_v34, %v20013_v20 }
 0x1b8   :  { %9387 = vmatpush1.bf16.msra.mxu1 %v17553_v48  ;;  %9898 = vmatpush1.bf16.msra.mxu0 %v17556_v49  ;;  %v20054_v57 = vpack.c.bf16 %v1283_v47, %v1270_v8  ;;  %v920_v52 = vpop.f32.mrb[28].mxu0  ;;  %v20062_v8 = vld [vmem:[#allocation4 + $0x8] sm:$0x1f]  ;;  %v1271_v18 = vmax.f32 %v984_v10, 0.0 }
 0x1b9   :  { %21057 = vst [vmem:[#allocation44_spill] sm:$0xff] %v20052_v12  ;;  %9388 = vmatprep.subr.bf16.mxu1 %v17561_v43  ;;  %9899 = vmatprep.subr.bf16.mxu0 %v17564_v21  ;;  %v921_v2 = vadd.f32 %v920_v52, %v19979_v19  ;;  %v922_v4 = vpop.f32.mrb[29].mxu0  ;;  %v989_v52 = vpop.f32.mrb[27].mxu1  ;;  %v17576_v31 = vld [vmem:[#allocation6 + $0xc3c] ss:$52 sps:$4 sm:$0xff]   ;;  %v1284_v10 = vmax.f32 %v988_v40, 0.0 }
 0x1ba   :  { %21058 = vst [vmem:[#allocation45_spill] sm:$0xff] %v20054_v57  ;;  %v923_v48 = vadd.f32 %v922_v4, %v19984_v23  ;;  %v924_v49 = vpop.f32.mrb[30].mxu0  ;;  %v17573_v4 = vld [vmem:[#allocation6 + $0xc34] ss:$52 sps:$4 sm:$0xff]   ;;  %v17577_v40 = vld [vmem:[#allocation6 + $0xc98] ss:$52 sps:$4 sm:$0xff]  }
 0x1bb   :  { %v1295_v60 = vmax.f32 %v921_v2, 0.0  ;;  %v925_v43 = vadd.f32 %v924_v49, %v19979_v19  ;;  %v926_v21 = vpop.f32.mrb[31].mxu0  ;;  %v20071_v19 = vrot.slane %v20062_v8, %v19886_v58  ;;  %v1272_v49 = vmax.f32 %v986_v15, 0.0  ;;  %v17579_v15 = vld [vmem:[#allocation6 + $0xc9c] ss:$52 sps:$4 sm:$0xff]  }
 0x1bc   :  { %9389 = vmatpush1.bf16.msra.mxu1 %v17559_v36  ;;  %9900 = vmatpush1.bf16.msra.mxu0 %v17562_v41  ;;  %v1296_v24 = vmax.f32 %v923_v48, 0.0  ;;  %v927_v47 = vadd.f32 %v926_v21, %v19984_v23  ;;  %v990_v36 = vadd.f32 %v989_v52, %v20020_v14  ;;  %v17571_v41 = vld [vmem:[#allocation6 + $0xc30] ss:$52 sps:$4 sm:$0xff]   ;;  %v17574_v48 = vld [vmem:[#allocation6 + $0xc38] ss:$52 sps:$4 sm:$0xff]   ;;  %v20076_v23 = vrot.slane %v20062_v8, %v19889_v59 }
 0x1bd   :  { %9390 = vmatprep.subr.bf16.mxu1 %v17567_v38  ;;  %9901 = vmatprep.subr.bf16.mxu0 %v17570_v54  ;;  %v1308_v2 = vmax.f32 %v925_v43, 0.0  ;;  %v20082_v34 = vpack.c.bf16 %v1284_v10, %v1271_v18  ;;  %v17582_v52 = vld [vmem:[#allocation6 + $0xca4] ss:$52 sps:$4 sm:$0xff]   ;;  %v17586_v59 = vld [vmem:[#allocation6 + $0xd08] ss:$52 sps:$4 sm:$0xff]  }
 0x1be   :  { %v1309_v11 = vmax.f32 %v927_v47, 0.0  ;;  %v1285_v54 = vmax.f32 %v990_v36, 0.0 }
 0x1bf   :  { %v20078_v38 = vpack.c.bf16 %v1308_v2, %v1295_v60  ;;  %v17580_v60 = vld [vmem:[#allocation6 + $0xca0] ss:$52 sps:$4 sm:$0xff]  }
 0x1c0   :  { %9391 = vmatpush1.bf16.msra.mxu1 %v17565_v63  ;;  %9902 = vmatpush1.bf16.msra.mxu0 %v17568_v9  ;;  %v20080_v43 = vpack.c.bf16 %v1309_v11, %v1296_v24  ;;  %v1036_v21 = vpop.f32.mrb[32].mxu0  ;;  %v20085_v50 = vpack.c.bf16 %v1285_v54, %v1272_v49  ;;  %v993_v9 = vpop.f32.mrb[28].mxu1  ;;  %v17585_v24 = vld [vmem:[#allocation6 + $0xd04] ss:$52 sps:$4 sm:$0xff]  }
 0x1c1   :  { %21059 = vst [vmem:[#allocation46_spill] sm:$0xff] %v20078_v38  ;;  %9392 = vmatprep.subr.bf16.mxu1 %v17573_v4  ;;  %9903 = vmatprep.subr.bf16.mxu0 %v17576_v31  ;;  %v1037_v47 = vadd.f32 %v1036_v21, %v20071_v19  ;;  %v1038_v62 = vpop.f32.mrb[33].mxu0  ;;  %v994_v4 = vadd.f32 %v993_v9, %v20013_v20  ;;  %v995_v31 = vpop.f32.mrb[29].mxu1 }
 0x1c2   :  { %21060 = vst [vmem:[#allocation47_spill] sm:$0xff] %v20080_v43  ;;  %v1039_v2 = vadd.f32 %v1038_v62, %v20076_v23  ;;  %v1040_v63 = vpop.f32.mrb[34].mxu0  ;;  %v996_v54 = vadd.f32 %v995_v31, %v20020_v14  ;;  %v997_v21 = vpop.f32.mrb[30].mxu1  ;;  %v17588_v62 = vld [vmem:[#allocation6 + $0xd0c] ss:$52 sps:$4 sm:$0xff]  }
 0x1c3   :  { %v1221_v36 = vmax.f32 %v1037_v47, 0.0  ;;  %v1041_v18 = vadd.f32 %v1040_v63, %v20071_v19  ;;  %v1042_v11 = vpop.f32.mrb[35].mxu0  ;;  %v1297_v0 = vmax.f32 %v994_v4, 0.0  ;;  %v998_v47 = vadd.f32 %v997_v21, %v20013_v20  ;;  %v999_v63 = vpop.f32.mrb[31].mxu1 }
 0x1c4   :  { %9393 = vmatpush1.bf16.msra.mxu1 %v17571_v41  ;;  %9904 = vmatpush1.bf16.msra.mxu0 %v17574_v48  ;;  %v1222_v10 = vmax.f32 %v1039_v2, 0.0  ;;  %v1043_v49 = vadd.f32 %v1042_v11, %v20076_v23  ;;  %v1298_v58 = vmax.f32 %v996_v54, 0.0  ;;  %v1000_v41 = vadd.f32 %v999_v63, %v20020_v14  ;;  %v17591_v48 = vld [vmem:[#allocation6 + $0xd6c] ss:$52 sps:$4 sm:$0xff]   ;;  %v17594_v2 = vld [vmem:[#allocation6 + $0xd74] ss:$52 sps:$4 sm:$0xff]  }
 0x1c5   :  { %9394 = vmatprep.subr.bf16.mxu1 %v17579_v15  ;;  %9905 = vmatprep.subr.bf16.mxu0 %v17582_v52  ;;  %v1234_v46 = vmax.f32 %v1041_v18, 0.0  ;;  %v1310_v31 = vmax.f32 %v998_v47, 0.0  ;;  %v20098_v15 = vrot.slane %v20062_v8, %v19902_v3  ;;  %v20104_v4 = vrot.slane %v20062_v8, %v19906_v7  ;;  %v17592_v54 = vld [vmem:[#allocation6 + $0xd70] ss:$52 sps:$4 sm:$0xff]   ;;  %v1109_v21 = vpop.f32.mrb[32].mxu1 }
 0x1c6   :  { %v1235_v9 = vmax.f32 %v1043_v49, 0.0  ;;  %v1311_v18 = vmax.f32 %v1000_v41, 0.0  ;;  %v17589_v49 = vld [vmem:[#allocation6 + $0xd68] ss:$52 sps:$4 sm:$0xff]   ;;  %v17595_v3 = vld [vmem:[#allocation6 + $0xdd0] ss:$52 sps:$4 sm:$0xff]  }
 0x1c7   :  { %v20094_v11 = vpack.c.bf16 %v1234_v46, %v1221_v36  ;;  %v20107_v36 = vpack.c.bf16 %v1310_v31, %v1297_v0  ;;  %v17597_v47 = vld [vmem:[#allocation6 + $0xdd4] ss:$52 sps:$4 sm:$0xff]   ;;  %v1110_v0 = vadd.f32 %v1109_v21, %v20098_v15  ;;  %v17600_v41 = vld [vmem:[#allocation6 + $0xddc] ss:$52 sps:$4 sm:$0xff]  }
 0x1c8   :  { %9395 = vmatpush1.bf16.msra.mxu1 %v17577_v40  ;;  %9906 = vmatpush1.bf16.msra.mxu0 %v17580_v60  ;;  %v20100_v52 = vpack.c.bf16 %v1235_v9, %v1222_v10  ;;  %v1046_v20 = vpop.f32.mrb[36].mxu0  ;;  %v20110_v10 = vpack.c.bf16 %v1311_v18, %v1298_v58  ;;  %v1111_v9 = vpop.f32.mrb[33].mxu1  ;;  %v17603_v21 = vld [vmem:[#allocation6 + $0xe3c] ss:$52 sps:$4 sm:$0xff]  }
 0x1c9   :  { %9437 = vmatprep.subr.bf16.mxu1 %v17585_v24  ;;  %9948 = vmatprep.subr.bf16.mxu0 %v17588_v62  ;;  %v1047_v46 = vadd.f32 %v1046_v20, %v20071_v19  ;;  %v1048_v14 = vpop.f32.mrb[37].mxu0  ;;  %v1112_v20 = vadd.f32 %v1111_v9, %v20104_v4  ;;  %v1113_v18 = vpop.f32.mrb[34].mxu1  ;;  %v1223_v7 = vmax.f32 %v1110_v0, 0.0 }
 0x1ca   :  { %v1049_v40 = vadd.f32 %v1048_v14, %v20076_v23  ;;  %v1050_v60 = vpop.f32.mrb[38].mxu0 }
 0x1cb   :  { %9397 = vmatmul.mubr.bf16.vlgmr.msra.gmra.mrb[48].mxu1 %v19937_v61  ;;  %9908 = vmatmul.mubr.bf16.vlgmr.msra.gmra.mrb[56].mxu0 %v19937_v61  ;;  %v1247_v24 = vmax.f32 %v1047_v46, 0.0  ;;  %v1051_v62 = vadd.f32 %v1050_v60, %v20071_v19  ;;  %v1052_v63 = vpop.f32.mrb[39].mxu0  ;;  %v1114_v46 = vadd.f32 %v1113_v18, %v20098_v15  ;;  %v1115_v60 = vpop.f32.mrb[35].mxu1  ;;  %v17598_v61 = vld [vmem:[#allocation6 + $0xdd8] ss:$52 sps:$4 sm:$0xff]  }
 0x1cc   :  { %9438 = vmatpush1.bf16.msra.mxu1 %v17583_v56  ;;  %9949 = vmatpush1.bf16.msra.mxu0 %v17586_v59  ;;  %v1248_v31 = vmax.f32 %v1049_v40, 0.0  ;;  %v1053_v58 = vadd.f32 %v1052_v63, %v20076_v23  ;;  %v1224_v59 = vmax.f32 %v1112_v20, 0.0  ;;  %v1116_v40 = vadd.f32 %v1115_v60, %v20104_v4  ;;  %v17606_v63 = vld [vmem:[#allocation6 + $0xe44] ss:$52 sps:$4 sm:$0xff]  }
 0x1cd   :  { %9439 = vmatprep.subr.bf16.mxu1 %v17591_v48  ;;  %9950 = vmatprep.subr.bf16.mxu0 %v17594_v2  ;;  %v1260_v14 = vmax.f32 %v1051_v62, 0.0  ;;  %v1236_v48 = vmax.f32 %v1114_v46, 0.0 }
 0x1ce   :  { %9406 = vmatprep.mubr.bf16.mxu1 %v19960_v42  ;;  %9917 = vmatprep.mubr.bf16.mxu0 %v19960_v42  ;;  %v1261_v56 = vmax.f32 %v1053_v58, 0.0  ;;  %v1237_v0 = vmax.f32 %v1116_v40, 0.0 }
 0x1cf   :  { %v20122_v9 = vpack.c.bf16 %v1260_v14, %v1247_v24  ;;  %v20127_v58 = vpack.c.bf16 %v1236_v48, %v1223_v7  ;;  %v1119_v24 = vpop.f32.mrb[36].mxu1  ;;  %v17601_v14 = vld [vmem:[#allocation6 + $0xe38] ss:$52 sps:$4 sm:$0xff]   ;;  %v17604_v7 = vld [vmem:[#allocation6 + $0xe40] ss:$52 sps:$4 sm:$0xff]  }
 0x1d0   :  { %9440 = vmatpush1.bf16.msra.mxu1 %v17589_v49  ;;  %9951 = vmatpush1.bf16.msra.mxu0 %v17592_v54  ;;  %v20124_v2 = vpack.c.bf16 %v1261_v56, %v1248_v31  ;;  %v1056_v62 = vpop.f32.mrb[40].mxu0  ;;  %v20130_v1 = vpack.c.bf16 %v1237_v0, %v1224_v59  ;;  %v1121_v31 = vpop.f32.mrb[37].mxu1  ;;  %v17612_v48 = vld [vmem:[#allocation6 + $0xeac] ss:$52 sps:$4 sm:$0xff]  }
 0x1d1   :  { %9441 = vmatprep.subr.bf16.mxu1 %v17597_v47  ;;  %9952 = vmatprep.subr.bf16.mxu0 %v17600_v41  ;;  %v1057_v18 = vadd.f32 %v1056_v62, %v20071_v19  ;;  %v1058_v42 = vpop.f32.mrb[41].mxu0  ;;  %v1120_v41 = vadd.f32 %v1119_v24, %v20098_v15  ;;  %v1122_v59 = vadd.f32 %v1121_v31, %v20104_v4  ;;  %v1123_v40 = vpop.f32.mrb[38].mxu1  ;;  %v17607_v24 = vld [vmem:[#allocation6 + $0xea0] ss:$52 sps:$4 sm:$0xff]  }
 0x1d2   :  { %v1059_v20 = vadd.f32 %v1058_v42, %v20076_v23  ;;  %v1060_v60 = vpop.f32.mrb[42].mxu0  ;;  %v17609_v42 = vld [vmem:[#allocation6 + $0xea4] ss:$52 sps:$4 sm:$0xff]   ;;  %v17618_v31 = vld [vmem:[#allocation6 + $0xf14] ss:$52 sps:$4 sm:$0xff]  }
 0x1d3   :  { %9407 = vmatmul.mubr.bf16.gmra.mrb[52].mxu1 %v19957_v39  ;;  %9918 = vmatmul.mubr.bf16.gmra.mrb[60].mxu0 %v19957_v39  ;;  %v1273_v49 = vmax.f32 %v1057_v18, 0.0  ;;  %v1061_v54 = vadd.f32 %v1060_v60, %v20071_v19  ;;  %v1062_v47 = vpop.f32.mrb[43].mxu0  ;;  %v1249_v0 = vmax.f32 %v1120_v41, 0.0  ;;  %v1124_v18 = vadd.f32 %v1123_v40, %v20098_v15  ;;  %v1125_v60 = vpop.f32.mrb[39].mxu1  ;;  %v17610_v39 = vld [vmem:[#allocation6 + $0xea8] ss:$52 sps:$4 sm:$0xff]  }
 0x1d4   :  { %9442 = vmatpush1.bf16.msra.mxu1 %v17595_v3  ;;  %9953 = vmatpush1.bf16.msra.mxu0 %v17598_v61  ;;  %v1274_v46 = vmax.f32 %v1059_v20, 0.0  ;;  %v1063_v56 = vadd.f32 %v1062_v47, %v20076_v23  ;;  %v1250_v61 = vmax.f32 %v1122_v59, 0.0  ;;  %v1126_v20 = vadd.f32 %v1125_v60, %v20104_v4  ;;  %v17615_v47 = vld [vmem:[#allocation6 + $0xf0c] ss:$52 sps:$4 sm:$0xff]  }
 0x1d5   :  { %9443 = vmatprep.subr.bf16.mxu1 %v17603_v21  ;;  %9954 = vmatprep.subr.bf16.mxu0 %v17606_v63  ;;  %v1286_v62 = vmax.f32 %v1061_v54, 0.0  ;;  %v1262_v63 = vmax.f32 %v1124_v18, 0.0 }
 0x1d6   :  { %9416 = vmatprep.mubr.bf16.mxu1 %v19992_v30  ;;  %9927 = vmatprep.mubr.bf16.mxu0 %v19992_v30  ;;  %v1287_v3 = vmax.f32 %v1063_v56, 0.0  ;;  %v1263_v40 = vmax.f32 %v1126_v20, 0.0 }
 0x1d7   :  { %v20142_v21 = vpack.c.bf16 %v1286_v62, %v1273_v49  ;;  %v20147_v56 = vpack.c.bf16 %v1262_v63, %v1249_v0  ;;  %v1129_v49 = vpop.f32.mrb[40].mxu1  ;;  %v17613_v62 = vld [vmem:[#allocation6 + $0xf08] ss:$52 sps:$4 sm:$0xff]   ;;  %v17616_v0 = vld [vmem:[#allocation6 + $0xf10] ss:$52 sps:$4 sm:$0xff]  }
 0x1d8   :  { %9444 = vmatpush1.bf16.msra.mxu1 %v17601_v14  ;;  %9955 = vmatpush1.bf16.msra.mxu0 %v17604_v7  ;;  %v20144_v54 = vpack.c.bf16 %v1287_v3, %v1274_v46  ;;  %v1066_v41 = vpop.f32.mrb[44].mxu0  ;;  %v20150_v27 = vpack.c.bf16 %v1263_v40, %v1250_v61  ;;  %v1130_v46 = vadd.f32 %v1129_v49, %v20098_v15  ;;  %v17624_v63 = vld [vmem:[#allocation6 + $0xf7c] ss:$52 sps:$4 sm:$0xff]   ;;  %v17630_v49 = vld [vmem:[#allocation6 + $0xfe4] ss:$52 sps:$4 sm:$0xff]  }
 0x1d9   :  { %9445 = vmatprep.subr.bf16.mxu1 %v17609_v42  ;;  %9956 = vmatprep.subr.bf16.mxu0 %v17612_v48  ;;  %v1067_v25 = vadd.f32 %v1066_v41, %v20071_v19  ;;  %v1068_v30 = vpop.f32.mrb[45].mxu0  ;;  %v1131_v48 = vpop.f32.mrb[41].mxu1  ;;  %v17619_v40 = vld [vmem:[#allocation6 + $0xf70] ss:$52 sps:$4 sm:$0xff]  }
 0x1da   :  { %v1069_v59 = vadd.f32 %v1068_v30, %v20076_v23  ;;  %v1070_v60 = vpop.f32.mrb[46].mxu0  ;;  %v17621_v30 = vld [vmem:[#allocation6 + $0xf74] ss:$52 sps:$4 sm:$0xff]   ;;  %v1132_v61 = vadd.f32 %v1131_v48, %v20104_v4  ;;  %v1133_v20 = vpop.f32.mrb[42].mxu1  ;;  %v1275_v41 = vmax.f32 %v1130_v46, 0.0 }
 0x1db   :  { %9417 = vmatmul.mubr.bf16.gmra.mrb[56].mxu1 %v19990_v28  ;;  %9928 = vmatmul.mubr.bf16.gmra.mrb[64].mxu0 %v19990_v28  ;;  %v1299_v14 = vmax.f32 %v1067_v25, 0.0  ;;  %v1071_v7 = vadd.f32 %v1070_v60, %v20071_v19  ;;  %v1072_v42 = vpop.f32.mrb[47].mxu0  ;;  %v20160_v19 = vrot.slane %v20062_v8, %v19963_v45  ;;  %v17622_v60 = vld [vmem:[#allocation6 + $0xf78] ss:$52 sps:$4 sm:$0xff]  }
 0x1dc   :  { %9446 = vmatpush1.bf16.msra.mxu1 %v17607_v24  ;;  %9957 = vmatpush1.bf16.msra.mxu0 %v17610_v39  ;;  %v1300_v18 = vmax.f32 %v1069_v59, 0.0  ;;  %v1073_v3 = vadd.f32 %v1072_v42, %v20076_v23  ;;  %v1134_v24 = vadd.f32 %v1133_v20, %v20098_v15  ;;  %v1135_v39 = vpop.f32.mrb[43].mxu1  ;;  %v1276_v59 = vmax.f32 %v1132_v61, 0.0 }
 0x1dd   :  { %9447 = vmatprep.subr.bf16.mxu1 %v17615_v47  ;;  %9958 = vmatprep.subr.bf16.mxu0 %v17618_v31  ;;  %v1312_v25 = vmax.f32 %v1071_v7, 0.0  ;;  %v1136_v47 = vadd.f32 %v1135_v39, %v20104_v4  ;;  %v17627_v31 = vld [vmem:[#allocation6 + $0xfdc] ss:$52 sps:$4 sm:$0xff]  }
 0x1de   :  { %9426 = vmatprep.mubr.bf16.mxu1 %v20026_v32  ;;  %9937 = vmatprep.mubr.bf16.mxu0 %v20026_v32  ;;  %v1313_v23 = vmax.f32 %v1073_v3, 0.0  ;;  %v1288_v8 = vmax.f32 %v1134_v24, 0.0 }
 0x1df   :  { %v20166_v7 = vpack.c.bf16 %v1312_v25, %v1299_v14  ;;  %v1289_v48 = vmax.f32 %v1136_v47, 0.0  ;;  %v1139_v14 = vpop.f32.mrb[44].mxu1  ;;  %v17625_v25 = vld [vmem:[#allocation6 + $0xfd8] ss:$52 sps:$4 sm:$0xff]  }
 0x1e0   :  { %9448 = vmatpush1.bf16.msra.mxu1 %v17613_v62  ;;  %9959 = vmatpush1.bf16.msra.mxu0 %v17616_v0  ;;  %v20168_v42 = vpack.c.bf16 %v1313_v23, %v1300_v18  ;;  %v16540_v46 = vpop.f32.mrb[48].mxu0  ;;  %v20171_v3 = vpack.c.bf16 %v1288_v8, %v1275_v41  ;;  %v1140_v18 = vadd.f32 %v1139_v14, %v20098_v15  ;;  %v17628_v41 = vld [vmem:[#allocation6 + $0xfe0] ss:$52 sps:$4 sm:$0xff]  }
 0x1e1   :  { %9449 = vmatprep.subr.bf16.mxu1 %v17621_v30  ;;  %9960 = vmatprep.subr.bf16.mxu0 %v17624_v63  ;;  %v1191_v20 = vadd.f32 %v16540_v46, %v20160_v19  ;;  %v1182_v45 = vpop.f32.mrb[49].mxu0  ;;  %v20174_v32 = vpack.c.bf16 %v1289_v48, %v1276_v59  ;;  %v1141_v63 = vpop.f32.mrb[45].mxu1  ;;  %v17636_v8 = vld [vmem:[#allocation6 + $0x104c] ss:$52 sps:$4 sm:$0xff]  }
 0x1e2   :  { %v1183_v61 = vadd.f32 %v1182_v45, %v20160_v19  ;;  %v16541_v39 = vpop.f32.mrb[50].mxu0  ;;  %v17633_v45 = vld [vmem:[#allocation6 + $0x1044] ss:$52 sps:$4 sm:$0xff]   ;;  %v1142_v59 = vadd.f32 %v1141_v63, %v20104_v4  ;;  %v1143_v47 = vpop.f32.mrb[46].mxu1  ;;  %v1301_v48 = vmax.f32 %v1140_v18, 0.0 }
 0x1e3   :  { %9427 = vmatmul.mubr.bf16.gmra.mrb[60].mxu1 %v20022_v16  ;;  %9938 = vmatmul.mubr.bf16.gmra.mrb[68].mxu0 %v20022_v16  ;;  %v1251_v62 = vmax.f32 %v1191_v20, 0.0  ;;  %v1194_v0 = vadd.f32 %v16541_v39, %v20160_v19  ;;  %v1185_v30 = vpop.f32.mrb[51].mxu0  ;;  %v1144_v20 = vadd.f32 %v1143_v47, %v20098_v15  ;;  %v1145_v39 = vpop.f32.mrb[47].mxu1  ;;  %v17631_v14 = vld [vmem:[#allocation6 + $0x1040] ss:$52 sps:$4 sm:$0xff]  }
 0x1e4   :  { %9450 = vmatpush1.bf16.msra.mxu1 %v17619_v40  ;;  %9961 = vmatpush1.bf16.msra.mxu0 %v17622_v60  ;;  %v1225_v24 = vmax.f32 %v1183_v61, 0.0  ;;  %v1186_v23 = vadd.f32 %v1185_v30, %v20160_v19  ;;  %v17634_v16 = vld [vmem:[#allocation6 + $0x1048] ss:$52 sps:$4 sm:$0xff]   ;;  %v1302_v60 = vmax.f32 %v1142_v59, 0.0  ;;  %v1146_v61 = vadd.f32 %v1145_v39, %v20104_v4  ;;  %v17639_v30 = vld [vmem:[#allocation6 + $0x10ac] ss:$52 sps:$4 sm:$0xff]  }
 0x1e5   :  { %9451 = vmatprep.subr.bf16.mxu1 %v17627_v31  ;;  %9962 = vmatprep.subr.bf16.mxu0 %v17630_v49  ;;  %v1264_v46 = vmax.f32 %v1194_v0, 0.0  ;;  %v17642_v63 = vld [vmem:[#allocation6 + $0x10b4] ss:$52 sps:$4 sm:$0xff]   ;;  %v1314_v49 = vmax.f32 %v1144_v20, 0.0  ;;  %v17640_v4 = vld [vmem:[#allocation6 + $0x10b0] ss:$52 sps:$4 sm:$0xff]  }
 0x1e6   :  { %9469 = vmatprep.mubr.bf16.mxu1 %v20024_v5  ;;  %9980 = vmatprep.mubr.bf16.mxu0 %v20024_v5  ;;  %v1238_v40 = vmax.f32 %v1186_v23, 0.0  ;;  %v1315_v15 = vmax.f32 %v1146_v61, 0.0  ;;  %v17637_v5 = vld [vmem:[#allocation6 + $0x10a8] ss:$52 sps:$4 sm:$0xff]   ;;  %v17643_v61 = vld [vmem:[#allocation6 + $0x1110] ss:$52 sps:$4 sm:$0xff]  }
 0x1e7   :  { %v20186_v31 = vpack.c.bf16 %v1264_v46, %v1251_v62  ;;  %v20190_v47 = vpack.c.bf16 %v1314_v49, %v1301_v48 }
 0x1e8   :  { %9452 = vmatpush1.bf16.msra.mxu1 %v17625_v25  ;;  %9963 = vmatpush1.bf16.msra.mxu0 %v17628_v41  ;;  %v20188_v0 = vpack.c.bf16 %v1238_v40, %v1225_v24  ;;  %v16544_v18 = vpop.f32.mrb[52].mxu0  ;;  %v20193_v39 = vpack.c.bf16 %v1315_v15, %v1302_v60  ;;  %v17645_v25 = vld [vmem:[#allocation6 + $0x1114] ss:$52 sps:$4 sm:$0xff]   ;;  %v17648_v41 = vld [vmem:[#allocation6 + $0x111c] ss:$52 sps:$4 sm:$0xff]  }
 0x1e9   :  { %9453 = vmatprep.subr.bf16.mxu1 %v17633_v45  ;;  %9964 = vmatprep.subr.bf16.mxu0 %v17636_v8  ;;  %v1207_v23 = vadd.f32 %v16544_v18, %v20160_v19  ;;  %v1198_v59 = vpop.f32.mrb[53].mxu0  ;;  %v17646_v60 = vld [vmem:[#allocation6 + $0x1118] ss:$52 sps:$4 sm:$0xff]   ;;  %v17651_v15 = vld [vmem:[#allocation6 + $0x117c] ss:$52 sps:$4 sm:$0xff]  }
 0x1ea   :  { %v1199_v62 = vadd.f32 %v1198_v59, %v20160_v19  ;;  %v16545_v46 = vpop.f32.mrb[54].mxu0  ;;  %v17654_v18 = vld [vmem:[#allocation6 + $0x1184] ss:$52 sps:$4 sm:$0xff]  }
 0x1eb   :  { %v1303_v24 = vmax.f32 %v1207_v23, 0.0  ;;  %v1210_v20 = vadd.f32 %v16545_v46, %v20160_v19  ;;  %v1201_v40 = vpop.f32.mrb[55].mxu0  ;;  %v17663_v46 = vld [vmem:[#allocation6 + $0x124c] ss:$52 sps:$4 sm:$0xff]  }
 0x1ec   :  { %9454 = vmatpush1.bf16.msra.mxu1 %v17631_v14  ;;  %9965 = vmatpush1.bf16.msra.mxu0 %v17634_v16  ;;  %v1277_v45 = vmax.f32 %v1199_v62, 0.0  ;;  %v1202_v8 = vadd.f32 %v1201_v40, %v20160_v19  ;;  %v17649_v16 = vld [vmem:[#allocation6 + $0x1178] ss:$52 sps:$4 sm:$0xff]   ;;  %v17652_v14 = vld [vmem:[#allocation6 + $0x1180] ss:$52 sps:$4 sm:$0xff]  }
 0x1ed   :  { %9455 = vmatprep.subr.bf16.mxu1 %v17639_v30  ;;  %9966 = vmatprep.subr.bf16.mxu0 %v17642_v63  ;;  %v1316_v48 = vmax.f32 %v1210_v20, 0.0  ;;  %v17657_v62 = vld [vmem:[#allocation6 + $0x11e4] ss:$52 sps:$4 sm:$0xff]   ;;  %v17660_v19 = vld [vmem:[#allocation6 + $0x11ec] ss:$52 sps:$4 sm:$0xff]  }
 0x1ee   :  { %v1290_v49 = vmax.f32 %v1202_v8, 0.0  ;;  %v17655_v30 = vld [vmem:[#allocation6 + $0x11e0] ss:$52 sps:$4 sm:$0xff]   ;;  %v17658_v63 = vld [vmem:[#allocation6 + $0x11e8] ss:$52 sps:$4 sm:$0xff]  }
 0x1ef   :  { %v20198_v59 = vpack.c.bf16 %v1316_v48, %v1303_v24  ;;  %v17666_v20 = vld [vmem:[#allocation6 + $0x1254] ss:$52 sps:$4 sm:$0xff]   ;;  %v17667_v24 = vld [vmem:[#allocation6 + $0x12b0] ss:$52 sps:$4 sm:$0xff]   ;;  %v17670_v40 = vld [vmem:[#allocation6 + $0x12b8] ss:$52 sps:$4 sm:$0xff]  }
 0x1f0   :  { %9456 = vmatpush1.bf16.msra.mxu1 %v17637_v5  ;;  %9967 = vmatpush1.bf16.msra.mxu0 %v17640_v4  ;;  %v20200_v23 = vpack.c.bf16 %v1290_v49, %v1277_v45  ;;  %v17661_v5 = vld [vmem:[#allocation6 + $0x1248] ss:$52 sps:$4 sm:$0xff]   ;;  %v17664_v4 = vld [vmem:[#allocation6 + $0x1250] ss:$52 sps:$4 sm:$0xff]   ;;  %v17673_v48 = vld [vmem:[#allocation6 + $0x1318] ss:$52 sps:$4 sm:$0xff]  }
 0x1f1   :  { %9457 = vmatprep.subr.bf16.mxu1 %v17645_v25  ;;  %9968 = vmatprep.subr.bf16.mxu0 %v17648_v41  ;;  %v17669_v25 = vld [vmem:[#allocation6 + $0x12b4] ss:$52 sps:$4 sm:$0xff]   ;;  %v17672_v41 = vld [vmem:[#allocation6 + $0x12bc] ss:$52 sps:$4 sm:$0xff]   ;;  %v17678_v8 = vld [vmem:[#allocation6 + $0x1324] ss:$52 sps:$4 sm:$0xff]  }
 0x1f2   :  { %v17675_v45 = vld [vmem:[#allocation6 + $0x131c] ss:$52 sps:$4 sm:$0xff]   ;;  %v17684_v49 = vld [vmem:[#allocation6 + $0x138c] ss:$52 sps:$4 sm:$0xff]  }
 0x1f4   :  { %9458 = vmatpush1.bf16.msra.mxu1 %v17643_v61  ;;  %9969 = vmatpush1.bf16.msra.mxu0 %v17646_v60  ;;  %v17676_v61 = vld [vmem:[#allocation6 + $0x1320] ss:$52 sps:$4 sm:$0xff]   ;;  %v17681_v60 = vld [vmem:[#allocation6 + $0x1384] ss:$52 sps:$4 sm:$0xff]  }
 0x1f5   :  { %9459 = vmatprep.subr.bf16.mxu1 %v17651_v15  ;;  %9970 = vmatprep.subr.bf16.mxu0 %v17654_v18  ;;  %v17679_v15 = vld [vmem:[#allocation6 + $0x1380] ss:$52 sps:$4 sm:$0xff]   ;;  %v17682_v18 = vld [vmem:[#allocation6 + $0x1388] ss:$52 sps:$4 sm:$0xff]  }
 0x1f8   :  { %9460 = vmatpush1.bf16.msra.mxu1 %v17649_v16  ;;  %9971 = vmatpush1.bf16.msra.mxu0 %v17652_v14  ;;  %v17687_v16 = vld [vmem:[#allocation6 + $0x13ec] ss:$52 sps:$4 sm:$0xff]   ;;  %v17690_v14 = vld [vmem:[#allocation6 + $0x13f4] ss:$52 sps:$4 sm:$0xff]  }
 0x1f9   :  { %9461 = vmatprep.subr.bf16.mxu1 %v17657_v62  ;;  %9972 = vmatprep.subr.bf16.mxu0 %v17660_v19  ;;  %v17685_v62 = vld [vmem:[#allocation6 + $0x13e8] ss:$52 sps:$4 sm:$0xff]   ;;  %v17688_v19 = vld [vmem:[#allocation6 + $0x13f0] ss:$52 sps:$4 sm:$0xff]  }
 0x1fc   :  { %9462 = vmatpush1.bf16.msra.mxu1 %v17655_v30  ;;  %9973 = vmatpush1.bf16.msra.mxu0 %v17658_v63  ;;  %v17693_v30 = vld [vmem:[#allocation6 + $0x1454] ss:$52 sps:$4 sm:$0xff]   ;;  %v17696_v63 = vld [vmem:[#allocation6 + $0x145c] ss:$52 sps:$4 sm:$0xff]  }
 0x1fd   :  { %9463 = vmatprep.subr.bf16.mxu1 %v17663_v46  ;;  %9974 = vmatprep.subr.bf16.mxu0 %v17666_v20  ;;  %v17691_v46 = vld [vmem:[#allocation6 + $0x1450] ss:$52 sps:$4 sm:$0xff]   ;;  %v17694_v20 = vld [vmem:[#allocation6 + $0x1458] ss:$52 sps:$4 sm:$0xff]  }
 0x200   :  { %9464 = vmatpush1.bf16.msra.mxu1 %v17661_v5  ;;  %9975 = vmatpush1.bf16.msra.mxu0 %v17664_v4  ;;  %v17699_v5 = vld [vmem:[#allocation6 + $0x14bc] ss:$52 sps:$4 sm:$0xff]   ;;  %v17702_v4 = vld [vmem:[#allocation6 + $0x14c4] ss:$52 sps:$4 sm:$0xff]  }
 0x201   :  { %9465 = vmatprep.subr.bf16.mxu1 %v17669_v25  ;;  %9976 = vmatprep.subr.bf16.mxu0 %v17672_v41  ;;  %v17697_v25 = vld [vmem:[#allocation6 + $0x14b8] ss:$52 sps:$4 sm:$0xff]   ;;  %v17700_v41 = vld [vmem:[#allocation6 + $0x14c0] ss:$52 sps:$4 sm:$0xff]  }
 0x204   :  { %9466 = vmatpush1.bf16.msra.mxu1 %v17667_v24  ;;  %9977 = vmatpush1.bf16.msra.mxu0 %v17670_v40  ;;  %v17705_v24 = vld [vmem:[#allocation6 + $0x1524] ss:$52 sps:$4 sm:$0xff]   ;;  %v17708_v40 = vld [vmem:[#allocation6 + $0x152c] ss:$52 sps:$4 sm:$0xff]  }
 0x205   :  { %9467 = vmatprep.subr.bf16.mxu1 %v17675_v45  ;;  %9978 = vmatprep.subr.bf16.mxu0 %v17678_v8  ;;  %v17703_v45 = vld [vmem:[#allocation6 + $0x1520] ss:$52 sps:$4 sm:$0xff]   ;;  %v17706_v8 = vld [vmem:[#allocation6 + $0x1528] ss:$52 sps:$4 sm:$0xff]  }
 0x208   :  { %9468 = vmatpush1.bf16.msra.mxu1 %v17673_v48  ;;  %9979 = vmatpush1.bf16.msra.mxu0 %v17676_v61  ;;  %v17711_v48 = vld [vmem:[#allocation6 + $0x158c] ss:$52 sps:$4 sm:$0xff]   ;;  %v17714_v61 = vld [vmem:[#allocation6 + $0x1594] ss:$52 sps:$4 sm:$0xff]  }
 0x209   :  { %9510 = vmatprep.subr.bf16.mxu1 %v17681_v60  ;;  %10021 = vmatprep.subr.bf16.mxu0 %v17684_v49  ;;  %v17709_v60 = vld [vmem:[#allocation6 + $0x1588] ss:$52 sps:$4 sm:$0xff]   ;;  %v17712_v49 = vld [vmem:[#allocation6 + $0x1590] ss:$52 sps:$4 sm:$0xff]  }
 0x20b   :  { %9470 = vmatmul.mubr.bf16.vlgmr.msra.gmra.mrb[48].mxu1 %v20015_v22  ;;  %9981 = vmatmul.mubr.bf16.vlgmr.msra.gmra.mrb[56].mxu0 %v20015_v22 }
 0x20c   :  { %9479 = vmatprep.mubr.bf16.mxu1 %v20038_v33  ;;  %9511 = vmatpush1.bf16.msra.mxu1 %v17679_v15  ;;  %v17717_v15 = vld [vmem:[#allocation6 + $0x15f4] ss:$52 sps:$4 sm:$0xff]  }
 0x20d   :  { %9990 = vmatprep.mubr.bf16.mxu0 %v20038_v33  ;;  %10022 = vmatpush1.bf16.msra.mxu0 %v17682_v18  ;;  %v17720_v18 = vld [vmem:[#allocation6 + $0x15fc] ss:$52 sps:$4 sm:$0xff]  }
 0x20e   :  { %9512 = vmatprep.subr.bf16.mxu1 %v17687_v16  ;;  %10023 = vmatprep.subr.bf16.mxu0 %v17690_v14  ;;  %v17715_v16 = vld [vmem:[#allocation6 + $0x15f0] ss:$52 sps:$4 sm:$0xff]   ;;  %v17718_v14 = vld [vmem:[#allocation6 + $0x15f8] ss:$52 sps:$4 sm:$0xff]  }
 0x210   :  { %9513 = vmatpush1.bf16.msra.mxu1 %v17685_v62  ;;  %v17723_v62 = vld [vmem:[#allocation6 + $0x165c] ss:$52 sps:$4 sm:$0xff]  }
 0x211   :  { %10024 = vmatpush1.bf16.msra.mxu0 %v17688_v19  ;;  %9514 = vmatprep.subr.bf16.mxu1 %v17693_v30  ;;  %v17726_v19 = vld [vmem:[#allocation6 + $0x1664] ss:$52 sps:$4 sm:$0xff]  }
 0x212   :  { %10025 = vmatprep.subr.bf16.mxu0 %v17696_v63  ;;  %v17721_v30 = vld [vmem:[#allocation6 + $0x1658] ss:$52 sps:$4 sm:$0xff]   ;;  %v17724_v63 = vld [vmem:[#allocation6 + $0x1660] ss:$52 sps:$4 sm:$0xff]  }
 0x213   :  { %9480 = vmatmul.mubr.bf16.gmra.mrb[52].mxu1 %v20036_v17  ;;  %9991 = vmatmul.mubr.bf16.gmra.mrb[60].mxu0 %v20036_v17 }
 0x214   :  { %9489 = vmatprep.mubr.bf16.mxu1 %v20054_v57  ;;  %9515 = vmatpush1.bf16.msra.mxu1 %v17691_v46  ;;  %v17729_v46 = vld [vmem:[#allocation6 + $0x16c4] ss:$52 sps:$4 sm:$0xff]  }
 0x215   :  { %10000 = vmatprep.mubr.bf16.mxu0 %v20054_v57  ;;  %10026 = vmatpush1.bf16.msra.mxu0 %v17694_v20  ;;  %v17732_v20 = vld [vmem:[#allocation6 + $0x16cc] ss:$52 sps:$4 sm:$0xff]  }
 0x216   :  { %9516 = vmatprep.subr.bf16.mxu1 %v17699_v5  ;;  %10027 = vmatprep.subr.bf16.mxu0 %v17702_v4  ;;  %v17727_v5 = vld [vmem:[#allocation6 + $0x16c0] ss:$52 sps:$4 sm:$0xff]   ;;  %v17730_v4 = vld [vmem:[#allocation6 + $0x16c8] ss:$52 sps:$4 sm:$0xff]  }
 0x218   :  { %9517 = vmatpush1.bf16.msra.mxu1 %v17697_v25  ;;  %v17735_v25 = vld [vmem:[#allocation6 + $0x172c] ss:$52 sps:$4 sm:$0xff]  }
 0x219   :  { %10028 = vmatpush1.bf16.msra.mxu0 %v17700_v41  ;;  %9518 = vmatprep.subr.bf16.mxu1 %v17705_v24  ;;  %v17738_v41 = vld [vmem:[#allocation6 + $0x1734] ss:$52 sps:$4 sm:$0xff]  }
 0x21a   :  { %10029 = vmatprep.subr.bf16.mxu0 %v17708_v40  ;;  %v17733_v24 = vld [vmem:[#allocation6 + $0x1728] ss:$52 sps:$4 sm:$0xff]   ;;  %v17736_v40 = vld [vmem:[#allocation6 + $0x1730] ss:$52 sps:$4 sm:$0xff]  }
 0x21b   :  { %9490 = vmatmul.mubr.bf16.gmra.mrb[56].mxu1 %v20052_v12  ;;  %10001 = vmatmul.mubr.bf16.gmra.mrb[64].mxu0 %v20052_v12 }
 0x21c   :  { %9499 = vmatprep.mubr.bf16.mxu1 %v20080_v43  ;;  %9519 = vmatpush1.bf16.msra.mxu1 %v17703_v45  ;;  %v17741_v45 = vld [vmem:[#allocation6 + $0x1794] ss:$52 sps:$4 sm:$0xff]  }
 0x21d   :  { %10010 = vmatprep.mubr.bf16.mxu0 %v20080_v43  ;;  %10030 = vmatpush1.bf16.msra.mxu0 %v17706_v8  ;;  %v17744_v8 = vld [vmem:[#allocation6 + $0x179c] ss:$52 sps:$4 sm:$0xff]  }
 0x21e   :  { %9520 = vmatprep.subr.bf16.mxu1 %v17711_v48  ;;  %10031 = vmatprep.subr.bf16.mxu0 %v17714_v61  ;;  %v17739_v48 = vld [vmem:[#allocation6 + $0x1790] ss:$52 sps:$4 sm:$0xff]   ;;  %v17742_v61 = vld [vmem:[#allocation6 + $0x1798] ss:$52 sps:$4 sm:$0xff]  }
 0x220   :  { %9521 = vmatpush1.bf16.msra.mxu1 %v17709_v60  ;;  %v17747_v60 = vld [vmem:[#allocation6 + $0x17fc] ss:$52 sps:$4 sm:$0xff]  }
 0x221   :  { %10032 = vmatpush1.bf16.msra.mxu0 %v17712_v49  ;;  %9522 = vmatprep.subr.bf16.mxu1 %v17717_v15  ;;  %v17750_v49 = vld [vmem:[#allocation6 + $0x1804] ss:$52 sps:$4 sm:$0xff]  }
 0x222   :  { %10033 = vmatprep.subr.bf16.mxu0 %v17720_v18  ;;  %v17745_v15 = vld [vmem:[#allocation6 + $0x17f8] ss:$52 sps:$4 sm:$0xff]   ;;  %v17748_v18 = vld [vmem:[#allocation6 + $0x1800] ss:$52 sps:$4 sm:$0xff]  }
 0x223   :  { %9500 = vmatmul.mubr.bf16.gmra.mrb[60].mxu1 %v20078_v38  ;;  %10011 = vmatmul.mubr.bf16.gmra.mrb[68].mxu0 %v20078_v38 }
 0x224   :  { %9523 = vmatpush1.bf16.msra.mxu1 %v17715_v16  ;;  %9542 = vmatprep.mubr.bf16.mxu1 %v20043_v44  ;;  %v17753_v16 = vld [vmem:[#allocation6 + $0x1864] ss:$52 sps:$4 sm:$0xff]  }
 0x225   :  { %10034 = vmatpush1.bf16.msra.mxu0 %v17718_v14  ;;  %10053 = vmatprep.mubr.bf16.mxu0 %v20043_v44  ;;  %v17756_v14 = vld [vmem:[#allocation6 + $0x186c] ss:$52 sps:$4 sm:$0xff]  }
 0x226   :  { %9524 = vmatprep.subr.bf16.mxu1 %v17723_v62  ;;  %10035 = vmatprep.subr.bf16.mxu0 %v17726_v19  ;;  %v17751_v62 = vld [vmem:[#allocation6 + $0x1860] ss:$52 sps:$4 sm:$0xff]   ;;  %v17754_v19 = vld [vmem:[#allocation6 + $0x1868] ss:$52 sps:$4 sm:$0xff]  }
 0x228   :  { %9525 = vmatpush1.bf16.msra.mxu1 %v17721_v30  ;;  %v17759_v30 = vld [vmem:[#allocation6 + $0x18cc] ss:$52 sps:$4 sm:$0xff]  }
 0x229   :  { %10036 = vmatpush1.bf16.msra.mxu0 %v17724_v63  ;;  %9526 = vmatprep.subr.bf16.mxu1 %v17729_v46  ;;  %v17762_v63 = vld [vmem:[#allocation6 + $0x18d4] ss:$52 sps:$4 sm:$0xff]  }
 0x22a   :  { %10037 = vmatprep.subr.bf16.mxu0 %v17732_v20  ;;  %v17757_v46 = vld [vmem:[#allocation6 + $0x18c8] ss:$52 sps:$4 sm:$0xff]   ;;  %v17760_v20 = vld [vmem:[#allocation6 + $0x18d0] ss:$52 sps:$4 sm:$0xff]  }
 0x22c   :  { %9527 = vmatpush1.bf16.msra.mxu1 %v17727_v5  ;;  %v17765_v5 = vld [vmem:[#allocation6 + $0x1934] ss:$52 sps:$4 sm:$0xff]  }
 0x22d   :  { %10038 = vmatpush1.bf16.msra.mxu0 %v17730_v4  ;;  %9528 = vmatprep.subr.bf16.mxu1 %v17735_v25  ;;  %v17768_v4 = vld [vmem:[#allocation6 + $0x193c] ss:$52 sps:$4 sm:$0xff]  }
 0x22e   :  { %10039 = vmatprep.subr.bf16.mxu0 %v17738_v41  ;;  %v17763_v25 = vld [vmem:[#allocation6 + $0x1930] ss:$52 sps:$4 sm:$0xff]   ;;  %v17766_v41 = vld [vmem:[#allocation6 + $0x1938] ss:$52 sps:$4 sm:$0xff]  }
 0x230   :  { %9529 = vmatpush1.bf16.msra.mxu1 %v17733_v24  ;;  %v17771_v24 = vld [vmem:[#allocation6 + $0x199c] ss:$52 sps:$4 sm:$0xff]  }
 0x231   :  { %10040 = vmatpush1.bf16.msra.mxu0 %v17736_v40  ;;  %9530 = vmatprep.subr.bf16.mxu1 %v17741_v45  ;;  %v17774_v40 = vld [vmem:[#allocation6 + $0x19a4] ss:$52 sps:$4 sm:$0xff]  }
 0x232   :  { %10041 = vmatprep.subr.bf16.mxu0 %v17744_v8  ;;  %v17769_v45 = vld [vmem:[#allocation6 + $0x1998] ss:$52 sps:$4 sm:$0xff]   ;;  %v17772_v8 = vld [vmem:[#allocation6 + $0x19a0] ss:$52 sps:$4 sm:$0xff]  }
 0x234   :  { %9531 = vmatpush1.bf16.msra.mxu1 %v17739_v48  ;;  %v17777_v48 = vld [vmem:[#allocation6 + $0x1a04] ss:$52 sps:$4 sm:$0xff]  }
 0x235   :  { %10042 = vmatpush1.bf16.msra.mxu0 %v17742_v61  ;;  %9532 = vmatprep.subr.bf16.mxu1 %v17747_v60  ;;  %v17780_v61 = vld [vmem:[#allocation6 + $0x1a0c] ss:$52 sps:$4 sm:$0xff]  }
 0x236   :  { %10043 = vmatprep.subr.bf16.mxu0 %v17750_v49  ;;  %v17775_v60 = vld [vmem:[#allocation6 + $0x1a00] ss:$52 sps:$4 sm:$0xff]   ;;  %v17778_v49 = vld [vmem:[#allocation6 + $0x1a08] ss:$52 sps:$4 sm:$0xff]  }
 0x238   :  { %9533 = vmatpush1.bf16.msra.mxu1 %v17745_v15  ;;  %v17783_v15 = vld [vmem:[#allocation6 + $0x1a6c] ss:$52 sps:$4 sm:$0xff]  }
 0x239   :  { %10044 = vmatpush1.bf16.msra.mxu0 %v17748_v18  ;;  %9534 = vmatprep.subr.bf16.mxu1 %v17753_v16  ;;  %v17786_v18 = vld [vmem:[#allocation6 + $0x1a74] ss:$52 sps:$4 sm:$0xff]  }
 0x23a   :  { %10045 = vmatprep.subr.bf16.mxu0 %v17756_v14  ;;  %v17781_v16 = vld [vmem:[#allocation6 + $0x1a68] ss:$52 sps:$4 sm:$0xff]   ;;  %v17784_v14 = vld [vmem:[#allocation6 + $0x1a70] ss:$52 sps:$4 sm:$0xff]  }
 0x23c   :  { %9535 = vmatpush1.bf16.msra.mxu1 %v17751_v62  ;;  %v17789_v62 = vld [vmem:[#allocation6 + $0x1ad4] ss:$52 sps:$4 sm:$0xff]  }
 0x23d   :  { %10046 = vmatpush1.bf16.msra.mxu0 %v17754_v19  ;;  %9536 = vmatprep.subr.bf16.mxu1 %v17759_v30  ;;  %v17792_v19 = vld [vmem:[#allocation6 + $0x1adc] ss:$52 sps:$4 sm:$0xff]  }
 0x23e   :  { %10047 = vmatprep.subr.bf16.mxu0 %v17762_v63  ;;  %v17787_v30 = vld [vmem:[#allocation6 + $0x1ad0] ss:$52 sps:$4 sm:$0xff]   ;;  %v17790_v63 = vld [vmem:[#allocation6 + $0x1ad8] ss:$52 sps:$4 sm:$0xff]  }
 0x240   :  { %9537 = vmatpush1.bf16.msra.mxu1 %v17757_v46  ;;  %v17795_v46 = vld [vmem:[#allocation6 + $0x1b3c] ss:$52 sps:$4 sm:$0xff]  }
 0x241   :  { %10048 = vmatpush1.bf16.msra.mxu0 %v17760_v20  ;;  %9538 = vmatprep.subr.bf16.mxu1 %v17765_v5  ;;  %v17798_v20 = vld [vmem:[#allocation6 + $0x1b44] ss:$52 sps:$4 sm:$0xff]  }
 0x242   :  { %10049 = vmatprep.subr.bf16.mxu0 %v17768_v4  ;;  %v17793_v5 = vld [vmem:[#allocation6 + $0x1b38] ss:$52 sps:$4 sm:$0xff]   ;;  %v17796_v4 = vld [vmem:[#allocation6 + $0x1b40] ss:$52 sps:$4 sm:$0xff]  }
 0x244   :  { %9539 = vmatpush1.bf16.msra.mxu1 %v17763_v25  ;;  %v17801_v25 = vld [vmem:[#allocation6 + $0x1ba4] ss:$52 sps:$4 sm:$0xff]  }
 0x245   :  { %10050 = vmatpush1.bf16.msra.mxu0 %v17766_v41  ;;  %9540 = vmatprep.subr.bf16.mxu1 %v17771_v24  ;;  %v17799_v41 = vld [vmem:[#allocation6 + $0x1ba0] ss:$52 sps:$4 sm:$0xff]  }
 0x246   :  { %10051 = vmatprep.subr.bf16.mxu0 %v17774_v40  ;;  %v17804_v24 = vld [vmem:[#allocation6 + $0x1bac] ss:$52 sps:$4 sm:$0xff]   ;;  %v17802_v40 = vld [vmem:[#allocation6 + $0x1ba8] ss:$52 sps:$4 sm:$0xff]  }
 0x248   :  { %9541 = vmatpush1.bf16.msra.mxu1 %v17769_v45  ;;  %v17807_v45 = vld [vmem:[#allocation6 + $0x1c0c] ss:$52 sps:$4 sm:$0xff]  }
 0x249   :  { %10052 = vmatpush1.bf16.msra.mxu0 %v17772_v8  ;;  %9583 = vmatprep.subr.bf16.mxu1 %v17777_v48  ;;  %v17810_v8 = vld [vmem:[#allocation6 + $0x1c14] ss:$52 sps:$4 sm:$0xff]  }
 0x24a   :  { %10094 = vmatprep.subr.bf16.mxu0 %v17780_v61  ;;  %v17805_v48 = vld [vmem:[#allocation6 + $0x1c08] ss:$52 sps:$4 sm:$0xff]   ;;  %v17808_v61 = vld [vmem:[#allocation6 + $0x1c10] ss:$52 sps:$4 sm:$0xff]  }
 0x24b   :  { %9543 = vmatmul.mubr.bf16.vlgmr.msra.gmra.mrb[48].mxu1 %v20040_v26 }
 0x24c   :  { %10054 = vmatmul.mubr.bf16.vlgmr.msra.gmra.mrb[56].mxu0 %v20040_v26  ;;  %9552 = vmatprep.mubr.bf16.mxu1 %v20059_v6 }
 0x24d   :  { %9584 = vmatpush1.bf16.msra.mxu1 %v17775_v60  ;;  %10063 = vmatprep.mubr.bf16.mxu0 %v20059_v6  ;;  %v17813_v60 = vld [vmem:[#allocation6 + $0x1c74] ss:$52 sps:$4 sm:$0xff]  }
 0x24e   :  { %10095 = vmatpush1.bf16.msra.mxu0 %v17778_v49  ;;  %9585 = vmatprep.subr.bf16.mxu1 %v17783_v15  ;;  %v17816_v49 = vld [vmem:[#allocation6 + $0x1c7c] ss:$52 sps:$4 sm:$0xff]  }
 0x24f   :  { %10096 = vmatprep.subr.bf16.mxu0 %v17786_v18  ;;  %v17811_v15 = vld [vmem:[#allocation6 + $0x1c70] ss:$52 sps:$4 sm:$0xff]   ;;  %v17814_v18 = vld [vmem:[#allocation6 + $0x1c78] ss:$52 sps:$4 sm:$0xff]  }
 0x251   :  { %9586 = vmatpush1.bf16.msra.mxu1 %v17781_v16  ;;  %v17819_v16 = vld [vmem:[#allocation6 + $0x1cdc] ss:$52 sps:$4 sm:$0xff]  }
 0x252   :  { %10097 = vmatpush1.bf16.msra.mxu0 %v17784_v14  ;;  %9587 = vmatprep.subr.bf16.mxu1 %v17789_v62  ;;  %v17822_v14 = vld [vmem:[#allocation6 + $0x1ce4] ss:$52 sps:$4 sm:$0xff]  }
 0x253   :  { %9553 = vmatmul.mubr.bf16.gmra.mrb[52].mxu1 %v20056_v29  ;;  %10098 = vmatprep.subr.bf16.mxu0 %v17792_v19  ;;  %v17817_v62 = vld [vmem:[#allocation6 + $0x1cd8] ss:$52 sps:$4 sm:$0xff]   ;;  %v17820_v19 = vld [vmem:[#allocation6 + $0x1ce0] ss:$52 sps:$4 sm:$0xff]  }
 0x254   :  { %10064 = vmatmul.mubr.bf16.gmra.mrb[60].mxu0 %v20056_v29  ;;  %9562 = vmatprep.mubr.bf16.mxu1 %v20085_v50 }
 0x255   :  { %9588 = vmatpush1.bf16.msra.mxu1 %v17787_v30  ;;  %10073 = vmatprep.mubr.bf16.mxu0 %v20085_v50  ;;  %v17825_v30 = vld [vmem:[#allocation6 + $0x1d44] ss:$52 sps:$4 sm:$0xff]  }
 0x256   :  { %10099 = vmatpush1.bf16.msra.mxu0 %v17790_v63  ;;  %9589 = vmatprep.subr.bf16.mxu1 %v17795_v46  ;;  %v17823_v63 = vld [vmem:[#allocation6 + $0x1d40] ss:$52 sps:$4 sm:$0xff]  }
 0x257   :  { %10100 = vmatprep.subr.bf16.mxu0 %v17798_v20  ;;  %v17828_v46 = vld [vmem:[#allocation6 + $0x1d4c] ss:$52 sps:$4 sm:$0xff]   ;;  %v17826_v20 = vld [vmem:[#allocation6 + $0x1d48] ss:$52 sps:$4 sm:$0xff]  }
 0x259   :  { %9590 = vmatpush1.bf16.msra.mxu1 %v17793_v5  ;;  %v17831_v5 = vld [vmem:[#allocation6 + $0x1dac] ss:$52 sps:$4 sm:$0xff]  }
 0x25a   :  { %10101 = vmatpush1.bf16.msra.mxu0 %v17796_v4  ;;  %9591 = vmatprep.subr.bf16.mxu1 %v17801_v25  ;;  %v17834_v4 = vld [vmem:[#allocation6 + $0x1db4] ss:$52 sps:$4 sm:$0xff]  }
 0x25b   :  { %9563 = vmatmul.mubr.bf16.gmra.mrb[56].mxu1 %v20082_v34  ;;  %10102 = vmatprep.subr.bf16.mxu0 %v17804_v24  ;;  %v17829_v25 = vld [vmem:[#allocation6 + $0x1da8] ss:$52 sps:$4 sm:$0xff]  }
 0x25c   :  { %10074 = vmatmul.mubr.bf16.gmra.mrb[64].mxu0 %v20082_v34  ;;  %9572 = vmatprep.mubr.bf16.mxu1 %v20110_v10  ;;  %v17837_v24 = vld [vmem:[#allocation6 + $0x1e14] ss:$52 sps:$4 sm:$0xff]  }
 0x25d   :  { %9592 = vmatpush1.bf16.msra.mxu1 %v17799_v41  ;;  %10083 = vmatprep.mubr.bf16.mxu0 %v20110_v10  ;;  %v17832_v41 = vld [vmem:[#allocation6 + $0x1db0] ss:$52 sps:$4 sm:$0xff]  }
 0x25e   :  { %10103 = vmatpush1.bf16.msra.mxu0 %v17802_v40  ;;  %9593 = vmatprep.subr.bf16.mxu1 %v17807_v45  ;;  %v17835_v40 = vld [vmem:[#allocation6 + $0x1e10] ss:$52 sps:$4 sm:$0xff]  }
 0x25f   :  { %10104 = vmatprep.subr.bf16.mxu0 %v17810_v8  ;;  %v17840_v45 = vld [vmem:[#allocation6 + $0x1e1c] ss:$52 sps:$4 sm:$0xff]   ;;  %v17838_v8 = vld [vmem:[#allocation6 + $0x1e18] ss:$52 sps:$4 sm:$0xff]  }
 0x261   :  { %9594 = vmatpush1.bf16.msra.mxu1 %v17805_v48  ;;  %v17843_v48 = vld [vmem:[#allocation6 + $0x1e7c] ss:$52 sps:$4 sm:$0xff]  }
 0x262   :  { %10105 = vmatpush1.bf16.msra.mxu0 %v17808_v61  ;;  %9595 = vmatprep.subr.bf16.mxu1 %v17813_v60  ;;  %v17841_v61 = vld [vmem:[#allocation6 + $0x1e78] ss:$52 sps:$4 sm:$0xff]  }
 0x263   :  { %9573 = vmatmul.mubr.bf16.gmra.mrb[60].mxu1 %v20107_v36  ;;  %10106 = vmatprep.subr.bf16.mxu0 %v17816_v49  ;;  %v17846_v60 = vld [vmem:[#allocation6 + $0x1e84] ss:$52 sps:$4 sm:$0xff]   ;;  %v17844_v49 = vld [vmem:[#allocation6 + $0x1e80] ss:$52 sps:$4 sm:$0xff]  }
 0x264   :  { %10084 = vmatmul.mubr.bf16.gmra.mrb[68].mxu0 %v20107_v36  ;;  %9615 = vmatprep.mubr.bf16.mxu1 %v20100_v52 }
 0x265   :  { %9596 = vmatpush1.bf16.msra.mxu1 %v17811_v15  ;;  %10126 = vmatprep.mubr.bf16.mxu0 %v20100_v52  ;;  %v17849_v15 = vld [vmem:[#allocation6 + $0x1ee4] ss:$52 sps:$4 sm:$0xff]  }
 0x266   :  { %10107 = vmatpush1.bf16.msra.mxu0 %v17814_v18  ;;  %9597 = vmatprep.subr.bf16.mxu1 %v17819_v16  ;;  %v17847_v18 = vld [vmem:[#allocation6 + $0x1ee0] ss:$52 sps:$4 sm:$0xff]  }
 0x267   :  { %10108 = vmatprep.subr.bf16.mxu0 %v17822_v14  ;;  %v17852_v16 = vld [vmem:[#allocation6 + $0x1eec] ss:$52 sps:$4 sm:$0xff]   ;;  %v17850_v14 = vld [vmem:[#allocation6 + $0x1ee8] ss:$52 sps:$4 sm:$0xff]  }
 0x269   :  { %9598 = vmatpush1.bf16.msra.mxu1 %v17817_v62  ;;  %v17855_v62 = vld [vmem:[#allocation6 + $0x1f4c] ss:$52 sps:$4 sm:$0xff]  }
 0x26a   :  { %10109 = vmatpush1.bf16.msra.mxu0 %v17820_v19  ;;  %9599 = vmatprep.subr.bf16.mxu1 %v17825_v30  ;;  %v17853_v19 = vld [vmem:[#allocation6 + $0x1f48] ss:$52 sps:$4 sm:$0xff]  }
 0x26b   :  { %10110 = vmatprep.subr.bf16.mxu0 %v17828_v46  ;;  %v17858_v30 = vld [vmem:[#allocation6 + $0x1f54] ss:$52 sps:$4 sm:$0xff]  }
 0x26c   :  { %v17861_v46 = vld [vmem:[#allocation6 + $0x1fb4] ss:$52 sps:$4 sm:$0xff]  }
 0x26d   :  { %9600 = vmatpush1.bf16.msra.mxu1 %v17823_v63  ;;  %v17856_v63 = vld [vmem:[#allocation6 + $0x1f50] ss:$52 sps:$4 sm:$0xff]  }
 0x26e   :  { %10111 = vmatpush1.bf16.msra.mxu0 %v17826_v20  ;;  %9601 = vmatprep.subr.bf16.mxu1 %v17831_v5  ;;  %v17859_v20 = vld [vmem:[#allocation6 + $0x1fb0] ss:$52 sps:$4 sm:$0xff]  }
 0x26f   :  { %10112 = vmatprep.subr.bf16.mxu0 %v17834_v4  ;;  %v17864_v5 = vld [vmem:[#allocation6 + $0x1fbc] ss:$52 sps:$4 sm:$0xff]   ;;  %v17862_v4 = vld [vmem:[#allocation6 + $0x1fb8] ss:$52 sps:$4 sm:$0xff]  }
 0x271   :  { %9602 = vmatpush1.bf16.msra.mxu1 %v17829_v25  ;;  %v17867_v25 = vld [vmem:[#allocation6 + $0x201c] ss:$52 sps:$4 sm:$0xff]  }
 0x272   :  { %10113 = vmatpush1.bf16.msra.mxu0 %v17832_v41  ;;  %9603 = vmatprep.subr.bf16.mxu1 %v17837_v24  ;;  %v17865_v41 = vld [vmem:[#allocation6 + $0x2018] ss:$52 sps:$4 sm:$0xff]  }
 0x273   :  { %10114 = vmatprep.subr.bf16.mxu0 %v17840_v45  ;;  %v17870_v24 = vld [vmem:[#allocation6 + $0x2024] ss:$52 sps:$4 sm:$0xff]  }
 0x274   :  { %v17873_v45 = vld [vmem:[#allocation6 + $0x2084] ss:$52 sps:$4 sm:$0xff]  }
 0x275   :  { %9604 = vmatpush1.bf16.msra.mxu1 %v17835_v40  ;;  %v17868_v40 = vld [vmem:[#allocation6 + $0x2020] ss:$52 sps:$4 sm:$0xff]  }
 0x276   :  { %10115 = vmatpush1.bf16.msra.mxu0 %v17838_v8  ;;  %9605 = vmatprep.subr.bf16.mxu1 %v17843_v48  ;;  %v17876_v8 = vld [vmem:[#allocation6 + $0x208c] ss:$52 sps:$4 sm:$0xff]  }
 0x277   :  { %10116 = vmatprep.subr.bf16.mxu0 %v17846_v60  ;;  %v17871_v48 = vld [vmem:[#allocation6 + $0x2080] ss:$52 sps:$4 sm:$0xff]  }
 0x278   :  { %v17879_v60 = vld [vmem:[#allocation6 + $0x20ec] ss:$52 sps:$4 sm:$0xff]  }
 0x279   :  { %9606 = vmatpush1.bf16.msra.mxu1 %v17841_v61  ;;  %v17874_v61 = vld [vmem:[#allocation6 + $0x2088] ss:$52 sps:$4 sm:$0xff]  }
 0x27a   :  { %10117 = vmatpush1.bf16.msra.mxu0 %v17844_v49  ;;  %9607 = vmatprep.subr.bf16.mxu1 %v17849_v15  ;;  %v17877_v49 = vld [vmem:[#allocation6 + $0x20e8] ss:$52 sps:$4 sm:$0xff]  }
 0x27b   :  { %10118 = vmatprep.subr.bf16.mxu0 %v17852_v16  ;;  %v17882_v15 = vld [vmem:[#allocation6 + $0x20f4] ss:$52 sps:$4 sm:$0xff]  }
 0x27c   :  { %v17885_v16 = vld [vmem:[#allocation6 + $0x2154] ss:$52 sps:$4 sm:$0xff]  }
 0x27d   :  { %9608 = vmatpush1.bf16.msra.mxu1 %v17847_v18  ;;  %v17880_v18 = vld [vmem:[#allocation6 + $0x20f0] ss:$52 sps:$4 sm:$0xff]  }
 0x27e   :  { %10119 = vmatpush1.bf16.msra.mxu0 %v17850_v14  ;;  %9609 = vmatprep.subr.bf16.mxu1 %v17855_v62  ;;  %v17883_v14 = vld [vmem:[#allocation6 + $0x2150] ss:$52 sps:$4 sm:$0xff]  }
 0x27f   :  { %10120 = vmatprep.subr.bf16.mxu0 %v17858_v30  ;;  %v17888_v62 = vld [vmem:[#allocation6 + $0x215c] ss:$52 sps:$4 sm:$0xff]  }
 0x280   :  { %v17891_v30 = vld [vmem:[#allocation6 + $0x21bc] ss:$52 sps:$4 sm:$0xff]  }
 0x281   :  { %9610 = vmatpush1.bf16.msra.mxu1 %v17853_v19  ;;  %v17886_v19 = vld [vmem:[#allocation6 + $0x2158] ss:$52 sps:$4 sm:$0xff]  }
 0x282   :  { %10121 = vmatpush1.bf16.msra.mxu0 %v17856_v63  ;;  %9611 = vmatprep.subr.bf16.mxu1 %v17861_v46  ;;  %v17889_v63 = vld [vmem:[#allocation6 + $0x21b8] ss:$52 sps:$4 sm:$0xff]  }
 0x283   :  { %10122 = vmatprep.subr.bf16.mxu0 %v17864_v5  ;;  %v17894_v46 = vld [vmem:[#allocation6 + $0x21c4] ss:$52 sps:$4 sm:$0xff]  }
 0x284   :  { %v17897_v5 = vld [vmem:[#allocation6 + $0x2224] ss:$52 sps:$4 sm:$0xff]  }
 0x285   :  { %9612 = vmatpush1.bf16.msra.mxu1 %v17859_v20  ;;  %v17892_v20 = vld [vmem:[#allocation6 + $0x21c0] ss:$52 sps:$4 sm:$0xff]  }
 0x286   :  { %10123 = vmatpush1.bf16.msra.mxu0 %v17862_v4  ;;  %9613 = vmatprep.subr.bf16.mxu1 %v17867_v25  ;;  %v17895_v4 = vld [vmem:[#allocation6 + $0x2220] ss:$52 sps:$4 sm:$0xff]  }
 0x287   :  { %10124 = vmatprep.subr.bf16.mxu0 %v17870_v24  ;;  %v17900_v25 = vld [vmem:[#allocation6 + $0x222c] ss:$52 sps:$4 sm:$0xff]  }
 0x288   :  { %v17903_v24 = vld [vmem:[#allocation6 + $0x228c] ss:$52 sps:$4 sm:$0xff]  }
 0x289   :  { %9614 = vmatpush1.bf16.msra.mxu1 %v17865_v41  ;;  %v17898_v41 = vld [vmem:[#allocation6 + $0x2228] ss:$52 sps:$4 sm:$0xff]  }
 0x28a   :  { %10125 = vmatpush1.bf16.msra.mxu0 %v17868_v40  ;;  %9656 = vmatprep.subr.bf16.mxu1 %v17873_v45  ;;  %v17901_v40 = vld [vmem:[#allocation6 + $0x2288] ss:$52 sps:$4 sm:$0xff]  }
 0x28b   :  { %10167 = vmatprep.subr.bf16.mxu0 %v17876_v8  ;;  %v17906_v45 = vld [vmem:[#allocation6 + $0x2294] ss:$52 sps:$4 sm:$0xff]   ;;  %v17904_v8 = vld [vmem:[#allocation6 + $0x2290] ss:$52 sps:$4 sm:$0xff]  }
 0x28c   :  { %9616 = vmatmul.mubr.bf16.vlgmr.msra.gmra.mrb[48].mxu1 %v20094_v11 }
 0x28d   :  { %10127 = vmatmul.mubr.bf16.vlgmr.msra.gmra.mrb[56].mxu0 %v20094_v11  ;;  %9625 = vmatprep.mubr.bf16.mxu1 %v20124_v2 }
 0x28e   :  { %9657 = vmatpush1.bf16.msra.mxu1 %v17871_v48  ;;  %10136 = vmatprep.mubr.bf16.mxu0 %v20124_v2  ;;  %v17909_v48 = vld [vmem:[#allocation6 + $0x22f4] ss:$52 sps:$4 sm:$0xff]  }
 0x28f   :  { %10168 = vmatpush1.bf16.msra.mxu0 %v17874_v61  ;;  %9658 = vmatprep.subr.bf16.mxu1 %v17879_v60  ;;  %v17907_v61 = vld [vmem:[#allocation6 + $0x22f0] ss:$52 sps:$4 sm:$0xff]  }
 0x290   :  { %10169 = vmatprep.subr.bf16.mxu0 %v17882_v15  ;;  %v17912_v60 = vld [vmem:[#allocation6 + $0x22fc] ss:$52 sps:$4 sm:$0xff]  }
 0x291   :  { %v17915_v15 = vld [vmem:[#allocation6 + $0x235c] ss:$52 sps:$4 sm:$0xff]  }
 0x292   :  { %9659 = vmatpush1.bf16.msra.mxu1 %v17877_v49  ;;  %v17910_v49 = vld [vmem:[#allocation6 + $0x22f8] ss:$52 sps:$4 sm:$0xff]  }
 0x293   :  { %10170 = vmatpush1.bf16.msra.mxu0 %v17880_v18  ;;  %9660 = vmatprep.subr.bf16.mxu1 %v17885_v16  ;;  %v17913_v18 = vld [vmem:[#allocation6 + $0x2358] ss:$52 sps:$4 sm:$0xff]  }
 0x294   :  { %9626 = vmatmul.mubr.bf16.gmra.mrb[52].mxu1 %v20122_v9  ;;  %10171 = vmatprep.subr.bf16.mxu0 %v17888_v62  ;;  %v17918_v16 = vld [vmem:[#allocation6 + $0x2364] ss:$52 sps:$4 sm:$0xff]  }
 0x295   :  { %10137 = vmatmul.mubr.bf16.gmra.mrb[60].mxu0 %v20122_v9  ;;  %9635 = vmatprep.mubr.bf16.mxu1 %v20144_v54  ;;  %v17921_v62 = vld [vmem:[#allocation6 + $0x23c4] ss:$52 sps:$4 sm:$0xff]  }
 0x296   :  { %9661 = vmatpush1.bf16.msra.mxu1 %v17883_v14  ;;  %10146 = vmatprep.mubr.bf16.mxu0 %v20144_v54  ;;  %v17916_v14 = vld [vmem:[#allocation6 + $0x2360] ss:$52 sps:$4 sm:$0xff]  }
 0x297   :  { %10172 = vmatpush1.bf16.msra.mxu0 %v17886_v19  ;;  %9662 = vmatprep.subr.bf16.mxu1 %v17891_v30  ;;  %v17919_v19 = vld [vmem:[#allocation6 + $0x23c0] ss:$52 sps:$4 sm:$0xff]  }
 0x298   :  { %10173 = vmatprep.subr.bf16.mxu0 %v17894_v46  ;;  %v17924_v30 = vld [vmem:[#allocation6 + $0x23cc] ss:$52 sps:$4 sm:$0xff]  }
 0x299   :  { %v17927_v46 = vld [vmem:[#allocation6 + $0x242c] ss:$52 sps:$4 sm:$0xff]  }
 0x29a   :  { %9663 = vmatpush1.bf16.msra.mxu1 %v17889_v63  ;;  %v17922_v63 = vld [vmem:[#allocation6 + $0x23c8] ss:$52 sps:$4 sm:$0xff]  }
 0x29b   :  { %10174 = vmatpush1.bf16.msra.mxu0 %v17892_v20  ;;  %9664 = vmatprep.subr.bf16.mxu1 %v17897_v5  ;;  %v17925_v20 = vld [vmem:[#allocation6 + $0x2428] ss:$52 sps:$4 sm:$0xff]  }
 0x29c   :  { %9636 = vmatmul.mubr.bf16.gmra.mrb[56].mxu1 %v20142_v21  ;;  %10175 = vmatprep.subr.bf16.mxu0 %v17900_v25  ;;  %v17930_v5 = vld [vmem:[#allocation6 + $0x2434] ss:$52 sps:$4 sm:$0xff]  }
 0x29d   :  { %10147 = vmatmul.mubr.bf16.gmra.mrb[64].mxu0 %v20142_v21  ;;  %9645 = vmatprep.mubr.bf16.mxu1 %v20168_v42  ;;  %v17933_v25 = vld [vmem:[#allocation6 + $0x2494] ss:$52 sps:$4 sm:$0xff]  }
 0x29e   :  { %9665 = vmatpush1.bf16.msra.mxu1 %v17895_v4  ;;  %10156 = vmatprep.mubr.bf16.mxu0 %v20168_v42  ;;  %v17928_v4 = vld [vmem:[#allocation6 + $0x2430] ss:$52 sps:$4 sm:$0xff]  }
 0x29f   :  { %10176 = vmatpush1.bf16.msra.mxu0 %v17898_v41  ;;  %9666 = vmatprep.subr.bf16.mxu1 %v17903_v24  ;;  %v17931_v41 = vld [vmem:[#allocation6 + $0x2490] ss:$52 sps:$4 sm:$0xff]  }
 0x2a0   :  { %10177 = vmatprep.subr.bf16.mxu0 %v17906_v45  ;;  %v17936_v24 = vld [vmem:[#allocation6 + $0x249c] ss:$52 sps:$4 sm:$0xff]  }
 0x2a1   :  { %v17939_v45 = vld [vmem:[#allocation6 + $0x24fc] ss:$52 sps:$4 sm:$0xff]  }
 0x2a2   :  { %9667 = vmatpush1.bf16.msra.mxu1 %v17901_v40  ;;  %v17934_v40 = vld [vmem:[#allocation6 + $0x2498] ss:$52 sps:$4 sm:$0xff]  }
 0x2a3   :  { %10178 = vmatpush1.bf16.msra.mxu0 %v17904_v8  ;;  %9668 = vmatprep.subr.bf16.mxu1 %v17909_v48  ;;  %v17942_v8 = vld [vmem:[#allocation6 + $0x2504] ss:$52 sps:$4 sm:$0xff]  }
 0x2a4   :  { %9646 = vmatmul.mubr.bf16.gmra.mrb[60].mxu1 %v20166_v7  ;;  %10179 = vmatprep.subr.bf16.mxu0 %v17912_v60  ;;  %v17937_v48 = vld [vmem:[#allocation6 + $0x24f8] ss:$52 sps:$4 sm:$0xff]  }
 0x2a5   :  { %10157 = vmatmul.mubr.bf16.gmra.mrb[68].mxu0 %v20166_v7  ;;  %9688 = vmatprep.mubr.bf16.mxu1 %v20130_v1  ;;  %v17945_v60 = vld [vmem:[#allocation6 + $0x2564] ss:$52 sps:$4 sm:$0xff]  }
 0x2a6   :  { %9669 = vmatpush1.bf16.msra.mxu1 %v17907_v61  ;;  %10199 = vmatprep.mubr.bf16.mxu0 %v20130_v1  ;;  %v17940_v61 = vld [vmem:[#allocation6 + $0x2500] ss:$52 sps:$4 sm:$0xff]  }
 0x2a7   :  { %10180 = vmatpush1.bf16.msra.mxu0 %v17910_v49  ;;  %9670 = vmatprep.subr.bf16.mxu1 %v17915_v15  ;;  %v17943_v49 = vld [vmem:[#allocation6 + $0x2560] ss:$52 sps:$4 sm:$0xff]  }
 0x2a8   :  { %10181 = vmatprep.subr.bf16.mxu0 %v17918_v16  ;;  %v17948_v15 = vld [vmem:[#allocation6 + $0x256c] ss:$52 sps:$4 sm:$0xff]  }
 0x2a9   :  { %v17951_v16 = vld [vmem:[#allocation6 + $0x25cc] ss:$52 sps:$4 sm:$0xff]  }
 0x2aa   :  { %9671 = vmatpush1.bf16.msra.mxu1 %v17913_v18  ;;  %v17946_v18 = vld [vmem:[#allocation6 + $0x2568] ss:$52 sps:$4 sm:$0xff]  }
 0x2ab   :  { %10182 = vmatpush1.bf16.msra.mxu0 %v17916_v14  ;;  %9672 = vmatprep.subr.bf16.mxu1 %v17921_v62  ;;  %v17954_v14 = vld [vmem:[#allocation6 + $0x25d4] ss:$52 sps:$4 sm:$0xff]  }
 0x2ac   :  { %10183 = vmatprep.subr.bf16.mxu0 %v17924_v30  ;;  %v17949_v62 = vld [vmem:[#allocation6 + $0x25c8] ss:$52 sps:$4 sm:$0xff]  }
 0x2ad   :  { %v17957_v30 = vld [vmem:[#allocation6 + $0x2634] ss:$52 sps:$4 sm:$0xff]  }
 0x2ae   :  { %9673 = vmatpush1.bf16.msra.mxu1 %v17919_v19  ;;  %v17952_v19 = vld [vmem:[#allocation6 + $0x25d0] ss:$52 sps:$4 sm:$0xff]  }
 0x2af   :  { %10184 = vmatpush1.bf16.msra.mxu0 %v17922_v63  ;;  %9674 = vmatprep.subr.bf16.mxu1 %v17927_v46  ;;  %v17955_v63 = vld [vmem:[#allocation6 + $0x2630] ss:$52 sps:$4 sm:$0xff]  }
 0x2b0   :  { %10185 = vmatprep.subr.bf16.mxu0 %v17930_v5  ;;  %v17960_v46 = vld [vmem:[#allocation6 + $0x263c] ss:$52 sps:$4 sm:$0xff]  }
 0x2b1   :  { %v17963_v5 = vld [vmem:[#allocation6 + $0x269c] ss:$52 sps:$4 sm:$0xff]  }
 0x2b2   :  { %9675 = vmatpush1.bf16.msra.mxu1 %v17925_v20  ;;  %v17958_v20 = vld [vmem:[#allocation6 + $0x2638] ss:$52 sps:$4 sm:$0xff]  }
 0x2b3   :  { %10186 = vmatpush1.bf16.msra.mxu0 %v17928_v4  ;;  %9676 = vmatprep.subr.bf16.mxu1 %v17933_v25  ;;  %v17966_v4 = vld [vmem:[#allocation6 + $0x26a4] ss:$52 sps:$4 sm:$0xff]  }
 0x2b4   :  { %10187 = vmatprep.subr.bf16.mxu0 %v17936_v24  ;;  %v17961_v25 = vld [vmem:[#allocation6 + $0x2698] ss:$52 sps:$4 sm:$0xff]  }
 0x2b5   :  { %v17969_v24 = vld [vmem:[#allocation6 + $0x2704] ss:$52 sps:$4 sm:$0xff]  }
 0x2b6   :  { %9677 = vmatpush1.bf16.msra.mxu1 %v17931_v41  ;;  %v17964_v41 = vld [vmem:[#allocation6 + $0x26a0] ss:$52 sps:$4 sm:$0xff]  }
 0x2b7   :  { %10188 = vmatpush1.bf16.msra.mxu0 %v17934_v40  ;;  %9678 = vmatprep.subr.bf16.mxu1 %v17939_v45  ;;  %v17972_v40 = vld [vmem:[#allocation6 + $0x270c] ss:$52 sps:$4 sm:$0xff]  }
 0x2b8   :  { %10189 = vmatprep.subr.bf16.mxu0 %v17942_v8  ;;  %v17967_v45 = vld [vmem:[#allocation6 + $0x2700] ss:$52 sps:$4 sm:$0xff]   ;;  %v17970_v8 = vld [vmem:[#allocation6 + $0x2708] ss:$52 sps:$4 sm:$0xff]  }
 0x2ba   :  { %9679 = vmatpush1.bf16.msra.mxu1 %v17937_v48  ;;  %v17975_v48 = vld [vmem:[#allocation6 + $0x276c] ss:$52 sps:$4 sm:$0xff]  }
 0x2bb   :  { %10190 = vmatpush1.bf16.msra.mxu0 %v17940_v61  ;;  %9680 = vmatprep.subr.bf16.mxu1 %v17945_v60  ;;  %v17973_v61 = vld [vmem:[#allocation6 + $0x2768] ss:$52 sps:$4 sm:$0xff]  }
 0x2bc   :  { %10191 = vmatprep.subr.bf16.mxu0 %v17948_v15  ;;  %v17978_v60 = vld [vmem:[#allocation6 + $0x2774] ss:$52 sps:$4 sm:$0xff]  }
 0x2bd   :  { %v17981_v15 = vld [vmem:[#allocation6 + $0x14] ss:$52 sps:$4 sm:$0xff]  }
 0x2be   :  { %9681 = vmatpush1.bf16.msra.mxu1 %v17943_v49  ;;  %v17976_v49 = vld [vmem:[#allocation6 + $0x2770] ss:$52 sps:$4 sm:$0xff]  }
 0x2bf   :  { %10192 = vmatpush1.bf16.msra.mxu0 %v17946_v18  ;;  %9682 = vmatprep.subr.bf16.mxu1 %v17951_v16  ;;  %v17984_v18 = vld [vmem:[#allocation6 + $0x1c] ss:$52 sps:$4 sm:$0xff]   ;;  %v21061_v16 = vmov 0  }
 0x2c0   :  { %10193 = vmatprep.subr.bf16.mxu0 %v17954_v14  ;;  %v17979_v14 = vld [vmem:[#allocation6 + $0x10] ss:$52 sps:$4 sm:$0xff]  }
 0x2c2   :  { %9683 = vmatpush1.bf16.msra.mxu1 %v17949_v62  ;;  %v17982_v62 = vld [vmem:[#allocation6 + $0x18] ss:$52 sps:$4 sm:$0xff]  }
 0x2c3   :  { %10194 = vmatpush1.bf16.msra.mxu0 %v17952_v19  ;;  %9684 = vmatprep.subr.bf16.mxu1 %v17957_v30  ;;  %v17987_v19 = vld [vmem:[#allocation6 + $0x7c] ss:$52 sps:$4 sm:$0xff]   ;;  %v17990_v30 = vld [vmem:[#allocation6 + $0x84] ss:$52 sps:$4 sm:$0xff]  }
 0x2c4   :  { %10195 = vmatprep.subr.bf16.mxu0 %v17960_v46  ;;  %v17988_v46 = vld [vmem:[#allocation6 + $0x80] ss:$52 sps:$4 sm:$0xff]  }
 0x2c6   :  { %9685 = vmatpush1.bf16.msra.mxu1 %v17955_v63  ;;  %v17985_v63 = vld [vmem:[#allocation6 + $0x78] ss:$52 sps:$4 sm:$0xff]  }
 0x2c7   :  { %10196 = vmatpush1.bf16.msra.mxu0 %v17958_v20  ;;  %9686 = vmatprep.subr.bf16.mxu1 %v17963_v5  ;;  %v17993_v20 = vld [vmem:[#allocation6 + $0xe4] ss:$52 sps:$4 sm:$0xff]   ;;  %v17996_v5 = vld [vmem:[#allocation6 + $0xec] ss:$52 sps:$4 sm:$0xff]  }
 0x2c8   :  { %10197 = vmatprep.subr.bf16.mxu0 %v17966_v4  ;;  %v17991_v4 = vld [vmem:[#allocation6 + $0xe0] ss:$52 sps:$4 sm:$0xff]  }
 0x2ca   :  { %9687 = vmatpush1.bf16.msra.mxu1 %v17961_v25  ;;  %v17994_v25 = vld [vmem:[#allocation6 + $0xe8] ss:$52 sps:$4 sm:$0xff]  }
 0x2cb   :  { %10198 = vmatpush1.bf16.msra.mxu0 %v17964_v41  ;;  %9729 = vmatprep.subr.bf16.mxu1 %v17969_v24  ;;  %v17999_v41 = vld [vmem:[#allocation6 + $0x14c] ss:$52 sps:$4 sm:$0xff]   ;;  %v18002_v24 = vld [vmem:[#allocation6 + $0x154] ss:$52 sps:$4 sm:$0xff]  }
 0x2cc   :  { %10240 = vmatprep.subr.bf16.mxu0 %v17972_v40  ;;  %v17997_v40 = vld [vmem:[#allocation6 + $0x148] ss:$52 sps:$4 sm:$0xff]  }
 0x2cd   :  { %9689 = vmatmul.mubr.bf16.vlgmr.msra.gmra.mrb[48].mxu1 %v20127_v58 }
 0x2ce   :  { %10200 = vmatmul.mubr.bf16.vlgmr.msra.gmra.mrb[56].mxu0 %v20127_v58  ;;  %9698 = vmatprep.mubr.bf16.mxu1 %v20150_v27 }
 0x2cf   :  { %9730 = vmatpush1.bf16.msra.mxu1 %v17967_v45  ;;  %10209 = vmatprep.mubr.bf16.mxu0 %v20150_v27  ;;  %v18000_v45 = vld [vmem:[#allocation6 + $0x150] ss:$52 sps:$4 sm:$0xff]  }
 0x2d0   :  { %10241 = vmatpush1.bf16.msra.mxu0 %v17970_v8  ;;  %9731 = vmatprep.subr.bf16.mxu1 %v17975_v48  ;;  %v18005_v8 = vld [vmem:[#allocation6 + $0x1b4] ss:$52 sps:$4 sm:$0xff]   ;;  %v18008_v48 = vld [vmem:[#allocation6 + $0x1bc] ss:$52 sps:$4 sm:$0xff]  }
 0x2d1   :  { %10242 = vmatprep.subr.bf16.mxu0 %v17978_v60  ;;  %v18006_v60 = vld [vmem:[#allocation6 + $0x1b8] ss:$52 sps:$4 sm:$0xff]  }
 0x2d3   :  { %9732 = vmatpush1.bf16.msra.mxu1 %v17973_v61  ;;  %v18003_v61 = vld [vmem:[#allocation6 + $0x1b0] ss:$52 sps:$4 sm:$0xff]  }
 0x2d4   :  { %10243 = vmatpush1.bf16.msra.mxu0 %v17976_v49  ;;  %10313 = vmatprep.subr.bf16.mxu1 %v17981_v15  ;;  %v18011_v49 = vld [vmem:[#allocation6 + $0x21c] ss:$52 sps:$4 sm:$0xff]   ;;  %v18014_v15 = vld [vmem:[#allocation6 + $0x224] ss:$52 sps:$4 sm:$0xff]  }
 0x2d5   :  { %9699 = vmatmul.mubr.bf16.gmra.mrb[52].mxu1 %v20147_v56  ;;  %10824 = vmatprep.subr.bf16.mxu0 %v17984_v18  ;;  %v18009_v18 = vld [vmem:[#allocation6 + $0x218] ss:$52 sps:$4 sm:$0xff]  }
 0x2d6   :  { %10210 = vmatmul.mubr.bf16.gmra.mrb[60].mxu0 %v20147_v56  ;;  %9708 = vmatprep.mubr.bf16.mxu1 %v20174_v32 }
 0x2d7   :  { %10219 = vmatprep.mubr.bf16.mxu0 %v20174_v32 }
 0x2dd   :  { %9709 = vmatmul.mubr.bf16.gmra.mrb[56].mxu1 %v20171_v3 }
 0x2de   :  { %10220 = vmatmul.mubr.bf16.gmra.mrb[64].mxu0 %v20171_v3  ;;  %9718 = vmatprep.mubr.bf16.mxu1 %v20193_v39 }
 0x2df   :  { %10229 = vmatprep.mubr.bf16.mxu0 %v20193_v39 }
 0x2e5   :  { %9719 = vmatmul.mubr.bf16.gmra.mrb[60].mxu1 %v20190_v47 }
 0x2e6   :  { %10230 = vmatmul.mubr.bf16.gmra.mrb[68].mxu0 %v20190_v47  ;;  %9761 = vmatprep.mubr.bf16.mxu1 %v21061_v16 }
 0x2e7   :  { %10272 = vmatprep.mubr.bf16.mxu0 %v21061_v16 }
 0x2ed   :  { %15868 = vmatmul.mubr.msk.bf16.vlgmr.msra.gmra.mrb[48].mxu1 %vm9278_vm2, %v20188_v0 }
 0x2ee   :  { %15872 = vmatmul.mubr.msk.bf16.vlgmr.msra.gmra.mrb[56].mxu0 %vm9278_vm2, %v20188_v0  ;;  %10314 = vmatpush1.bf16.msra.mxu1 %v17979_v14  ;;  %v18012_v14 = vld [vmem:[#allocation6 + $0x220] ss:$52 sps:$4 sm:$0xff]  }
 0x2ef   :  { %10825 = vmatpush1.bf16.msra.mxu0 %v17982_v62  ;;  %10315 = vmatprep.subr.bf16.mxu1 %v17987_v19  ;;  %v18017_v62 = vld [vmem:[#allocation6 + $0x284] ss:$52 sps:$4 sm:$0xff]   ;;  %v18020_v19 = vld [vmem:[#allocation6 + $0x28c] ss:$52 sps:$4 sm:$0xff]  }
 0x2f0   :  { %10826 = vmatprep.subr.bf16.mxu0 %v17990_v30  ;;  %9771 = vmatprep.mubr.bf16.mxu1 %v21061_v16  ;;  %v18015_v30 = vld [vmem:[#allocation6 + $0x280] ss:$52 sps:$4 sm:$0xff]  }
 0x2f1   :  { %10282 = vmatprep.mubr.bf16.mxu0 %v21061_v16 }
 0x2f2   :  { %10316 = vmatpush1.bf16.msra.mxu1 %v17985_v63  ;;  %v18018_v63 = vld [vmem:[#allocation6 + $0x288] ss:$52 sps:$4 sm:$0xff]  }
 0x2f3   :  { %10827 = vmatpush1.bf16.msra.mxu0 %v17988_v46  ;;  %10317 = vmatprep.subr.bf16.mxu1 %v17993_v20  ;;  %v18023_v46 = vld [vmem:[#allocation6 + $0x2ec] ss:$52 sps:$4 sm:$0xff]   ;;  %v18026_v20 = vld [vmem:[#allocation6 + $0x2f4] ss:$52 sps:$4 sm:$0xff]  }
 0x2f4   :  { %10828 = vmatprep.subr.bf16.mxu0 %v17996_v5  ;;  %v18021_v5 = vld [vmem:[#allocation6 + $0x2e8] ss:$52 sps:$4 sm:$0xff]  }
 0x2f5   :  { %15869 = vmatmul.mubr.msk.bf16.gmra.mrb[52].mxu1 %vm9278_vm2, %v20186_v31 }
 0x2f6   :  { %15873 = vmatmul.mubr.msk.bf16.gmra.mrb[60].mxu0 %vm9278_vm2, %v20186_v31  ;;  %10318 = vmatpush1.bf16.msra.mxu1 %v17991_v4  ;;  %v18024_v4 = vld [vmem:[#allocation6 + $0x2f0] ss:$52 sps:$4 sm:$0xff]  }
 0x2f7   :  { %10829 = vmatpush1.bf16.msra.mxu0 %v17994_v25  ;;  %10319 = vmatprep.subr.bf16.mxu1 %v17999_v41  ;;  %v18029_v25 = vld [vmem:[#allocation6 + $0x354] ss:$52 sps:$4 sm:$0xff]   ;;  %v18032_v41 = vld [vmem:[#allocation6 + $0x35c] ss:$52 sps:$4 sm:$0xff]  }
 0x2f8   :  { %10830 = vmatprep.subr.bf16.mxu0 %v18002_v24  ;;  %9781 = vmatprep.mubr.bf16.mxu1 %v21061_v16  ;;  %v18027_v24 = vld [vmem:[#allocation6 + $0x350] ss:$52 sps:$4 sm:$0xff]  }
 0x2f9   :  { %10292 = vmatprep.mubr.bf16.mxu0 %v21061_v16 }
 0x2fa   :  { %10320 = vmatpush1.bf16.msra.mxu1 %v17997_v40  ;;  %v18030_v40 = vld [vmem:[#allocation6 + $0x358] ss:$52 sps:$4 sm:$0xff]  }
 0x2fb   :  { %10831 = vmatpush1.bf16.msra.mxu0 %v18000_v45  ;;  %10321 = vmatprep.subr.bf16.mxu1 %v18005_v8  ;;  %v18035_v45 = vld [vmem:[#allocation6 + $0x3bc] ss:$52 sps:$4 sm:$0xff]   ;;  %v18038_v8 = vld [vmem:[#allocation6 + $0x3c4] ss:$52 sps:$4 sm:$0xff]  }
 0x2fc   :  { %10832 = vmatprep.subr.bf16.mxu0 %v18008_v48  ;;  %v18033_v48 = vld [vmem:[#allocation6 + $0x3b8] ss:$52 sps:$4 sm:$0xff]  }
 0x2fd   :  { %15870 = vmatmul.mubr.msk.bf16.gmra.mrb[56].mxu1 %vm9278_vm2, %v20200_v23 }
 0x2fe   :  { %15874 = vmatmul.mubr.msk.bf16.gmra.mrb[64].mxu0 %vm9278_vm2, %v20200_v23  ;;  %10322 = vmatpush1.bf16.msra.mxu1 %v18003_v61  ;;  %v18036_v61 = vld [vmem:[#allocation6 + $0x3c0] ss:$52 sps:$4 sm:$0xff]  }
 0x2ff   :  { %10833 = vmatpush1.bf16.msra.mxu0 %v18006_v60  ;;  %10323 = vmatprep.subr.bf16.mxu1 %v18011_v49  ;;  %v18041_v60 = vld [vmem:[#allocation6 + $0x424] ss:$52 sps:$4 sm:$0xff]   ;;  %v18044_v49 = vld [vmem:[#allocation6 + $0x42c] ss:$52 sps:$4 sm:$0xff]  }
 0x300   :  { %10834 = vmatprep.subr.bf16.mxu0 %v18014_v15  ;;  %9791 = vmatprep.mubr.bf16.mxu1 %v21061_v16  ;;  %v18039_v15 = vld [vmem:[#allocation6 + $0x420] ss:$52 sps:$4 sm:$0xff]  }
 0x301   :  { %10302 = vmatprep.mubr.bf16.mxu0 %v21061_v16 }
 0x302   :  { %10324 = vmatpush1.bf16.msra.mxu1 %v18009_v18  ;;  %v18042_v18 = vld [vmem:[#allocation6 + $0x428] ss:$52 sps:$4 sm:$0xff]  }
 0x303   :  { %10835 = vmatpush1.bf16.msra.mxu0 %v18012_v14  ;;  %10325 = vmatprep.subr.bf16.mxu1 %v18017_v62  ;;  %v18047_v14 = vld [vmem:[#allocation6 + $0x48c] ss:$52 sps:$4 sm:$0xff]   ;;  %v18050_v62 = vld [vmem:[#allocation6 + $0x494] ss:$52 sps:$4 sm:$0xff]  }
 0x304   :  { %10836 = vmatprep.subr.bf16.mxu0 %v18020_v19  ;;  %v18045_v19 = vld [vmem:[#allocation6 + $0x488] ss:$52 sps:$4 sm:$0xff]  }
 0x305   :  { %15871 = vmatmul.mubr.msk.bf16.gmra.mrb[60].mxu1 %vm9278_vm2, %v20198_v59 }
 0x306   :  { %15875 = vmatmul.mubr.msk.bf16.gmra.mrb[68].mxu0 %vm9278_vm2, %v20198_v59  ;;  %10326 = vmatpush1.bf16.msra.mxu1 %v18015_v30  ;;  %v18048_v30 = vld [vmem:[#allocation6 + $0x490] ss:$52 sps:$4 sm:$0xff]  }
 0x307   :  { %10837 = vmatpush1.bf16.msra.mxu0 %v18018_v63  ;;  %10345 = vmatprep.mubr.bf16.mxu1 %v19919_v55  ;;  %v18053_v63 = vld [vmem:[#allocation6 + $0x4f4] ss:$52 sps:$4 sm:$0xff]  }
 0x308   :  { %10856 = vmatprep.mubr.bf16.mxu0 %v19919_v55  ;;  %10327 = vmatprep.subr.bf16.mxu1 %v18023_v46  ;;  %v18056_v46 = vld [vmem:[#allocation6 + $0x4fc] ss:$52 sps:$4 sm:$0xff]  }
 0x309   :  { %10838 = vmatprep.subr.bf16.mxu0 %v18026_v20  ;;  %v18051_v20 = vld [vmem:[#allocation6 + $0x4f0] ss:$52 sps:$4 sm:$0xff]  }
 0x30a   :  { %10328 = vmatpush1.bf16.msra.mxu1 %v18021_v5  ;;  %v18054_v5 = vld [vmem:[#allocation6 + $0x4f8] ss:$52 sps:$4 sm:$0xff]  }
 0x30b   :  { %10839 = vmatpush1.bf16.msra.mxu0 %v18024_v4  ;;  %10329 = vmatprep.subr.bf16.mxu1 %v18029_v25  ;;  %v18059_v4 = vld [vmem:[#allocation6 + $0x55c] ss:$52 sps:$4 sm:$0xff]   ;;  %v18062_v25 = vld [vmem:[#allocation6 + $0x564] ss:$52 sps:$4 sm:$0xff]  }
 0x30c   :  { %10840 = vmatprep.subr.bf16.mxu0 %v18032_v41  ;;  %v18057_v41 = vld [vmem:[#allocation6 + $0x558] ss:$52 sps:$4 sm:$0xff]  }
 0x30e   :  { %10330 = vmatpush1.bf16.msra.mxu1 %v18027_v24  ;;  %v18060_v24 = vld [vmem:[#allocation6 + $0x560] ss:$52 sps:$4 sm:$0xff]  }
 0x30f   :  { %10841 = vmatpush1.bf16.msra.mxu0 %v18030_v40  ;;  %10331 = vmatprep.subr.bf16.mxu1 %v18035_v45  ;;  %v18065_v40 = vld [vmem:[#allocation6 + $0x5c4] ss:$52 sps:$4 sm:$0xff]   ;;  %v18068_v45 = vld [vmem:[#allocation6 + $0x5cc] ss:$52 sps:$4 sm:$0xff]  }
 0x310   :  { %10842 = vmatprep.subr.bf16.mxu0 %v18038_v8  ;;  %v18063_v8 = vld [vmem:[#allocation6 + $0x5c0] ss:$52 sps:$4 sm:$0xff]  }
 0x312   :  { %10332 = vmatpush1.bf16.msra.mxu1 %v18033_v48  ;;  %v18066_v48 = vld [vmem:[#allocation6 + $0x5c8] ss:$52 sps:$4 sm:$0xff]  }
 0x313   :  { %10843 = vmatpush1.bf16.msra.mxu0 %v18036_v61  ;;  %10333 = vmatprep.subr.bf16.mxu1 %v18041_v60  ;;  %v18071_v61 = vld [vmem:[#allocation6 + $0x62c] ss:$52 sps:$4 sm:$0xff]   ;;  %v18074_v60 = vld [vmem:[#allocation6 + $0x634] ss:$52 sps:$4 sm:$0xff]  }
 0x314   :  { %10844 = vmatprep.subr.bf16.mxu0 %v18044_v49  ;;  %v18069_v49 = vld [vmem:[#allocation6 + $0x628] ss:$52 sps:$4 sm:$0xff]  }
 0x316   :  { %10334 = vmatpush1.bf16.msra.mxu1 %v18039_v15  ;;  %v18072_v15 = vld [vmem:[#allocation6 + $0x630] ss:$52 sps:$4 sm:$0xff]  }
 0x317   :  { %10845 = vmatpush1.bf16.msra.mxu0 %v18042_v18  ;;  %10335 = vmatprep.subr.bf16.mxu1 %v18047_v14  ;;  %v18077_v18 = vld [vmem:[#allocation6 + $0x694] ss:$52 sps:$4 sm:$0xff]   ;;  %v18080_v14 = vld [vmem:[#allocation6 + $0x69c] ss:$52 sps:$4 sm:$0xff]  }
 0x318   :  { %10846 = vmatprep.subr.bf16.mxu0 %v18050_v62  ;;  %v18075_v62 = vld [vmem:[#allocation6 + $0x690] ss:$52 sps:$4 sm:$0xff]  }
 0x31a   :  { %10336 = vmatpush1.bf16.msra.mxu1 %v18045_v19  ;;  %v18078_v19 = vld [vmem:[#allocation6 + $0x698] ss:$52 sps:$4 sm:$0xff]  }
 0x31b   :  { %10847 = vmatpush1.bf16.msra.mxu0 %v18048_v30  ;;  %10337 = vmatprep.subr.bf16.mxu1 %v18053_v63  ;;  %v18083_v30 = vld [vmem:[#allocation6 + $0x6fc] ss:$52 sps:$4 sm:$0xff]   ;;  %v18086_v63 = vld [vmem:[#allocation6 + $0x704] ss:$52 sps:$4 sm:$0xff]  }
 0x31c   :  { %10848 = vmatprep.subr.bf16.mxu0 %v18056_v46  ;;  %v18081_v46 = vld [vmem:[#allocation6 + $0x6f8] ss:$52 sps:$4 sm:$0xff]  }
 0x31e   :  { %10338 = vmatpush1.bf16.msra.mxu1 %v18051_v20  ;;  %v18084_v20 = vld [vmem:[#allocation6 + $0x700] ss:$52 sps:$4 sm:$0xff]  }
 0x31f   :  { %10849 = vmatpush1.bf16.msra.mxu0 %v18054_v5  ;;  %10339 = vmatprep.subr.bf16.mxu1 %v18059_v4  ;;  %v18089_v5 = vld [vmem:[#allocation6 + $0x764] ss:$52 sps:$4 sm:$0xff]   ;;  %v18092_v4 = vld [vmem:[#allocation6 + $0x76c] ss:$52 sps:$4 sm:$0xff]  }
 0x320   :  { %10850 = vmatprep.subr.bf16.mxu0 %v18062_v25  ;;  %v18087_v25 = vld [vmem:[#allocation6 + $0x760] ss:$52 sps:$4 sm:$0xff]  }
 0x322   :  { %10340 = vmatpush1.bf16.msra.mxu1 %v18057_v41  ;;  %v18090_v41 = vld [vmem:[#allocation6 + $0x768] ss:$52 sps:$4 sm:$0xff]  }
 0x323   :  { %10851 = vmatpush1.bf16.msra.mxu0 %v18060_v24  ;;  %10341 = vmatprep.subr.bf16.mxu1 %v18065_v40  ;;  %v18095_v24 = vld [vmem:[#allocation6 + $0x7cc] ss:$52 sps:$4 sm:$0xff]   ;;  %v18098_v40 = vld [vmem:[#allocation6 + $0x7d4] ss:$52 sps:$4 sm:$0xff]  }
 0x324   :  { %10852 = vmatprep.subr.bf16.mxu0 %v18068_v45  ;;  %v18093_v45 = vld [vmem:[#allocation6 + $0x7c8] ss:$52 sps:$4 sm:$0xff]  }
 0x326   :  { %10342 = vmatpush1.bf16.msra.mxu1 %v18063_v8  ;;  %v18096_v8 = vld [vmem:[#allocation6 + $0x7d0] ss:$52 sps:$4 sm:$0xff]  }
 0x327   :  { %10853 = vmatpush1.bf16.msra.mxu0 %v18066_v48  ;;  %10343 = vmatprep.subr.bf16.mxu1 %v18071_v61  ;;  %v18101_v48 = vld [vmem:[#allocation6 + $0x834] ss:$52 sps:$4 sm:$0xff]   ;;  %v18104_v61 = vld [vmem:[#allocation6 + $0x83c] ss:$52 sps:$4 sm:$0xff]  }
 0x328   :  { %10854 = vmatprep.subr.bf16.mxu0 %v18074_v60  ;;  %v18099_v60 = vld [vmem:[#allocation6 + $0x830] ss:$52 sps:$4 sm:$0xff]  }
 0x32a   :  { %10344 = vmatpush1.bf16.msra.mxu1 %v18069_v49  ;;  %v18102_v49 = vld [vmem:[#allocation6 + $0x838] ss:$52 sps:$4 sm:$0xff]  }
 0x32b   :  { %10855 = vmatpush1.bf16.msra.mxu0 %v18072_v15  ;;  %10386 = vmatprep.subr.bf16.mxu1 %v18077_v18  ;;  %v18107_v15 = vld [vmem:[#allocation6 + $0x89c] ss:$52 sps:$4 sm:$0xff]   ;;  %v18110_v18 = vld [vmem:[#allocation6 + $0x8a4] ss:$52 sps:$4 sm:$0xff]  }
 0x32c   :  { %10897 = vmatprep.subr.bf16.mxu0 %v18080_v14  ;;  %v21062_v14 = vld [vmem:[#allocation34_spill] sm:$0xff] }
 0x32d   :  { %10346 = vmatmul.mubr.bf16.vlgmr.msra.gmra.mrb[64].mxu1 %v19913_v13 }
 0x32e   :  { %10857 = vmatmul.mubr.bf16.vlgmr.msra.gmra.mrb[72].mxu0 %v19913_v13  ;;  %10355 = vmatprep.mubr.bf16.mxu1 %v19935_v53 }
 0x32f   :  { %10387 = vmatpush1.bf16.msra.mxu1 %v18075_v62  ;;  %10866 = vmatprep.mubr.bf16.mxu0 %v19935_v53  ;;  %v18105_v62 = vld [vmem:[#allocation6 + $0x898] ss:$52 sps:$4 sm:$0xff]  }
 0x330   :  { %10898 = vmatpush1.bf16.msra.mxu0 %v18078_v19  ;;  %10388 = vmatprep.subr.bf16.mxu1 %v18083_v30  ;;  %v18108_v19 = vld [vmem:[#allocation6 + $0x8a0] ss:$52 sps:$4 sm:$0xff]   ;;  %v18113_v30 = vld [vmem:[#allocation6 + $0x904] ss:$52 sps:$4 sm:$0xff]  }
 0x331   :  { %10899 = vmatprep.subr.bf16.mxu0 %v18086_v63  ;;  %v18116_v63 = vld [vmem:[#allocation6 + $0x90c] ss:$52 sps:$4 sm:$0xff]  }
 0x333   :  { %10389 = vmatpush1.bf16.msra.mxu1 %v18081_v46  ;;  %v18111_v46 = vld [vmem:[#allocation6 + $0x900] ss:$52 sps:$4 sm:$0xff]  }
 0x334   :  { %10900 = vmatpush1.bf16.msra.mxu0 %v18084_v20  ;;  %10390 = vmatprep.subr.bf16.mxu1 %v18089_v5  ;;  %v18114_v20 = vld [vmem:[#allocation6 + $0x908] ss:$52 sps:$4 sm:$0xff]   ;;  %v18119_v5 = vld [vmem:[#allocation6 + $0x96c] ss:$52 sps:$4 sm:$0xff]  }
 0x335   :  { %10356 = vmatmul.mubr.bf16.gmra.mrb[68].mxu1 %v19933_v51  ;;  %10901 = vmatprep.subr.bf16.mxu0 %v18092_v4  ;;  %v18122_v4 = vld [vmem:[#allocation6 + $0x974] ss:$52 sps:$4 sm:$0xff]  }
 0x336   :  { %10867 = vmatmul.mubr.bf16.gmra.mrb[76].mxu0 %v19933_v51  ;;  %10365 = vmatprep.mubr.bf16.mxu1 %v19955_v37 }
 0x337   :  { %10391 = vmatpush1.bf16.msra.mxu1 %v18087_v25  ;;  %10876 = vmatprep.mubr.bf16.mxu0 %v19955_v37  ;;  %v21063_v25 = vld [vmem:[#allocation33_spill] sm:$0xff] }
 0x338   :  { %10902 = vmatpush1.bf16.msra.mxu0 %v18090_v41  ;;  %10392 = vmatprep.subr.bf16.mxu1 %v18095_v24  ;;  %v21064_v41 = vld [vmem:[#allocation27_spill] sm:$0xff] }
 0x339   :  { %10903 = vmatprep.subr.bf16.mxu0 %v18098_v40  ;;  %v18117_v24 = vld [vmem:[#allocation6 + $0x968] ss:$52 sps:$4 sm:$0xff]   ;;  %v18120_v40 = vld [vmem:[#allocation6 + $0x970] ss:$52 sps:$4 sm:$0xff]  }
 0x33b   :  { %10393 = vmatpush1.bf16.msra.mxu1 %v18093_v45  ;;  %v18125_v45 = vld [vmem:[#allocation6 + $0x9d4] ss:$52 sps:$4 sm:$0xff]  }
 0x33c   :  { %10904 = vmatpush1.bf16.msra.mxu0 %v18096_v8  ;;  %10394 = vmatprep.subr.bf16.mxu1 %v18101_v48  ;;  %v18128_v8 = vld [vmem:[#allocation6 + $0x9dc] ss:$52 sps:$4 sm:$0xff]  }
 0x33d   :  { %10366 = vmatmul.mubr.bf16.gmra.mrb[72].mxu1 %v19953_v35  ;;  %10905 = vmatprep.subr.bf16.mxu0 %v18104_v61  ;;  %v18123_v48 = vld [vmem:[#allocation6 + $0x9d0] ss:$52 sps:$4 sm:$0xff]   ;;  %v18126_v61 = vld [vmem:[#allocation6 + $0x9d8] ss:$52 sps:$4 sm:$0xff]  }
 0x33e   :  { %10877 = vmatmul.mubr.bf16.gmra.mrb[80].mxu0 %v19953_v35  ;;  %10375 = vmatprep.mubr.bf16.mxu1 %v21062_v14 }
 0x33f   :  { %10395 = vmatpush1.bf16.msra.mxu1 %v18099_v60  ;;  %10886 = vmatprep.mubr.bf16.mxu0 %v21062_v14  ;;  %v18131_v60 = vld [vmem:[#allocation6 + $0xa3c] ss:$52 sps:$4 sm:$0xff]  }
 0x340   :  { %10906 = vmatpush1.bf16.msra.mxu0 %v18102_v49  ;;  %10396 = vmatprep.subr.bf16.mxu1 %v18107_v15  ;;  %v18134_v49 = vld [vmem:[#allocation6 + $0xa44] ss:$52 sps:$4 sm:$0xff]  }
 0x341   :  { %10907 = vmatprep.subr.bf16.mxu0 %v18110_v18  ;;  %v18129_v15 = vld [vmem:[#allocation6 + $0xa38] ss:$52 sps:$4 sm:$0xff]   ;;  %v18132_v18 = vld [vmem:[#allocation6 + $0xa40] ss:$52 sps:$4 sm:$0xff]  }
 0x343   :  { %10397 = vmatpush1.bf16.msra.mxu1 %v18105_v62  ;;  %v18137_v62 = vld [vmem:[#allocation6 + $0xaa4] ss:$52 sps:$4 sm:$0xff]  }
 0x344   :  { %10908 = vmatpush1.bf16.msra.mxu0 %v18108_v19  ;;  %10398 = vmatprep.subr.bf16.mxu1 %v18113_v30  ;;  %v18140_v19 = vld [vmem:[#allocation6 + $0xaac] ss:$52 sps:$4 sm:$0xff]  }
 0x345   :  { %10376 = vmatmul.mubr.bf16.gmra.mrb[76].mxu1 %v21063_v25  ;;  %10909 = vmatprep.subr.bf16.mxu0 %v18116_v63  ;;  %v18135_v30 = vld [vmem:[#allocation6 + $0xaa0] ss:$52 sps:$4 sm:$0xff]   ;;  %v18138_v63 = vld [vmem:[#allocation6 + $0xaa8] ss:$52 sps:$4 sm:$0xff]  }
 0x346   :  { %10887 = vmatmul.mubr.bf16.gmra.mrb[84].mxu0 %v21063_v25  ;;  %10418 = vmatprep.mubr.bf16.mxu1 %v21064_v41  ;;  %v18314_v25 = vld [vmem:[#allocation6 + $0x1674] ss:$52 sps:$4 sm:$0xff]  }
 0x347   :  { %10399 = vmatpush1.bf16.msra.mxu1 %v18111_v46  ;;  %10929 = vmatprep.mubr.bf16.mxu0 %v21064_v41  ;;  %v18143_v46 = vld [vmem:[#allocation6 + $0xb0c] ss:$52 sps:$4 sm:$0xff]  }
 0x348   :  { %10910 = vmatpush1.bf16.msra.mxu0 %v18114_v20  ;;  %10400 = vmatprep.subr.bf16.mxu1 %v18119_v5  ;;  %v18146_v20 = vld [vmem:[#allocation6 + $0xb14] ss:$52 sps:$4 sm:$0xff]  }
 0x349   :  { %10911 = vmatprep.subr.bf16.mxu0 %v18122_v4  ;;  %v18141_v5 = vld [vmem:[#allocation6 + $0xb08] ss:$52 sps:$4 sm:$0xff]   ;;  %v18144_v4 = vld [vmem:[#allocation6 + $0xb10] ss:$52 sps:$4 sm:$0xff]  }
 0x34b   :  { %10401 = vmatpush1.bf16.msra.mxu1 %v18117_v24  ;;  %v18149_v24 = vld [vmem:[#allocation6 + $0xb74] ss:$52 sps:$4 sm:$0xff]  }
 0x34c   :  { %10912 = vmatpush1.bf16.msra.mxu0 %v18120_v40  ;;  %10402 = vmatprep.subr.bf16.mxu1 %v18125_v45  ;;  %v18152_v40 = vld [vmem:[#allocation6 + $0xb7c] ss:$52 sps:$4 sm:$0xff]  }
 0x34d   :  { %10913 = vmatprep.subr.bf16.mxu0 %v18128_v8  ;;  %v18147_v45 = vld [vmem:[#allocation6 + $0xb70] ss:$52 sps:$4 sm:$0xff]   ;;  %v18150_v8 = vld [vmem:[#allocation6 + $0xb78] ss:$52 sps:$4 sm:$0xff]  }
 0x34f   :  { %10403 = vmatpush1.bf16.msra.mxu1 %v18123_v48  ;;  %v18155_v48 = vld [vmem:[#allocation6 + $0xbdc] ss:$52 sps:$4 sm:$0xff]  }
 0x350   :  { %10914 = vmatpush1.bf16.msra.mxu0 %v18126_v61  ;;  %10404 = vmatprep.subr.bf16.mxu1 %v18131_v60  ;;  %v18158_v61 = vld [vmem:[#allocation6 + $0xbe4] ss:$52 sps:$4 sm:$0xff]  }
 0x351   :  { %10915 = vmatprep.subr.bf16.mxu0 %v18134_v49  ;;  %v18153_v60 = vld [vmem:[#allocation6 + $0xbd8] ss:$52 sps:$4 sm:$0xff]   ;;  %v18156_v49 = vld [vmem:[#allocation6 + $0xbe0] ss:$52 sps:$4 sm:$0xff]  }
 0x353   :  { %10405 = vmatpush1.bf16.msra.mxu1 %v18129_v15  ;;  %v18161_v15 = vld [vmem:[#allocation6 + $0xc44] ss:$52 sps:$4 sm:$0xff]  }
 0x354   :  { %10916 = vmatpush1.bf16.msra.mxu0 %v18132_v18  ;;  %10406 = vmatprep.subr.bf16.mxu1 %v18137_v62  ;;  %v18164_v18 = vld [vmem:[#allocation6 + $0xc4c] ss:$52 sps:$4 sm:$0xff]  }
 0x355   :  { %10917 = vmatprep.subr.bf16.mxu0 %v18140_v19  ;;  %v18159_v62 = vld [vmem:[#allocation6 + $0xc40] ss:$52 sps:$4 sm:$0xff]   ;;  %v18162_v19 = vld [vmem:[#allocation6 + $0xc48] ss:$52 sps:$4 sm:$0xff]  }
 0x357   :  { %10407 = vmatpush1.bf16.msra.mxu1 %v18135_v30  ;;  %v18167_v30 = vld [vmem:[#allocation6 + $0xcac] ss:$52 sps:$4 sm:$0xff]  }
 0x358   :  { %10918 = vmatpush1.bf16.msra.mxu0 %v18138_v63  ;;  %10408 = vmatprep.subr.bf16.mxu1 %v18143_v46  ;;  %v18170_v63 = vld [vmem:[#allocation6 + $0xcb4] ss:$52 sps:$4 sm:$0xff]  }
 0x359   :  { %10919 = vmatprep.subr.bf16.mxu0 %v18146_v20  ;;  %v18165_v46 = vld [vmem:[#allocation6 + $0xca8] ss:$52 sps:$4 sm:$0xff]   ;;  %v18168_v20 = vld [vmem:[#allocation6 + $0xcb0] ss:$52 sps:$4 sm:$0xff]  }
 0x35b   :  { %10409 = vmatpush1.bf16.msra.mxu1 %v18141_v5  ;;  %v18173_v5 = vld [vmem:[#allocation6 + $0xd14] ss:$52 sps:$4 sm:$0xff]  }
 0x35c   :  { %10920 = vmatpush1.bf16.msra.mxu0 %v18144_v4  ;;  %10410 = vmatprep.subr.bf16.mxu1 %v18149_v24  ;;  %v18176_v4 = vld [vmem:[#allocation6 + $0xd1c] ss:$52 sps:$4 sm:$0xff]  }
 0x35d   :  { %10921 = vmatprep.subr.bf16.mxu0 %v18152_v40  ;;  %v18171_v24 = vld [vmem:[#allocation6 + $0xd10] ss:$52 sps:$4 sm:$0xff]   ;;  %v18174_v40 = vld [vmem:[#allocation6 + $0xd18] ss:$52 sps:$4 sm:$0xff]  }
 0x35f   :  { %10411 = vmatpush1.bf16.msra.mxu1 %v18147_v45  ;;  %v18179_v45 = vld [vmem:[#allocation6 + $0xd7c] ss:$52 sps:$4 sm:$0xff]  }
 0x360   :  { %10922 = vmatpush1.bf16.msra.mxu0 %v18150_v8  ;;  %10412 = vmatprep.subr.bf16.mxu1 %v18155_v48  ;;  %v18182_v8 = vld [vmem:[#allocation6 + $0xd84] ss:$52 sps:$4 sm:$0xff]  }
 0x361   :  { %10923 = vmatprep.subr.bf16.mxu0 %v18158_v61  ;;  %v21065_v48 = vld [vmem:[#allocation26_spill] sm:$0xff]  ;;  %v21066_v61 = vld [vmem:[#allocation31_spill] sm:$0xff] }
 0x363   :  { %10413 = vmatpush1.bf16.msra.mxu1 %v18153_v60  ;;  %v18177_v60 = vld [vmem:[#allocation6 + $0xd78] ss:$52 sps:$4 sm:$0xff]  }
 0x364   :  { %10924 = vmatpush1.bf16.msra.mxu0 %v18156_v49  ;;  %10414 = vmatprep.subr.bf16.mxu1 %v18161_v15  ;;  %v18180_v49 = vld [vmem:[#allocation6 + $0xd80] ss:$52 sps:$4 sm:$0xff]   ;;  %v18185_v15 = vld [vmem:[#allocation6 + $0xde4] ss:$52 sps:$4 sm:$0xff]  }
 0x365   :  { %10925 = vmatprep.subr.bf16.mxu0 %v18164_v18  ;;  %v18188_v18 = vld [vmem:[#allocation6 + $0xdec] ss:$52 sps:$4 sm:$0xff]  }
 0x367   :  { %10415 = vmatpush1.bf16.msra.mxu1 %v18159_v62  ;;  %v18183_v62 = vld [vmem:[#allocation6 + $0xde0] ss:$52 sps:$4 sm:$0xff]  }
 0x368   :  { %10926 = vmatpush1.bf16.msra.mxu0 %v18162_v19  ;;  %10416 = vmatprep.subr.bf16.mxu1 %v18167_v30  ;;  %v18186_v19 = vld [vmem:[#allocation6 + $0xde8] ss:$52 sps:$4 sm:$0xff]   ;;  %v18191_v30 = vld [vmem:[#allocation6 + $0xe4c] ss:$52 sps:$4 sm:$0xff]  }
 0x369   :  { %10927 = vmatprep.subr.bf16.mxu0 %v18170_v63  ;;  %v18194_v63 = vld [vmem:[#allocation6 + $0xe54] ss:$52 sps:$4 sm:$0xff]  }
 0x36b   :  { %10417 = vmatpush1.bf16.msra.mxu1 %v18165_v46  ;;  %v21067_v46 = vld [vmem:[#allocation30_spill] sm:$0xff] }
 0x36c   :  { %10928 = vmatpush1.bf16.msra.mxu0 %v18168_v20  ;;  %10459 = vmatprep.subr.bf16.mxu1 %v18173_v5  ;;  %v21068_v20 = vld [vmem:[#allocation36_spill] sm:$0xff] }
 0x36d   :  { %10970 = vmatprep.subr.bf16.mxu0 %v18176_v4  ;;  %v18189_v5 = vld [vmem:[#allocation6 + $0xe48] ss:$52 sps:$4 sm:$0xff]   ;;  %v18192_v4 = vld [vmem:[#allocation6 + $0xe50] ss:$52 sps:$4 sm:$0xff]  }
 0x36e   :  { %10419 = vmatmul.mubr.bf16.vlgmr.msra.gmra.mrb[64].mxu1 %v21065_v48 }
 0x36f   :  { %10930 = vmatmul.mubr.bf16.vlgmr.msra.gmra.mrb[72].mxu0 %v21065_v48  ;;  %10428 = vmatprep.mubr.bf16.mxu1 %v21066_v61 }
 0x370   :  { %10460 = vmatpush1.bf16.msra.mxu1 %v18171_v24  ;;  %10939 = vmatprep.mubr.bf16.mxu0 %v21066_v61  ;;  %v18197_v24 = vld [vmem:[#allocation6 + $0xeb4] ss:$52 sps:$4 sm:$0xff]  }
 0x371   :  { %10971 = vmatpush1.bf16.msra.mxu0 %v18174_v40  ;;  %10461 = vmatprep.subr.bf16.mxu1 %v18179_v45  ;;  %v18200_v40 = vld [vmem:[#allocation6 + $0xebc] ss:$52 sps:$4 sm:$0xff]  }
 0x372   :  { %10972 = vmatprep.subr.bf16.mxu0 %v18182_v8  ;;  %v18195_v45 = vld [vmem:[#allocation6 + $0xeb0] ss:$52 sps:$4 sm:$0xff]   ;;  %v18198_v8 = vld [vmem:[#allocation6 + $0xeb8] ss:$52 sps:$4 sm:$0xff]   ;;  %v18306_v61 = vld [vmem:[#allocation6 + $0x1608] ss:$52 sps:$4 sm:$0xff]  }
 0x374   :  { %10462 = vmatpush1.bf16.msra.mxu1 %v18177_v60  ;;  %v18203_v60 = vld [vmem:[#allocation6 + $0xf1c] ss:$52 sps:$4 sm:$0xff]  }
 0x375   :  { %10973 = vmatpush1.bf16.msra.mxu0 %v18180_v49  ;;  %10463 = vmatprep.subr.bf16.mxu1 %v18185_v15  ;;  %v18206_v49 = vld [vmem:[#allocation6 + $0xf24] ss:$52 sps:$4 sm:$0xff]  }
 0x376   :  { %10429 = vmatmul.mubr.bf16.gmra.mrb[68].mxu1 %v21067_v46  ;;  %10974 = vmatprep.subr.bf16.mxu0 %v18188_v18  ;;  %v21069_v15 = vld [vmem:[#allocation40_spill] sm:$0xff]  ;;  %v18201_v18 = vld [vmem:[#allocation6 + $0xf18] ss:$52 sps:$4 sm:$0xff]  }
 0x377   :  { %10940 = vmatmul.mubr.bf16.gmra.mrb[76].mxu0 %v21067_v46  ;;  %10438 = vmatprep.mubr.bf16.mxu1 %v21068_v20 }
 0x378   :  { %10464 = vmatpush1.bf16.msra.mxu1 %v18183_v62  ;;  %10949 = vmatprep.mubr.bf16.mxu0 %v21068_v20  ;;  %v18204_v62 = vld [vmem:[#allocation6 + $0xf20] ss:$52 sps:$4 sm:$0xff]  }
 0x379   :  { %10975 = vmatpush1.bf16.msra.mxu0 %v18186_v19  ;;  %10465 = vmatprep.subr.bf16.mxu1 %v18191_v30  ;;  %v18209_v19 = vld [vmem:[#allocation6 + $0xf84] ss:$52 sps:$4 sm:$0xff]   ;;  %v18212_v30 = vld [vmem:[#allocation6 + $0xf8c] ss:$52 sps:$4 sm:$0xff]  }
 0x37a   :  { %10976 = vmatprep.subr.bf16.mxu0 %v18194_v63  ;;  %v18207_v63 = vld [vmem:[#allocation6 + $0xf80] ss:$52 sps:$4 sm:$0xff]  }
 0x37b   :  { %v18239_v20 = vld [vmem:[#allocation6 + $0x118c] ss:$52 sps:$4 sm:$0xff]  }
 0x37c   :  { %10466 = vmatpush1.bf16.msra.mxu1 %v18189_v5  ;;  %v18210_v5 = vld [vmem:[#allocation6 + $0xf88] ss:$52 sps:$4 sm:$0xff]  }
 0x37d   :  { %10977 = vmatpush1.bf16.msra.mxu0 %v18192_v4  ;;  %10467 = vmatprep.subr.bf16.mxu1 %v18197_v24  ;;  %v18215_v4 = vld [vmem:[#allocation6 + $0xfec] ss:$52 sps:$4 sm:$0xff]   ;;  %v18218_v24 = vld [vmem:[#allocation6 + $0xff4] ss:$52 sps:$4 sm:$0xff]  }
 0x37e   :  { %10439 = vmatmul.mubr.bf16.gmra.mrb[72].mxu1 %v19990_v28  ;;  %10978 = vmatprep.subr.bf16.mxu0 %v18200_v40  ;;  %v21070_v40 = vld [vmem:[#allocation38_spill] sm:$0xff] }
 0x37f   :  { %10950 = vmatmul.mubr.bf16.gmra.mrb[80].mxu0 %v19990_v28  ;;  %10448 = vmatprep.mubr.bf16.mxu1 %v21069_v15  ;;  %v18230_v28 = vld [vmem:[#allocation6 + $0x10c4] ss:$52 sps:$4 sm:$0xff]  }
 0x380   :  { %10468 = vmatpush1.bf16.msra.mxu1 %v18195_v45  ;;  %10959 = vmatprep.mubr.bf16.mxu0 %v21069_v15  ;;  %v21071_v45 = vld [vmem:[#allocation39_spill] sm:$0xff] }
 0x381   :  { %10979 = vmatpush1.bf16.msra.mxu0 %v18198_v8  ;;  %10469 = vmatprep.subr.bf16.mxu1 %v18203_v60  ;;  %v18213_v8 = vld [vmem:[#allocation6 + $0xfe8] ss:$52 sps:$4 sm:$0xff]   ;;  %v18216_v60 = vld [vmem:[#allocation6 + $0xff0] ss:$52 sps:$4 sm:$0xff]  }
 0x382   :  { %10980 = vmatprep.subr.bf16.mxu0 %v18206_v49  ;;  %v18221_v49 = vld [vmem:[#allocation6 + $0x1054] ss:$52 sps:$4 sm:$0xff]   ;;  %v18224_v15 = vld [vmem:[#allocation6 + $0x105c] ss:$52 sps:$4 sm:$0xff]  }
 0x384   :  { %10470 = vmatpush1.bf16.msra.mxu1 %v18201_v18  ;;  %v18219_v18 = vld [vmem:[#allocation6 + $0x1050] ss:$52 sps:$4 sm:$0xff]  }
 0x385   :  { %10981 = vmatpush1.bf16.msra.mxu0 %v18204_v62  ;;  %10471 = vmatprep.subr.bf16.mxu1 %v18209_v19  ;;  %v18222_v62 = vld [vmem:[#allocation6 + $0x1058] ss:$52 sps:$4 sm:$0xff]   ;;  %v18227_v19 = vld [vmem:[#allocation6 + $0x10bc] ss:$52 sps:$4 sm:$0xff]  }
 0x386   :  { %10449 = vmatmul.mubr.bf16.gmra.mrb[76].mxu1 %v21070_v40  ;;  %10982 = vmatprep.subr.bf16.mxu0 %v18212_v30  ;;  %v18225_v30 = vld [vmem:[#allocation6 + $0x10b8] ss:$52 sps:$4 sm:$0xff]  }
 0x387   :  { %10960 = vmatmul.mubr.bf16.gmra.mrb[84].mxu0 %v21070_v40  ;;  %10491 = vmatprep.mubr.bf16.mxu1 %v21071_v45  ;;  %v18228_v40 = vld [vmem:[#allocation6 + $0x10c0] ss:$52 sps:$4 sm:$0xff]  }
 0x388   :  { %10472 = vmatpush1.bf16.msra.mxu1 %v18207_v63  ;;  %11002 = vmatprep.mubr.bf16.mxu0 %v21071_v45  ;;  %v18233_v63 = vld [vmem:[#allocation6 + $0x1124] ss:$52 sps:$4 sm:$0xff]   ;;  %v18236_v45 = vld [vmem:[#allocation6 + $0x112c] ss:$52 sps:$4 sm:$0xff]  }
 0x389   :  { %10983 = vmatpush1.bf16.msra.mxu0 %v18210_v5  ;;  %10473 = vmatprep.subr.bf16.mxu1 %v18215_v4  ;;  %v18231_v5 = vld [vmem:[#allocation6 + $0x1120] ss:$52 sps:$4 sm:$0xff]   ;;  %v18234_v4 = vld [vmem:[#allocation6 + $0x1128] ss:$52 sps:$4 sm:$0xff]  }
 0x38a   :  { %10984 = vmatprep.subr.bf16.mxu0 %v18218_v24  ;;  %v18242_v24 = vld [vmem:[#allocation6 + $0x1194] ss:$52 sps:$4 sm:$0xff]  }
 0x38c   :  { %10474 = vmatpush1.bf16.msra.mxu1 %v18213_v8  ;;  %v18237_v8 = vld [vmem:[#allocation6 + $0x1188] ss:$52 sps:$4 sm:$0xff]  }
 0x38d   :  { %10985 = vmatpush1.bf16.msra.mxu0 %v18216_v60  ;;  %10475 = vmatprep.subr.bf16.mxu1 %v18221_v49  ;;  %v18240_v60 = vld [vmem:[#allocation6 + $0x1190] ss:$52 sps:$4 sm:$0xff]   ;;  %v18245_v49 = vld [vmem:[#allocation6 + $0x11f4] ss:$52 sps:$4 sm:$0xff]  }
 0x38e   :  { %10986 = vmatprep.subr.bf16.mxu0 %v18224_v15  ;;  %v18248_v15 = vld [vmem:[#allocation6 + $0x11fc] ss:$52 sps:$4 sm:$0xff]  }
 0x390   :  { %10476 = vmatpush1.bf16.msra.mxu1 %v18219_v18  ;;  %v18243_v18 = vld [vmem:[#allocation6 + $0x11f0] ss:$52 sps:$4 sm:$0xff]  }
 0x391   :  { %10987 = vmatpush1.bf16.msra.mxu0 %v18222_v62  ;;  %10477 = vmatprep.subr.bf16.mxu1 %v18227_v19  ;;  %v18246_v62 = vld [vmem:[#allocation6 + $0x11f8] ss:$52 sps:$4 sm:$0xff]   ;;  %v18251_v19 = vld [vmem:[#allocation6 + $0x125c] ss:$52 sps:$4 sm:$0xff]  }
 0x392   :  { %10988 = vmatprep.subr.bf16.mxu0 %v18230_v28  ;;  %v18254_v28 = vld [vmem:[#allocation6 + $0x1264] ss:$52 sps:$4 sm:$0xff]  }
 0x394   :  { %10478 = vmatpush1.bf16.msra.mxu1 %v18225_v30  ;;  %v18249_v30 = vld [vmem:[#allocation6 + $0x1258] ss:$52 sps:$4 sm:$0xff]  }
 0x395   :  { %10989 = vmatpush1.bf16.msra.mxu0 %v18228_v40  ;;  %10479 = vmatprep.subr.bf16.mxu1 %v18233_v63  ;;  %v18252_v40 = vld [vmem:[#allocation6 + $0x1260] ss:$52 sps:$4 sm:$0xff]   ;;  %v18257_v63 = vld [vmem:[#allocation6 + $0x12c4] ss:$52 sps:$4 sm:$0xff]  }
 0x396   :  { %10990 = vmatprep.subr.bf16.mxu0 %v18236_v45  ;;  %v18260_v45 = vld [vmem:[#allocation6 + $0x12cc] ss:$52 sps:$4 sm:$0xff]  }
 0x398   :  { %10480 = vmatpush1.bf16.msra.mxu1 %v18231_v5  ;;  %v18255_v5 = vld [vmem:[#allocation6 + $0x12c0] ss:$52 sps:$4 sm:$0xff]  }
 0x399   :  { %10991 = vmatpush1.bf16.msra.mxu0 %v18234_v4  ;;  %10481 = vmatprep.subr.bf16.mxu1 %v18239_v20  ;;  %v18258_v4 = vld [vmem:[#allocation6 + $0x12c8] ss:$52 sps:$4 sm:$0xff]   ;;  %v18263_v20 = vld [vmem:[#allocation6 + $0x132c] ss:$52 sps:$4 sm:$0xff]  }
 0x39a   :  { %10992 = vmatprep.subr.bf16.mxu0 %v18242_v24  ;;  %v18266_v24 = vld [vmem:[#allocation6 + $0x1334] ss:$52 sps:$4 sm:$0xff]  }
 0x39c   :  { %10482 = vmatpush1.bf16.msra.mxu1 %v18237_v8  ;;  %v18261_v8 = vld [vmem:[#allocation6 + $0x1328] ss:$52 sps:$4 sm:$0xff]  }
 0x39d   :  { %10993 = vmatpush1.bf16.msra.mxu0 %v18240_v60  ;;  %10483 = vmatprep.subr.bf16.mxu1 %v18245_v49  ;;  %v18264_v60 = vld [vmem:[#allocation6 + $0x1330] ss:$52 sps:$4 sm:$0xff]   ;;  %v18269_v49 = vld [vmem:[#allocation6 + $0x1394] ss:$52 sps:$4 sm:$0xff]  }
 0x39e   :  { %10994 = vmatprep.subr.bf16.mxu0 %v18248_v15  ;;  %v18272_v15 = vld [vmem:[#allocation6 + $0x139c] ss:$52 sps:$4 sm:$0xff]  }
 0x3a0   :  { %10484 = vmatpush1.bf16.msra.mxu1 %v18243_v18  ;;  %v18267_v18 = vld [vmem:[#allocation6 + $0x1390] ss:$52 sps:$4 sm:$0xff]  }
 0x3a1   :  { %10995 = vmatpush1.bf16.msra.mxu0 %v18246_v62  ;;  %10485 = vmatprep.subr.bf16.mxu1 %v18251_v19  ;;  %v18270_v62 = vld [vmem:[#allocation6 + $0x1398] ss:$52 sps:$4 sm:$0xff]   ;;  %v18275_v19 = vld [vmem:[#allocation6 + $0x13fc] ss:$52 sps:$4 sm:$0xff]  }
 0x3a2   :  { %10996 = vmatprep.subr.bf16.mxu0 %v18254_v28  ;;  %v18278_v28 = vld [vmem:[#allocation6 + $0x1404] ss:$52 sps:$4 sm:$0xff]  }
 0x3a4   :  { %10486 = vmatpush1.bf16.msra.mxu1 %v18249_v30  ;;  %v18273_v30 = vld [vmem:[#allocation6 + $0x13f8] ss:$52 sps:$4 sm:$0xff]  }
 0x3a5   :  { %10997 = vmatpush1.bf16.msra.mxu0 %v18252_v40  ;;  %10487 = vmatprep.subr.bf16.mxu1 %v18257_v63  ;;  %v18276_v40 = vld [vmem:[#allocation6 + $0x1400] ss:$52 sps:$4 sm:$0xff]   ;;  %v18281_v63 = vld [vmem:[#allocation6 + $0x1464] ss:$52 sps:$4 sm:$0xff]  }
 0x3a6   :  { %10998 = vmatprep.subr.bf16.mxu0 %v18260_v45  ;;  %v18284_v45 = vld [vmem:[#allocation6 + $0x146c] ss:$52 sps:$4 sm:$0xff]  }
 0x3a8   :  { %10488 = vmatpush1.bf16.msra.mxu1 %v18255_v5  ;;  %v18279_v5 = vld [vmem:[#allocation6 + $0x1460] ss:$52 sps:$4 sm:$0xff]  }
 0x3a9   :  { %10999 = vmatpush1.bf16.msra.mxu0 %v18258_v4  ;;  %10489 = vmatprep.subr.bf16.mxu1 %v18263_v20  ;;  %v18282_v4 = vld [vmem:[#allocation6 + $0x1468] ss:$52 sps:$4 sm:$0xff]   ;;  %v18287_v20 = vld [vmem:[#allocation6 + $0x14cc] ss:$52 sps:$4 sm:$0xff]  }
 0x3aa   :  { %11000 = vmatprep.subr.bf16.mxu0 %v18266_v24  ;;  %v18290_v24 = vld [vmem:[#allocation6 + $0x14d4] ss:$52 sps:$4 sm:$0xff]  }
 0x3ac   :  { %10490 = vmatpush1.bf16.msra.mxu1 %v18261_v8  ;;  %v18285_v8 = vld [vmem:[#allocation6 + $0x14c8] ss:$52 sps:$4 sm:$0xff]  }
 0x3ad   :  { %11001 = vmatpush1.bf16.msra.mxu0 %v18264_v60  ;;  %10532 = vmatprep.subr.bf16.mxu1 %v18269_v49  ;;  %v18288_v60 = vld [vmem:[#allocation6 + $0x14d0] ss:$52 sps:$4 sm:$0xff]   ;;  %v18293_v49 = vld [vmem:[#allocation6 + $0x1534] ss:$52 sps:$4 sm:$0xff]  }
 0x3ae   :  { %11043 = vmatprep.subr.bf16.mxu0 %v18272_v15  ;;  %v18296_v15 = vld [vmem:[#allocation6 + $0x153c] ss:$52 sps:$4 sm:$0xff]  }
 0x3af   :  { %10492 = vmatmul.mubr.bf16.vlgmr.msra.gmra.mrb[64].mxu1 %v20015_v22 }
 0x3b0   :  { %11003 = vmatmul.mubr.bf16.vlgmr.msra.gmra.mrb[72].mxu0 %v20015_v22  ;;  %10501 = vmatprep.mubr.bf16.mxu1 %v20038_v33  ;;  %v18308_v22 = vld [vmem:[#allocation6 + $0x160c] ss:$52 sps:$4 sm:$0xff]  }
 0x3b1   :  { %10533 = vmatpush1.bf16.msra.mxu1 %v18267_v18  ;;  %11012 = vmatprep.mubr.bf16.mxu0 %v20038_v33  ;;  %v2741_v18 = vld [vmem:[#allocation7] sm:$0xff] }
 0x3b2   :  { %11044 = vmatpush1.bf16.msra.mxu0 %v18270_v62  ;;  %10534 = vmatprep.subr.bf16.mxu1 %v18275_v19  ;;  %v18291_v62 = vld [vmem:[#allocation6 + $0x1530] ss:$52 sps:$4 sm:$0xff]   ;;  %v18294_v19 = vld [vmem:[#allocation6 + $0x1538] ss:$52 sps:$4 sm:$0xff]  }
 0x3b3   :  { %11045 = vmatprep.subr.bf16.mxu0 %v18278_v28  ;;  %v18299_v28 = vld [vmem:[#allocation6 + $0x159c] ss:$52 sps:$4 sm:$0xff]  }
 0x3b5   :  { %10535 = vmatpush1.bf16.msra.mxu1 %v18273_v30  ;;  %v21072_v30 = vld [vmem:[#allocation21_spill] sm:$0xff] }
 0x3b6   :  { %11046 = vmatpush1.bf16.msra.mxu0 %v18276_v40  ;;  %10536 = vmatprep.subr.bf16.mxu1 %v18281_v63  ;;  %v20331_v40 = vrot.slane %v2741_v18, %v21072_v30  ;;  %v18302_v63 = vld [vmem:[#allocation6 + $0x15a4] ss:$52 sps:$4 sm:$0xff]  }
 0x3b7   :  { %10502 = vmatmul.mubr.bf16.gmra.mrb[68].mxu1 %v20036_v17  ;;  %11047 = vmatprep.subr.bf16.mxu0 %v18284_v45  ;;  %v21073_v45 = vld [vmem:[#allocation23_spill] sm:$0xff] }
 0x3b8   :  { %11013 = vmatmul.mubr.bf16.gmra.mrb[76].mxu0 %v20036_v17  ;;  %10511 = vmatprep.mubr.bf16.mxu1 %v20054_v57 }
 0x3b9   :  { %10537 = vmatpush1.bf16.msra.mxu1 %v18279_v5  ;;  %11022 = vmatprep.mubr.bf16.mxu0 %v20054_v57  ;;  %v20334_v5 = vrot.slane %v2741_v18, %v21073_v45  ;;  %v21074_v57 = vld [vmem:[#allocation22_spill] sm:$0xff] }
 0x3ba   :  { %11048 = vmatpush1.bf16.msra.mxu0 %v18282_v4  ;;  %10538 = vmatprep.subr.bf16.mxu1 %v18287_v20  ;;  %v20337_v17 = vrot.slane %v2741_v18, %v21074_v57  ;;  %v21075_v4 = vld [vmem:[#allocation24_spill] sm:$0xff] }
 0x3bb   :  { %11049 = vmatprep.subr.bf16.mxu0 %v18290_v24  ;;  %v20341_v20 = vrot.slane %v2741_v18, %v21075_v4 }
 0x3bd   :  { %10539 = vmatpush1.bf16.msra.mxu1 %v18285_v8 }
 0x3be   :  { %11050 = vmatpush1.bf16.msra.mxu0 %v18288_v60  ;;  %10540 = vmatprep.subr.bf16.mxu1 %v18293_v49  ;;  %v18297_v49 = vld [vmem:[#allocation6 + $0x1598] ss:$52 sps:$4 sm:$0xff]  }
 0x3bf   :  { %10512 = vmatmul.mubr.bf16.gmra.mrb[72].mxu1 %v20052_v12  ;;  %11051 = vmatprep.subr.bf16.mxu0 %v18296_v15  ;;  %v18300_v15 = vld [vmem:[#allocation6 + $0x15a0] ss:$52 sps:$4 sm:$0xff]  }
 0x3c0   :  { %11023 = vmatmul.mubr.bf16.gmra.mrb[80].mxu0 %v20052_v12  ;;  %10521 = vmatprep.mubr.bf16.mxu1 %v20080_v43  ;;  %v9763_v24 = vpop.f32.mrb[48].mxu1  ;;  %v18305_v12 = vld [vmem:[#allocation6 + $0x1604] ss:$52 sps:$4 sm:$0xff]  }
 0x3c1   :  { %10541 = vmatpush1.bf16.msra.mxu1 %v18291_v62  ;;  %11032 = vmatprep.mubr.bf16.mxu0 %v20080_v43  ;;  %v16598_v8 = vadd.f32 %v9763_v24, %v20331_v40  ;;  %v10274_v60 = vpop.f32.mrb[56].mxu0  ;;  %v9765_v57 = vpop.f32.mrb[49].mxu1 }
 0x3c2   :  { %11052 = vmatpush1.bf16.msra.mxu0 %v18294_v19  ;;  %v16614_v45 = vadd.f32 %v10274_v60, %v20334_v5  ;;  %10542 = vmatprep.subr.bf16.mxu1 %v18299_v28  ;;  %v16599_v18 = vadd.f32 %v9765_v57, %v20337_v17  ;;  %v10276_v4 = vpop.f32.mrb[57].mxu0  ;;  %v9767_v30 = vpop.f32.mrb[50].mxu1  ;;  %v18303_v28 = vld [vmem:[#allocation6 + $0x1600] ss:$52 sps:$4 sm:$0xff]  }
 0x3c3   :  { %11053 = vmatprep.subr.bf16.mxu0 %v18302_v63  ;;  %v16615_v62 = vadd.f32 %v10276_v4, %v20341_v20  ;;  %v16600_v43 = vadd.f32 %v9767_v30, %v20331_v40  ;;  %v10278_v33 = vpop.f32.mrb[58].mxu0  ;;  %v9769_v24 = vpop.f32.mrb[51].mxu1  ;;  %v12812_v48 = vmax.f32 %v16598_v8, 0.0  ;;  %v18311_v63 = vld [vmem:[#allocation6 + $0x166c] ss:$52 sps:$4 sm:$0xff]  }
 0x3c4   :  { %v16616_v46 = vadd.f32 %v10278_v33, %v20334_v5  ;;  %v16601_v19 = vadd.f32 %v9769_v24, %v20337_v17  ;;  %v10280_v60 = vpop.f32.mrb[59].mxu0  ;;  %v12814_v4 = vmax.f32 %v16614_v45, 0.0  ;;  %v12813_v14 = vmax.f32 %v16599_v18, 0.0 }
 0x3c5   :  { %10543 = vmatpush1.bf16.msra.mxu1 %v18297_v49  ;;  %v12825_v57 = vmax.f32 %v16600_v43, 0.0  ;;  %v16617_v41 = vadd.f32 %v10280_v60, %v20341_v20  ;;  %v12815_v37 = vmax.f32 %v16615_v62, 0.0  ;;  %v18317_v62 = vld [vmem:[#allocation6 + $0x16d4] ss:$52 sps:$4 sm:$0xff]  }
 0x3c6   :  { %11054 = vmatpush1.bf16.msra.mxu0 %v18300_v15  ;;  %v12827_v30 = vmax.f32 %v16616_v46, 0.0  ;;  %v12826_v35 = vmax.f32 %v16601_v19, 0.0  ;;  %10544 = vmatprep.subr.bf16.mxu1 %v18305_v12 }
 0x3c7   :  { %v20354_v33 = vpack.c.bf16 %v12825_v57, %v12812_v48  ;;  %v12828_v24 = vmax.f32 %v16617_v41, 0.0  ;;  %10522 = vmatmul.mubr.bf16.gmra.mrb[76].mxu1 %v20078_v38  ;;  %11055 = vmatprep.subr.bf16.mxu0 %v18308_v22  ;;  %v18309_v48 = vld [vmem:[#allocation6 + $0x1668] ss:$52 sps:$4 sm:$0xff]  }
 0x3c8   :  { %v20357_v8 = vpack.c.bf16 %v12827_v30, %v12814_v4  ;;  %v20359_v43 = vpack.c.bf16 %v12826_v35, %v12813_v14  ;;  %11033 = vmatmul.mubr.bf16.gmra.mrb[84].mxu0 %v20078_v38  ;;  %10564 = vmatprep.mubr.bf16.mxu1 %v20043_v44  ;;  %v9773_v45 = vpop.f32.mrb[52].mxu1  ;;  %v18312_v35 = vld [vmem:[#allocation6 + $0x1670] ss:$52 sps:$4 sm:$0xff]  }
 0x3c9   :  { %21076 = vst [vmem:[#allocation48_spill] sm:$0xff] %v20354_v33  ;;  %v20363_v49 = vpack.c.bf16 %v12828_v24, %v12815_v37  ;;  %10545 = vmatpush1.bf16.msra.mxu1 %v18303_v28  ;;  %11075 = vmatprep.mubr.bf16.mxu0 %v20043_v44  ;;  %v16602_v12 = vadd.f32 %v9773_v45, %v20331_v40  ;;  %v10284_v41 = vpop.f32.mrb[60].mxu0  ;;  %v9775_v46 = vpop.f32.mrb[53].mxu1  ;;  %v18320_v57 = vld [vmem:[#allocation6 + $0x16dc] ss:$52 sps:$4 sm:$0xff]  }
 0x3ca   :  { %21077 = vst [vmem:[#allocation49_spill] sm:$0xff] %v20357_v8  ;;  %21078 = vst [vmem:[#allocation50_spill] sm:$0xff] %v20359_v43  ;;  %11056 = vmatpush1.bf16.msra.mxu0 %v18306_v61  ;;  %v16618_v22 = vadd.f32 %v10284_v41, %v20334_v5  ;;  %10546 = vmatprep.subr.bf16.mxu1 %v18311_v63  ;;  %v16603_v14 = vadd.f32 %v9775_v46, %v20337_v17  ;;  %v10286_v15 = vpop.f32.mrb[61].mxu0  ;;  %v9777_v18 = vpop.f32.mrb[54].mxu1  ;;  %v18315_v63 = vld [vmem:[#allocation6 + $0x16d0] ss:$52 sps:$4 sm:$0xff]  }
 0x3cb   :  { %21079 = vst [vmem:[#allocation51_spill] sm:$0xff] %v20363_v49  ;;  %11057 = vmatprep.subr.bf16.mxu0 %v18314_v25  ;;  %v16619_v37 = vadd.f32 %v10286_v15, %v20341_v20  ;;  %v16604_v19 = vadd.f32 %v9777_v18, %v20331_v40  ;;  %v10288_v60 = vpop.f32.mrb[62].mxu0  ;;  %v9779_v28 = vpop.f32.mrb[55].mxu1  ;;  %v18318_v24 = vld [vmem:[#allocation6 + $0x16d8] ss:$52 sps:$4 sm:$0xff]   ;;  %v12838_v45 = vmax.f32 %v16602_v12, 0.0 }
 0x3cc   :  { %v16620_v4 = vadd.f32 %v10288_v60, %v20334_v5  ;;  %v16605_v61 = vadd.f32 %v9779_v28, %v20337_v17  ;;  %v10290_v30 = vpop.f32.mrb[63].mxu0  ;;  %v18323_v25 = vld [vmem:[#allocation6 + $0x173c] ss:$52 sps:$4 sm:$0xff]   ;;  %v18326_v8 = vld [vmem:[#allocation6 + $0x1744] ss:$52 sps:$4 sm:$0xff]   ;;  %v12840_v15 = vmax.f32 %v16618_v22, 0.0 }
 0x3cd   :  { %10547 = vmatpush1.bf16.msra.mxu1 %v18309_v48  ;;  %v12851_v41 = vmax.f32 %v16604_v19, 0.0  ;;  %v16621_v46 = vadd.f32 %v10290_v30, %v20341_v20  ;;  %v12839_v49 = vmax.f32 %v16603_v14, 0.0  ;;  %v12841_v43 = vmax.f32 %v16619_v37, 0.0  ;;  %v18321_v19 = vld [vmem:[#allocation6 + $0x1738] ss:$52 sps:$4 sm:$0xff]  }
 0x3ce   :  { %11058 = vmatpush1.bf16.msra.mxu0 %v18312_v35  ;;  %v12853_v18 = vmax.f32 %v16620_v4, 0.0  ;;  %v12852_v33 = vmax.f32 %v16605_v61, 0.0  ;;  %10548 = vmatprep.subr.bf16.mxu1 %v18317_v62  ;;  %v18324_v14 = vld [vmem:[#allocation6 + $0x1740] ss:$52 sps:$4 sm:$0xff]   ;;  %v18329_v62 = vld [vmem:[#allocation6 + $0x17a4] ss:$52 sps:$4 sm:$0xff]  }
 0x3cf   :  { %v20374_v60 = vpack.c.bf16 %v12851_v41, %v12838_v45  ;;  %v12854_v28 = vmax.f32 %v16621_v46, 0.0  ;;  %11059 = vmatprep.subr.bf16.mxu0 %v18320_v57  ;;  %v18332_v41 = vld [vmem:[#allocation6 + $0x17ac] ss:$52 sps:$4 sm:$0xff]  }
 0x3d0   :  { %v20376_v44 = vpack.c.bf16 %v12853_v18, %v12840_v15  ;;  %v20378_v12 = vpack.c.bf16 %v12852_v33, %v12839_v49  ;;  %v9783_v48 = vpop.f32.mrb[56].mxu1  ;;  %v18327_v18 = vld [vmem:[#allocation6 + $0x17a0] ss:$52 sps:$4 sm:$0xff]  }
 0x3d1   :  { %21080 = vst [vmem:[#allocation52_spill] sm:$0xff] %v20374_v60  ;;  %v20380_v30 = vpack.c.bf16 %v12854_v28, %v12841_v43  ;;  %10549 = vmatpush1.bf16.msra.mxu1 %v18315_v63  ;;  %v16606_v22 = vadd.f32 %v9783_v48, %v20331_v40  ;;  %v10294_v35 = vpop.f32.mrb[64].mxu0  ;;  %v9785_v4 = vpop.f32.mrb[57].mxu1  ;;  %v18330_v28 = vld [vmem:[#allocation6 + $0x17a8] ss:$52 sps:$4 sm:$0xff]  }
 0x3d2   :  { %21081 = vst [vmem:[#allocation53_spill] sm:$0xff] %v20376_v44  ;;  %21082 = vst [vmem:[#allocation54_spill] sm:$0xff] %v20378_v12  ;;  %11060 = vmatpush1.bf16.msra.mxu0 %v18318_v24  ;;  %v16622_v37 = vadd.f32 %v10294_v35, %v20334_v5  ;;  %10550 = vmatprep.subr.bf16.mxu1 %v18323_v25  ;;  %v16607_v57 = vadd.f32 %v9785_v4, %v20337_v17  ;;  %v10296_v61 = vpop.f32.mrb[65].mxu0  ;;  %v9787_v33 = vpop.f32.mrb[58].mxu1  ;;  %v18338_v4 = vld [vmem:[#allocation6 + $0x1814] ss:$52 sps:$4 sm:$0xff]  }
 0x3d3   :  { %21083 = vst [vmem:[#allocation55_spill] sm:$0xff] %v20380_v30  ;;  %11061 = vmatprep.subr.bf16.mxu0 %v18326_v8  ;;  %v16623_v49 = vadd.f32 %v10296_v61, %v20341_v20  ;;  %v16608_v43 = vadd.f32 %v9787_v33, %v20331_v40  ;;  %v10298_v63 = vpop.f32.mrb[66].mxu0  ;;  %v9789_v45 = vpop.f32.mrb[59].mxu1  ;;  %v12864_v25 = vmax.f32 %v16606_v22, 0.0  ;;  %v18335_v8 = vld [vmem:[#allocation6 + $0x180c] ss:$52 sps:$4 sm:$0xff]  }
 0x3d4   :  { %v16624_v46 = vadd.f32 %v10298_v63, %v20334_v5  ;;  %v16609_v15 = vadd.f32 %v9789_v45, %v20337_v17  ;;  %v10300_v24 = vpop.f32.mrb[67].mxu0  ;;  %v12866_v61 = vmax.f32 %v16622_v37, 0.0  ;;  %v12865_v44 = vmax.f32 %v16607_v57, 0.0  ;;  %v18336_v57 = vld [vmem:[#allocation6 + $0x1810] ss:$52 sps:$4 sm:$0xff]  }
 0x3d5   :  { %10551 = vmatpush1.bf16.msra.mxu1 %v18321_v19  ;;  %v12877_v48 = vmax.f32 %v16608_v43, 0.0  ;;  %v16625_v35 = vadd.f32 %v10300_v24, %v20341_v20  ;;  %v12867_v60 = vmax.f32 %v16623_v49, 0.0  ;;  %v18333_v43 = vld [vmem:[#allocation6 + $0x1808] ss:$52 sps:$4 sm:$0xff]  }
 0x3d6   :  { %11062 = vmatpush1.bf16.msra.mxu0 %v18324_v14  ;;  %v12879_v33 = vmax.f32 %v16624_v46, 0.0  ;;  %v12878_v30 = vmax.f32 %v16609_v15, 0.0  ;;  %10552 = vmatprep.subr.bf16.mxu1 %v18329_v62  ;;  %v18341_v62 = vld [vmem:[#allocation6 + $0x1874] ss:$52 sps:$4 sm:$0xff]  }
 0x3d7   :  { %v20390_v63 = vpack.c.bf16 %v12877_v48, %v12864_v25  ;;  %v12880_v45 = vmax.f32 %v16625_v35, 0.0  ;;  %11063 = vmatprep.subr.bf16.mxu0 %v18332_v41  ;;  %v18344_v48 = vld [vmem:[#allocation6 + $0x187c] ss:$52 sps:$4 sm:$0xff]  }
 0x3d8   :  { %v20392_v12 = vpack.c.bf16 %v12879_v33, %v12866_v61  ;;  %v20394_v22 = vpack.c.bf16 %v12878_v30, %v12865_v44  ;;  %v9793_v19 = vpop.f32.mrb[60].mxu1  ;;  %v18339_v33 = vld [vmem:[#allocation6 + $0x1870] ss:$52 sps:$4 sm:$0xff]  }
 0x3d9   :  { %21084 = vst [vmem:[#allocation56_spill] sm:$0xff] %v20390_v63  ;;  %v20396_v24 = vpack.c.bf16 %v12880_v45, %v12867_v60  ;;  %10553 = vmatpush1.bf16.msra.mxu1 %v18327_v18  ;;  %v16610_v37 = vadd.f32 %v9793_v19, %v20331_v40  ;;  %v10304_v14 = vpop.f32.mrb[68].mxu0  ;;  %v9795_v46 = vpop.f32.mrb[61].mxu1  ;;  %v18342_v45 = vld [vmem:[#allocation6 + $0x1878] ss:$52 sps:$4 sm:$0xff]  }
 0x3da   :  { %21085 = vst [vmem:[#allocation57_spill] sm:$0xff] %v20392_v12  ;;  %21086 = vst [vmem:[#allocation58_spill] sm:$0xff] %v20394_v22  ;;  %11064 = vmatpush1.bf16.msra.mxu0 %v18330_v28  ;;  %v16626_v49 = vadd.f32 %v10304_v14, %v20334_v5  ;;  %10554 = vmatprep.subr.bf16.mxu1 %v18335_v8  ;;  %v16611_v41 = vadd.f32 %v9795_v46, %v20337_v17  ;;  %v10306_v15 = vpop.f32.mrb[69].mxu0  ;;  %v9797_v44 = vpop.f32.mrb[62].mxu1  ;;  %v18350_v46 = vld [vmem:[#allocation6 + $0x18e4] ss:$52 sps:$4 sm:$0xff]  }
 0x3db   :  { %21087 = vst [vmem:[#allocation59_spill] sm:$0xff] %v20396_v24  ;;  %11065 = vmatprep.subr.bf16.mxu0 %v18338_v4  ;;  %v16627_v30 = vadd.f32 %v10306_v15, %v20341_v20  ;;  %v16612_v60 = vadd.f32 %v9797_v44, %v20331_v40  ;;  %v10308_v18 = vpop.f32.mrb[70].mxu0  ;;  %v9799_v25 = vpop.f32.mrb[63].mxu1  ;;  %v12890_v8 = vmax.f32 %v16610_v37, 0.0  ;;  %v18347_v4 = vld [vmem:[#allocation6 + $0x18dc] ss:$52 sps:$4 sm:$0xff]  }
 0x3dc   :  { %v16628_v35 = vadd.f32 %v10308_v18, %v20334_v5  ;;  %v16613_v61 = vadd.f32 %v9799_v25, %v20337_v17  ;;  %v10310_v28 = vpop.f32.mrb[71].mxu0  ;;  %v12892_v15 = vmax.f32 %v16626_v49, 0.0  ;;  %v12891_v12 = vmax.f32 %v16611_v41, 0.0  ;;  %v18356_v49 = vld [vmem:[#allocation6 + $0x194c] ss:$52 sps:$4 sm:$0xff]  }
 0x3dd   :  { %10555 = vmatpush1.bf16.msra.mxu1 %v18333_v43  ;;  %v12903_v19 = vmax.f32 %v16612_v60, 0.0  ;;  %v16629_v14 = vadd.f32 %v10310_v28, %v20341_v20  ;;  %v12893_v24 = vmax.f32 %v16627_v30, 0.0  ;;  %v18345_v43 = vld [vmem:[#allocation6 + $0x18d8] ss:$52 sps:$4 sm:$0xff]   ;;  %v18348_v60 = vld [vmem:[#allocation6 + $0x18e0] ss:$52 sps:$4 sm:$0xff]  }
 0x3de   :  { %11066 = vmatpush1.bf16.msra.mxu0 %v18336_v57  ;;  %v12905_v40 = vmax.f32 %v16628_v35, 0.0  ;;  %v12904_v44 = vmax.f32 %v16613_v61, 0.0  ;;  %10556 = vmatprep.subr.bf16.mxu1 %v18341_v62  ;;  %v18353_v20 = vld [vmem:[#allocation6 + $0x1944] ss:$52 sps:$4 sm:$0xff]   ;;  %v18351_v57 = vld [vmem:[#allocation6 + $0x1940] ss:$52 sps:$4 sm:$0xff]  }
 0x3df   :  { %v20406_v5 = vpack.c.bf16 %v12903_v19, %v12890_v8  ;;  %v12906_v17 = vmax.f32 %v16629_v14, 0.0  ;;  %11067 = vmatprep.subr.bf16.mxu0 %v18344_v48  ;;  %v18354_v62 = vld [vmem:[#allocation6 + $0x1948] ss:$52 sps:$4 sm:$0xff]   ;;  %v18359_v41 = vld [vmem:[#allocation6 + $0x19ac] ss:$52 sps:$4 sm:$0xff]  }
 0x3e0   :  { %v20408_v18 = vpack.c.bf16 %v12905_v40, %v12892_v15  ;;  %v20410_v37 = vpack.c.bf16 %v12904_v44, %v12891_v12  ;;  %v18362_v30 = vld [vmem:[#allocation6 + $0x19b4] ss:$52 sps:$4 sm:$0xff]   ;;  %v18360_v48 = vld [vmem:[#allocation6 + $0x19b0] ss:$52 sps:$4 sm:$0xff]   ;;  %v18366_v28 = vld [vmem:[#allocation6 + $0x1a18] ss:$52 sps:$4 sm:$0xff]  }
 0x3e1   :  { %21088 = vst [vmem:[#allocation60_spill] sm:$0xff] %v20406_v5  ;;  %v20412_v25 = vpack.c.bf16 %v12906_v17, %v12893_v24  ;;  %10557 = vmatpush1.bf16.msra.mxu1 %v18339_v33  ;;  %v18357_v12 = vld [vmem:[#allocation6 + $0x19a8] ss:$52 sps:$4 sm:$0xff]   ;;  %v18363_v24 = vld [vmem:[#allocation6 + $0x1a10] ss:$52 sps:$4 sm:$0xff]  }
 0x3e2   :  { %21089 = vst [vmem:[#allocation61_spill] sm:$0xff] %v20408_v18  ;;  %21090 = vst [vmem:[#allocation62_spill] sm:$0xff] %v20410_v37  ;;  %11068 = vmatpush1.bf16.msra.mxu0 %v18342_v45  ;;  %10558 = vmatprep.subr.bf16.mxu1 %v18347_v4  ;;  %v18365_v35 = vld [vmem:[#allocation6 + $0x1a14] ss:$52 sps:$4 sm:$0xff]   ;;  %v18368_v61 = vld [vmem:[#allocation6 + $0x1a1c] ss:$52 sps:$4 sm:$0xff]  }
 0x3e3   :  { %21091 = vst [vmem:[#allocation63_spill] sm:$0xff] %v20412_v25  ;;  %11069 = vmatprep.subr.bf16.mxu0 %v18350_v46  ;;  %v18371_v33 = vld [vmem:[#allocation6 + $0x1a7c] ss:$52 sps:$4 sm:$0xff]   ;;  %v18374_v45 = vld [vmem:[#allocation6 + $0x1a84] ss:$52 sps:$4 sm:$0xff]  }
 0x3e4   :  { %v18369_v8 = vld [vmem:[#allocation6 + $0x1a78] ss:$52 sps:$4 sm:$0xff]   ;;  %v18372_v19 = vld [vmem:[#allocation6 + $0x1a80] ss:$52 sps:$4 sm:$0xff]   ;;  %v18378_v15 = vld [vmem:[#allocation6 + $0x1ae8] ss:$52 sps:$4 sm:$0xff]  }
 0x3e5   :  { %10559 = vmatpush1.bf16.msra.mxu1 %v18345_v43  ;;  %v18377_v14 = vld [vmem:[#allocation6 + $0x1ae4] ss:$52 sps:$4 sm:$0xff]   ;;  %v18380_v4 = vld [vmem:[#allocation6 + $0x1aec] ss:$52 sps:$4 sm:$0xff]   ;;  %v18386_v44 = vld [vmem:[#allocation6 + $0x1b54] ss:$52 sps:$4 sm:$0xff]  }
 0x3e6   :  { %11070 = vmatpush1.bf16.msra.mxu0 %v18348_v60  ;;  %10560 = vmatprep.subr.bf16.mxu1 %v18353_v20  ;;  %v18375_v46 = vld [vmem:[#allocation6 + $0x1ae0] ss:$52 sps:$4 sm:$0xff]   ;;  %v18381_v17 = vld [vmem:[#allocation6 + $0x1b48] ss:$52 sps:$4 sm:$0xff]   ;;  %v18384_v43 = vld [vmem:[#allocation6 + $0x1b50] ss:$52 sps:$4 sm:$0xff]  }
 0x3e7   :  { %11071 = vmatprep.subr.bf16.mxu0 %v18356_v49  ;;  %v18383_v40 = vld [vmem:[#allocation6 + $0x1b4c] ss:$52 sps:$4 sm:$0xff]   ;;  %v18389_v60 = vld [vmem:[#allocation6 + $0x1bb4] ss:$52 sps:$4 sm:$0xff]   ;;  %v18392_v20 = vld [vmem:[#allocation6 + $0x1bbc] ss:$52 sps:$4 sm:$0xff]  }
 0x3e8   :  { %v18387_v49 = vld [vmem:[#allocation6 + $0x1bb0] ss:$52 sps:$4 sm:$0xff]   ;;  %v18813_v18 = vld [vmem:[#allocation6 + $0x10c8] ss:$52 sps:$4 sm:$0xff]  }
 0x3e9   :  { %10561 = vmatpush1.bf16.msra.mxu1 %v18351_v57  ;;  %v18390_v57 = vld [vmem:[#allocation6 + $0x1bb8] ss:$52 sps:$4 sm:$0xff]   ;;  %v18821_v25 = vld [vmem:[#allocation6 + $0x1134] ss:$52 sps:$4 sm:$0xff]  }
 0x3ea   :  { %11072 = vmatpush1.bf16.msra.mxu0 %v18354_v62  ;;  %10562 = vmatprep.subr.bf16.mxu1 %v18359_v41  ;;  %v18395_v62 = vld [vmem:[#allocation6 + $0x1c1c] ss:$52 sps:$4 sm:$0xff]   ;;  %v18398_v41 = vld [vmem:[#allocation6 + $0x1c24] ss:$52 sps:$4 sm:$0xff]  }
 0x3eb   :  { %11073 = vmatprep.subr.bf16.mxu0 %v18362_v30  ;;  %v18393_v30 = vld [vmem:[#allocation6 + $0x1c18] ss:$52 sps:$4 sm:$0xff]   ;;  %v21109_v37 = vld [vmem:[#allocation32_spill] sm:$0xff] }
 0x3ec   :  { %v18878_v5 = vld [vmem:[#allocation6 + $0x14e4] ss:$52 sps:$4 sm:$0xff]   ;;  %v18882_v63 = vld [vmem:[#allocation6 + $0x1548] ss:$52 sps:$4 sm:$0xff]  }
 0x3ed   :  { %10563 = vmatpush1.bf16.msra.mxu1 %v18357_v12  ;;  %v18396_v12 = vld [vmem:[#allocation6 + $0x1c20] ss:$52 sps:$4 sm:$0xff]  }
 0x3ee   :  { %11074 = vmatpush1.bf16.msra.mxu0 %v18360_v48  ;;  %10605 = vmatprep.subr.bf16.mxu1 %v18365_v35  ;;  %v18401_v48 = vld [vmem:[#allocation6 + $0x1c84] ss:$52 sps:$4 sm:$0xff]   ;;  %v18404_v35 = vld [vmem:[#allocation6 + $0x1c8c] ss:$52 sps:$4 sm:$0xff]  }
 0x3ef   :  { %11116 = vmatprep.subr.bf16.mxu0 %v18368_v61  ;;  %v18399_v61 = vld [vmem:[#allocation6 + $0x1c80] ss:$52 sps:$4 sm:$0xff]  }
 0x3f0   :  { %10565 = vmatmul.mubr.bf16.vlgmr.msra.gmra.mrb[64].mxu1 %v20040_v26  ;;  %v21110_v22 = vld [vmem:[#allocation20_spill] sm:$0xff] }
 0x3f1   :  { %11076 = vmatmul.mubr.bf16.vlgmr.msra.gmra.mrb[72].mxu0 %v20040_v26  ;;  %10574 = vmatprep.mubr.bf16.mxu1 %v20059_v6 }
 0x3f2   :  { %10606 = vmatpush1.bf16.msra.mxu1 %v18363_v24  ;;  %11085 = vmatprep.mubr.bf16.mxu0 %v20059_v6  ;;  %v18402_v24 = vld [vmem:[#allocation6 + $0x1c88] ss:$52 sps:$4 sm:$0xff]  }
 0x3f3   :  { %11117 = vmatpush1.bf16.msra.mxu0 %v18366_v28  ;;  %10607 = vmatprep.subr.bf16.mxu1 %v18371_v33  ;;  %v18407_v28 = vld [vmem:[#allocation6 + $0x1cec] ss:$52 sps:$4 sm:$0xff]   ;;  %v18410_v33 = vld [vmem:[#allocation6 + $0x1cf4] ss:$52 sps:$4 sm:$0xff]  }
 0x3f4   :  { %11118 = vmatprep.subr.bf16.mxu0 %v18374_v45  ;;  %v18405_v45 = vld [vmem:[#allocation6 + $0x1ce8] ss:$52 sps:$4 sm:$0xff]  }
 0x3f6   :  { %10608 = vmatpush1.bf16.msra.mxu1 %v18369_v8  ;;  %v18408_v8 = vld [vmem:[#allocation6 + $0x1cf0] ss:$52 sps:$4 sm:$0xff]  }
 0x3f7   :  { %11119 = vmatpush1.bf16.msra.mxu0 %v18372_v19  ;;  %10609 = vmatprep.subr.bf16.mxu1 %v18377_v14  ;;  %v18413_v19 = vld [vmem:[#allocation6 + $0x1d54] ss:$52 sps:$4 sm:$0xff]   ;;  %v18416_v14 = vld [vmem:[#allocation6 + $0x1d5c] ss:$52 sps:$4 sm:$0xff]  }
 0x3f8   :  { %10575 = vmatmul.mubr.bf16.gmra.mrb[68].mxu1 %v20056_v29  ;;  %11120 = vmatprep.subr.bf16.mxu0 %v18380_v4  ;;  %v18411_v4 = vld [vmem:[#allocation6 + $0x1d50] ss:$52 sps:$4 sm:$0xff]  }
 0x3f9   :  { %11086 = vmatmul.mubr.bf16.gmra.mrb[76].mxu0 %v20056_v29  ;;  %10584 = vmatprep.mubr.bf16.mxu1 %v20085_v50 }
 0x3fa   :  { %10610 = vmatpush1.bf16.msra.mxu1 %v18375_v46  ;;  %11095 = vmatprep.mubr.bf16.mxu0 %v20085_v50  ;;  %v18414_v46 = vld [vmem:[#allocation6 + $0x1d58] ss:$52 sps:$4 sm:$0xff]  }
 0x3fb   :  { %11121 = vmatpush1.bf16.msra.mxu0 %v18378_v15  ;;  %10611 = vmatprep.subr.bf16.mxu1 %v18383_v40  ;;  %v18419_v15 = vld [vmem:[#allocation6 + $0x1dbc] ss:$52 sps:$4 sm:$0xff]   ;;  %v18422_v40 = vld [vmem:[#allocation6 + $0x1dc4] ss:$52 sps:$4 sm:$0xff]  }
 0x3fc   :  { %11122 = vmatprep.subr.bf16.mxu0 %v18386_v44  ;;  %v18417_v44 = vld [vmem:[#allocation6 + $0x1db8] ss:$52 sps:$4 sm:$0xff]  }
 0x3fe   :  { %10612 = vmatpush1.bf16.msra.mxu1 %v18381_v17  ;;  %v18420_v17 = vld [vmem:[#allocation6 + $0x1dc0] ss:$52 sps:$4 sm:$0xff]  }
 0x3ff   :  { %11123 = vmatpush1.bf16.msra.mxu0 %v18384_v43  ;;  %10613 = vmatprep.subr.bf16.mxu1 %v18389_v60  ;;  %v18425_v43 = vld [vmem:[#allocation6 + $0x1e24] ss:$52 sps:$4 sm:$0xff]   ;;  %v18428_v60 = vld [vmem:[#allocation6 + $0x1e2c] ss:$52 sps:$4 sm:$0xff]  }
 0x400   :  { %10585 = vmatmul.mubr.bf16.gmra.mrb[72].mxu1 %v20082_v34  ;;  %11124 = vmatprep.subr.bf16.mxu0 %v18392_v20  ;;  %v18423_v20 = vld [vmem:[#allocation6 + $0x1e20] ss:$52 sps:$4 sm:$0xff]  }
 0x401   :  { %11096 = vmatmul.mubr.bf16.gmra.mrb[80].mxu0 %v20082_v34  ;;  %10594 = vmatprep.mubr.bf16.mxu1 %v20110_v10 }
 0x402   :  { %10614 = vmatpush1.bf16.msra.mxu1 %v18387_v49  ;;  %11105 = vmatprep.mubr.bf16.mxu0 %v20110_v10  ;;  %v18426_v49 = vld [vmem:[#allocation6 + $0x1e28] ss:$52 sps:$4 sm:$0xff]  }
 0x403   :  { %11125 = vmatpush1.bf16.msra.mxu0 %v18390_v57  ;;  %10615 = vmatprep.subr.bf16.mxu1 %v18395_v62  ;;  %v18431_v57 = vld [vmem:[#allocation6 + $0x1e8c] ss:$52 sps:$4 sm:$0xff]   ;;  %v18434_v62 = vld [vmem:[#allocation6 + $0x1e94] ss:$52 sps:$4 sm:$0xff]  }
 0x404   :  { %11126 = vmatprep.subr.bf16.mxu0 %v18398_v41  ;;  %v18429_v41 = vld [vmem:[#allocation6 + $0x1e88] ss:$52 sps:$4 sm:$0xff]  }
 0x406   :  { %10616 = vmatpush1.bf16.msra.mxu1 %v18393_v30  ;;  %v18432_v30 = vld [vmem:[#allocation6 + $0x1e90] ss:$52 sps:$4 sm:$0xff]  }
 0x407   :  { %11127 = vmatpush1.bf16.msra.mxu0 %v18396_v12  ;;  %10617 = vmatprep.subr.bf16.mxu1 %v18401_v48  ;;  %v18437_v12 = vld [vmem:[#allocation6 + $0x1ef4] ss:$52 sps:$4 sm:$0xff]   ;;  %v18440_v48 = vld [vmem:[#allocation6 + $0x1efc] ss:$52 sps:$4 sm:$0xff]  }
 0x408   :  { %10595 = vmatmul.mubr.bf16.gmra.mrb[76].mxu1 %v20107_v36  ;;  %11128 = vmatprep.subr.bf16.mxu0 %v18404_v35  ;;  %v18435_v35 = vld [vmem:[#allocation6 + $0x1ef0] ss:$52 sps:$4 sm:$0xff]  }
 0x409   :  { %11106 = vmatmul.mubr.bf16.gmra.mrb[84].mxu0 %v20107_v36  ;;  %10637 = vmatprep.mubr.bf16.mxu1 %v20100_v52 }
 0x40a   :  { %10618 = vmatpush1.bf16.msra.mxu1 %v18399_v61  ;;  %11148 = vmatprep.mubr.bf16.mxu0 %v20100_v52  ;;  %v18438_v61 = vld [vmem:[#allocation6 + $0x1ef8] ss:$52 sps:$4 sm:$0xff]  }
 0x40b   :  { %11129 = vmatpush1.bf16.msra.mxu0 %v18402_v24  ;;  %10619 = vmatprep.subr.bf16.mxu1 %v18407_v28  ;;  %v18443_v24 = vld [vmem:[#allocation6 + $0x1f5c] ss:$52 sps:$4 sm:$0xff]   ;;  %v18446_v28 = vld [vmem:[#allocation6 + $0x1f64] ss:$52 sps:$4 sm:$0xff]  }
 0x40c   :  { %11130 = vmatprep.subr.bf16.mxu0 %v18410_v33  ;;  %v18441_v33 = vld [vmem:[#allocation6 + $0x1f58] ss:$52 sps:$4 sm:$0xff]  }
 0x40e   :  { %10620 = vmatpush1.bf16.msra.mxu1 %v18405_v45  ;;  %v18444_v45 = vld [vmem:[#allocation6 + $0x1f60] ss:$52 sps:$4 sm:$0xff]  }
 0x40f   :  { %11131 = vmatpush1.bf16.msra.mxu0 %v18408_v8  ;;  %10621 = vmatprep.subr.bf16.mxu1 %v18413_v19  ;;  %v18449_v8 = vld [vmem:[#allocation6 + $0x1fc4] ss:$52 sps:$4 sm:$0xff]   ;;  %v18452_v19 = vld [vmem:[#allocation6 + $0x1fcc] ss:$52 sps:$4 sm:$0xff]  }
 0x410   :  { %11132 = vmatprep.subr.bf16.mxu0 %v18416_v14  ;;  %v18447_v14 = vld [vmem:[#allocation6 + $0x1fc0] ss:$52 sps:$4 sm:$0xff]  }
 0x412   :  { %10622 = vmatpush1.bf16.msra.mxu1 %v18411_v4  ;;  %v18450_v4 = vld [vmem:[#allocation6 + $0x1fc8] ss:$52 sps:$4 sm:$0xff]  }
 0x413   :  { %11133 = vmatpush1.bf16.msra.mxu0 %v18414_v46  ;;  %10623 = vmatprep.subr.bf16.mxu1 %v18419_v15  ;;  %v18455_v46 = vld [vmem:[#allocation6 + $0x202c] ss:$52 sps:$4 sm:$0xff]   ;;  %v18458_v15 = vld [vmem:[#allocation6 + $0x2034] ss:$52 sps:$4 sm:$0xff]  }
 0x414   :  { %11134 = vmatprep.subr.bf16.mxu0 %v18422_v40  ;;  %v18453_v40 = vld [vmem:[#allocation6 + $0x2028] ss:$52 sps:$4 sm:$0xff]  }
 0x416   :  { %10624 = vmatpush1.bf16.msra.mxu1 %v18417_v44  ;;  %v18456_v44 = vld [vmem:[#allocation6 + $0x2030] ss:$52 sps:$4 sm:$0xff]  }
 0x417   :  { %11135 = vmatpush1.bf16.msra.mxu0 %v18420_v17  ;;  %10625 = vmatprep.subr.bf16.mxu1 %v18425_v43  ;;  %v18461_v17 = vld [vmem:[#allocation6 + $0x2094] ss:$52 sps:$4 sm:$0xff]   ;;  %v18464_v43 = vld [vmem:[#allocation6 + $0x209c] ss:$52 sps:$4 sm:$0xff]  }
 0x418   :  { %11136 = vmatprep.subr.bf16.mxu0 %v18428_v60  ;;  %v18459_v60 = vld [vmem:[#allocation6 + $0x2090] ss:$52 sps:$4 sm:$0xff]  }
 0x41a   :  { %10626 = vmatpush1.bf16.msra.mxu1 %v18423_v20  ;;  %v18462_v20 = vld [vmem:[#allocation6 + $0x2098] ss:$52 sps:$4 sm:$0xff]  }
 0x41b   :  { %11137 = vmatpush1.bf16.msra.mxu0 %v18426_v49  ;;  %10627 = vmatprep.subr.bf16.mxu1 %v18431_v57  ;;  %v18467_v49 = vld [vmem:[#allocation6 + $0x20fc] ss:$52 sps:$4 sm:$0xff]   ;;  %v18470_v57 = vld [vmem:[#allocation6 + $0x2104] ss:$52 sps:$4 sm:$0xff]  }
 0x41c   :  { %11138 = vmatprep.subr.bf16.mxu0 %v18434_v62  ;;  %v18465_v62 = vld [vmem:[#allocation6 + $0x20f8] ss:$52 sps:$4 sm:$0xff]  }
 0x41e   :  { %10628 = vmatpush1.bf16.msra.mxu1 %v18429_v41  ;;  %v18468_v41 = vld [vmem:[#allocation6 + $0x2100] ss:$52 sps:$4 sm:$0xff]  }
 0x41f   :  { %11139 = vmatpush1.bf16.msra.mxu0 %v18432_v30  ;;  %10629 = vmatprep.subr.bf16.mxu1 %v18437_v12  ;;  %v18473_v30 = vld [vmem:[#allocation6 + $0x2164] ss:$52 sps:$4 sm:$0xff]   ;;  %v18476_v12 = vld [vmem:[#allocation6 + $0x216c] ss:$52 sps:$4 sm:$0xff]  }
 0x420   :  { %11140 = vmatprep.subr.bf16.mxu0 %v18440_v48  ;;  %v18471_v48 = vld [vmem:[#allocation6 + $0x2160] ss:$52 sps:$4 sm:$0xff]  }
 0x422   :  { %10630 = vmatpush1.bf16.msra.mxu1 %v18435_v35  ;;  %v18474_v35 = vld [vmem:[#allocation6 + $0x2168] ss:$52 sps:$4 sm:$0xff]  }
 0x423   :  { %11141 = vmatpush1.bf16.msra.mxu0 %v18438_v61  ;;  %10631 = vmatprep.subr.bf16.mxu1 %v18443_v24  ;;  %v18479_v61 = vld [vmem:[#allocation6 + $0x21cc] ss:$52 sps:$4 sm:$0xff]   ;;  %v18482_v24 = vld [vmem:[#allocation6 + $0x21d4] ss:$52 sps:$4 sm:$0xff]  }
 0x424   :  { %11142 = vmatprep.subr.bf16.mxu0 %v18446_v28  ;;  %v18477_v28 = vld [vmem:[#allocation6 + $0x21c8] ss:$52 sps:$4 sm:$0xff]  }
 0x426   :  { %10632 = vmatpush1.bf16.msra.mxu1 %v18441_v33  ;;  %v18480_v33 = vld [vmem:[#allocation6 + $0x21d0] ss:$52 sps:$4 sm:$0xff]  }
 0x427   :  { %11143 = vmatpush1.bf16.msra.mxu0 %v18444_v45  ;;  %10633 = vmatprep.subr.bf16.mxu1 %v18449_v8  ;;  %v18485_v45 = vld [vmem:[#allocation6 + $0x2234] ss:$52 sps:$4 sm:$0xff]   ;;  %v18488_v8 = vld [vmem:[#allocation6 + $0x223c] ss:$52 sps:$4 sm:$0xff]  }
 0x428   :  { %11144 = vmatprep.subr.bf16.mxu0 %v18452_v19  ;;  %v18483_v19 = vld [vmem:[#allocation6 + $0x2230] ss:$52 sps:$4 sm:$0xff]  }
 0x42a   :  { %10634 = vmatpush1.bf16.msra.mxu1 %v18447_v14  ;;  %v18486_v14 = vld [vmem:[#allocation6 + $0x2238] ss:$52 sps:$4 sm:$0xff]  }
 0x42b   :  { %11145 = vmatpush1.bf16.msra.mxu0 %v18450_v4  ;;  %10635 = vmatprep.subr.bf16.mxu1 %v18455_v46  ;;  %v18491_v4 = vld [vmem:[#allocation6 + $0x229c] ss:$52 sps:$4 sm:$0xff]   ;;  %v18494_v46 = vld [vmem:[#allocation6 + $0x22a4] ss:$52 sps:$4 sm:$0xff]  }
 0x42c   :  { %11146 = vmatprep.subr.bf16.mxu0 %v18458_v15  ;;  %v18489_v15 = vld [vmem:[#allocation6 + $0x2298] ss:$52 sps:$4 sm:$0xff]  }
 0x42e   :  { %10636 = vmatpush1.bf16.msra.mxu1 %v18453_v40  ;;  %v18492_v40 = vld [vmem:[#allocation6 + $0x22a0] ss:$52 sps:$4 sm:$0xff]  }
 0x42f   :  { %11147 = vmatpush1.bf16.msra.mxu0 %v18456_v44  ;;  %10678 = vmatprep.subr.bf16.mxu1 %v18461_v17  ;;  %v18497_v44 = vld [vmem:[#allocation6 + $0x2304] ss:$52 sps:$4 sm:$0xff]   ;;  %v18500_v17 = vld [vmem:[#allocation6 + $0x230c] ss:$52 sps:$4 sm:$0xff]  }
 0x430   :  { %11189 = vmatprep.subr.bf16.mxu0 %v18464_v43  ;;  %v18495_v43 = vld [vmem:[#allocation6 + $0x2300] ss:$52 sps:$4 sm:$0xff]  }
 0x431   :  { %10638 = vmatmul.mubr.bf16.vlgmr.msra.gmra.mrb[64].mxu1 %v20094_v11 }
 0x432   :  { %11149 = vmatmul.mubr.bf16.vlgmr.msra.gmra.mrb[72].mxu0 %v20094_v11  ;;  %10647 = vmatprep.mubr.bf16.mxu1 %v20124_v2 }
 0x433   :  { %10679 = vmatpush1.bf16.msra.mxu1 %v18459_v60  ;;  %11158 = vmatprep.mubr.bf16.mxu0 %v20124_v2  ;;  %v18498_v60 = vld [vmem:[#allocation6 + $0x2308] ss:$52 sps:$4 sm:$0xff]  }
 0x434   :  { %11190 = vmatpush1.bf16.msra.mxu0 %v18462_v20  ;;  %10680 = vmatprep.subr.bf16.mxu1 %v18467_v49  ;;  %v18503_v20 = vld [vmem:[#allocation6 + $0x236c] ss:$52 sps:$4 sm:$0xff]   ;;  %v18506_v49 = vld [vmem:[#allocation6 + $0x2374] ss:$52 sps:$4 sm:$0xff]  }
 0x435   :  { %11191 = vmatprep.subr.bf16.mxu0 %v18470_v57  ;;  %v18501_v57 = vld [vmem:[#allocation6 + $0x2368] ss:$52 sps:$4 sm:$0xff]  }
 0x437   :  { %10681 = vmatpush1.bf16.msra.mxu1 %v18465_v62  ;;  %v18504_v62 = vld [vmem:[#allocation6 + $0x2370] ss:$52 sps:$4 sm:$0xff]  }
 0x438   :  { %11192 = vmatpush1.bf16.msra.mxu0 %v18468_v41  ;;  %10682 = vmatprep.subr.bf16.mxu1 %v18473_v30  ;;  %v18509_v41 = vld [vmem:[#allocation6 + $0x23d4] ss:$52 sps:$4 sm:$0xff]   ;;  %v18512_v30 = vld [vmem:[#allocation6 + $0x23dc] ss:$52 sps:$4 sm:$0xff]  }
 0x439   :  { %10648 = vmatmul.mubr.bf16.gmra.mrb[68].mxu1 %v20122_v9  ;;  %11193 = vmatprep.subr.bf16.mxu0 %v18476_v12  ;;  %v18507_v12 = vld [vmem:[#allocation6 + $0x23d0] ss:$52 sps:$4 sm:$0xff]  }
 0x43a   :  { %11159 = vmatmul.mubr.bf16.gmra.mrb[76].mxu0 %v20122_v9  ;;  %10657 = vmatprep.mubr.bf16.mxu1 %v20144_v54 }
 0x43b   :  { %10683 = vmatpush1.bf16.msra.mxu1 %v18471_v48  ;;  %11168 = vmatprep.mubr.bf16.mxu0 %v20144_v54  ;;  %v18510_v48 = vld [vmem:[#allocation6 + $0x23d8] ss:$52 sps:$4 sm:$0xff]  }
 0x43c   :  { %11194 = vmatpush1.bf16.msra.mxu0 %v18474_v35  ;;  %10684 = vmatprep.subr.bf16.mxu1 %v18479_v61  ;;  %v18515_v35 = vld [vmem:[#allocation6 + $0x243c] ss:$52 sps:$4 sm:$0xff]   ;;  %v18518_v61 = vld [vmem:[#allocation6 + $0x2444] ss:$52 sps:$4 sm:$0xff]  }
 0x43d   :  { %11195 = vmatprep.subr.bf16.mxu0 %v18482_v24  ;;  %v18513_v24 = vld [vmem:[#allocation6 + $0x2438] ss:$52 sps:$4 sm:$0xff]  }
 0x43f   :  { %10685 = vmatpush1.bf16.msra.mxu1 %v18477_v28  ;;  %v18516_v28 = vld [vmem:[#allocation6 + $0x2440] ss:$52 sps:$4 sm:$0xff]  }
 0x440   :  { %11196 = vmatpush1.bf16.msra.mxu0 %v18480_v33  ;;  %10686 = vmatprep.subr.bf16.mxu1 %v18485_v45  ;;  %v18521_v33 = vld [vmem:[#allocation6 + $0x24a4] ss:$52 sps:$4 sm:$0xff]   ;;  %v18524_v45 = vld [vmem:[#allocation6 + $0x24ac] ss:$52 sps:$4 sm:$0xff]  }
 0x441   :  { %10658 = vmatmul.mubr.bf16.gmra.mrb[72].mxu1 %v20142_v21  ;;  %11197 = vmatprep.subr.bf16.mxu0 %v18488_v8  ;;  %v18519_v8 = vld [vmem:[#allocation6 + $0x24a0] ss:$52 sps:$4 sm:$0xff]  }
 0x442   :  { %11169 = vmatmul.mubr.bf16.gmra.mrb[80].mxu0 %v20142_v21  ;;  %10667 = vmatprep.mubr.bf16.mxu1 %v20168_v42 }
 0x443   :  { %10687 = vmatpush1.bf16.msra.mxu1 %v18483_v19  ;;  %11178 = vmatprep.mubr.bf16.mxu0 %v20168_v42  ;;  %v18522_v19 = vld [vmem:[#allocation6 + $0x24a8] ss:$52 sps:$4 sm:$0xff]  }
 0x444   :  { %11198 = vmatpush1.bf16.msra.mxu0 %v18486_v14  ;;  %10688 = vmatprep.subr.bf16.mxu1 %v18491_v4  ;;  %v18527_v14 = vld [vmem:[#allocation6 + $0x250c] ss:$52 sps:$4 sm:$0xff]   ;;  %v18530_v4 = vld [vmem:[#allocation6 + $0x2514] ss:$52 sps:$4 sm:$0xff]  }
 0x445   :  { %11199 = vmatprep.subr.bf16.mxu0 %v18494_v46  ;;  %v18525_v46 = vld [vmem:[#allocation6 + $0x2508] ss:$52 sps:$4 sm:$0xff]  }
 0x447   :  { %10689 = vmatpush1.bf16.msra.mxu1 %v18489_v15  ;;  %v18528_v15 = vld [vmem:[#allocation6 + $0x2510] ss:$52 sps:$4 sm:$0xff]  }
 0x448   :  { %11200 = vmatpush1.bf16.msra.mxu0 %v18492_v40  ;;  %10690 = vmatprep.subr.bf16.mxu1 %v18497_v44  ;;  %v18533_v40 = vld [vmem:[#allocation6 + $0x2574] ss:$52 sps:$4 sm:$0xff]   ;;  %v18536_v44 = vld [vmem:[#allocation6 + $0x257c] ss:$52 sps:$4 sm:$0xff]  }
 0x449   :  { %10668 = vmatmul.mubr.bf16.gmra.mrb[76].mxu1 %v20166_v7  ;;  %11201 = vmatprep.subr.bf16.mxu0 %v18500_v17  ;;  %v18531_v17 = vld [vmem:[#allocation6 + $0x2570] ss:$52 sps:$4 sm:$0xff]  }
 0x44a   :  { %11179 = vmatmul.mubr.bf16.gmra.mrb[84].mxu0 %v20166_v7  ;;  %10710 = vmatprep.mubr.bf16.mxu1 %v20130_v1 }
 0x44b   :  { %10691 = vmatpush1.bf16.msra.mxu1 %v18495_v43  ;;  %11221 = vmatprep.mubr.bf16.mxu0 %v20130_v1  ;;  %v18534_v43 = vld [vmem:[#allocation6 + $0x2578] ss:$52 sps:$4 sm:$0xff]  }
 0x44c   :  { %11202 = vmatpush1.bf16.msra.mxu0 %v18498_v60  ;;  %10692 = vmatprep.subr.bf16.mxu1 %v18503_v20  ;;  %v18539_v60 = vld [vmem:[#allocation6 + $0x25dc] ss:$52 sps:$4 sm:$0xff]   ;;  %v18542_v20 = vld [vmem:[#allocation6 + $0x25e4] ss:$52 sps:$4 sm:$0xff]  }
 0x44d   :  { %11203 = vmatprep.subr.bf16.mxu0 %v18506_v49  ;;  %v18537_v49 = vld [vmem:[#allocation6 + $0x25d8] ss:$52 sps:$4 sm:$0xff]  }
 0x44f   :  { %10693 = vmatpush1.bf16.msra.mxu1 %v18501_v57  ;;  %v18540_v57 = vld [vmem:[#allocation6 + $0x25e0] ss:$52 sps:$4 sm:$0xff]  }
 0x450   :  { %11204 = vmatpush1.bf16.msra.mxu0 %v18504_v62  ;;  %10694 = vmatprep.subr.bf16.mxu1 %v18509_v41  ;;  %v18545_v62 = vld [vmem:[#allocation6 + $0x2644] ss:$52 sps:$4 sm:$0xff]   ;;  %v18548_v41 = vld [vmem:[#allocation6 + $0x264c] ss:$52 sps:$4 sm:$0xff]  }
 0x451   :  { %11205 = vmatprep.subr.bf16.mxu0 %v18512_v30  ;;  %v18543_v30 = vld [vmem:[#allocation6 + $0x2640] ss:$52 sps:$4 sm:$0xff]  }
 0x453   :  { %10695 = vmatpush1.bf16.msra.mxu1 %v18507_v12  ;;  %v18546_v12 = vld [vmem:[#allocation6 + $0x2648] ss:$52 sps:$4 sm:$0xff]  }
 0x454   :  { %11206 = vmatpush1.bf16.msra.mxu0 %v18510_v48  ;;  %10696 = vmatprep.subr.bf16.mxu1 %v18515_v35  ;;  %v18551_v48 = vld [vmem:[#allocation6 + $0x26ac] ss:$52 sps:$4 sm:$0xff]   ;;  %v18554_v35 = vld [vmem:[#allocation6 + $0x26b4] ss:$52 sps:$4 sm:$0xff]  }
 0x455   :  { %11207 = vmatprep.subr.bf16.mxu0 %v18518_v61  ;;  %v18549_v61 = vld [vmem:[#allocation6 + $0x26a8] ss:$52 sps:$4 sm:$0xff]  }
 0x457   :  { %10697 = vmatpush1.bf16.msra.mxu1 %v18513_v24  ;;  %v18552_v24 = vld [vmem:[#allocation6 + $0x26b0] ss:$52 sps:$4 sm:$0xff]  }
 0x458   :  { %11208 = vmatpush1.bf16.msra.mxu0 %v18516_v28  ;;  %10698 = vmatprep.subr.bf16.mxu1 %v18521_v33  ;;  %v18557_v28 = vld [vmem:[#allocation6 + $0x2714] ss:$52 sps:$4 sm:$0xff]   ;;  %v18560_v33 = vld [vmem:[#allocation6 + $0x271c] ss:$52 sps:$4 sm:$0xff]  }
 0x459   :  { %11209 = vmatprep.subr.bf16.mxu0 %v18524_v45  ;;  %v18555_v45 = vld [vmem:[#allocation6 + $0x2710] ss:$52 sps:$4 sm:$0xff]  }
 0x45b   :  { %10699 = vmatpush1.bf16.msra.mxu1 %v18519_v8  ;;  %v18558_v8 = vld [vmem:[#allocation6 + $0x2718] ss:$52 sps:$4 sm:$0xff]  }
 0x45c   :  { %11210 = vmatpush1.bf16.msra.mxu0 %v18522_v19  ;;  %10700 = vmatprep.subr.bf16.mxu1 %v18527_v14  ;;  %v18563_v19 = vld [vmem:[#allocation6 + $0x277c] ss:$52 sps:$4 sm:$0xff]   ;;  %v18566_v14 = vld [vmem:[#allocation6 + $0x2784] ss:$52 sps:$4 sm:$0xff]  }
 0x45d   :  { %11211 = vmatprep.subr.bf16.mxu0 %v18530_v4  ;;  %v18561_v4 = vld [vmem:[#allocation6 + $0x2778] ss:$52 sps:$4 sm:$0xff]  }
 0x45f   :  { %10701 = vmatpush1.bf16.msra.mxu1 %v18525_v46  ;;  %v18564_v46 = vld [vmem:[#allocation6 + $0x2780] ss:$52 sps:$4 sm:$0xff]  }
 0x460   :  { %11212 = vmatpush1.bf16.msra.mxu0 %v18528_v15  ;;  %10702 = vmatprep.subr.bf16.mxu1 %v18533_v40  ;;  %v18569_v15 = vld [vmem:[#allocation6 + $0x24] ss:$52 sps:$4 sm:$0xff]   ;;  %v18572_v40 = vld [vmem:[#allocation6 + $0x2c] ss:$52 sps:$4 sm:$0xff]  }
 0x461   :  { %11213 = vmatprep.subr.bf16.mxu0 %v18536_v44  ;;  %v18567_v44 = vld [vmem:[#allocation6 + $0x20] ss:$52 sps:$4 sm:$0xff]  }
 0x463   :  { %10703 = vmatpush1.bf16.msra.mxu1 %v18531_v17  ;;  %v18570_v17 = vld [vmem:[#allocation6 + $0x28] ss:$52 sps:$4 sm:$0xff]  }
 0x464   :  { %11214 = vmatpush1.bf16.msra.mxu0 %v18534_v43  ;;  %10704 = vmatprep.subr.bf16.mxu1 %v18539_v60  ;;  %v18575_v43 = vld [vmem:[#allocation6 + $0x8c] ss:$52 sps:$4 sm:$0xff]   ;;  %v18578_v60 = vld [vmem:[#allocation6 + $0x94] ss:$52 sps:$4 sm:$0xff]  }
 0x465   :  { %11215 = vmatprep.subr.bf16.mxu0 %v18542_v20  ;;  %v18573_v20 = vld [vmem:[#allocation6 + $0x88] ss:$52 sps:$4 sm:$0xff]  }
 0x467   :  { %10705 = vmatpush1.bf16.msra.mxu1 %v18537_v49  ;;  %v18576_v49 = vld [vmem:[#allocation6 + $0x90] ss:$52 sps:$4 sm:$0xff]  }
 0x468   :  { %11216 = vmatpush1.bf16.msra.mxu0 %v18540_v57  ;;  %10706 = vmatprep.subr.bf16.mxu1 %v18545_v62  ;;  %v18581_v57 = vld [vmem:[#allocation6 + $0xf4] ss:$52 sps:$4 sm:$0xff]   ;;  %v18584_v62 = vld [vmem:[#allocation6 + $0xfc] ss:$52 sps:$4 sm:$0xff]  }
 0x469   :  { %11217 = vmatprep.subr.bf16.mxu0 %v18548_v41  ;;  %v18579_v41 = vld [vmem:[#allocation6 + $0xf0] ss:$52 sps:$4 sm:$0xff]  }
 0x46b   :  { %10707 = vmatpush1.bf16.msra.mxu1 %v18543_v30  ;;  %v18582_v30 = vld [vmem:[#allocation6 + $0xf8] ss:$52 sps:$4 sm:$0xff]  }
 0x46c   :  { %11218 = vmatpush1.bf16.msra.mxu0 %v18546_v12  ;;  %10708 = vmatprep.subr.bf16.mxu1 %v18551_v48  ;;  %v18587_v12 = vld [vmem:[#allocation6 + $0x15c] ss:$52 sps:$4 sm:$0xff]   ;;  %v18590_v48 = vld [vmem:[#allocation6 + $0x164] ss:$52 sps:$4 sm:$0xff]  }
 0x46d   :  { %11219 = vmatprep.subr.bf16.mxu0 %v18554_v35  ;;  %v18585_v35 = vld [vmem:[#allocation6 + $0x158] ss:$52 sps:$4 sm:$0xff]  }
 0x46f   :  { %10709 = vmatpush1.bf16.msra.mxu1 %v18549_v61  ;;  %v18588_v61 = vld [vmem:[#allocation6 + $0x160] ss:$52 sps:$4 sm:$0xff]  }
 0x470   :  { %11220 = vmatpush1.bf16.msra.mxu0 %v18552_v24  ;;  %10751 = vmatprep.subr.bf16.mxu1 %v18557_v28  ;;  %v18593_v24 = vld [vmem:[#allocation6 + $0x1c4] ss:$52 sps:$4 sm:$0xff]   ;;  %v18596_v28 = vld [vmem:[#allocation6 + $0x1cc] ss:$52 sps:$4 sm:$0xff]  }
 0x471   :  { %11262 = vmatprep.subr.bf16.mxu0 %v18560_v33  ;;  %v18591_v33 = vld [vmem:[#allocation6 + $0x1c0] ss:$52 sps:$4 sm:$0xff]  }
 0x472   :  { %10711 = vmatmul.mubr.bf16.vlgmr.msra.gmra.mrb[64].mxu1 %v20127_v58 }
 0x473   :  { %11222 = vmatmul.mubr.bf16.vlgmr.msra.gmra.mrb[72].mxu0 %v20127_v58  ;;  %10720 = vmatprep.mubr.bf16.mxu1 %v20150_v27 }
 0x474   :  { %10752 = vmatpush1.bf16.msra.mxu1 %v18555_v45  ;;  %11231 = vmatprep.mubr.bf16.mxu0 %v20150_v27  ;;  %v18594_v45 = vld [vmem:[#allocation6 + $0x1c8] ss:$52 sps:$4 sm:$0xff]  }
 0x475   :  { %11263 = vmatpush1.bf16.msra.mxu0 %v18558_v8  ;;  %10753 = vmatprep.subr.bf16.mxu1 %v18563_v19  ;;  %v18599_v8 = vld [vmem:[#allocation6 + $0x22c] ss:$52 sps:$4 sm:$0xff]   ;;  %v18602_v19 = vld [vmem:[#allocation6 + $0x234] ss:$52 sps:$4 sm:$0xff]  }
 0x476   :  { %11264 = vmatprep.subr.bf16.mxu0 %v18566_v14  ;;  %v18597_v14 = vld [vmem:[#allocation6 + $0x228] ss:$52 sps:$4 sm:$0xff]  }
 0x478   :  { %10754 = vmatpush1.bf16.msra.mxu1 %v18561_v4  ;;  %v18600_v4 = vld [vmem:[#allocation6 + $0x230] ss:$52 sps:$4 sm:$0xff]  }
 0x479   :  { %11265 = vmatpush1.bf16.msra.mxu0 %v18564_v46  ;;  %11335 = vmatprep.subr.bf16.mxu1 %v18569_v15  ;;  %v18605_v46 = vld [vmem:[#allocation6 + $0x294] ss:$52 sps:$4 sm:$0xff]   ;;  %v18608_v15 = vld [vmem:[#allocation6 + $0x29c] ss:$52 sps:$4 sm:$0xff]  }
 0x47a   :  { %10721 = vmatmul.mubr.bf16.gmra.mrb[68].mxu1 %v20147_v56  ;;  %11846 = vmatprep.subr.bf16.mxu0 %v18572_v40  ;;  %v18603_v40 = vld [vmem:[#allocation6 + $0x290] ss:$52 sps:$4 sm:$0xff]  }
 0x47b   :  { %11232 = vmatmul.mubr.bf16.gmra.mrb[76].mxu0 %v20147_v56  ;;  %10730 = vmatprep.mubr.bf16.mxu1 %v20174_v32 }
 0x47c   :  { %11241 = vmatprep.mubr.bf16.mxu0 %v20174_v32 }
 0x482   :  { %10731 = vmatmul.mubr.bf16.gmra.mrb[72].mxu1 %v20171_v3 }
 0x483   :  { %11242 = vmatmul.mubr.bf16.gmra.mrb[80].mxu0 %v20171_v3  ;;  %10740 = vmatprep.mubr.bf16.mxu1 %v20193_v39 }
 0x484   :  { %11251 = vmatprep.mubr.bf16.mxu0 %v20193_v39 }
 0x48a   :  { %10741 = vmatmul.mubr.bf16.gmra.mrb[76].mxu1 %v20190_v47 }
 0x48b   :  { %11252 = vmatmul.mubr.bf16.gmra.mrb[84].mxu0 %v20190_v47  ;;  %10783 = vmatprep.mubr.bf16.mxu1 %v21061_v16 }
 0x48c   :  { %11294 = vmatprep.mubr.bf16.mxu0 %v21061_v16 }
 0x492   :  { %15876 = vmatmul.mubr.msk.bf16.vlgmr.msra.gmra.mrb[64].mxu1 %vm9278_vm2, %v20188_v0 }
 0x493   :  { %15880 = vmatmul.mubr.msk.bf16.vlgmr.msra.gmra.mrb[72].mxu0 %vm9278_vm2, %v20188_v0  ;;  %11336 = vmatpush1.bf16.msra.mxu1 %v18567_v44  ;;  %v18606_v44 = vld [vmem:[#allocation6 + $0x298] ss:$52 sps:$4 sm:$0xff]  }
 0x494   :  { %11847 = vmatpush1.bf16.msra.mxu0 %v18570_v17  ;;  %11337 = vmatprep.subr.bf16.mxu1 %v18575_v43  ;;  %v18611_v17 = vld [vmem:[#allocation6 + $0x2fc] ss:$52 sps:$4 sm:$0xff]   ;;  %v18614_v43 = vld [vmem:[#allocation6 + $0x304] ss:$52 sps:$4 sm:$0xff]  }
 0x495   :  { %11848 = vmatprep.subr.bf16.mxu0 %v18578_v60  ;;  %10793 = vmatprep.mubr.bf16.mxu1 %v21061_v16  ;;  %v18609_v60 = vld [vmem:[#allocation6 + $0x2f8] ss:$52 sps:$4 sm:$0xff]  }
 0x496   :  { %11304 = vmatprep.mubr.bf16.mxu0 %v21061_v16 }
 0x497   :  { %11338 = vmatpush1.bf16.msra.mxu1 %v18573_v20  ;;  %v18612_v20 = vld [vmem:[#allocation6 + $0x300] ss:$52 sps:$4 sm:$0xff]  }
 0x498   :  { %11849 = vmatpush1.bf16.msra.mxu0 %v18576_v49  ;;  %11339 = vmatprep.subr.bf16.mxu1 %v18581_v57  ;;  %v18617_v49 = vld [vmem:[#allocation6 + $0x364] ss:$52 sps:$4 sm:$0xff]   ;;  %v18620_v57 = vld [vmem:[#allocation6 + $0x36c] ss:$52 sps:$4 sm:$0xff]  }
 0x499   :  { %11850 = vmatprep.subr.bf16.mxu0 %v18584_v62  ;;  %v18615_v62 = vld [vmem:[#allocation6 + $0x360] ss:$52 sps:$4 sm:$0xff]  }
 0x49a   :  { %15877 = vmatmul.mubr.msk.bf16.gmra.mrb[68].mxu1 %vm9278_vm2, %v20186_v31 }
 0x49b   :  { %15881 = vmatmul.mubr.msk.bf16.gmra.mrb[76].mxu0 %vm9278_vm2, %v20186_v31  ;;  %11340 = vmatpush1.bf16.msra.mxu1 %v18579_v41  ;;  %v18618_v41 = vld [vmem:[#allocation6 + $0x368] ss:$52 sps:$4 sm:$0xff]  }
 0x49c   :  { %11851 = vmatpush1.bf16.msra.mxu0 %v18582_v30  ;;  %11341 = vmatprep.subr.bf16.mxu1 %v18587_v12  ;;  %v18623_v30 = vld [vmem:[#allocation6 + $0x3cc] ss:$52 sps:$4 sm:$0xff]   ;;  %v18626_v12 = vld [vmem:[#allocation6 + $0x3d4] ss:$52 sps:$4 sm:$0xff]  }
 0x49d   :  { %11852 = vmatprep.subr.bf16.mxu0 %v18590_v48  ;;  %10803 = vmatprep.mubr.bf16.mxu1 %v21061_v16  ;;  %v18621_v48 = vld [vmem:[#allocation6 + $0x3c8] ss:$52 sps:$4 sm:$0xff]  }
 0x49e   :  { %11314 = vmatprep.mubr.bf16.mxu0 %v21061_v16 }
 0x49f   :  { %11342 = vmatpush1.bf16.msra.mxu1 %v18585_v35  ;;  %v18624_v35 = vld [vmem:[#allocation6 + $0x3d0] ss:$52 sps:$4 sm:$0xff]  }
 0x4a0   :  { %11853 = vmatpush1.bf16.msra.mxu0 %v18588_v61  ;;  %11343 = vmatprep.subr.bf16.mxu1 %v18593_v24  ;;  %v18629_v61 = vld [vmem:[#allocation6 + $0x434] ss:$52 sps:$4 sm:$0xff]   ;;  %v18632_v24 = vld [vmem:[#allocation6 + $0x43c] ss:$52 sps:$4 sm:$0xff]  }
 0x4a1   :  { %11854 = vmatprep.subr.bf16.mxu0 %v18596_v28  ;;  %v18627_v28 = vld [vmem:[#allocation6 + $0x430] ss:$52 sps:$4 sm:$0xff]  }
 0x4a2   :  { %15878 = vmatmul.mubr.msk.bf16.gmra.mrb[72].mxu1 %vm9278_vm2, %v20200_v23 }
 0x4a3   :  { %15882 = vmatmul.mubr.msk.bf16.gmra.mrb[80].mxu0 %vm9278_vm2, %v20200_v23  ;;  %11344 = vmatpush1.bf16.msra.mxu1 %v18591_v33  ;;  %v18630_v33 = vld [vmem:[#allocation6 + $0x438] ss:$52 sps:$4 sm:$0xff]  }
 0x4a4   :  { %11855 = vmatpush1.bf16.msra.mxu0 %v18594_v45  ;;  %11345 = vmatprep.subr.bf16.mxu1 %v18599_v8  ;;  %v18635_v45 = vld [vmem:[#allocation6 + $0x49c] ss:$52 sps:$4 sm:$0xff]   ;;  %v18638_v8 = vld [vmem:[#allocation6 + $0x4a4] ss:$52 sps:$4 sm:$0xff]  }
 0x4a5   :  { %11856 = vmatprep.subr.bf16.mxu0 %v18602_v19  ;;  %10813 = vmatprep.mubr.bf16.mxu1 %v21061_v16  ;;  %v18633_v19 = vld [vmem:[#allocation6 + $0x498] ss:$52 sps:$4 sm:$0xff]  }
 0x4a6   :  { %11324 = vmatprep.mubr.bf16.mxu0 %v21061_v16 }
 0x4a7   :  { %11346 = vmatpush1.bf16.msra.mxu1 %v18597_v14  ;;  %v18636_v14 = vld [vmem:[#allocation6 + $0x4a0] ss:$52 sps:$4 sm:$0xff]  }
 0x4a8   :  { %11857 = vmatpush1.bf16.msra.mxu0 %v18600_v4  ;;  %11347 = vmatprep.subr.bf16.mxu1 %v18605_v46  ;;  %v18641_v4 = vld [vmem:[#allocation6 + $0x504] ss:$52 sps:$4 sm:$0xff]   ;;  %v18644_v46 = vld [vmem:[#allocation6 + $0x50c] ss:$52 sps:$4 sm:$0xff]  }
 0x4a9   :  { %11858 = vmatprep.subr.bf16.mxu0 %v18608_v15  ;;  %v18639_v15 = vld [vmem:[#allocation6 + $0x500] ss:$52 sps:$4 sm:$0xff]  }
 0x4aa   :  { %15879 = vmatmul.mubr.msk.bf16.gmra.mrb[76].mxu1 %vm9278_vm2, %v20198_v59 }
 0x4ab   :  { %15883 = vmatmul.mubr.msk.bf16.gmra.mrb[84].mxu0 %vm9278_vm2, %v20198_v59  ;;  %11348 = vmatpush1.bf16.msra.mxu1 %v18603_v40  ;;  %v18642_v40 = vld [vmem:[#allocation6 + $0x508] ss:$52 sps:$4 sm:$0xff]  }
 0x4ac   :  { %11859 = vmatpush1.bf16.msra.mxu0 %v18606_v44  ;;  %11367 = vmatprep.mubr.bf16.mxu1 %v19919_v55  ;;  %v18647_v44 = vld [vmem:[#allocation6 + $0x56c] ss:$52 sps:$4 sm:$0xff]  }
 0x4ad   :  { %11878 = vmatprep.mubr.bf16.mxu0 %v19919_v55  ;;  %11349 = vmatprep.subr.bf16.mxu1 %v18611_v17  ;;  %v18650_v17 = vld [vmem:[#allocation6 + $0x574] ss:$52 sps:$4 sm:$0xff]  }
 0x4ae   :  { %11860 = vmatprep.subr.bf16.mxu0 %v18614_v43  ;;  %v18645_v43 = vld [vmem:[#allocation6 + $0x568] ss:$52 sps:$4 sm:$0xff]  }
 0x4af   :  { %11350 = vmatpush1.bf16.msra.mxu1 %v18609_v60  ;;  %v18648_v60 = vld [vmem:[#allocation6 + $0x570] ss:$52 sps:$4 sm:$0xff]  }
 0x4b0   :  { %11861 = vmatpush1.bf16.msra.mxu0 %v18612_v20  ;;  %11351 = vmatprep.subr.bf16.mxu1 %v18617_v49  ;;  %v18653_v20 = vld [vmem:[#allocation6 + $0x5d4] ss:$52 sps:$4 sm:$0xff]   ;;  %v18656_v49 = vld [vmem:[#allocation6 + $0x5dc] ss:$52 sps:$4 sm:$0xff]  }
 0x4b1   :  { %11862 = vmatprep.subr.bf16.mxu0 %v18620_v57  ;;  %v18651_v57 = vld [vmem:[#allocation6 + $0x5d0] ss:$52 sps:$4 sm:$0xff]  }
 0x4b3   :  { %11352 = vmatpush1.bf16.msra.mxu1 %v18615_v62  ;;  %v18654_v62 = vld [vmem:[#allocation6 + $0x5d8] ss:$52 sps:$4 sm:$0xff]  }
 0x4b4   :  { %11863 = vmatpush1.bf16.msra.mxu0 %v18618_v41  ;;  %11353 = vmatprep.subr.bf16.mxu1 %v18623_v30  ;;  %v18659_v41 = vld [vmem:[#allocation6 + $0x63c] ss:$52 sps:$4 sm:$0xff]   ;;  %v18662_v30 = vld [vmem:[#allocation6 + $0x644] ss:$52 sps:$4 sm:$0xff]  }
 0x4b5   :  { %11864 = vmatprep.subr.bf16.mxu0 %v18626_v12  ;;  %v18657_v12 = vld [vmem:[#allocation6 + $0x638] ss:$52 sps:$4 sm:$0xff]  }
 0x4b7   :  { %11354 = vmatpush1.bf16.msra.mxu1 %v18621_v48  ;;  %v18660_v48 = vld [vmem:[#allocation6 + $0x640] ss:$52 sps:$4 sm:$0xff]  }
 0x4b8   :  { %11865 = vmatpush1.bf16.msra.mxu0 %v18624_v35  ;;  %11355 = vmatprep.subr.bf16.mxu1 %v18629_v61  ;;  %v18665_v35 = vld [vmem:[#allocation6 + $0x6a4] ss:$52 sps:$4 sm:$0xff]   ;;  %v18668_v61 = vld [vmem:[#allocation6 + $0x6ac] ss:$52 sps:$4 sm:$0xff]  }
 0x4b9   :  { %11866 = vmatprep.subr.bf16.mxu0 %v18632_v24  ;;  %v18663_v24 = vld [vmem:[#allocation6 + $0x6a0] ss:$52 sps:$4 sm:$0xff]  }
 0x4bb   :  { %11356 = vmatpush1.bf16.msra.mxu1 %v18627_v28  ;;  %v18666_v28 = vld [vmem:[#allocation6 + $0x6a8] ss:$52 sps:$4 sm:$0xff]  }
 0x4bc   :  { %11867 = vmatpush1.bf16.msra.mxu0 %v18630_v33  ;;  %11357 = vmatprep.subr.bf16.mxu1 %v18635_v45  ;;  %v18671_v33 = vld [vmem:[#allocation6 + $0x70c] ss:$52 sps:$4 sm:$0xff]   ;;  %v18674_v45 = vld [vmem:[#allocation6 + $0x714] ss:$52 sps:$4 sm:$0xff]  }
 0x4bd   :  { %11868 = vmatprep.subr.bf16.mxu0 %v18638_v8  ;;  %v18669_v8 = vld [vmem:[#allocation6 + $0x708] ss:$52 sps:$4 sm:$0xff]  }
 0x4bf   :  { %11358 = vmatpush1.bf16.msra.mxu1 %v18633_v19  ;;  %v18672_v19 = vld [vmem:[#allocation6 + $0x710] ss:$52 sps:$4 sm:$0xff]  }
 0x4c0   :  { %11869 = vmatpush1.bf16.msra.mxu0 %v18636_v14  ;;  %11359 = vmatprep.subr.bf16.mxu1 %v18641_v4  ;;  %v18677_v14 = vld [vmem:[#allocation6 + $0x774] ss:$52 sps:$4 sm:$0xff]   ;;  %v18680_v4 = vld [vmem:[#allocation6 + $0x77c] ss:$52 sps:$4 sm:$0xff]  }
 0x4c1   :  { %11870 = vmatprep.subr.bf16.mxu0 %v18644_v46  ;;  %v18675_v46 = vld [vmem:[#allocation6 + $0x770] ss:$52 sps:$4 sm:$0xff]  }
 0x4c3   :  { %11360 = vmatpush1.bf16.msra.mxu1 %v18639_v15  ;;  %v18678_v15 = vld [vmem:[#allocation6 + $0x778] ss:$52 sps:$4 sm:$0xff]  }
 0x4c4   :  { %11871 = vmatpush1.bf16.msra.mxu0 %v18642_v40  ;;  %11361 = vmatprep.subr.bf16.mxu1 %v18647_v44  ;;  %v18683_v40 = vld [vmem:[#allocation6 + $0x7dc] ss:$52 sps:$4 sm:$0xff]   ;;  %v18686_v44 = vld [vmem:[#allocation6 + $0x7e4] ss:$52 sps:$4 sm:$0xff]  }
 0x4c5   :  { %11872 = vmatprep.subr.bf16.mxu0 %v18650_v17  ;;  %v21092_v17 = vld [vmem:[#allocation29_spill] sm:$0xff] }
 0x4c7   :  { %11362 = vmatpush1.bf16.msra.mxu1 %v18645_v43  ;;  %v18681_v43 = vld [vmem:[#allocation6 + $0x7d8] ss:$52 sps:$4 sm:$0xff]  }
 0x4c8   :  { %11873 = vmatpush1.bf16.msra.mxu0 %v18648_v60  ;;  %11363 = vmatprep.subr.bf16.mxu1 %v18653_v20  ;;  %v18684_v60 = vld [vmem:[#allocation6 + $0x7e0] ss:$52 sps:$4 sm:$0xff]   ;;  %v18689_v20 = vld [vmem:[#allocation6 + $0x844] ss:$52 sps:$4 sm:$0xff]  }
 0x4c9   :  { %11874 = vmatprep.subr.bf16.mxu0 %v18656_v49  ;;  %v18692_v49 = vld [vmem:[#allocation6 + $0x84c] ss:$52 sps:$4 sm:$0xff]  }
 0x4cb   :  { %11364 = vmatpush1.bf16.msra.mxu1 %v18651_v57  ;;  %v18687_v57 = vld [vmem:[#allocation6 + $0x840] ss:$52 sps:$4 sm:$0xff]  }
 0x4cc   :  { %11875 = vmatpush1.bf16.msra.mxu0 %v18654_v62  ;;  %11365 = vmatprep.subr.bf16.mxu1 %v18659_v41  ;;  %v18690_v62 = vld [vmem:[#allocation6 + $0x848] ss:$52 sps:$4 sm:$0xff]   ;;  %v18695_v41 = vld [vmem:[#allocation6 + $0x8ac] ss:$52 sps:$4 sm:$0xff]  }
 0x4cd   :  { %11876 = vmatprep.subr.bf16.mxu0 %v18662_v30  ;;  %v21093_v30 = vld [vmem:[#allocation28_spill] sm:$0xff] }
 0x4cf   :  { %11366 = vmatpush1.bf16.msra.mxu1 %v18657_v12  ;;  %v18698_v12 = vld [vmem:[#allocation6 + $0x8b4] ss:$52 sps:$4 sm:$0xff]  }
 0x4d0   :  { %11877 = vmatpush1.bf16.msra.mxu0 %v18660_v48  ;;  %11408 = vmatprep.subr.bf16.mxu1 %v18665_v35  ;;  %v21094_v48 = vld [vmem:[#allocation34_spill] sm:$0xff]  ;;  %v18693_v35 = vld [vmem:[#allocation6 + $0x8a8] ss:$52 sps:$4 sm:$0xff]  }
 0x4d1   :  { %11919 = vmatprep.subr.bf16.mxu0 %v18668_v61  ;;  %v18696_v61 = vld [vmem:[#allocation6 + $0x8b0] ss:$52 sps:$4 sm:$0xff]  }
 0x4d2   :  { %11368 = vmatmul.mubr.bf16.vlgmr.msra.gmra.mrb[80].mxu1 %v19913_v13 }
 0x4d3   :  { %11879 = vmatmul.mubr.bf16.vlgmr.msra.gmra.mrb[88].mxu0 %v19913_v13  ;;  %11377 = vmatprep.mubr.bf16.mxu1 %v19935_v53 }
 0x4d4   :  { %11409 = vmatpush1.bf16.msra.mxu1 %v18663_v24  ;;  %11888 = vmatprep.mubr.bf16.mxu0 %v19935_v53  ;;  %v18701_v24 = vld [vmem:[#allocation6 + $0x914] ss:$52 sps:$4 sm:$0xff]  }
 0x4d5   :  { %11920 = vmatpush1.bf16.msra.mxu0 %v18666_v28  ;;  %11410 = vmatprep.subr.bf16.mxu1 %v18671_v33  ;;  %v18704_v28 = vld [vmem:[#allocation6 + $0x91c] ss:$52 sps:$4 sm:$0xff]  }
 0x4d6   :  { %11921 = vmatprep.subr.bf16.mxu0 %v18674_v45  ;;  %v18699_v33 = vld [vmem:[#allocation6 + $0x910] ss:$52 sps:$4 sm:$0xff]   ;;  %v18702_v45 = vld [vmem:[#allocation6 + $0x918] ss:$52 sps:$4 sm:$0xff]  }
 0x4d8   :  { %11411 = vmatpush1.bf16.msra.mxu1 %v18669_v8  ;;  %v18707_v8 = vld [vmem:[#allocation6 + $0x97c] ss:$52 sps:$4 sm:$0xff]  }
 0x4d9   :  { %11922 = vmatpush1.bf16.msra.mxu0 %v18672_v19  ;;  %11412 = vmatprep.subr.bf16.mxu1 %v18677_v14  ;;  %v21095_v19 = vld [vmem:[#allocation33_spill] sm:$0xff]  ;;  %v18710_v14 = vld [vmem:[#allocation6 + $0x984] ss:$52 sps:$4 sm:$0xff]  }
 0x4da   :  { %11378 = vmatmul.mubr.bf16.gmra.mrb[84].mxu1 %v19933_v51  ;;  %11923 = vmatprep.subr.bf16.mxu0 %v18680_v4  ;;  %v21096_v4 = vld [vmem:[#allocation27_spill] sm:$0xff] }
 0x4db   :  { %11889 = vmatmul.mubr.bf16.gmra.mrb[92].mxu0 %v19933_v51  ;;  %11387 = vmatprep.mubr.bf16.mxu1 %v21092_v17 }
 0x4dc   :  { %11413 = vmatpush1.bf16.msra.mxu1 %v18675_v46  ;;  %11898 = vmatprep.mubr.bf16.mxu0 %v21092_v17  ;;  %v18705_v46 = vld [vmem:[#allocation6 + $0x978] ss:$52 sps:$4 sm:$0xff]  }
 0x4dd   :  { %11924 = vmatpush1.bf16.msra.mxu0 %v18678_v15  ;;  %11414 = vmatprep.subr.bf16.mxu1 %v18683_v40  ;;  %v18708_v15 = vld [vmem:[#allocation6 + $0x980] ss:$52 sps:$4 sm:$0xff]   ;;  %v18713_v40 = vld [vmem:[#allocation6 + $0x9e4] ss:$52 sps:$4 sm:$0xff]  }
 0x4de   :  { %11925 = vmatprep.subr.bf16.mxu0 %v18686_v44  ;;  %v18716_v44 = vld [vmem:[#allocation6 + $0x9ec] ss:$52 sps:$4 sm:$0xff]  }
 0x4e0   :  { %11415 = vmatpush1.bf16.msra.mxu1 %v18681_v43  ;;  %v18711_v43 = vld [vmem:[#allocation6 + $0x9e0] ss:$52 sps:$4 sm:$0xff]  }
 0x4e1   :  { %11926 = vmatpush1.bf16.msra.mxu0 %v18684_v60  ;;  %11416 = vmatprep.subr.bf16.mxu1 %v18689_v20  ;;  %v18714_v60 = vld [vmem:[#allocation6 + $0x9e8] ss:$52 sps:$4 sm:$0xff]   ;;  %v18719_v20 = vld [vmem:[#allocation6 + $0xa4c] ss:$52 sps:$4 sm:$0xff]  }
 0x4e2   :  { %11388 = vmatmul.mubr.bf16.gmra.mrb[88].mxu1 %v21093_v30  ;;  %11927 = vmatprep.subr.bf16.mxu0 %v18692_v49  ;;  %v18722_v49 = vld [vmem:[#allocation6 + $0xa54] ss:$52 sps:$4 sm:$0xff]  }
 0x4e3   :  { %11899 = vmatmul.mubr.bf16.gmra.mrb[96].mxu0 %v21093_v30  ;;  %11397 = vmatprep.mubr.bf16.mxu1 %v21094_v48  ;;  %v18891_v30 = vld [vmem:[#allocation6 + $0x1610] ss:$52 sps:$4 sm:$0xff]  }
 0x4e4   :  { %11417 = vmatpush1.bf16.msra.mxu1 %v18687_v57  ;;  %11908 = vmatprep.mubr.bf16.mxu0 %v21094_v48  ;;  %v18717_v57 = vld [vmem:[#allocation6 + $0xa48] ss:$52 sps:$4 sm:$0xff]  }
 0x4e5   :  { %11928 = vmatpush1.bf16.msra.mxu0 %v18690_v62  ;;  %11418 = vmatprep.subr.bf16.mxu1 %v18695_v41  ;;  %v18720_v62 = vld [vmem:[#allocation6 + $0xa50] ss:$52 sps:$4 sm:$0xff]   ;;  %v18725_v41 = vld [vmem:[#allocation6 + $0xab4] ss:$52 sps:$4 sm:$0xff]  }
 0x4e6   :  { %11929 = vmatprep.subr.bf16.mxu0 %v18698_v12  ;;  %v18728_v12 = vld [vmem:[#allocation6 + $0xabc] ss:$52 sps:$4 sm:$0xff]  }
 0x4e8   :  { %11419 = vmatpush1.bf16.msra.mxu1 %v18693_v35  ;;  %v18723_v35 = vld [vmem:[#allocation6 + $0xab0] ss:$52 sps:$4 sm:$0xff]  }
 0x4e9   :  { %11930 = vmatpush1.bf16.msra.mxu0 %v18696_v61  ;;  %11420 = vmatprep.subr.bf16.mxu1 %v18701_v24  ;;  %v18726_v61 = vld [vmem:[#allocation6 + $0xab8] ss:$52 sps:$4 sm:$0xff]   ;;  %v18731_v24 = vld [vmem:[#allocation6 + $0xb1c] ss:$52 sps:$4 sm:$0xff]  }
 0x4ea   :  { %11398 = vmatmul.mubr.bf16.gmra.mrb[92].mxu1 %v21095_v19  ;;  %11931 = vmatprep.subr.bf16.mxu0 %v18704_v28  ;;  %v18734_v28 = vld [vmem:[#allocation6 + $0xb24] ss:$52 sps:$4 sm:$0xff]  }
 0x4eb   :  { %11909 = vmatmul.mubr.bf16.gmra.mrb[100].mxu0 %v21095_v19  ;;  %11440 = vmatprep.mubr.bf16.mxu1 %v21096_v4 }
 0x4ec   :  { %11421 = vmatpush1.bf16.msra.mxu1 %v18699_v33  ;;  %11951 = vmatprep.mubr.bf16.mxu0 %v21096_v4  ;;  %v18729_v33 = vld [vmem:[#allocation6 + $0xb18] ss:$52 sps:$4 sm:$0xff]  }
 0x4ed   :  { %11932 = vmatpush1.bf16.msra.mxu0 %v18702_v45  ;;  %11422 = vmatprep.subr.bf16.mxu1 %v18707_v8  ;;  %v18732_v45 = vld [vmem:[#allocation6 + $0xb20] ss:$52 sps:$4 sm:$0xff]   ;;  %v18737_v8 = vld [vmem:[#allocation6 + $0xb84] ss:$52 sps:$4 sm:$0xff]  }
 0x4ee   :  { %11933 = vmatprep.subr.bf16.mxu0 %v18710_v14  ;;  %v18740_v14 = vld [vmem:[#allocation6 + $0xb8c] ss:$52 sps:$4 sm:$0xff]  }
 0x4f0   :  { %11423 = vmatpush1.bf16.msra.mxu1 %v18705_v46  ;;  %v18735_v46 = vld [vmem:[#allocation6 + $0xb80] ss:$52 sps:$4 sm:$0xff]  }
 0x4f1   :  { %11934 = vmatpush1.bf16.msra.mxu0 %v18708_v15  ;;  %11424 = vmatprep.subr.bf16.mxu1 %v18713_v40  ;;  %v18738_v15 = vld [vmem:[#allocation6 + $0xb88] ss:$52 sps:$4 sm:$0xff]   ;;  %v18743_v40 = vld [vmem:[#allocation6 + $0xbec] ss:$52 sps:$4 sm:$0xff]  }
 0x4f2   :  { %11935 = vmatprep.subr.bf16.mxu0 %v18716_v44  ;;  %v18746_v44 = vld [vmem:[#allocation6 + $0xbf4] ss:$52 sps:$4 sm:$0xff]  }
 0x4f4   :  { %11425 = vmatpush1.bf16.msra.mxu1 %v18711_v43  ;;  %v18741_v43 = vld [vmem:[#allocation6 + $0xbe8] ss:$52 sps:$4 sm:$0xff]  }
 0x4f5   :  { %11936 = vmatpush1.bf16.msra.mxu0 %v18714_v60  ;;  %11426 = vmatprep.subr.bf16.mxu1 %v18719_v20  ;;  %v18744_v60 = vld [vmem:[#allocation6 + $0xbf0] ss:$52 sps:$4 sm:$0xff]   ;;  %v18749_v20 = vld [vmem:[#allocation6 + $0xc54] ss:$52 sps:$4 sm:$0xff]  }
 0x4f6   :  { %11937 = vmatprep.subr.bf16.mxu0 %v18722_v49  ;;  %v18752_v49 = vld [vmem:[#allocation6 + $0xc5c] ss:$52 sps:$4 sm:$0xff]  }
 0x4f8   :  { %11427 = vmatpush1.bf16.msra.mxu1 %v18717_v57  ;;  %v18747_v57 = vld [vmem:[#allocation6 + $0xc50] ss:$52 sps:$4 sm:$0xff]  }
 0x4f9   :  { %11938 = vmatpush1.bf16.msra.mxu0 %v18720_v62  ;;  %11428 = vmatprep.subr.bf16.mxu1 %v18725_v41  ;;  %v18750_v62 = vld [vmem:[#allocation6 + $0xc58] ss:$52 sps:$4 sm:$0xff]   ;;  %v18755_v41 = vld [vmem:[#allocation6 + $0xcbc] ss:$52 sps:$4 sm:$0xff]  }
 0x4fa   :  { %11939 = vmatprep.subr.bf16.mxu0 %v18728_v12  ;;  %v18758_v12 = vld [vmem:[#allocation6 + $0xcc4] ss:$52 sps:$4 sm:$0xff]  }
 0x4fc   :  { %11429 = vmatpush1.bf16.msra.mxu1 %v18723_v35  ;;  %v18753_v35 = vld [vmem:[#allocation6 + $0xcb8] ss:$52 sps:$4 sm:$0xff]  }
 0x4fd   :  { %11940 = vmatpush1.bf16.msra.mxu0 %v18726_v61  ;;  %11430 = vmatprep.subr.bf16.mxu1 %v18731_v24  ;;  %v18756_v61 = vld [vmem:[#allocation6 + $0xcc0] ss:$52 sps:$4 sm:$0xff]   ;;  %v18761_v24 = vld [vmem:[#allocation6 + $0xd24] ss:$52 sps:$4 sm:$0xff]  }
 0x4fe   :  { %11941 = vmatprep.subr.bf16.mxu0 %v18734_v28  ;;  %v18764_v28 = vld [vmem:[#allocation6 + $0xd2c] ss:$52 sps:$4 sm:$0xff]  }
 0x500   :  { %11431 = vmatpush1.bf16.msra.mxu1 %v18729_v33  ;;  %v18759_v33 = vld [vmem:[#allocation6 + $0xd20] ss:$52 sps:$4 sm:$0xff]  }
 0x501   :  { %11942 = vmatpush1.bf16.msra.mxu0 %v18732_v45  ;;  %11432 = vmatprep.subr.bf16.mxu1 %v18737_v8  ;;  %v18762_v45 = vld [vmem:[#allocation6 + $0xd28] ss:$52 sps:$4 sm:$0xff]   ;;  %v18767_v8 = vld [vmem:[#allocation6 + $0xd8c] ss:$52 sps:$4 sm:$0xff]  }
 0x502   :  { %11943 = vmatprep.subr.bf16.mxu0 %v18740_v14  ;;  %v21097_v14 = vld [vmem:[#allocation26_spill] sm:$0xff] }
 0x504   :  { %11433 = vmatpush1.bf16.msra.mxu1 %v18735_v46  ;;  %v18770_v46 = vld [vmem:[#allocation6 + $0xd94] ss:$52 sps:$4 sm:$0xff]  }
 0x505   :  { %11944 = vmatpush1.bf16.msra.mxu0 %v18738_v15  ;;  %11434 = vmatprep.subr.bf16.mxu1 %v18743_v40  ;;  %v21098_v15 = vld [vmem:[#allocation31_spill] sm:$0xff] }
 0x506   :  { %11945 = vmatprep.subr.bf16.mxu0 %v18746_v44  ;;  %v18765_v40 = vld [vmem:[#allocation6 + $0xd88] ss:$52 sps:$4 sm:$0xff]   ;;  %v18768_v44 = vld [vmem:[#allocation6 + $0xd90] ss:$52 sps:$4 sm:$0xff]  }
 0x508   :  { %11435 = vmatpush1.bf16.msra.mxu1 %v18741_v43  ;;  %v18773_v43 = vld [vmem:[#allocation6 + $0xdf4] ss:$52 sps:$4 sm:$0xff]  }
 0x509   :  { %11946 = vmatpush1.bf16.msra.mxu0 %v18744_v60  ;;  %11436 = vmatprep.subr.bf16.mxu1 %v18749_v20  ;;  %v18776_v60 = vld [vmem:[#allocation6 + $0xdfc] ss:$52 sps:$4 sm:$0xff]  }
 0x50a   :  { %11947 = vmatprep.subr.bf16.mxu0 %v18752_v49  ;;  %v18771_v20 = vld [vmem:[#allocation6 + $0xdf0] ss:$52 sps:$4 sm:$0xff]   ;;  %v18774_v49 = vld [vmem:[#allocation6 + $0xdf8] ss:$52 sps:$4 sm:$0xff]  }
 0x50c   :  { %11437 = vmatpush1.bf16.msra.mxu1 %v18747_v57  ;;  %v18779_v57 = vld [vmem:[#allocation6 + $0xe5c] ss:$52 sps:$4 sm:$0xff]  }
 0x50d   :  { %11948 = vmatpush1.bf16.msra.mxu0 %v18750_v62  ;;  %11438 = vmatprep.subr.bf16.mxu1 %v18755_v41  ;;  %v21099_v62 = vld [vmem:[#allocation30_spill] sm:$0xff] }
 0x50e   :  { %11949 = vmatprep.subr.bf16.mxu0 %v18758_v12  ;;  %v18782_v41 = vld [vmem:[#allocation6 + $0xe64] ss:$52 sps:$4 sm:$0xff]  }
 0x50f   :  { %v21100_v12 = vld [vmem:[#allocation36_spill] sm:$0xff] }
 0x510   :  { %11439 = vmatpush1.bf16.msra.mxu1 %v18753_v35  ;;  %v18777_v35 = vld [vmem:[#allocation6 + $0xe58] ss:$52 sps:$4 sm:$0xff]  }
 0x511   :  { %11950 = vmatpush1.bf16.msra.mxu0 %v18756_v61  ;;  %11481 = vmatprep.subr.bf16.mxu1 %v18761_v24  ;;  %v18780_v61 = vld [vmem:[#allocation6 + $0xe60] ss:$52 sps:$4 sm:$0xff]   ;;  %v18785_v24 = vld [vmem:[#allocation6 + $0xec4] ss:$52 sps:$4 sm:$0xff]  }
 0x512   :  { %11992 = vmatprep.subr.bf16.mxu0 %v18764_v28  ;;  %v18788_v28 = vld [vmem:[#allocation6 + $0xecc] ss:$52 sps:$4 sm:$0xff]  }
 0x513   :  { %11441 = vmatmul.mubr.bf16.vlgmr.msra.gmra.mrb[80].mxu1 %v21097_v14 }
 0x514   :  { %11952 = vmatmul.mubr.bf16.vlgmr.msra.gmra.mrb[88].mxu0 %v21097_v14  ;;  %11450 = vmatprep.mubr.bf16.mxu1 %v21098_v15 }
 0x515   :  { %11482 = vmatpush1.bf16.msra.mxu1 %v18759_v33  ;;  %11961 = vmatprep.mubr.bf16.mxu0 %v21098_v15  ;;  %v18783_v33 = vld [vmem:[#allocation6 + $0xec0] ss:$52 sps:$4 sm:$0xff]  }
 0x516   :  { %11993 = vmatpush1.bf16.msra.mxu0 %v18762_v45  ;;  %11483 = vmatprep.subr.bf16.mxu1 %v18767_v8  ;;  %v18786_v45 = vld [vmem:[#allocation6 + $0xec8] ss:$52 sps:$4 sm:$0xff]   ;;  %v18791_v8 = vld [vmem:[#allocation6 + $0xf2c] ss:$52 sps:$4 sm:$0xff]  }
 0x517   :  { %11994 = vmatprep.subr.bf16.mxu0 %v18770_v46  ;;  %v21101_v46 = vld [vmem:[#allocation35_spill] sm:$0xff] }
 0x519   :  { %11484 = vmatpush1.bf16.msra.mxu1 %v18765_v40  ;;  %v18794_v40 = vld [vmem:[#allocation6 + $0xf34] ss:$52 sps:$4 sm:$0xff]  }
 0x51a   :  { %11995 = vmatpush1.bf16.msra.mxu0 %v18768_v44  ;;  %11485 = vmatprep.subr.bf16.mxu1 %v18773_v43  ;;  %v21102_v44 = vld [vmem:[#allocation40_spill] sm:$0xff] }
 0x51b   :  { %11451 = vmatmul.mubr.bf16.gmra.mrb[84].mxu1 %v21099_v62  ;;  %11996 = vmatprep.subr.bf16.mxu0 %v18776_v60  ;;  %v18789_v43 = vld [vmem:[#allocation6 + $0xf28] ss:$52 sps:$4 sm:$0xff]   ;;  %v18792_v60 = vld [vmem:[#allocation6 + $0xf30] ss:$52 sps:$4 sm:$0xff]  }
 0x51c   :  { %11962 = vmatmul.mubr.bf16.gmra.mrb[92].mxu0 %v21099_v62  ;;  %11460 = vmatprep.mubr.bf16.mxu1 %v21100_v12  ;;  %v18899_v62 = vld [vmem:[#allocation6 + $0x167c] ss:$52 sps:$4 sm:$0xff]  }
 0x51d   :  { %11486 = vmatpush1.bf16.msra.mxu1 %v18771_v20  ;;  %11971 = vmatprep.mubr.bf16.mxu0 %v21100_v12  ;;  %v18797_v20 = vld [vmem:[#allocation6 + $0xf94] ss:$52 sps:$4 sm:$0xff]   ;;  %v18894_v12 = vld [vmem:[#allocation6 + $0x1618] ss:$52 sps:$4 sm:$0xff]  }
 0x51e   :  { %11997 = vmatpush1.bf16.msra.mxu0 %v18774_v49  ;;  %11487 = vmatprep.subr.bf16.mxu1 %v18779_v57  ;;  %v18800_v49 = vld [vmem:[#allocation6 + $0xf9c] ss:$52 sps:$4 sm:$0xff]  }
 0x51f   :  { %11998 = vmatprep.subr.bf16.mxu0 %v18782_v41  ;;  %v18795_v57 = vld [vmem:[#allocation6 + $0xf90] ss:$52 sps:$4 sm:$0xff]   ;;  %v18798_v41 = vld [vmem:[#allocation6 + $0xf98] ss:$52 sps:$4 sm:$0xff]  }
 0x521   :  { %11488 = vmatpush1.bf16.msra.mxu1 %v18777_v35  ;;  %v18803_v35 = vld [vmem:[#allocation6 + $0xffc] ss:$52 sps:$4 sm:$0xff]  }
 0x522   :  { %11999 = vmatpush1.bf16.msra.mxu0 %v18780_v61  ;;  %11489 = vmatprep.subr.bf16.mxu1 %v18785_v24  ;;  %v21103_v61 = vld [vmem:[#allocation38_spill] sm:$0xff] }
 0x523   :  { %11461 = vmatmul.mubr.bf16.gmra.mrb[88].mxu1 %v21101_v46  ;;  %12000 = vmatprep.subr.bf16.mxu0 %v18788_v28  ;;  %v18806_v24 = vld [vmem:[#allocation6 + $0x1004] ss:$52 sps:$4 sm:$0xff]  }
 0x524   :  { %11972 = vmatmul.mubr.bf16.gmra.mrb[96].mxu0 %v21101_v46  ;;  %11470 = vmatprep.mubr.bf16.mxu1 %v21102_v44  ;;  %v21104_v28 = vld [vmem:[#allocation39_spill] sm:$0xff] }
 0x525   :  { %11490 = vmatpush1.bf16.msra.mxu1 %v18783_v33  ;;  %11981 = vmatprep.mubr.bf16.mxu0 %v21102_v44  ;;  %v18801_v33 = vld [vmem:[#allocation6 + $0xff8] ss:$52 sps:$4 sm:$0xff]   ;;  %v18896_v44 = vld [vmem:[#allocation6 + $0x161c] ss:$52 sps:$4 sm:$0xff]  }
 0x526   :  { %12001 = vmatpush1.bf16.msra.mxu0 %v18786_v45  ;;  %11491 = vmatprep.subr.bf16.mxu1 %v18791_v8  ;;  %v18804_v45 = vld [vmem:[#allocation6 + $0x1000] ss:$52 sps:$4 sm:$0xff]   ;;  %v18809_v8 = vld [vmem:[#allocation6 + $0x1064] ss:$52 sps:$4 sm:$0xff]  }
 0x527   :  { %12002 = vmatprep.subr.bf16.mxu0 %v18794_v40  ;;  %v18812_v40 = vld [vmem:[#allocation6 + $0x106c] ss:$52 sps:$4 sm:$0xff]  }
 0x529   :  { %11492 = vmatpush1.bf16.msra.mxu1 %v18789_v43  ;;  %v18807_v43 = vld [vmem:[#allocation6 + $0x1060] ss:$52 sps:$4 sm:$0xff]  }
 0x52a   :  { %12003 = vmatpush1.bf16.msra.mxu0 %v18792_v60  ;;  %11493 = vmatprep.subr.bf16.mxu1 %v18797_v20  ;;  %v18810_v60 = vld [vmem:[#allocation6 + $0x1068] ss:$52 sps:$4 sm:$0xff]   ;;  %v18815_v20 = vld [vmem:[#allocation6 + $0x10cc] ss:$52 sps:$4 sm:$0xff]  }
 0x52b   :  { %11471 = vmatmul.mubr.bf16.gmra.mrb[92].mxu1 %v21103_v61  ;;  %12004 = vmatprep.subr.bf16.mxu0 %v18800_v49  ;;  %v18818_v49 = vld [vmem:[#allocation6 + $0x10d4] ss:$52 sps:$4 sm:$0xff]  }
 0x52c   :  { %11982 = vmatmul.mubr.bf16.gmra.mrb[100].mxu0 %v21103_v61  ;;  %11513 = vmatprep.mubr.bf16.mxu1 %v21104_v28  ;;  %v18893_v61 = vld [vmem:[#allocation6 + $0x1614] ss:$52 sps:$4 sm:$0xff]  }
 0x52d   :  { %11494 = vmatpush1.bf16.msra.mxu1 %v18795_v57  ;;  %12024 = vmatprep.mubr.bf16.mxu0 %v21104_v28  ;;  %v18816_v57 = vld [vmem:[#allocation6 + $0x10d0] ss:$52 sps:$4 sm:$0xff]  }
 0x52e   :  { %12005 = vmatpush1.bf16.msra.mxu0 %v18798_v41  ;;  %11495 = vmatprep.subr.bf16.mxu1 %v18803_v35  ;;  %v18824_v41 = vld [vmem:[#allocation6 + $0x113c] ss:$52 sps:$4 sm:$0xff]  }
 0x52f   :  { %12006 = vmatprep.subr.bf16.mxu0 %v18806_v24  ;;  %v18819_v35 = vld [vmem:[#allocation6 + $0x1130] ss:$52 sps:$4 sm:$0xff]   ;;  %v18822_v24 = vld [vmem:[#allocation6 + $0x1138] ss:$52 sps:$4 sm:$0xff]  }
 0x531   :  { %11496 = vmatpush1.bf16.msra.mxu1 %v18801_v33  ;;  %v18827_v33 = vld [vmem:[#allocation6 + $0x119c] ss:$52 sps:$4 sm:$0xff]  }
 0x532   :  { %12007 = vmatpush1.bf16.msra.mxu0 %v18804_v45  ;;  %11497 = vmatprep.subr.bf16.mxu1 %v18809_v8  ;;  %v18830_v45 = vld [vmem:[#allocation6 + $0x11a4] ss:$52 sps:$4 sm:$0xff]  }
 0x533   :  { %12008 = vmatprep.subr.bf16.mxu0 %v18812_v40  ;;  %v18825_v8 = vld [vmem:[#allocation6 + $0x1198] ss:$52 sps:$4 sm:$0xff]   ;;  %v18828_v40 = vld [vmem:[#allocation6 + $0x11a0] ss:$52 sps:$4 sm:$0xff]  }
 0x535   :  { %11498 = vmatpush1.bf16.msra.mxu1 %v18807_v43  ;;  %v18833_v43 = vld [vmem:[#allocation6 + $0x1204] ss:$52 sps:$4 sm:$0xff]  }
 0x536   :  { %12009 = vmatpush1.bf16.msra.mxu0 %v18810_v60  ;;  %11499 = vmatprep.subr.bf16.mxu1 %v18815_v20  ;;  %v18836_v60 = vld [vmem:[#allocation6 + $0x120c] ss:$52 sps:$4 sm:$0xff]  }
 0x537   :  { %12010 = vmatprep.subr.bf16.mxu0 %v18818_v49  ;;  %v18831_v20 = vld [vmem:[#allocation6 + $0x1200] ss:$52 sps:$4 sm:$0xff]  }
 0x538   :  { %v18839_v49 = vld [vmem:[#allocation6 + $0x126c] ss:$52 sps:$4 sm:$0xff]  }
 0x539   :  { %11500 = vmatpush1.bf16.msra.mxu1 %v18813_v18  ;;  %v18834_v18 = vld [vmem:[#allocation6 + $0x1208] ss:$52 sps:$4 sm:$0xff]  }
 0x53a   :  { %12011 = vmatpush1.bf16.msra.mxu0 %v18816_v57  ;;  %11501 = vmatprep.subr.bf16.mxu1 %v18821_v25  ;;  %v18842_v25 = vld [vmem:[#allocation6 + $0x1274] ss:$52 sps:$4 sm:$0xff]  }
 0x53b   :  { %12012 = vmatprep.subr.bf16.mxu0 %v18824_v41  ;;  %v18837_v57 = vld [vmem:[#allocation6 + $0x1268] ss:$52 sps:$4 sm:$0xff]   ;;  %v18840_v41 = vld [vmem:[#allocation6 + $0x1270] ss:$52 sps:$4 sm:$0xff]  }
 0x53d   :  { %11502 = vmatpush1.bf16.msra.mxu1 %v18819_v35  ;;  %v18845_v35 = vld [vmem:[#allocation6 + $0x12d4] ss:$52 sps:$4 sm:$0xff]  }
 0x53e   :  { %12013 = vmatpush1.bf16.msra.mxu0 %v18822_v24  ;;  %11503 = vmatprep.subr.bf16.mxu1 %v18827_v33  ;;  %v18848_v24 = vld [vmem:[#allocation6 + $0x12dc] ss:$52 sps:$4 sm:$0xff]  }
 0x53f   :  { %12014 = vmatprep.subr.bf16.mxu0 %v18830_v45  ;;  %v18843_v33 = vld [vmem:[#allocation6 + $0x12d0] ss:$52 sps:$4 sm:$0xff]   ;;  %v18846_v45 = vld [vmem:[#allocation6 + $0x12d8] ss:$52 sps:$4 sm:$0xff]  }
 0x541   :  { %11504 = vmatpush1.bf16.msra.mxu1 %v18825_v8  ;;  %v18851_v8 = vld [vmem:[#allocation6 + $0x133c] ss:$52 sps:$4 sm:$0xff]  }
 0x542   :  { %12015 = vmatpush1.bf16.msra.mxu0 %v18828_v40  ;;  %11505 = vmatprep.subr.bf16.mxu1 %v18833_v43  ;;  %v18854_v40 = vld [vmem:[#allocation6 + $0x1344] ss:$52 sps:$4 sm:$0xff]  }
 0x543   :  { %12016 = vmatprep.subr.bf16.mxu0 %v18836_v60  ;;  %v18849_v43 = vld [vmem:[#allocation6 + $0x1338] ss:$52 sps:$4 sm:$0xff]   ;;  %v18852_v60 = vld [vmem:[#allocation6 + $0x1340] ss:$52 sps:$4 sm:$0xff]  }
 0x545   :  { %11506 = vmatpush1.bf16.msra.mxu1 %v18831_v20  ;;  %v18857_v20 = vld [vmem:[#allocation6 + $0x13a4] ss:$52 sps:$4 sm:$0xff]  }
 0x546   :  { %12017 = vmatpush1.bf16.msra.mxu0 %v18834_v18  ;;  %11507 = vmatprep.subr.bf16.mxu1 %v18839_v49  ;;  %v18860_v18 = vld [vmem:[#allocation6 + $0x13ac] ss:$52 sps:$4 sm:$0xff]  }
 0x547   :  { %12018 = vmatprep.subr.bf16.mxu0 %v18842_v25  ;;  %v18855_v49 = vld [vmem:[#allocation6 + $0x13a0] ss:$52 sps:$4 sm:$0xff]   ;;  %v18858_v25 = vld [vmem:[#allocation6 + $0x13a8] ss:$52 sps:$4 sm:$0xff]  }
 0x549   :  { %11508 = vmatpush1.bf16.msra.mxu1 %v18837_v57  ;;  %v18863_v57 = vld [vmem:[#allocation6 + $0x140c] ss:$52 sps:$4 sm:$0xff]  }
 0x54a   :  { %12019 = vmatpush1.bf16.msra.mxu0 %v18840_v41  ;;  %11509 = vmatprep.subr.bf16.mxu1 %v18845_v35  ;;  %v21105_v41 = vld [vmem:[#allocation37_spill] sm:$0xff] }
 0x54b   :  { %12020 = vmatprep.subr.bf16.mxu0 %v18848_v24  ;;  %v18866_v35 = vld [vmem:[#allocation6 + $0x1414] ss:$52 sps:$4 sm:$0xff]  }
 0x54c   :  { %v21106_v24 = vld [vmem:[#allocation42_spill] sm:$0xff] }
 0x54d   :  { %11510 = vmatpush1.bf16.msra.mxu1 %v18843_v33  ;;  %v18861_v33 = vld [vmem:[#allocation6 + $0x1408] ss:$52 sps:$4 sm:$0xff]  }
 0x54e   :  { %12021 = vmatpush1.bf16.msra.mxu0 %v18846_v45  ;;  %11511 = vmatprep.subr.bf16.mxu1 %v18851_v8  ;;  %v18864_v45 = vld [vmem:[#allocation6 + $0x1410] ss:$52 sps:$4 sm:$0xff]   ;;  %v18869_v8 = vld [vmem:[#allocation6 + $0x1474] ss:$52 sps:$4 sm:$0xff]  }
 0x54f   :  { %12022 = vmatprep.subr.bf16.mxu0 %v18854_v40  ;;  %v18872_v40 = vld [vmem:[#allocation6 + $0x147c] ss:$52 sps:$4 sm:$0xff]  }
 0x551   :  { %11512 = vmatpush1.bf16.msra.mxu1 %v18849_v43  ;;  %v18867_v43 = vld [vmem:[#allocation6 + $0x1470] ss:$52 sps:$4 sm:$0xff]  }
 0x552   :  { %12023 = vmatpush1.bf16.msra.mxu0 %v18852_v60  ;;  %11554 = vmatprep.subr.bf16.mxu1 %v18857_v20  ;;  %v18870_v60 = vld [vmem:[#allocation6 + $0x1478] ss:$52 sps:$4 sm:$0xff]   ;;  %v18875_v20 = vld [vmem:[#allocation6 + $0x14dc] ss:$52 sps:$4 sm:$0xff]  }
 0x553   :  { %12065 = vmatprep.subr.bf16.mxu0 %v18860_v18  ;;  %v21107_v18 = vld [vmem:[#allocation41_spill] sm:$0xff] }
 0x554   :  { %11514 = vmatmul.mubr.bf16.vlgmr.msra.gmra.mrb[80].mxu1 %v21105_v41 }
 0x555   :  { %12025 = vmatmul.mubr.bf16.vlgmr.msra.gmra.mrb[88].mxu0 %v21105_v41  ;;  %11523 = vmatprep.mubr.bf16.mxu1 %v21106_v24  ;;  %v18885_v41 = vld [vmem:[#allocation6 + $0x15a8] ss:$52 sps:$4 sm:$0xff]  }
 0x556   :  { %11555 = vmatpush1.bf16.msra.mxu1 %v18855_v49  ;;  %12034 = vmatprep.mubr.bf16.mxu0 %v21106_v24  ;;  %v21108_v49 = vld [vmem:[#allocation45_spill] sm:$0xff]  ;;  %v21114_v24 = vsub.s32 7, %v21110_v22 }
 0x557   :  { %12066 = vmatpush1.bf16.msra.mxu0 %v18858_v25  ;;  %11556 = vmatprep.subr.bf16.mxu1 %v18863_v57  ;;  %v18873_v25 = vld [vmem:[#allocation6 + $0x14d8] ss:$52 sps:$4 sm:$0xff]   ;;  %v18876_v57 = vld [vmem:[#allocation6 + $0x14e0] ss:$52 sps:$4 sm:$0xff]  }
 0x558   :  { %12067 = vmatprep.subr.bf16.mxu0 %v18866_v35  ;;  %v18881_v35 = vld [vmem:[#allocation6 + $0x1544] ss:$52 sps:$4 sm:$0xff]  }
 0x55a   :  { %11557 = vmatpush1.bf16.msra.mxu1 %v18861_v33  ;;  %v18884_v33 = vld [vmem:[#allocation6 + $0x154c] ss:$52 sps:$4 sm:$0xff]  }
 0x55b   :  { %12068 = vmatpush1.bf16.msra.mxu0 %v18864_v45  ;;  %11558 = vmatprep.subr.bf16.mxu1 %v18869_v8  ;;  %v18879_v45 = vld [vmem:[#allocation6 + $0x1540] ss:$52 sps:$4 sm:$0xff]  }
 0x55c   :  { %11524 = vmatmul.mubr.bf16.gmra.mrb[84].mxu1 %v21107_v18  ;;  %12069 = vmatprep.subr.bf16.mxu0 %v18872_v40  ;;  %v19393_v8 = vld [vmem:[#allocation7] sm:$0xff] }
 0x55d   :  { %12035 = vmatmul.mubr.bf16.gmra.mrb[92].mxu0 %v21107_v18  ;;  %11533 = vmatprep.mubr.bf16.mxu1 %v21108_v49  ;;  %v20527_v40 = vrot.slane %v19393_v8, %v21109_v37  ;;  %v20540_v37 = vrot.slane %v19393_v8, %v21114_v24 }
 0x55e   :  { %11559 = vmatpush1.bf16.msra.mxu1 %v18867_v43  ;;  %12044 = vmatprep.mubr.bf16.mxu0 %v21108_v49  ;;  %v21111_v43 = vsub.s32 6, %v21110_v22  ;;  %v18887_v49 = vld [vmem:[#allocation6 + $0x15ac] ss:$52 sps:$4 sm:$0xff]  }
 0x55f   :  { %12070 = vmatpush1.bf16.msra.mxu0 %v18870_v60  ;;  %11560 = vmatprep.subr.bf16.mxu1 %v18875_v20  ;;  %v21112_v60 = vsub.s32 5, %v21110_v22  ;;  %v18888_v22 = vld [vmem:[#allocation6 + $0x15b0] ss:$52 sps:$4 sm:$0xff]  }
 0x560   :  { %12071 = vmatprep.subr.bf16.mxu0 %v18878_v5  ;;  %v20531_v18 = vrot.slane %v19393_v8, %v21111_v43  ;;  %v21113_v5 = vld [vmem:[#allocation44_spill] sm:$0xff] }
 0x561   :  { %v20535_v20 = vrot.slane %v19393_v8, %v21112_v60 }
 0x562   :  { %11561 = vmatpush1.bf16.msra.mxu1 %v18873_v25  ;;  %v18890_v25 = vld [vmem:[#allocation6 + $0x15b4] ss:$52 sps:$4 sm:$0xff]  }
 0x563   :  { %12072 = vmatpush1.bf16.msra.mxu0 %v18876_v57  ;;  %11562 = vmatprep.subr.bf16.mxu1 %v18881_v35  ;;  %v21115_v57 = vld [vmem:[#allocation47_spill] sm:$0xff] }
 0x564   :  { %11534 = vmatmul.mubr.bf16.gmra.mrb[88].mxu1 %v21113_v5  ;;  %12073 = vmatprep.subr.bf16.mxu0 %v18884_v33 }
 0x565   :  { %12045 = vmatmul.mubr.bf16.gmra.mrb[96].mxu0 %v21113_v5  ;;  %11543 = vmatprep.mubr.bf16.mxu1 %v21115_v57  ;;  %v10785_v35 = vpop.f32.mrb[64].mxu1 }
 0x566   :  { %11563 = vmatpush1.bf16.msra.mxu1 %v18879_v45  ;;  %12054 = vmatprep.mubr.bf16.mxu0 %v21115_v57  ;;  %v16630_v43 = vadd.f32 %v10785_v35, %v20527_v40  ;;  %v11296_v60 = vpop.f32.mrb[72].mxu0  ;;  %v10787_v28 = vpop.f32.mrb[65].mxu1 }
 0x567   :  { %12074 = vmatpush1.bf16.msra.mxu0 %v18882_v63  ;;  %v16646_v33 = vadd.f32 %v11296_v60, %v20531_v18  ;;  %11564 = vmatprep.subr.bf16.mxu1 %v18887_v49  ;;  %v16631_v24 = vadd.f32 %v10787_v28, %v20535_v20  ;;  %v11298_v8 = vpop.f32.mrb[73].mxu0  ;;  %v10789_v5 = vpop.f32.mrb[66].mxu1 }
 0x568   :  { %12075 = vmatprep.subr.bf16.mxu0 %v18890_v25  ;;  %v16647_v45 = vadd.f32 %v11298_v8, %v20540_v37  ;;  %v16632_v57 = vadd.f32 %v10789_v5, %v20527_v40  ;;  %v11300_v19 = vpop.f32.mrb[74].mxu0  ;;  %v10791_v35 = vpop.f32.mrb[67].mxu1  ;;  %v12816_v49 = vmax.f32 %v16630_v43, 0.0 }
 0x569   :  { %v16648_v48 = vadd.f32 %v11300_v19, %v20531_v18  ;;  %v16633_v63 = vadd.f32 %v10791_v35, %v20535_v20  ;;  %v11302_v60 = vpop.f32.mrb[75].mxu0  ;;  %v12818_v25 = vmax.f32 %v16646_v33, 0.0  ;;  %v12817_v17 = vmax.f32 %v16631_v24, 0.0  ;;  %v21119_v33 = vld [vmem:[#allocation43_spill] sm:$0xff] }
 0x56a   :  { %11565 = vmatpush1.bf16.msra.mxu1 %v18885_v41  ;;  %v12829_v46 = vmax.f32 %v16632_v57, 0.0  ;;  %v16649_v28 = vadd.f32 %v11302_v60, %v20540_v37  ;;  %v12819_v51 = vmax.f32 %v16647_v45, 0.0  ;;  %v18902_v41 = vld [vmem:[#allocation6 + $0x1684] ss:$52 sps:$4 sm:$0xff]  }
 0x56b   :  { %12076 = vmatpush1.bf16.msra.mxu0 %v18888_v22  ;;  %v12831_v8 = vmax.f32 %v16648_v48, 0.0  ;;  %v12830_v5 = vmax.f32 %v16633_v63, 0.0  ;;  %11566 = vmatprep.subr.bf16.mxu1 %v18893_v61  ;;  %v18897_v24 = vld [vmem:[#allocation6 + $0x1678] ss:$52 sps:$4 sm:$0xff]  }
 0x56c   :  { %v20553_v15 = vpack.c.bf16 %v12829_v46, %v12816_v49  ;;  %v12832_v19 = vmax.f32 %v16649_v28, 0.0  ;;  %11544 = vmatmul.mubr.bf16.gmra.mrb[92].mxu1 %v20078_v38  ;;  %12077 = vmatprep.subr.bf16.mxu0 %v18896_v44  ;;  %v18905_v49 = vld [vmem:[#allocation6 + $0x16e4] ss:$52 sps:$4 sm:$0xff]  }
 0x56d   :  { %v20556_v57 = vpack.c.bf16 %v12831_v8, %v12818_v25  ;;  %v20558_v43 = vpack.c.bf16 %v12830_v5, %v12817_v17  ;;  %12055 = vmatmul.mubr.bf16.gmra.mrb[100].mxu0 %v20078_v38  ;;  %11586 = vmatprep.mubr.bf16.mxu1 %v21119_v33  ;;  %v10795_v48 = vpop.f32.mrb[68].mxu1  ;;  %v18900_v17 = vld [vmem:[#allocation6 + $0x1680] ss:$52 sps:$4 sm:$0xff]  }
 0x56e   :  { %21116 = vst [vmem:[#allocation27_spill] sm:$0xff] %v20553_v15  ;;  %v20562_v22 = vpack.c.bf16 %v12832_v19, %v12819_v51  ;;  %11567 = vmatpush1.bf16.msra.mxu1 %v18891_v30  ;;  %12097 = vmatprep.mubr.bf16.mxu0 %v21119_v33  ;;  %v16634_v46 = vadd.f32 %v10795_v48, %v20527_v40  ;;  %v11306_v61 = vpop.f32.mrb[76].mxu0  ;;  %v10797_v44 = vpop.f32.mrb[69].mxu1  ;;  %v18908_v8 = vld [vmem:[#allocation6 + $0x16ec] ss:$52 sps:$4 sm:$0xff]  }
 0x56f   :  { %21117 = vst [vmem:[#allocation26_spill] sm:$0xff] %v20556_v57  ;;  %21118 = vst [vmem:[#allocation20_spill] sm:$0xff] %v20558_v43  ;;  %12078 = vmatpush1.bf16.msra.mxu0 %v18894_v12  ;;  %v16650_v45 = vadd.f32 %v11306_v61, %v20531_v18  ;;  %11568 = vmatprep.subr.bf16.mxu1 %v18899_v62  ;;  %v16635_v35 = vadd.f32 %v10797_v44, %v20535_v20  ;;  %v11308_v63 = vpop.f32.mrb[77].mxu0  ;;  %v10799_v60 = vpop.f32.mrb[70].mxu1  ;;  %v18903_v44 = vld [vmem:[#allocation6 + $0x16e0] ss:$52 sps:$4 sm:$0xff]  }
 0x570   :  { %21120 = vst [vmem:[#allocation43_spill] sm:$0xff] %v20562_v22  ;;  %12079 = vmatprep.subr.bf16.mxu0 %v18902_v41  ;;  %v16651_v51 = vadd.f32 %v11308_v63, %v20540_v37  ;;  %v16636_v30 = vadd.f32 %v10799_v60, %v20527_v40  ;;  %v11310_v28 = vpop.f32.mrb[78].mxu0  ;;  %v10801_v25 = vpop.f32.mrb[71].mxu1  ;;  %v12842_v62 = vmax.f32 %v16634_v46, 0.0  ;;  %v18906_v57 = vld [vmem:[#allocation6 + $0x16e8] ss:$52 sps:$4 sm:$0xff]  }
 0x571   :  { %v16652_v5 = vadd.f32 %v11310_v28, %v20531_v18  ;;  %v16637_v12 = vadd.f32 %v10801_v25, %v20535_v20  ;;  %v11312_v19 = vpop.f32.mrb[79].mxu0  ;;  %v12844_v41 = vmax.f32 %v16650_v45, 0.0  ;;  %v12843_v22 = vmax.f32 %v16635_v35, 0.0  ;;  %v18911_v15 = vld [vmem:[#allocation6 + $0x174c] ss:$52 sps:$4 sm:$0xff]  }
 0x572   :  { %11569 = vmatpush1.bf16.msra.mxu1 %v18897_v24  ;;  %v12855_v48 = vmax.f32 %v16636_v30, 0.0  ;;  %v16653_v61 = vadd.f32 %v11312_v19, %v20540_v37  ;;  %v12845_v43 = vmax.f32 %v16651_v51, 0.0  ;;  %v18914_v25 = vld [vmem:[#allocation6 + $0x1754] ss:$52 sps:$4 sm:$0xff]  }
 0x573   :  { %12080 = vmatpush1.bf16.msra.mxu0 %v18900_v17  ;;  %v12857_v63 = vmax.f32 %v16652_v5, 0.0  ;;  %v12856_v60 = vmax.f32 %v16637_v12, 0.0  ;;  %11570 = vmatprep.subr.bf16.mxu1 %v18905_v49  ;;  %v18909_v35 = vld [vmem:[#allocation6 + $0x1748] ss:$52 sps:$4 sm:$0xff]   ;;  %v18912_v5 = vld [vmem:[#allocation6 + $0x1750] ss:$52 sps:$4 sm:$0xff]  }
 0x574   :  { %v20573_v38 = vpack.c.bf16 %v12855_v48, %v12842_v62  ;;  %v12858_v28 = vmax.f32 %v16653_v61, 0.0  ;;  %12081 = vmatprep.subr.bf16.mxu0 %v18908_v8 }
 0x575   :  { %v20575_v46 = vpack.c.bf16 %v12857_v63, %v12844_v41  ;;  %v20577_v24 = vpack.c.bf16 %v12856_v60, %v12843_v22  ;;  %v10805_v30 = vpop.f32.mrb[72].mxu1  ;;  %v18917_v22 = vld [vmem:[#allocation6 + $0x17b4] ss:$52 sps:$4 sm:$0xff]   ;;  %v18920_v41 = vld [vmem:[#allocation6 + $0x17bc] ss:$52 sps:$4 sm:$0xff]  }
 0x576   :  { %21121 = vst [vmem:[#allocation64_spill] sm:$0xff] %v20573_v38  ;;  %v20579_v19 = vpack.c.bf16 %v12858_v28, %v12845_v43  ;;  %11571 = vmatpush1.bf16.msra.mxu1 %v18903_v44  ;;  %v16638_v45 = vadd.f32 %v10805_v30, %v20527_v40  ;;  %v11316_v17 = vpop.f32.mrb[80].mxu0  ;;  %v10807_v49 = vpop.f32.mrb[73].mxu1 }
 0x577   :  { %21122 = vst [vmem:[#allocation65_spill] sm:$0xff] %v20575_v46  ;;  %21123 = vst [vmem:[#allocation66_spill] sm:$0xff] %v20577_v24  ;;  %12082 = vmatpush1.bf16.msra.mxu0 %v18906_v57  ;;  %v16654_v51 = vadd.f32 %v11316_v17, %v20531_v18  ;;  %11572 = vmatprep.subr.bf16.mxu1 %v18911_v15  ;;  %v16639_v8 = vadd.f32 %v10807_v49, %v20535_v20  ;;  %v11318_v12 = vpop.f32.mrb[81].mxu0  ;;  %v10809_v62 = vpop.f32.mrb[74].mxu1  ;;  %v18915_v17 = vld [vmem:[#allocation6 + $0x17b0] ss:$52 sps:$4 sm:$0xff]  }
 0x578   :  { %21124 = vst [vmem:[#allocation67_spill] sm:$0xff] %v20579_v19  ;;  %12083 = vmatprep.subr.bf16.mxu0 %v18914_v25  ;;  %v16655_v43 = vadd.f32 %v11318_v12, %v20540_v37  ;;  %v16640_v48 = vadd.f32 %v10809_v62, %v20527_v40  ;;  %v11320_v61 = vpop.f32.mrb[82].mxu0  ;;  %v10811_v44 = vpop.f32.mrb[75].mxu1  ;;  %v12868_v15 = vmax.f32 %v16638_v45, 0.0  ;;  %v18918_v49 = vld [vmem:[#allocation6 + $0x17b8] ss:$52 sps:$4 sm:$0xff]  }
 0x579   :  { %v16656_v63 = vadd.f32 %v11320_v61, %v20531_v18  ;;  %v16641_v57 = vadd.f32 %v10811_v44, %v20535_v20  ;;  %v11322_v60 = vpop.f32.mrb[83].mxu0  ;;  %v12870_v25 = vmax.f32 %v16654_v51, 0.0  ;;  %v12869_v46 = vmax.f32 %v16639_v8, 0.0  ;;  %v18923_v19 = vld [vmem:[#allocation6 + $0x181c] ss:$52 sps:$4 sm:$0xff]  }
 0x57a   :  { %11573 = vmatpush1.bf16.msra.mxu1 %v18909_v35  ;;  %v12881_v28 = vmax.f32 %v16640_v48, 0.0  ;;  %v16657_v30 = vadd.f32 %v11322_v60, %v20540_v37  ;;  %v12871_v38 = vmax.f32 %v16655_v43, 0.0  ;;  %v18926_v44 = vld [vmem:[#allocation6 + $0x1824] ss:$52 sps:$4 sm:$0xff]  }
 0x57b   :  { %12084 = vmatpush1.bf16.msra.mxu0 %v18912_v5  ;;  %v12883_v12 = vmax.f32 %v16656_v63, 0.0  ;;  %v12882_v62 = vmax.f32 %v16641_v57, 0.0  ;;  %11574 = vmatprep.subr.bf16.mxu1 %v18917_v22  ;;  %v18921_v8 = vld [vmem:[#allocation6 + $0x1818] ss:$52 sps:$4 sm:$0xff]   ;;  %v18924_v63 = vld [vmem:[#allocation6 + $0x1820] ss:$52 sps:$4 sm:$0xff]  }
 0x57c   :  { %v20589_v24 = vpack.c.bf16 %v12881_v28, %v12868_v15  ;;  %v12884_v61 = vmax.f32 %v16657_v30, 0.0  ;;  %12085 = vmatprep.subr.bf16.mxu0 %v18920_v41 }
 0x57d   :  { %v20591_v45 = vpack.c.bf16 %v12883_v12, %v12870_v25  ;;  %v20593_v35 = vpack.c.bf16 %v12882_v62, %v12869_v46  ;;  %v10815_v48 = vpop.f32.mrb[76].mxu1  ;;  %v18929_v46 = vld [vmem:[#allocation6 + $0x1884] ss:$52 sps:$4 sm:$0xff]   ;;  %v18932_v25 = vld [vmem:[#allocation6 + $0x188c] ss:$52 sps:$4 sm:$0xff]  }
 0x57e   :  { %21125 = vst [vmem:[#allocation68_spill] sm:$0xff] %v20589_v24  ;;  %v20595_v60 = vpack.c.bf16 %v12884_v61, %v12871_v38  ;;  %11575 = vmatpush1.bf16.msra.mxu1 %v18915_v17  ;;  %v16642_v51 = vadd.f32 %v10815_v48, %v20527_v40  ;;  %v11326_v5 = vpop.f32.mrb[84].mxu0  ;;  %v10817_v22 = vpop.f32.mrb[77].mxu1 }
 0x57f   :  { %21126 = vst [vmem:[#allocation69_spill] sm:$0xff] %v20591_v45  ;;  %12086 = vmatpush1.bf16.msra.mxu0 %v18918_v49  ;;  %v16658_v43 = vadd.f32 %v11326_v5, %v20531_v18  ;;  %11576 = vmatprep.subr.bf16.mxu1 %v18923_v19  ;;  %v16643_v41 = vadd.f32 %v10817_v22, %v20535_v20  ;;  %v11328_v57 = vpop.f32.mrb[85].mxu0  ;;  %v10819_v15 = vpop.f32.mrb[78].mxu1  ;;  %v18927_v5 = vld [vmem:[#allocation6 + $0x1880] ss:$52 sps:$4 sm:$0xff]  }
 0x580   :  { %21127 = vst [vmem:[#allocation70_spill] sm:$0xff] %v20595_v60  ;;  %12087 = vmatprep.subr.bf16.mxu0 %v18926_v44  ;;  %v16659_v38 = vadd.f32 %v11328_v57, %v20540_v37  ;;  %v16644_v28 = vadd.f32 %v10819_v15, %v20527_v40  ;;  %v11330_v30 = vpop.f32.mrb[86].mxu0  ;;  %v10821_v17 = vpop.f32.mrb[79].mxu1  ;;  %v12894_v19 = vmax.f32 %v16642_v51, 0.0  ;;  %v18930_v22 = vld [vmem:[#allocation6 + $0x1888] ss:$52 sps:$4 sm:$0xff]  }
 0x581   :  { %v16660_v12 = vadd.f32 %v11330_v30, %v20531_v18  ;;  %v16645_v49 = vadd.f32 %v10821_v17, %v20535_v20  ;;  %v11332_v62 = vpop.f32.mrb[87].mxu0  ;;  %v12896_v44 = vmax.f32 %v16658_v43, 0.0  ;;  %v12895_v45 = vmax.f32 %v16643_v41, 0.0  ;;  %v18935_v15 = vld [vmem:[#allocation6 + $0x18ec] ss:$52 sps:$4 sm:$0xff]  }
 0x582   :  { %11577 = vmatpush1.bf16.msra.mxu1 %v18921_v8  ;;  %v12907_v61 = vmax.f32 %v16644_v28, 0.0  ;;  %v16661_v48 = vadd.f32 %v11332_v62, %v20540_v37  ;;  %v12897_v60 = vmax.f32 %v16659_v38, 0.0  ;;  %v18938_v20 = vld [vmem:[#allocation6 + $0x18f4] ss:$52 sps:$4 sm:$0xff]   ;;  %v18939_v38 = vld [vmem:[#allocation6 + $0x1950] ss:$52 sps:$4 sm:$0xff]  }
 0x583   :  { %12088 = vmatpush1.bf16.msra.mxu0 %v18924_v63  ;;  %v12909_v57 = vmax.f32 %v16660_v12, 0.0  ;;  %v12908_v40 = vmax.f32 %v16645_v49, 0.0  ;;  %11578 = vmatprep.subr.bf16.mxu1 %v18929_v46  ;;  %v18933_v43 = vld [vmem:[#allocation6 + $0x18e8] ss:$52 sps:$4 sm:$0xff]   ;;  %v18936_v63 = vld [vmem:[#allocation6 + $0x18f0] ss:$52 sps:$4 sm:$0xff]  }
 0x584   :  { %v20605_v24 = vpack.c.bf16 %v12907_v61, %v12894_v19  ;;  %v12910_v18 = vmax.f32 %v16661_v48, 0.0  ;;  %12089 = vmatprep.subr.bf16.mxu0 %v18932_v25  ;;  %v18941_v41 = vld [vmem:[#allocation6 + $0x1954] ss:$52 sps:$4 sm:$0xff]   ;;  %v18944_v46 = vld [vmem:[#allocation6 + $0x195c] ss:$52 sps:$4 sm:$0xff]  }
 0x585   :  { %v20607_v51 = vpack.c.bf16 %v12909_v57, %v12896_v44  ;;  %v20609_v8 = vpack.c.bf16 %v12908_v40, %v12895_v45  ;;  %v18942_v28 = vld [vmem:[#allocation6 + $0x1958] ss:$52 sps:$4 sm:$0xff]   ;;  %v18947_v30 = vld [vmem:[#allocation6 + $0x19bc] ss:$52 sps:$4 sm:$0xff]   ;;  %v18951_v49 = vld [vmem:[#allocation6 + $0x1a20] ss:$52 sps:$4 sm:$0xff]  }
 0x586   :  { %v20611_v37 = vpack.c.bf16 %v12910_v18, %v12897_v60  ;;  %11579 = vmatpush1.bf16.msra.mxu1 %v18927_v5  ;;  %v18950_v17 = vld [vmem:[#allocation6 + $0x19c4] ss:$52 sps:$4 sm:$0xff]   ;;  %v18948_v60 = vld [vmem:[#allocation6 + $0x19c0] ss:$52 sps:$4 sm:$0xff]   ;;  %v18954_v62 = vld [vmem:[#allocation6 + $0x1a28] ss:$52 sps:$4 sm:$0xff]  }
 0x587   :  { %12090 = vmatpush1.bf16.msra.mxu0 %v18930_v22  ;;  %11580 = vmatprep.subr.bf16.mxu1 %v18935_v15  ;;  %v18945_v45 = vld [vmem:[#allocation6 + $0x19b8] ss:$52 sps:$4 sm:$0xff]   ;;  %v18962_v61 = vld [vmem:[#allocation6 + $0x1a94] ss:$52 sps:$4 sm:$0xff]   ;;  %v18960_v5 = vld [vmem:[#allocation6 + $0x1a90] ss:$52 sps:$4 sm:$0xff]  }
 0x588   :  { %12091 = vmatprep.subr.bf16.mxu0 %v18938_v20  ;;  %v18953_v25 = vld [vmem:[#allocation6 + $0x1a24] ss:$52 sps:$4 sm:$0xff]   ;;  %v18956_v12 = vld [vmem:[#allocation6 + $0x1a2c] ss:$52 sps:$4 sm:$0xff]   ;;  %v18957_v48 = vld [vmem:[#allocation6 + $0x1a88] ss:$52 sps:$4 sm:$0xff]  }
 0x589   :  { %v18959_v19 = vld [vmem:[#allocation6 + $0x1a8c] ss:$52 sps:$4 sm:$0xff]   ;;  %v18965_v22 = vld [vmem:[#allocation6 + $0x1af4] ss:$52 sps:$4 sm:$0xff]   ;;  %v18968_v44 = vld [vmem:[#allocation6 + $0x1afc] ss:$52 sps:$4 sm:$0xff]  }
 0x58a   :  { %11581 = vmatpush1.bf16.msra.mxu1 %v18933_v43  ;;  %v18963_v57 = vld [vmem:[#allocation6 + $0x1af0] ss:$52 sps:$4 sm:$0xff]   ;;  %v18966_v40 = vld [vmem:[#allocation6 + $0x1af8] ss:$52 sps:$4 sm:$0xff]   ;;  %v18972_v43 = vld [vmem:[#allocation6 + $0x1b60] ss:$52 sps:$4 sm:$0xff]  }
 0x58b   :  { %12092 = vmatpush1.bf16.msra.mxu0 %v18936_v63  ;;  %11582 = vmatprep.subr.bf16.mxu1 %v18941_v41  ;;  %v18971_v15 = vld [vmem:[#allocation6 + $0x1b5c] ss:$52 sps:$4 sm:$0xff]   ;;  %v18974_v18 = vld [vmem:[#allocation6 + $0x1b64] ss:$52 sps:$4 sm:$0xff]   ;;  %v18980_v41 = vld [vmem:[#allocation6 + $0x1bcc] ss:$52 sps:$4 sm:$0xff]  }
 0x58c   :  { %12093 = vmatprep.subr.bf16.mxu0 %v18944_v46  ;;  %v18969_v20 = vld [vmem:[#allocation6 + $0x1b58] ss:$52 sps:$4 sm:$0xff]   ;;  %v18975_v46 = vld [vmem:[#allocation6 + $0x1bc0] ss:$52 sps:$4 sm:$0xff]  }
 0x58d   :  { %v18977_v63 = vld [vmem:[#allocation6 + $0x1bc4] ss:$52 sps:$4 sm:$0xff]  }
 0x58e   :  { %11583 = vmatpush1.bf16.msra.mxu1 %v18939_v38  ;;  %v18978_v38 = vld [vmem:[#allocation6 + $0x1bc8] ss:$52 sps:$4 sm:$0xff]  }
 0x58f   :  { %12094 = vmatpush1.bf16.msra.mxu0 %v18942_v28  ;;  %11584 = vmatprep.subr.bf16.mxu1 %v18947_v30  ;;  %v18983_v28 = vld [vmem:[#allocation6 + $0x1c2c] ss:$52 sps:$4 sm:$0xff]   ;;  %v18986_v30 = vld [vmem:[#allocation6 + $0x1c34] ss:$52 sps:$4 sm:$0xff]  }
 0x590   :  { %12095 = vmatprep.subr.bf16.mxu0 %v18950_v17  ;;  %v18981_v17 = vld [vmem:[#allocation6 + $0x1c28] ss:$52 sps:$4 sm:$0xff]  }
 0x592   :  { %11585 = vmatpush1.bf16.msra.mxu1 %v18945_v45  ;;  %v18984_v45 = vld [vmem:[#allocation6 + $0x1c30] ss:$52 sps:$4 sm:$0xff]  }
 0x593   :  { %12096 = vmatpush1.bf16.msra.mxu0 %v18948_v60  ;;  %11627 = vmatprep.subr.bf16.mxu1 %v18953_v25  ;;  %v18989_v60 = vld [vmem:[#allocation6 + $0x1c94] ss:$52 sps:$4 sm:$0xff]   ;;  %v18992_v25 = vld [vmem:[#allocation6 + $0x1c9c] ss:$52 sps:$4 sm:$0xff]  }
 0x594   :  { %12138 = vmatprep.subr.bf16.mxu0 %v18956_v12  ;;  %v18987_v12 = vld [vmem:[#allocation6 + $0x1c90] ss:$52 sps:$4 sm:$0xff]  }
 0x595   :  { %11587 = vmatmul.mubr.bf16.vlgmr.msra.gmra.mrb[80].mxu1 %v20040_v26 }
 0x596   :  { %12098 = vmatmul.mubr.bf16.vlgmr.msra.gmra.mrb[88].mxu0 %v20040_v26  ;;  %11596 = vmatprep.mubr.bf16.mxu1 %v20059_v6 }
 0x597   :  { %11628 = vmatpush1.bf16.msra.mxu1 %v18951_v49  ;;  %12107 = vmatprep.mubr.bf16.mxu0 %v20059_v6  ;;  %v18990_v49 = vld [vmem:[#allocation6 + $0x1c98] ss:$52 sps:$4 sm:$0xff]  }
 0x598   :  { %12139 = vmatpush1.bf16.msra.mxu0 %v18954_v62  ;;  %11629 = vmatprep.subr.bf16.mxu1 %v18959_v19  ;;  %v18995_v62 = vld [vmem:[#allocation6 + $0x1cfc] ss:$52 sps:$4 sm:$0xff]   ;;  %v18998_v19 = vld [vmem:[#allocation6 + $0x1d04] ss:$52 sps:$4 sm:$0xff]  }
 0x599   :  { %12140 = vmatprep.subr.bf16.mxu0 %v18962_v61  ;;  %v18993_v61 = vld [vmem:[#allocation6 + $0x1cf8] ss:$52 sps:$4 sm:$0xff]  }
 0x59b   :  { %11630 = vmatpush1.bf16.msra.mxu1 %v18957_v48  ;;  %v18996_v48 = vld [vmem:[#allocation6 + $0x1d00] ss:$52 sps:$4 sm:$0xff]  }
 0x59c   :  { %12141 = vmatpush1.bf16.msra.mxu0 %v18960_v5  ;;  %11631 = vmatprep.subr.bf16.mxu1 %v18965_v22  ;;  %v19001_v5 = vld [vmem:[#allocation6 + $0x1d64] ss:$52 sps:$4 sm:$0xff]   ;;  %v19004_v22 = vld [vmem:[#allocation6 + $0x1d6c] ss:$52 sps:$4 sm:$0xff]  }
 0x59d   :  { %11597 = vmatmul.mubr.bf16.gmra.mrb[84].mxu1 %v20056_v29  ;;  %12142 = vmatprep.subr.bf16.mxu0 %v18968_v44  ;;  %v18999_v44 = vld [vmem:[#allocation6 + $0x1d60] ss:$52 sps:$4 sm:$0xff]  }
 0x59e   :  { %12108 = vmatmul.mubr.bf16.gmra.mrb[92].mxu0 %v20056_v29  ;;  %11606 = vmatprep.mubr.bf16.mxu1 %v20085_v50 }
 0x59f   :  { %11632 = vmatpush1.bf16.msra.mxu1 %v18963_v57  ;;  %12117 = vmatprep.mubr.bf16.mxu0 %v20085_v50  ;;  %v19002_v57 = vld [vmem:[#allocation6 + $0x1d68] ss:$52 sps:$4 sm:$0xff]  }
 0x5a0   :  { %12143 = vmatpush1.bf16.msra.mxu0 %v18966_v40  ;;  %11633 = vmatprep.subr.bf16.mxu1 %v18971_v15  ;;  %v19007_v40 = vld [vmem:[#allocation6 + $0x1dcc] ss:$52 sps:$4 sm:$0xff]   ;;  %v19010_v15 = vld [vmem:[#allocation6 + $0x1dd4] ss:$52 sps:$4 sm:$0xff]  }
 0x5a1   :  { %12144 = vmatprep.subr.bf16.mxu0 %v18974_v18  ;;  %v19005_v18 = vld [vmem:[#allocation6 + $0x1dc8] ss:$52 sps:$4 sm:$0xff]  }
 0x5a3   :  { %11634 = vmatpush1.bf16.msra.mxu1 %v18969_v20  ;;  %v19008_v20 = vld [vmem:[#allocation6 + $0x1dd0] ss:$52 sps:$4 sm:$0xff]  }
 0x5a4   :  { %12145 = vmatpush1.bf16.msra.mxu0 %v18972_v43  ;;  %11635 = vmatprep.subr.bf16.mxu1 %v18977_v63  ;;  %v19013_v43 = vld [vmem:[#allocation6 + $0x1e34] ss:$52 sps:$4 sm:$0xff]   ;;  %v19016_v63 = vld [vmem:[#allocation6 + $0x1e3c] ss:$52 sps:$4 sm:$0xff]  }
 0x5a5   :  { %11607 = vmatmul.mubr.bf16.gmra.mrb[88].mxu1 %v20082_v34  ;;  %12146 = vmatprep.subr.bf16.mxu0 %v18980_v41  ;;  %v19011_v41 = vld [vmem:[#allocation6 + $0x1e30] ss:$52 sps:$4 sm:$0xff]  }
 0x5a6   :  { %12118 = vmatmul.mubr.bf16.gmra.mrb[96].mxu0 %v20082_v34  ;;  %11616 = vmatprep.mubr.bf16.mxu1 %v20110_v10 }
 0x5a7   :  { %11636 = vmatpush1.bf16.msra.mxu1 %v18975_v46  ;;  %12127 = vmatprep.mubr.bf16.mxu0 %v20110_v10  ;;  %v19014_v46 = vld [vmem:[#allocation6 + $0x1e38] ss:$52 sps:$4 sm:$0xff]  }
 0x5a8   :  { %12147 = vmatpush1.bf16.msra.mxu0 %v18978_v38  ;;  %11637 = vmatprep.subr.bf16.mxu1 %v18983_v28  ;;  %v19019_v38 = vld [vmem:[#allocation6 + $0x1e9c] ss:$52 sps:$4 sm:$0xff]   ;;  %v19022_v28 = vld [vmem:[#allocation6 + $0x1ea4] ss:$52 sps:$4 sm:$0xff]  }
 0x5a9   :  { %12148 = vmatprep.subr.bf16.mxu0 %v18986_v30  ;;  %v19017_v30 = vld [vmem:[#allocation6 + $0x1e98] ss:$52 sps:$4 sm:$0xff]  }
 0x5ab   :  { %11638 = vmatpush1.bf16.msra.mxu1 %v18981_v17  ;;  %v19020_v17 = vld [vmem:[#allocation6 + $0x1ea0] ss:$52 sps:$4 sm:$0xff]  }
 0x5ac   :  { %12149 = vmatpush1.bf16.msra.mxu0 %v18984_v45  ;;  %11639 = vmatprep.subr.bf16.mxu1 %v18989_v60  ;;  %v19025_v45 = vld [vmem:[#allocation6 + $0x1f04] ss:$52 sps:$4 sm:$0xff]   ;;  %v19028_v60 = vld [vmem:[#allocation6 + $0x1f0c] ss:$52 sps:$4 sm:$0xff]  }
 0x5ad   :  { %11617 = vmatmul.mubr.bf16.gmra.mrb[92].mxu1 %v20107_v36  ;;  %12150 = vmatprep.subr.bf16.mxu0 %v18992_v25  ;;  %v19023_v25 = vld [vmem:[#allocation6 + $0x1f00] ss:$52 sps:$4 sm:$0xff]  }
 0x5ae   :  { %12128 = vmatmul.mubr.bf16.gmra.mrb[100].mxu0 %v20107_v36  ;;  %11659 = vmatprep.mubr.bf16.mxu1 %v20100_v52 }
 0x5af   :  { %11640 = vmatpush1.bf16.msra.mxu1 %v18987_v12  ;;  %12170 = vmatprep.mubr.bf16.mxu0 %v20100_v52  ;;  %v19026_v12 = vld [vmem:[#allocation6 + $0x1f08] ss:$52 sps:$4 sm:$0xff]  }
 0x5b0   :  { %12151 = vmatpush1.bf16.msra.mxu0 %v18990_v49  ;;  %11641 = vmatprep.subr.bf16.mxu1 %v18995_v62  ;;  %v19031_v49 = vld [vmem:[#allocation6 + $0x1f6c] ss:$52 sps:$4 sm:$0xff]   ;;  %v19034_v62 = vld [vmem:[#allocation6 + $0x1f74] ss:$52 sps:$4 sm:$0xff]  }
 0x5b1   :  { %12152 = vmatprep.subr.bf16.mxu0 %v18998_v19  ;;  %v19029_v19 = vld [vmem:[#allocation6 + $0x1f68] ss:$52 sps:$4 sm:$0xff]  }
 0x5b3   :  { %11642 = vmatpush1.bf16.msra.mxu1 %v18993_v61  ;;  %v19032_v61 = vld [vmem:[#allocation6 + $0x1f70] ss:$52 sps:$4 sm:$0xff]  }
 0x5b4   :  { %12153 = vmatpush1.bf16.msra.mxu0 %v18996_v48  ;;  %11643 = vmatprep.subr.bf16.mxu1 %v19001_v5  ;;  %v19037_v48 = vld [vmem:[#allocation6 + $0x1fd4] ss:$52 sps:$4 sm:$0xff]   ;;  %v19040_v5 = vld [vmem:[#allocation6 + $0x1fdc] ss:$52 sps:$4 sm:$0xff]  }
 0x5b5   :  { %12154 = vmatprep.subr.bf16.mxu0 %v19004_v22  ;;  %v19035_v22 = vld [vmem:[#allocation6 + $0x1fd0] ss:$52 sps:$4 sm:$0xff]  }
 0x5b7   :  { %11644 = vmatpush1.bf16.msra.mxu1 %v18999_v44  ;;  %v19038_v44 = vld [vmem:[#allocation6 + $0x1fd8] ss:$52 sps:$4 sm:$0xff]  }
 0x5b8   :  { %12155 = vmatpush1.bf16.msra.mxu0 %v19002_v57  ;;  %11645 = vmatprep.subr.bf16.mxu1 %v19007_v40  ;;  %v19043_v57 = vld [vmem:[#allocation6 + $0x203c] ss:$52 sps:$4 sm:$0xff]   ;;  %v19046_v40 = vld [vmem:[#allocation6 + $0x2044] ss:$52 sps:$4 sm:$0xff]  }
 0x5b9   :  { %12156 = vmatprep.subr.bf16.mxu0 %v19010_v15  ;;  %v19041_v15 = vld [vmem:[#allocation6 + $0x2038] ss:$52 sps:$4 sm:$0xff]  }
 0x5bb   :  { %11646 = vmatpush1.bf16.msra.mxu1 %v19005_v18  ;;  %v19044_v18 = vld [vmem:[#allocation6 + $0x2040] ss:$52 sps:$4 sm:$0xff]  }
 0x5bc   :  { %12157 = vmatpush1.bf16.msra.mxu0 %v19008_v20  ;;  %11647 = vmatprep.subr.bf16.mxu1 %v19013_v43  ;;  %v19049_v20 = vld [vmem:[#allocation6 + $0x20a4] ss:$52 sps:$4 sm:$0xff]   ;;  %v19052_v43 = vld [vmem:[#allocation6 + $0x20ac] ss:$52 sps:$4 sm:$0xff]  }
 0x5bd   :  { %12158 = vmatprep.subr.bf16.mxu0 %v19016_v63  ;;  %v19047_v63 = vld [vmem:[#allocation6 + $0x20a0] ss:$52 sps:$4 sm:$0xff]  }
 0x5bf   :  { %11648 = vmatpush1.bf16.msra.mxu1 %v19011_v41  ;;  %v19050_v41 = vld [vmem:[#allocation6 + $0x20a8] ss:$52 sps:$4 sm:$0xff]  }
 0x5c0   :  { %12159 = vmatpush1.bf16.msra.mxu0 %v19014_v46  ;;  %11649 = vmatprep.subr.bf16.mxu1 %v19019_v38  ;;  %v19055_v46 = vld [vmem:[#allocation6 + $0x210c] ss:$52 sps:$4 sm:$0xff]   ;;  %v19058_v38 = vld [vmem:[#allocation6 + $0x2114] ss:$52 sps:$4 sm:$0xff]  }
 0x5c1   :  { %12160 = vmatprep.subr.bf16.mxu0 %v19022_v28  ;;  %v19053_v28 = vld [vmem:[#allocation6 + $0x2108] ss:$52 sps:$4 sm:$0xff]  }
 0x5c3   :  { %11650 = vmatpush1.bf16.msra.mxu1 %v19017_v30  ;;  %v19056_v30 = vld [vmem:[#allocation6 + $0x2110] ss:$52 sps:$4 sm:$0xff]  }
 0x5c4   :  { %12161 = vmatpush1.bf16.msra.mxu0 %v19020_v17  ;;  %11651 = vmatprep.subr.bf16.mxu1 %v19025_v45  ;;  %v19061_v17 = vld [vmem:[#allocation6 + $0x2174] ss:$52 sps:$4 sm:$0xff]   ;;  %v19064_v45 = vld [vmem:[#allocation6 + $0x217c] ss:$52 sps:$4 sm:$0xff]  }
 0x5c5   :  { %12162 = vmatprep.subr.bf16.mxu0 %v19028_v60  ;;  %v19059_v60 = vld [vmem:[#allocation6 + $0x2170] ss:$52 sps:$4 sm:$0xff]  }
 0x5c7   :  { %11652 = vmatpush1.bf16.msra.mxu1 %v19023_v25  ;;  %v19062_v25 = vld [vmem:[#allocation6 + $0x2178] ss:$52 sps:$4 sm:$0xff]  }
 0x5c8   :  { %12163 = vmatpush1.bf16.msra.mxu0 %v19026_v12  ;;  %11653 = vmatprep.subr.bf16.mxu1 %v19031_v49  ;;  %v19067_v12 = vld [vmem:[#allocation6 + $0x21dc] ss:$52 sps:$4 sm:$0xff]   ;;  %v19070_v49 = vld [vmem:[#allocation6 + $0x21e4] ss:$52 sps:$4 sm:$0xff]  }
 0x5c9   :  { %12164 = vmatprep.subr.bf16.mxu0 %v19034_v62  ;;  %v19065_v62 = vld [vmem:[#allocation6 + $0x21d8] ss:$52 sps:$4 sm:$0xff]  }
 0x5cb   :  { %11654 = vmatpush1.bf16.msra.mxu1 %v19029_v19  ;;  %v19068_v19 = vld [vmem:[#allocation6 + $0x21e0] ss:$52 sps:$4 sm:$0xff]  }
 0x5cc   :  { %12165 = vmatpush1.bf16.msra.mxu0 %v19032_v61  ;;  %11655 = vmatprep.subr.bf16.mxu1 %v19037_v48  ;;  %v19073_v61 = vld [vmem:[#allocation6 + $0x2244] ss:$52 sps:$4 sm:$0xff]   ;;  %v19076_v48 = vld [vmem:[#allocation6 + $0x224c] ss:$52 sps:$4 sm:$0xff]  }
 0x5cd   :  { %12166 = vmatprep.subr.bf16.mxu0 %v19040_v5  ;;  %v19071_v5 = vld [vmem:[#allocation6 + $0x2240] ss:$52 sps:$4 sm:$0xff]  }
 0x5cf   :  { %11656 = vmatpush1.bf16.msra.mxu1 %v19035_v22  ;;  %v19074_v22 = vld [vmem:[#allocation6 + $0x2248] ss:$52 sps:$4 sm:$0xff]  }
 0x5d0   :  { %12167 = vmatpush1.bf16.msra.mxu0 %v19038_v44  ;;  %11657 = vmatprep.subr.bf16.mxu1 %v19043_v57  ;;  %v19079_v44 = vld [vmem:[#allocation6 + $0x22ac] ss:$52 sps:$4 sm:$0xff]   ;;  %v19082_v57 = vld [vmem:[#allocation6 + $0x22b4] ss:$52 sps:$4 sm:$0xff]  }
 0x5d1   :  { %12168 = vmatprep.subr.bf16.mxu0 %v19046_v40  ;;  %v19077_v40 = vld [vmem:[#allocation6 + $0x22a8] ss:$52 sps:$4 sm:$0xff]  }
 0x5d3   :  { %11658 = vmatpush1.bf16.msra.mxu1 %v19041_v15  ;;  %v19080_v15 = vld [vmem:[#allocation6 + $0x22b0] ss:$52 sps:$4 sm:$0xff]  }
 0x5d4   :  { %12169 = vmatpush1.bf16.msra.mxu0 %v19044_v18  ;;  %11700 = vmatprep.subr.bf16.mxu1 %v19049_v20  ;;  %v19085_v18 = vld [vmem:[#allocation6 + $0x2314] ss:$52 sps:$4 sm:$0xff]   ;;  %v19088_v20 = vld [vmem:[#allocation6 + $0x231c] ss:$52 sps:$4 sm:$0xff]  }
 0x5d5   :  { %12211 = vmatprep.subr.bf16.mxu0 %v19052_v43  ;;  %v19083_v43 = vld [vmem:[#allocation6 + $0x2310] ss:$52 sps:$4 sm:$0xff]  }
 0x5d6   :  { %11660 = vmatmul.mubr.bf16.vlgmr.msra.gmra.mrb[80].mxu1 %v20094_v11 }
 0x5d7   :  { %12171 = vmatmul.mubr.bf16.vlgmr.msra.gmra.mrb[88].mxu0 %v20094_v11  ;;  %11669 = vmatprep.mubr.bf16.mxu1 %v20124_v2 }
 0x5d8   :  { %11701 = vmatpush1.bf16.msra.mxu1 %v19047_v63  ;;  %12180 = vmatprep.mubr.bf16.mxu0 %v20124_v2  ;;  %v19086_v63 = vld [vmem:[#allocation6 + $0x2318] ss:$52 sps:$4 sm:$0xff]  }
 0x5d9   :  { %12212 = vmatpush1.bf16.msra.mxu0 %v19050_v41  ;;  %11702 = vmatprep.subr.bf16.mxu1 %v19055_v46  ;;  %v19091_v41 = vld [vmem:[#allocation6 + $0x237c] ss:$52 sps:$4 sm:$0xff]   ;;  %v19094_v46 = vld [vmem:[#allocation6 + $0x2384] ss:$52 sps:$4 sm:$0xff]  }
 0x5da   :  { %12213 = vmatprep.subr.bf16.mxu0 %v19058_v38  ;;  %v19089_v38 = vld [vmem:[#allocation6 + $0x2378] ss:$52 sps:$4 sm:$0xff]  }
 0x5dc   :  { %11703 = vmatpush1.bf16.msra.mxu1 %v19053_v28  ;;  %v19092_v28 = vld [vmem:[#allocation6 + $0x2380] ss:$52 sps:$4 sm:$0xff]  }
 0x5dd   :  { %12214 = vmatpush1.bf16.msra.mxu0 %v19056_v30  ;;  %11704 = vmatprep.subr.bf16.mxu1 %v19061_v17  ;;  %v19097_v30 = vld [vmem:[#allocation6 + $0x23e4] ss:$52 sps:$4 sm:$0xff]   ;;  %v19100_v17 = vld [vmem:[#allocation6 + $0x23ec] ss:$52 sps:$4 sm:$0xff]  }
 0x5de   :  { %11670 = vmatmul.mubr.bf16.gmra.mrb[84].mxu1 %v20122_v9  ;;  %12215 = vmatprep.subr.bf16.mxu0 %v19064_v45  ;;  %v19095_v45 = vld [vmem:[#allocation6 + $0x23e0] ss:$52 sps:$4 sm:$0xff]  }
 0x5df   :  { %12181 = vmatmul.mubr.bf16.gmra.mrb[92].mxu0 %v20122_v9  ;;  %11679 = vmatprep.mubr.bf16.mxu1 %v20144_v54 }
 0x5e0   :  { %11705 = vmatpush1.bf16.msra.mxu1 %v19059_v60  ;;  %12190 = vmatprep.mubr.bf16.mxu0 %v20144_v54  ;;  %v19098_v60 = vld [vmem:[#allocation6 + $0x23e8] ss:$52 sps:$4 sm:$0xff]  }
 0x5e1   :  { %12216 = vmatpush1.bf16.msra.mxu0 %v19062_v25  ;;  %11706 = vmatprep.subr.bf16.mxu1 %v19067_v12  ;;  %v19103_v25 = vld [vmem:[#allocation6 + $0x244c] ss:$52 sps:$4 sm:$0xff]   ;;  %v19106_v12 = vld [vmem:[#allocation6 + $0x2454] ss:$52 sps:$4 sm:$0xff]  }
 0x5e2   :  { %12217 = vmatprep.subr.bf16.mxu0 %v19070_v49  ;;  %v19101_v49 = vld [vmem:[#allocation6 + $0x2448] ss:$52 sps:$4 sm:$0xff]  }
 0x5e4   :  { %11707 = vmatpush1.bf16.msra.mxu1 %v19065_v62  ;;  %v19104_v62 = vld [vmem:[#allocation6 + $0x2450] ss:$52 sps:$4 sm:$0xff]  }
 0x5e5   :  { %12218 = vmatpush1.bf16.msra.mxu0 %v19068_v19  ;;  %11708 = vmatprep.subr.bf16.mxu1 %v19073_v61  ;;  %v19109_v19 = vld [vmem:[#allocation6 + $0x24b4] ss:$52 sps:$4 sm:$0xff]   ;;  %v19112_v61 = vld [vmem:[#allocation6 + $0x24bc] ss:$52 sps:$4 sm:$0xff]  }
 0x5e6   :  { %11680 = vmatmul.mubr.bf16.gmra.mrb[88].mxu1 %v20142_v21  ;;  %12219 = vmatprep.subr.bf16.mxu0 %v19076_v48  ;;  %v19107_v48 = vld [vmem:[#allocation6 + $0x24b0] ss:$52 sps:$4 sm:$0xff]  }
 0x5e7   :  { %12191 = vmatmul.mubr.bf16.gmra.mrb[96].mxu0 %v20142_v21  ;;  %11689 = vmatprep.mubr.bf16.mxu1 %v20168_v42 }
 0x5e8   :  { %11709 = vmatpush1.bf16.msra.mxu1 %v19071_v5  ;;  %12200 = vmatprep.mubr.bf16.mxu0 %v20168_v42  ;;  %v19110_v5 = vld [vmem:[#allocation6 + $0x24b8] ss:$52 sps:$4 sm:$0xff]  }
 0x5e9   :  { %12220 = vmatpush1.bf16.msra.mxu0 %v19074_v22  ;;  %11710 = vmatprep.subr.bf16.mxu1 %v19079_v44  ;;  %v19115_v22 = vld [vmem:[#allocation6 + $0x251c] ss:$52 sps:$4 sm:$0xff]   ;;  %v19118_v44 = vld [vmem:[#allocation6 + $0x2524] ss:$52 sps:$4 sm:$0xff]  }
 0x5ea   :  { %12221 = vmatprep.subr.bf16.mxu0 %v19082_v57  ;;  %v19113_v57 = vld [vmem:[#allocation6 + $0x2518] ss:$52 sps:$4 sm:$0xff]  }
 0x5ec   :  { %11711 = vmatpush1.bf16.msra.mxu1 %v19077_v40  ;;  %v19116_v40 = vld [vmem:[#allocation6 + $0x2520] ss:$52 sps:$4 sm:$0xff]  }
 0x5ed   :  { %12222 = vmatpush1.bf16.msra.mxu0 %v19080_v15  ;;  %11712 = vmatprep.subr.bf16.mxu1 %v19085_v18  ;;  %v19121_v15 = vld [vmem:[#allocation6 + $0x2584] ss:$52 sps:$4 sm:$0xff]   ;;  %v19124_v18 = vld [vmem:[#allocation6 + $0x258c] ss:$52 sps:$4 sm:$0xff]  }
 0x5ee   :  { %11690 = vmatmul.mubr.bf16.gmra.mrb[92].mxu1 %v20166_v7  ;;  %12223 = vmatprep.subr.bf16.mxu0 %v19088_v20  ;;  %v19119_v20 = vld [vmem:[#allocation6 + $0x2580] ss:$52 sps:$4 sm:$0xff]  }
 0x5ef   :  { %12201 = vmatmul.mubr.bf16.gmra.mrb[100].mxu0 %v20166_v7  ;;  %11732 = vmatprep.mubr.bf16.mxu1 %v20130_v1 }
 0x5f0   :  { %11713 = vmatpush1.bf16.msra.mxu1 %v19083_v43  ;;  %12243 = vmatprep.mubr.bf16.mxu0 %v20130_v1  ;;  %v19122_v43 = vld [vmem:[#allocation6 + $0x2588] ss:$52 sps:$4 sm:$0xff]  }
 0x5f1   :  { %12224 = vmatpush1.bf16.msra.mxu0 %v19086_v63  ;;  %11714 = vmatprep.subr.bf16.mxu1 %v19091_v41  ;;  %v19127_v63 = vld [vmem:[#allocation6 + $0x25ec] ss:$52 sps:$4 sm:$0xff]   ;;  %v19130_v41 = vld [vmem:[#allocation6 + $0x25f4] ss:$52 sps:$4 sm:$0xff]  }
 0x5f2   :  { %12225 = vmatprep.subr.bf16.mxu0 %v19094_v46  ;;  %v19125_v46 = vld [vmem:[#allocation6 + $0x25e8] ss:$52 sps:$4 sm:$0xff]  }
 0x5f4   :  { %11715 = vmatpush1.bf16.msra.mxu1 %v19089_v38  ;;  %v19128_v38 = vld [vmem:[#allocation6 + $0x25f0] ss:$52 sps:$4 sm:$0xff]  }
 0x5f5   :  { %12226 = vmatpush1.bf16.msra.mxu0 %v19092_v28  ;;  %11716 = vmatprep.subr.bf16.mxu1 %v19097_v30  ;;  %v19133_v28 = vld [vmem:[#allocation6 + $0x2654] ss:$52 sps:$4 sm:$0xff]   ;;  %v19136_v30 = vld [vmem:[#allocation6 + $0x265c] ss:$52 sps:$4 sm:$0xff]  }
 0x5f6   :  { %12227 = vmatprep.subr.bf16.mxu0 %v19100_v17  ;;  %v19131_v17 = vld [vmem:[#allocation6 + $0x2650] ss:$52 sps:$4 sm:$0xff]  }
 0x5f8   :  { %11717 = vmatpush1.bf16.msra.mxu1 %v19095_v45  ;;  %v19134_v45 = vld [vmem:[#allocation6 + $0x2658] ss:$52 sps:$4 sm:$0xff]  }
 0x5f9   :  { %12228 = vmatpush1.bf16.msra.mxu0 %v19098_v60  ;;  %11718 = vmatprep.subr.bf16.mxu1 %v19103_v25  ;;  %v19139_v60 = vld [vmem:[#allocation6 + $0x26bc] ss:$52 sps:$4 sm:$0xff]   ;;  %v19142_v25 = vld [vmem:[#allocation6 + $0x26c4] ss:$52 sps:$4 sm:$0xff]  }
 0x5fa   :  { %12229 = vmatprep.subr.bf16.mxu0 %v19106_v12  ;;  %v19137_v12 = vld [vmem:[#allocation6 + $0x26b8] ss:$52 sps:$4 sm:$0xff]  }
 0x5fc   :  { %11719 = vmatpush1.bf16.msra.mxu1 %v19101_v49  ;;  %v19140_v49 = vld [vmem:[#allocation6 + $0x26c0] ss:$52 sps:$4 sm:$0xff]  }
 0x5fd   :  { %12230 = vmatpush1.bf16.msra.mxu0 %v19104_v62  ;;  %11720 = vmatprep.subr.bf16.mxu1 %v19109_v19  ;;  %v19145_v62 = vld [vmem:[#allocation6 + $0x2724] ss:$52 sps:$4 sm:$0xff]   ;;  %v19148_v19 = vld [vmem:[#allocation6 + $0x272c] ss:$52 sps:$4 sm:$0xff]  }
 0x5fe   :  { %12231 = vmatprep.subr.bf16.mxu0 %v19112_v61  ;;  %v19143_v61 = vld [vmem:[#allocation6 + $0x2720] ss:$52 sps:$4 sm:$0xff]  }
 0x600   :  { %11721 = vmatpush1.bf16.msra.mxu1 %v19107_v48  ;;  %v19146_v48 = vld [vmem:[#allocation6 + $0x2728] ss:$52 sps:$4 sm:$0xff]  }
 0x601   :  { %12232 = vmatpush1.bf16.msra.mxu0 %v19110_v5  ;;  %11722 = vmatprep.subr.bf16.mxu1 %v19115_v22  ;;  %v19151_v5 = vld [vmem:[#allocation6 + $0x278c] ss:$52 sps:$4 sm:$0xff]   ;;  %v19154_v22 = vld [vmem:[#allocation6 + $0x2794] ss:$52 sps:$4 sm:$0xff]  }
 0x602   :  { %12233 = vmatprep.subr.bf16.mxu0 %v19118_v44  ;;  %v19149_v44 = vld [vmem:[#allocation6 + $0x2788] ss:$52 sps:$4 sm:$0xff]  }
 0x604   :  { %11723 = vmatpush1.bf16.msra.mxu1 %v19113_v57  ;;  %v19152_v57 = vld [vmem:[#allocation6 + $0x2790] ss:$52 sps:$4 sm:$0xff]  }
 0x605   :  { %12234 = vmatpush1.bf16.msra.mxu0 %v19116_v40  ;;  %11724 = vmatprep.subr.bf16.mxu1 %v19121_v15  ;;  %v19155_v40 = vld [vmem:[#allocation6 + $0x370] ss:$52 sps:$4 sm:$0xff]  }
 0x606   :  { %12235 = vmatprep.subr.bf16.mxu0 %v19124_v18  ;;  %v19156_v15 = vld [vmem:[#allocation6 + $0x9f0] ss:$52 sps:$4 sm:$0xff]  }
 0x607   :  { %v19157_v18 = vld [vmem:[#allocation6 + $0x30] ss:$52 sps:$4 sm:$0xff]  }
 0x608   :  { %11725 = vmatpush1.bf16.msra.mxu1 %v19119_v20  ;;  %v19158_v20 = vld [vmem:[#allocation6 + $0x6b0] ss:$52 sps:$4 sm:$0xff]  }
 0x609   :  { %12236 = vmatpush1.bf16.msra.mxu0 %v19122_v43  ;;  %11726 = vmatprep.subr.bf16.mxu1 %v19127_v63  ;;  %v19159_v43 = vld [vmem:[#allocation6 + $0x3d8] ss:$52 sps:$4 sm:$0xff]  }
 0x60a   :  { %12237 = vmatprep.subr.bf16.mxu0 %v19130_v41  ;;  %v19160_v63 = vld [vmem:[#allocation6 + $0xa58] ss:$52 sps:$4 sm:$0xff]  }
 0x60b   :  { %v19161_v41 = vld [vmem:[#allocation6 + $0x98] ss:$52 sps:$4 sm:$0xff]  }
 0x60c   :  { %11727 = vmatpush1.bf16.msra.mxu1 %v19125_v46  ;;  %v19162_v46 = vld [vmem:[#allocation6 + $0x718] ss:$52 sps:$4 sm:$0xff]  }
 0x60d   :  { %12238 = vmatpush1.bf16.msra.mxu0 %v19128_v38  ;;  %11728 = vmatprep.subr.bf16.mxu1 %v19133_v28  ;;  %v19163_v38 = vld [vmem:[#allocation6 + $0x440] ss:$52 sps:$4 sm:$0xff]  }
 0x60e   :  { %12239 = vmatprep.subr.bf16.mxu0 %v19136_v30  ;;  %v19164_v28 = vld [vmem:[#allocation6 + $0xac0] ss:$52 sps:$4 sm:$0xff]  }
 0x60f   :  { %v19165_v30 = vld [vmem:[#allocation6 + $0x100] ss:$52 sps:$4 sm:$0xff]  }
 0x610   :  { %11729 = vmatpush1.bf16.msra.mxu1 %v19131_v17  ;;  %v19166_v17 = vld [vmem:[#allocation6 + $0x780] ss:$52 sps:$4 sm:$0xff]  }
 0x611   :  { %12240 = vmatpush1.bf16.msra.mxu0 %v19134_v45  ;;  %11730 = vmatprep.subr.bf16.mxu1 %v19139_v60  ;;  %v19167_v45 = vld [vmem:[#allocation6 + $0x4a8] ss:$52 sps:$4 sm:$0xff]  }
 0x612   :  { %12241 = vmatprep.subr.bf16.mxu0 %v19142_v25  ;;  %v19168_v60 = vld [vmem:[#allocation6 + $0xb28] ss:$52 sps:$4 sm:$0xff]  }
 0x613   :  { %v19169_v25 = vld [vmem:[#allocation6 + $0x168] ss:$52 sps:$4 sm:$0xff]  }
 0x614   :  { %11731 = vmatpush1.bf16.msra.mxu1 %v19137_v12  ;;  %v19170_v12 = vld [vmem:[#allocation6 + $0x7e8] ss:$52 sps:$4 sm:$0xff]  }
 0x615   :  { %12242 = vmatpush1.bf16.msra.mxu0 %v19140_v49  ;;  %11773 = vmatprep.subr.bf16.mxu1 %v19145_v62  ;;  %v19171_v49 = vld [vmem:[#allocation6 + $0x510] ss:$52 sps:$4 sm:$0xff]  }
 0x616   :  { %12284 = vmatprep.subr.bf16.mxu0 %v19148_v19  ;;  %v19172_v62 = vld [vmem:[#allocation6 + $0xb90] ss:$52 sps:$4 sm:$0xff]  }
 0x617   :  { %11733 = vmatmul.mubr.bf16.vlgmr.msra.gmra.mrb[80].mxu1 %v20127_v58  ;;  %v19173_v19 = vld [vmem:[#allocation6 + $0x1d0] ss:$52 sps:$4 sm:$0xff]  }
 0x618   :  { %12244 = vmatmul.mubr.bf16.vlgmr.msra.gmra.mrb[88].mxu0 %v20127_v58  ;;  %11742 = vmatprep.mubr.bf16.mxu1 %v20150_v27 }
 0x619   :  { %11774 = vmatpush1.bf16.msra.mxu1 %v19143_v61  ;;  %12253 = vmatprep.mubr.bf16.mxu0 %v20150_v27  ;;  %v19174_v61 = vld [vmem:[#allocation6 + $0x850] ss:$52 sps:$4 sm:$0xff]  }
 0x61a   :  { %12285 = vmatpush1.bf16.msra.mxu0 %v19146_v48  ;;  %11775 = vmatprep.subr.bf16.mxu1 %v19151_v5  ;;  %v19175_v48 = vld [vmem:[#allocation6 + $0x578] ss:$52 sps:$4 sm:$0xff]  }
 0x61b   :  { %12286 = vmatprep.subr.bf16.mxu0 %v19154_v22  ;;  %v19176_v5 = vld [vmem:[#allocation6 + $0xbf8] ss:$52 sps:$4 sm:$0xff]  }
 0x61c   :  { %v19177_v22 = vld [vmem:[#allocation6 + $0x238] ss:$52 sps:$4 sm:$0xff]  }
 0x61d   :  { %11776 = vmatpush1.bf16.msra.mxu1 %v19149_v44  ;;  %v19178_v44 = vld [vmem:[#allocation6 + $0x8b8] ss:$52 sps:$4 sm:$0xff]  }
 0x61e   :  { %12287 = vmatpush1.bf16.msra.mxu0 %v19152_v57  ;;  %16020 = vmatprep.subr.bf16.mxu1 %v19155_v40  ;;  %v19179_v57 = vld [vmem:[#allocation6 + $0x5e0] ss:$52 sps:$4 sm:$0xff]  }
 0x61f   :  { %11743 = vmatmul.mubr.bf16.gmra.mrb[84].mxu1 %v20147_v56  ;;  %16060 = vmatprep.subr.bf16.mxu0 %v19156_v15  ;;  %v19180_v40 = vld [vmem:[#allocation6 + $0xc60] ss:$52 sps:$4 sm:$0xff]  }
 0x620   :  { %12254 = vmatmul.mubr.bf16.gmra.mrb[92].mxu0 %v20147_v56  ;;  %11752 = vmatprep.mubr.bf16.mxu1 %v20174_v32  ;;  %v19181_v15 = vld [vmem:[#allocation6 + $0x2a0] ss:$52 sps:$4 sm:$0xff]  }
 0x621   :  { %12263 = vmatprep.mubr.bf16.mxu0 %v20174_v32 }
 0x627   :  { %11753 = vmatmul.mubr.bf16.gmra.mrb[88].mxu1 %v20171_v3 }
 0x628   :  { %12264 = vmatmul.mubr.bf16.gmra.mrb[96].mxu0 %v20171_v3  ;;  %11762 = vmatprep.mubr.bf16.mxu1 %v20193_v39 }
 0x629   :  { %12273 = vmatprep.mubr.bf16.mxu0 %v20193_v39 }
 0x62f   :  { %11763 = vmatmul.mubr.bf16.gmra.mrb[92].mxu1 %v20190_v47 }
 0x630   :  { %12274 = vmatmul.mubr.bf16.gmra.mrb[100].mxu0 %v20190_v47  ;;  %11805 = vmatprep.mubr.bf16.mxu1 %v21061_v16 }
 0x631   :  { %12316 = vmatprep.mubr.bf16.mxu0 %v21061_v16 }
 0x637   :  { %15884 = vmatmul.mubr.msk.bf16.vlgmr.msra.gmra.mrb[80].mxu1 %vm9278_vm2, %v20188_v0 }
 0x638   :  { %15888 = vmatmul.mubr.msk.bf16.vlgmr.msra.gmra.mrb[88].mxu0 %vm9278_vm2, %v20188_v0  ;;  %16021 = vmatpush3.bf16.msra.mxu1 %v19157_v18  ;;  %v19182_v18 = vld [vmem:[#allocation6 + $0x920] ss:$52 sps:$4 sm:$0xff]  }
 0x639   :  { %16061 = vmatpush3.bf16.msra.mxu0 %v19158_v20  ;;  %16022 = vmatprep.subr.bf16.mxu1 %v19159_v43  ;;  %v19183_v20 = vld [vmem:[#allocation6 + $0x648] ss:$52 sps:$4 sm:$0xff]  }
 0x63a   :  { %16062 = vmatprep.subr.bf16.mxu0 %v19160_v63  ;;  %11815 = vmatprep.mubr.bf16.mxu1 %v21061_v16  ;;  %v19184_v43 = vld [vmem:[#allocation6 + $0xcc8] ss:$52 sps:$4 sm:$0xff]  }
 0x63b   :  { %12326 = vmatprep.mubr.bf16.mxu0 %v21061_v16  ;;  %v19185_v63 = vld [vmem:[#allocation6 + $0x308] ss:$52 sps:$4 sm:$0xff]  }
 0x63c   :  { %16023 = vmatpush3.bf16.msra.mxu1 %v19161_v41  ;;  %v19187_v41 = vld [vmem:[#allocation6 + $0x1070] ss:$52 sps:$4 sm:$0xff]  }
 0x63d   :  { %16063 = vmatpush3.bf16.msra.mxu0 %v19162_v46  ;;  %16024 = vmatprep.subr.bf16.mxu1 %v19163_v38  ;;  %v19188_v46 = vld [vmem:[#allocation6 + $0x16f0] ss:$52 sps:$4 sm:$0xff]  }
 0x63e   :  { %16064 = vmatprep.subr.bf16.mxu0 %v19164_v28  ;;  %v19189_v38 = vld [vmem:[#allocation6 + $0xd30] ss:$52 sps:$4 sm:$0xff]  }
 0x63f   :  { %15885 = vmatmul.mubr.msk.bf16.gmra.mrb[84].mxu1 %vm9278_vm2, %v20186_v31  ;;  %v19190_v28 = vld [vmem:[#allocation6 + $0x13b0] ss:$52 sps:$4 sm:$0xff]  }
 0x640   :  { %15889 = vmatmul.mubr.msk.bf16.gmra.mrb[92].mxu0 %vm9278_vm2, %v20186_v31  ;;  %16025 = vmatpush3.bf16.msra.mxu1 %v19165_v30  ;;  %v19191_v30 = vld [vmem:[#allocation6 + $0x10d8] ss:$52 sps:$4 sm:$0xff]  }
 0x641   :  { %16065 = vmatpush3.bf16.msra.mxu0 %v19166_v17  ;;  %16026 = vmatprep.subr.bf16.mxu1 %v19167_v45  ;;  %v19192_v17 = vld [vmem:[#allocation6 + $0x1758] ss:$52 sps:$4 sm:$0xff]  }
 0x642   :  { %16066 = vmatprep.subr.bf16.mxu0 %v19168_v60  ;;  %11825 = vmatprep.mubr.bf16.mxu1 %v21061_v16  ;;  %v19194_v45 = vld [vmem:[#allocation6 + $0x1418] ss:$52 sps:$4 sm:$0xff]   ;;  %v19195_v60 = vld [vmem:[#allocation6 + $0x1140] ss:$52 sps:$4 sm:$0xff]  }
 0x643   :  { %12336 = vmatprep.mubr.bf16.mxu0 %v21061_v16 }
 0x644   :  { %16027 = vmatpush3.bf16.msra.mxu1 %v19169_v25  ;;  %v19196_v25 = vld [vmem:[#allocation6 + $0x17c0] ss:$52 sps:$4 sm:$0xff]  }
 0x645   :  { %16067 = vmatpush3.bf16.msra.mxu0 %v19170_v12  ;;  %16028 = vmatprep.subr.bf16.mxu1 %v19171_v49  ;;  %v19197_v12 = vld [vmem:[#allocation6 + $0xe00] ss:$52 sps:$4 sm:$0xff]   ;;  %v19199_v49 = vld [vmem:[#allocation6 + $0x11a8] ss:$52 sps:$4 sm:$0xff]  }
 0x646   :  { %16068 = vmatprep.subr.bf16.mxu0 %v19172_v62  ;;  %v21129_v62 = vld [vmem:[#allocation25_spill] sm:$0xff] }
 0x647   :  { %15886 = vmatmul.mubr.msk.bf16.gmra.mrb[88].mxu1 %vm9278_vm2, %v20200_v23 }
 0x648   :  { %15890 = vmatmul.mubr.msk.bf16.gmra.mrb[96].mxu0 %vm9278_vm2, %v20200_v23  ;;  %16029 = vmatpush3.bf16.msra.mxu1 %v19173_v19  ;;  %v21131_v19 = vld [vmem:[#allocation29_spill] sm:$0xff] }
 0x649   :  { %16069 = vmatpush3.bf16.msra.mxu0 %v19174_v61  ;;  %16030 = vmatprep.subr.bf16.mxu1 %v19175_v48  ;;  %v21132_v61 = vld [vmem:[#allocation36_spill] sm:$0xff] }
 0x64a   :  { %16070 = vmatprep.subr.bf16.mxu0 %v19176_v5  ;;  %11835 = vmatprep.mubr.bf16.mxu1 %v21061_v16  ;;  %v19201_v48 = vld [vmem:[#allocation6 + $0xe68] ss:$52 sps:$4 sm:$0xff]  }
 0x64b   :  { %12346 = vmatprep.mubr.bf16.mxu0 %v21061_v16  ;;  %v19186_v16 = vld [vmem:[#allocation6 + $0x988] ss:$52 sps:$4 sm:$0xff]  }
 0x64c   :  { %16031 = vmatpush3.bf16.msra.mxu1 %v19177_v22  ;;  %v19202_v5 = vld [vmem:[#allocation6 + $0x14e8] ss:$52 sps:$4 sm:$0xff]   ;;  %v19203_v22 = vld [vmem:[#allocation6 + $0x1210] ss:$52 sps:$4 sm:$0xff]  }
 0x64d   :  { %16071 = vmatpush3.bf16.msra.mxu0 %v19178_v44  ;;  %16032 = vmatprep.subr.bf16.mxu1 %v19179_v57  ;;  %v19204_v44 = vld [vmem:[#allocation6 + $0x1890] ss:$52 sps:$4 sm:$0xff]  }
 0x64e   :  { %16072 = vmatprep.subr.bf16.mxu0 %v19180_v40  ;;  %v19205_v57 = vld [vmem:[#allocation6 + $0xed0] ss:$52 sps:$4 sm:$0xff]  }
 0x64f   :  { %15887 = vmatmul.mubr.msk.bf16.gmra.mrb[92].mxu1 %vm9278_vm2, %v20198_v59  ;;  %v19206_v40 = vld [vmem:[#allocation6 + $0x1550] ss:$52 sps:$4 sm:$0xff]  }
 0x650   :  { %15891 = vmatmul.mubr.msk.bf16.gmra.mrb[100].mxu0 %vm9278_vm2, %v20198_v59  ;;  %16033 = vmatpush3.bf16.msra.mxu1 %v19181_v15  ;;  %v19207_v15 = vld [vmem:[#allocation6 + $0x1278] ss:$52 sps:$4 sm:$0xff]  }
 0x651   :  { %12389 = vmatprep.mubr.bf16.mxu1 %v19919_v55  ;;  %16073 = vmatpush3.bf16.msra.mxu0 %v19182_v18  ;;  %v21128_v55 = vld [vmem:[#allocation31_spill] sm:$0xff]  ;;  %v21133_v18 = vld [vmem:[#allocation28_spill] sm:$0xff] }
 0x652   :  { %12454 = vmatprep.mubr.bf16.mxu0 %v21096_v4  ;;  %16034 = vmatprep.subr.bf16.mxu1 %v19183_v20  ;;  %v19193_v4 = vld [vmem:[#allocation6 + $0xd98] ss:$52 sps:$4 sm:$0xff]  }
 0x653   :  { %16074 = vmatprep.subr.bf16.mxu0 %v19184_v43  ;;  %v19208_v20 = vld [vmem:[#allocation6 + $0x18f8] ss:$52 sps:$4 sm:$0xff]  }
 0x654   :  { %16035 = vmatpush3.bf16.msra.mxu1 %v19185_v63  ;;  %v21134_v43 = vld [vmem:[#allocation35_spill] sm:$0xff]  ;;  %v21135_v63 = vld [vmem:[#allocation34_spill] sm:$0xff] }
 0x655   :  { %16075 = vmatpush3.bf16.msra.mxu0 %v19186_v16  ;;  %16100 = vmatprep.subr.bf16.mxu1 %v19187_v41  ;;  %v21136_v16 = vld [vmem:[#allocation40_spill] sm:$0xff]  ;;  %v19209_v41 = vld [vmem:[#allocation6 + $0xf38] ss:$52 sps:$4 sm:$0xff]  }
 0x656   :  { %16140 = vmatprep.subr.bf16.mxu0 %v19188_v46  ;;  %v19210_v46 = vld [vmem:[#allocation6 + $0x15b8] ss:$52 sps:$4 sm:$0xff]  }
 0x657   :  { %12390 = vmatmul.mubr.bf16.vlgmr.msra.gmra.mrb[96].mxu1 %v19913_v13  ;;  %v19198_v13 = vld [vmem:[#allocation6 + $0x1480] ss:$52 sps:$4 sm:$0xff]  }
 0x658   :  { %12455 = vmatmul.mubr.bf16.vlgmr.msra.gmra.mrb[104].mxu0 %v21097_v14  ;;  %12397 = vmatprep.mubr.bf16.mxu1 %v19935_v53  ;;  %v19200_v53 = vld [vmem:[#allocation6 + $0x1828] ss:$52 sps:$4 sm:$0xff]   ;;  %v21130_v14 = vld [vmem:[#allocation30_spill] sm:$0xff] }
 0x659   :  { %12462 = vmatprep.mubr.bf16.mxu0 %v21128_v55  ;;  %16101 = vmatpush3.bf16.msra.mxu1 %v19189_v38  ;;  %v19211_v38 = vld [vmem:[#allocation6 + $0x12e0] ss:$52 sps:$4 sm:$0xff]   ;;  %v19215_v55 = vld [vmem:[#allocation6 + $0x1348] ss:$52 sps:$4 sm:$0xff]  }
 0x65a   :  { %16141 = vmatpush3.bf16.msra.mxu0 %v19190_v28  ;;  %16102 = vmatprep.subr.bf16.mxu1 %v19191_v30  ;;  %v19212_v28 = vld [vmem:[#allocation6 + $0x1960] ss:$52 sps:$4 sm:$0xff]  }
 0x65b   :  { %16142 = vmatprep.subr.bf16.mxu0 %v19192_v17  ;;  %v19213_v30 = vld [vmem:[#allocation6 + $0xfa0] ss:$52 sps:$4 sm:$0xff]  }
 0x65c   :  { %v19214_v17 = vld [vmem:[#allocation6 + $0x1620] ss:$52 sps:$4 sm:$0xff]  }
 0x65d   :  { %16103 = vmatpush3.bf16.msra.mxu1 %v19193_v4  ;;  %v21137_v4 = vld [vmem:[#allocation33_spill] sm:$0xff] }
 0x65e   :  { %16143 = vmatpush3.bf16.msra.mxu0 %v19194_v45  ;;  %16104 = vmatprep.subr.bf16.mxu1 %v19195_v60  ;;  %v19216_v45 = vld [vmem:[#allocation6 + $0x19c8] ss:$52 sps:$4 sm:$0xff]   ;;  %v21138_v60 = vld [vmem:[#allocation38_spill] sm:$0xff] }
 0x65f   :  { %12398 = vmatmul.mubr.bf16.gmra.mrb[100].mxu1 %v21129_v62  ;;  %16144 = vmatprep.subr.bf16.mxu0 %v19196_v25  ;;  %v21139_v25 = vld [vmem:[#allocation39_spill] sm:$0xff]  ;;  %v19220_v62 = vld [vmem:[#allocation6 + $0x23f0] ss:$52 sps:$4 sm:$0xff]  }
 0x660   :  { %12463 = vmatmul.mubr.bf16.gmra.mrb[108].mxu0 %v21130_v14  ;;  %12405 = vmatprep.mubr.bf16.mxu1 %v21131_v19  ;;  %v19222_v14 = vld [vmem:[#allocation6 + $0x20b0] ss:$52 sps:$4 sm:$0xff]   ;;  %v19223_v19 = vld [vmem:[#allocation6 + $0x1dd8] ss:$52 sps:$4 sm:$0xff]  }
 0x661   :  { %12470 = vmatprep.mubr.bf16.mxu0 %v21132_v61  ;;  %16105 = vmatpush3.bf16.msra.mxu1 %v19197_v12  ;;  %v19217_v12 = vld [vmem:[#allocation6 + $0x1008] ss:$52 sps:$4 sm:$0xff]  }
 0x662   :  { %16145 = vmatpush3.bf16.msra.mxu0 %v19198_v13  ;;  %16106 = vmatprep.subr.bf16.mxu1 %v19199_v49  ;;  %v19218_v13 = vld [vmem:[#allocation6 + $0x1688] ss:$52 sps:$4 sm:$0xff]   ;;  %v19219_v49 = vld [vmem:[#allocation6 + $0x1d70] ss:$52 sps:$4 sm:$0xff]  }
 0x663   :  { %16146 = vmatprep.subr.bf16.mxu0 %v19200_v53  ;;  %v19221_v53 = vld [vmem:[#allocation6 + $0x1a30] ss:$52 sps:$4 sm:$0xff]  }
 0x664   :  { %v21140_v61 = vld [vmem:[#allocation37_spill] sm:$0xff] }
 0x665   :  { %16107 = vmatpush3.bf16.msra.mxu1 %v19201_v48  ;;  %v19224_v48 = vld [vmem:[#allocation6 + $0x2458] ss:$52 sps:$4 sm:$0xff]  }
 0x666   :  { %16147 = vmatpush3.bf16.msra.mxu0 %v19202_v5  ;;  %16108 = vmatprep.subr.bf16.mxu1 %v19203_v22  ;;  %v19225_v5 = vld [vmem:[#allocation6 + $0x1a98] ss:$52 sps:$4 sm:$0xff]  }
 0x667   :  { %12406 = vmatmul.mubr.bf16.gmra.mrb[104].mxu1 %v21133_v18  ;;  %16148 = vmatprep.subr.bf16.mxu0 %v19204_v44  ;;  %v19226_v22 = vld [vmem:[#allocation6 + $0x2118] ss:$52 sps:$4 sm:$0xff]   ;;  %v19227_v44 = vld [vmem:[#allocation6 + $0x1e40] ss:$52 sps:$4 sm:$0xff]   ;;  %v19231_v18 = vld [vmem:[#allocation6 + $0x1ea8] ss:$52 sps:$4 sm:$0xff]  }
 0x668   :  { %12471 = vmatmul.mubr.bf16.gmra.mrb[112].mxu0 %v21134_v43  ;;  %12413 = vmatprep.mubr.bf16.mxu1 %v21135_v63  ;;  %v19233_v43 = vld [vmem:[#allocation6 + $0x1b68] ss:$52 sps:$4 sm:$0xff]  }
 0x669   :  { %12478 = vmatprep.mubr.bf16.mxu0 %v21136_v16  ;;  %16109 = vmatpush3.bf16.msra.mxu1 %v19205_v57  ;;  %v19228_v57 = vld [vmem:[#allocation6 + $0x24c0] ss:$52 sps:$4 sm:$0xff]   ;;  %v19234_v63 = vld [vmem:[#allocation6 + $0x21e8] ss:$52 sps:$4 sm:$0xff]   ;;  %v19235_v16 = vld [vmem:[#allocation6 + $0x1f10] ss:$52 sps:$4 sm:$0xff]  }
 0x66a   :  { %16149 = vmatpush3.bf16.msra.mxu0 %v19206_v40  ;;  %16110 = vmatprep.subr.bf16.mxu1 %v19207_v15  ;;  %v19229_v40 = vld [vmem:[#allocation6 + $0x1b00] ss:$52 sps:$4 sm:$0xff]  }
 0x66b   :  { %16150 = vmatprep.subr.bf16.mxu0 %v19208_v20  ;;  %v19230_v15 = vld [vmem:[#allocation6 + $0x2180] ss:$52 sps:$4 sm:$0xff]   ;;  %v21142_v20 = vld [vmem:[#allocation41_spill] sm:$0xff] }
 0x66d   :  { %16111 = vmatpush3.bf16.msra.mxu1 %v19209_v41  ;;  %v19236_v41 = vld [vmem:[#allocation6 + $0x2590] ss:$52 sps:$4 sm:$0xff]  }
 0x66e   :  { %16151 = vmatpush3.bf16.msra.mxu0 %v19210_v46  ;;  %16112 = vmatprep.subr.bf16.mxu1 %v19211_v38  ;;  %v19237_v46 = vld [vmem:[#allocation6 + $0x1bd0] ss:$52 sps:$4 sm:$0xff]  }
 0x66f   :  { %12414 = vmatmul.mubr.bf16.gmra.mrb[108].mxu1 %v21137_v4  ;;  %16152 = vmatprep.subr.bf16.mxu0 %v19212_v28  ;;  %v19238_v38 = vld [vmem:[#allocation6 + $0x2250] ss:$52 sps:$4 sm:$0xff]   ;;  %v19239_v28 = vld [vmem:[#allocation6 + $0x1f78] ss:$52 sps:$4 sm:$0xff]   ;;  %v19243_v4 = vld [vmem:[#allocation6 + $0x1fe0] ss:$52 sps:$4 sm:$0xff]  }
 0x670   :  { %12479 = vmatmul.mubr.bf16.gmra.mrb[116].mxu0 %v21138_v60  ;;  %12519 = vmatprep.mubr.bf16.mxu1 %v21139_v25  ;;  %v19245_v60 = vld [vmem:[#allocation6 + $0x1ca0] ss:$52 sps:$4 sm:$0xff]  }
 0x671   :  { %16113 = vmatpush3.bf16.msra.mxu1 %v19213_v30  ;;  %12584 = vmatprep.mubr.bf16.mxu0 %v21119_v33  ;;  %v21141_v33 = vld [vmem:[#allocation42_spill] sm:$0xff]  ;;  %v21144_v30 = vld [vmem:[#allocation44_spill] sm:$0xff] }
 0x672   :  { %16153 = vmatpush3.bf16.msra.mxu0 %v19214_v17  ;;  %16114 = vmatprep.subr.bf16.mxu1 %v19215_v55  ;;  %v19241_v17 = vld [vmem:[#allocation6 + $0x1c38] ss:$52 sps:$4 sm:$0xff]   ;;  %v19246_v25 = vld [vmem:[#allocation6 + $0x2320] ss:$52 sps:$4 sm:$0xff]  }
 0x673   :  { %16154 = vmatprep.subr.bf16.mxu0 %v19216_v45  ;;  %v19242_v55 = vld [vmem:[#allocation6 + $0x22b8] ss:$52 sps:$4 sm:$0xff]   ;;  %v19244_v45 = vld [vmem:[#allocation6 + $0x2660] ss:$52 sps:$4 sm:$0xff]  }
 0x675   :  { %16115 = vmatpush3.bf16.msra.mxu1 %v19217_v12  ;;  %v19247_v12 = vld [vmem:[#allocation6 + $0x2048] ss:$52 sps:$4 sm:$0xff]  }
 0x676   :  { %16155 = vmatpush3.bf16.msra.mxu0 %v19218_v13  ;;  %16180 = vmatprep.subr.bf16.mxu1 %v19219_v49  ;;  %v21146_v13 = vld [vmem:[#allocation46_spill] sm:$0xff]  ;;  %v19250_v49 = vld [vmem:[#allocation6 + $0x2388] ss:$52 sps:$4 sm:$0xff]  }
 0x677   :  { %16220 = vmatprep.subr.bf16.mxu0 %v19220_v62  ;;  %v19251_v62 = vld [vmem:[#allocation6 + $0x2730] ss:$52 sps:$4 sm:$0xff]  }
 0x678   :  { %12520 = vmatmul.mubr.bf16.vlgmr.msra.gmra.mrb[112].mxu1 %v21140_v61  ;;  %v19256_v61 = vld [vmem:[#allocation9 + $0x50] sm:$0xff]  }
 0x679   :  { %12585 = vmatmul.mubr.bf16.vlgmr.msra.gmra.mrb[120].mxu0 %v20040_v26  ;;  %12527 = vmatprep.mubr.bf16.mxu1 %v21141_v33  ;;  %v19232_v26 = vld [vmem:[#allocation6 + $0x2528] ss:$52 sps:$4 sm:$0xff]  }
 0x67a   :  { %12592 = vmatprep.mubr.bf16.mxu0 %v20059_v6  ;;  %16181 = vmatpush3.bf16.msra.mxu1 %v19221_v53  ;;  %v21143_v6 = vld [vmem:[#allocation45_spill] sm:$0xff]  ;;  %v19252_v53 = vld [vmem:[#allocation9 + $0x40] sm:$0xff]  }
 0x67b   :  { %16221 = vmatpush3.bf16.msra.mxu0 %v19222_v14  ;;  %16182 = vmatprep.subr.bf16.mxu1 %v19223_v19  ;;  %v19253_v14 = vld [vmem:[#allocation9] sm:$0xff]   ;;  %v19260_v19 = vld [vmem:[#allocation6 + $0x2798] ss:$52 sps:$4 sm:$0xff]  }
 0x67c   :  { %16222 = vmatprep.subr.bf16.mxu0 %v19224_v48  ;;  %v19257_v48 = vld [vmem:[#allocation9 + $0x10] sm:$0xff]   ;;  %v19263_v33 = vld [vmem:[#allocation9 + $0x68] sm:$0xff]  }
 0x67e   :  { %16183 = vmatpush3.bf16.msra.mxu1 %v19225_v5  ;;  %v19273_v5 = vld [vmem:[#allocation9 + $0xc8] sm:$0xff]  }
 0x67f   :  { %16223 = vmatpush3.bf16.msra.mxu0 %v19226_v22  ;;  %16184 = vmatprep.subr.bf16.mxu1 %v19227_v44  ;;  %v19272_v22 = vld [vmem:[#allocation9 + $0x100] sm:$0xff]   ;;  %v19277_v44 = vld [vmem:[#allocation9 + $0xd0] sm:$0xff]  }
 0x680   :  { %12528 = vmatmul.mubr.bf16.gmra.mrb[116].mxu1 %v21142_v20  ;;  %16224 = vmatprep.subr.bf16.mxu0 %v19228_v57  ;;  %v21149_v57 = vld [vmem:[#allocation54_spill] sm:$0xff] }
 0x681   :  { %12593 = vmatmul.mubr.bf16.gmra.mrb[124].mxu0 %v20056_v29  ;;  %12535 = vmatprep.mubr.bf16.mxu1 %v21143_v6  ;;  %v19240_v29 = vld [vmem:[#allocation6 + $0x25f8] ss:$52 sps:$4 sm:$0xff]  }
 0x682   :  { %12600 = vmatprep.mubr.bf16.mxu0 %v20085_v50  ;;  %16185 = vmatpush3.bf16.msra.mxu1 %v19229_v40  ;;  %v21145_v50 = vld [vmem:[#allocation47_spill] sm:$0xff]  ;;  %v19276_v40 = vld [vmem:[#allocation9 + $0x108] sm:$0xff]   ;;  %v19280_v20 = vld [vmem:[#allocation9 + $0x110] sm:$0xff]  }
 0x683   :  { %16225 = vmatpush3.bf16.msra.mxu0 %v19230_v15  ;;  %16186 = vmatprep.subr.bf16.mxu1 %v19231_v18  ;;  %v19279_v15 = vld [vmem:[#allocation9 + $0x150] sm:$0xff]   ;;  %v19282_v6 = vld [vmem:[#allocation9 + $0x98] sm:$0xff]  }
 0x684   :  { %16226 = vmatprep.subr.bf16.mxu0 %v19232_v26  ;;  %v19278_v18 = vld [vmem:[#allocation9 + $0x90] sm:$0xff]   ;;  %v21150_v26 = vld [vmem:[#allocation51_spill] sm:$0xff] }
 0x686   :  { %16187 = vmatpush3.bf16.msra.mxu1 %v19233_v43  ;;  %v21151_v43 = vld [vmem:[#allocation52_spill] sm:$0xff] }
 0x687   :  { %16227 = vmatpush3.bf16.msra.mxu0 %v19234_v63  ;;  %16188 = vmatprep.subr.bf16.mxu1 %v19235_v16  ;;  %v19285_v63 = vld [vmem:[#allocation9 + $0xe0] sm:$0xff]   ;;  %v21152_v16 = vld [vmem:[#allocation58_spill] sm:$0xff] }
 0x688   :  { %12536 = vmatmul.mubr.bf16.gmra.mrb[120].mxu1 %v21144_v30  ;;  %16228 = vmatprep.subr.bf16.mxu0 %v19236_v41  ;;  %v19284_v41 = vld [vmem:[#allocation9 + $0x118] sm:$0xff]   ;;  %v19291_v30 = vld [vmem:[#allocation9 + $0x168] sm:$0xff]  }
 0x689   :  { %12601 = vmatmul.mubr.bf16.gmra.mrb[128].mxu0 %v20082_v34  ;;  %12543 = vmatprep.mubr.bf16.mxu1 %v21145_v50  ;;  %v19248_v34 = vld [vmem:[#allocation6 + $0x26c8] ss:$52 sps:$4 sm:$0xff]  }
 0x68a   :  { %12608 = vmatprep.mubr.bf16.mxu0 %v20110_v10  ;;  %16189 = vmatpush3.bf16.msra.mxu1 %v19237_v46  ;;  %v19249_v10 = vld [vmem:[#allocation6 + $0x1d08] ss:$52 sps:$4 sm:$0xff]  }
 0x68b   :  { %16229 = vmatpush3.bf16.msra.mxu0 %v19238_v38  ;;  %16190 = vmatprep.subr.bf16.mxu1 %v19239_v28  ;;  %v19287_v46 = vld [vmem:[#allocation9 + $0x160] sm:$0xff]  }
 0x68c   :  { %16230 = vmatprep.subr.bf16.mxu0 %v19240_v29  ;;  %v19286_v38 = vld [vmem:[#allocation9 + $0xa0] sm:$0xff]   ;;  %v19290_v29 = vld [vmem:[#allocation9 + $0xa8] sm:$0xff]  }
 0x68d   :  { %v19288_v28 = vld [vmem:[#allocation9 + $0x120] sm:$0xff]  }
 0x68e   :  { %16191 = vmatpush3.bf16.msra.mxu1 %v19241_v17  ;;  %v21153_v50 = vld [vmem:[#allocation56_spill] sm:$0xff]  ;;  %v19293_v17 = vld [vmem:[#allocation9 + $0xf0] sm:$0xff]  }
 0x68f   :  { %16231 = vmatpush3.bf16.msra.mxu0 %v19242_v55  ;;  %16192 = vmatprep.subr.bf16.mxu1 %v19243_v4  ;;  %v21154_v55 = vld [vmem:[#allocation62_spill] sm:$0xff]  ;;  %v19292_v4 = vld [vmem:[#allocation9 + $0x128] sm:$0xff]  }
 0x690   :  { %12544 = vmatmul.mubr.bf16.gmra.mrb[124].mxu1 %v21146_v13  ;;  %16232 = vmatprep.subr.bf16.mxu0 %v19244_v45  ;;  %v19295_v45 = vld [vmem:[#allocation9 + $0x170] sm:$0xff]   ;;  %v19299_v13 = vld [vmem:[#allocation9 + $0x178] sm:$0xff]  }
 0x691   :  { %12609 = vmatmul.mubr.bf16.gmra.mrb[132].mxu0 %v20107_v36  ;;  %12649 = vmatprep.mubr.bf16.mxu1 %v20100_v52  ;;  %v19254_v36 = vld [vmem:[#allocation9 + $0x48] sm:$0xff]   ;;  %v19269_v52 = vld [vmem:[#allocation9 + $0xc0] sm:$0xff]  }
 0x692   :  { %16193 = vmatpush3.bf16.msra.mxu1 %v19245_v60  ;;  %12714 = vmatprep.mubr.bf16.mxu0 %v20130_v1  ;;  %v19255_v1 = vld [vmem:[#allocation9 + $0x8] sm:$0xff]   ;;  %v19294_v60 = vld [vmem:[#allocation9 + $0xb0] sm:$0xff]  }
 0x693   :  { %16233 = vmatpush3.bf16.msra.mxu0 %v19246_v25  ;;  %16194 = vmatprep.subr.bf16.mxu1 %v19247_v12  ;;  %v19297_v25 = vld [vmem:[#allocation9 + $0xf8] sm:$0xff]   ;;  %v19296_v12 = vld [vmem:[#allocation9 + $0x130] sm:$0xff]  }
 0x694   :  { %16234 = vmatprep.subr.bf16.mxu0 %v19248_v34  ;;  %v19298_v34 = vld [vmem:[#allocation9 + $0xb8] sm:$0xff]  }
 0x696   :  { %16195 = vmatpush3.bf16.msra.mxu1 %v19249_v10  ;;  %v21155_v10 = vld [vmem:[#allocation60_spill] sm:$0xff] }
 0x697   :  { %16235 = vmatpush3.bf16.msra.mxu0 %v19250_v49  ;;  %16546 = vmatprep.subr.bf16.mxu1 %v19251_v62  ;;  %v19301_v49 = vld [vmem:[#allocation9 + $0x1c0] sm:$0xff]  }
 0x698   :  { %16266 = vmatprep.subr.bf16.mxu0 %v19252_v53  ;;  %v19300_v53 = vld [vmem:[#allocation9 + $0x138] sm:$0xff]  }
 0x699   :  { %12650 = vmatmul.mubr.bf16.vlgmr.msra.gmra.mrb[128].mxu1 %v20094_v11  ;;  %v19258_v11 = vld [vmem:[#allocation9 + $0x58] sm:$0xff]  }
 0x69a   :  { %12715 = vmatmul.mubr.bf16.vlgmr.msra.gmra.mrb[136].mxu0 %v20127_v58  ;;  %12657 = vmatprep.mubr.bf16.mxu1 %v20124_v2  ;;  %v19261_v2 = vld [vmem:[#allocation9 + $0x60] sm:$0xff]  }
 0x69b   :  { %12722 = vmatprep.mubr.bf16.mxu0 %v20150_v27  ;;  %16547 = vmatpush3.bf16.msra.mxu1 %v19251_v62  ;;  %v19259_v27 = vld [vmem:[#allocation9 + $0x18] sm:$0xff]   ;;  %v19262_v58 = vld [vmem:[#allocation9 + $0x20] sm:$0xff]  }
 0x69c   :  { %16267 = vmatpush3.bf16.msra.mxu0 %v19253_v14  ;;  %16548 = vmatprep.subr.bf16.mxu1 %v19260_v19  ;;  %v21156_v62 = vld [vmem:[#allocation20_spill] sm:$0xff] }
 0x69d   :  { %16268 = vmatprep.subr.bf16.mxu0 %v19254_v36  ;;  %v19317_v14 = vld [vmem:[#allocation9 + $0x240] sm:$0xff]   ;;  %v19303_v36 = vld [vmem:[#allocation9 + $0x1c8] sm:$0xff]  }
 0x69f   :  { %16549 = vmatpush3.bf16.msra.mxu1 %v19260_v19  ;;  %v19302_v19 = vld [vmem:[#allocation9 + $0x180] sm:$0xff]  }
 0x6a0   :  { %16269 = vmatpush3.bf16.msra.mxu0 %v19255_v1  ;;  %16306 = vmatprep.subr.bf16.mxu1 %v19269_v52  ;;  %v19318_v1 = vld [vmem:[#allocation9 + $0x200] sm:$0xff]   ;;  %v21157_v52 = vld [vmem:[#allocation49_spill] sm:$0xff] }
 0x6a1   :  { %12658 = vmatmul.mubr.bf16.gmra.mrb[132].mxu1 %v20122_v9  ;;  %16270 = vmatprep.subr.bf16.mxu0 %v19256_v61  ;;  %v19264_v9 = vld [vmem:[#allocation9 + $0x28] sm:$0xff]  }
 0x6a2   :  { %12723 = vmatmul.mubr.bf16.gmra.mrb[140].mxu0 %v20147_v56  ;;  %12665 = vmatprep.mubr.bf16.mxu1 %v20144_v54  ;;  %v19266_v54 = vld [vmem:[#allocation9 + $0x30] sm:$0xff]   ;;  %v19267_v56 = vld [vmem:[#allocation9 + $0x78] sm:$0xff]   ;;  %v19321_v61 = vld [vmem:[#allocation9 + $0x248] sm:$0xff]  }
 0x6a3   :  { %12730 = vmatprep.mubr.bf16.mxu0 %v20174_v32  ;;  %v19265_v32 = vld [vmem:[#allocation9 + $0x70] sm:$0xff]  }
 0x6a4   :  { %16271 = vmatpush3.bf16.msra.mxu0 %v19257_v48  ;;  %v21158_v48 = vld [vmem:[#allocation55_spill] sm:$0xff] }
 0x6a5   :  { %16272 = vmatprep.subr.bf16.mxu0 %v19258_v11  ;;  %v19304_v11 = vld [vmem:[#allocation9 + $0x188] sm:$0xff]  }
 0x6a8   :  { %16273 = vmatpush3.bf16.msra.mxu0 %v19259_v27  ;;  %v21159_v27 = vld [vmem:[#allocation27_spill] sm:$0xff] }
 0x6a9   :  { %12666 = vmatmul.mubr.bf16.gmra.mrb[136].mxu1 %v20142_v21  ;;  %16274 = vmatprep.subr.bf16.mxu0 %v19261_v2  ;;  %v21147_v21 = vld [vmem:[#allocation50_spill] sm:$0xff] }
 0x6aa   :  { %12731 = vmatmul.mubr.bf16.gmra.mrb[144].mxu0 %v20171_v3  ;;  %12673 = vmatprep.mubr.bf16.mxu1 %v20168_v42  ;;  %v19268_v42 = vld [vmem:[#allocation9 + $0x38] sm:$0xff]   ;;  %v19271_v3 = vld [vmem:[#allocation9 + $0x140] sm:$0xff]   ;;  %v19305_v2 = vld [vmem:[#allocation9 + $0x1d0] sm:$0xff]  }
 0x6ab   :  { %12738 = vmatprep.mubr.bf16.mxu0 %v20193_v39  ;;  %v19270_v39 = vld [vmem:[#allocation9 + $0x80] sm:$0xff]  }
 0x6ac   :  { %16275 = vmatpush3.bf16.msra.mxu0 %v19262_v58  ;;  %v21160_v58 = vld [vmem:[#allocation66_spill] sm:$0xff] }
 0x6ad   :  { %16276 = vmatprep.subr.bf16.mxu0 %v19263_v33  ;;  %v19322_v33 = vld [vmem:[#allocation9 + $0x208] sm:$0xff]  }
 0x6b0   :  { %16277 = vmatpush3.bf16.msra.mxu0 %v19264_v9  ;;  %v19325_v9 = vld [vmem:[#allocation9 + $0x250] sm:$0xff]  }
 0x6b1   :  { %12674 = vmatmul.mubr.bf16.gmra.mrb[140].mxu1 %v20166_v7  ;;  %16278 = vmatprep.subr.bf16.mxu0 %v19265_v32  ;;  %v19275_v7 = vld [vmem:[#allocation9 + $0x148] sm:$0xff]   ;;  %v19306_v32 = vld [vmem:[#allocation9 + $0x190] sm:$0xff]  }
 0x6b2   :  { %12739 = vmatmul.mubr.bf16.gmra.mrb[148].mxu0 %v20190_v47  ;;  %16550 = vmatprep.mubr.msk.bf16.mxu1 %vm9278_vm2, %v20188_v0  ;;  %v19274_v0 = vld [vmem:[#allocation9 + $0x88] sm:$0xff]  }
 0x6b3   :  { %13820 = vmatprep.mubr.bf16.mxu0 %v21147_v21  ;;  %v21148_v47 = vld [vmem:[#allocation48_spill] sm:$0xff]  ;;  %v21161_v21 = vld [vmem:[#allocation53_spill] sm:$0xff] }
 0x6b4   :  { %16279 = vmatpush3.bf16.msra.mxu0 %v19266_v54  ;;  %v19307_v54 = vld [vmem:[#allocation9 + $0x1d8] sm:$0xff]  }
 0x6b5   :  { %16280 = vmatprep.subr.bf16.mxu0 %v19267_v56  ;;  %v19326_v56 = vld [vmem:[#allocation9 + $0x210] sm:$0xff]  }
 0x6b8   :  { %16281 = vmatpush3.bf16.msra.mxu0 %v19268_v42  ;;  %v19329_v42 = vld [vmem:[#allocation9 + $0x258] sm:$0xff]  }
 0x6b9   :  { %16551 = vmatmul.mubr.msk.bf16.vlgmr.msra.gmra.mrb[144].mxu1 %vm9278_vm2, %v20186_v31  ;;  %16346 = vmatprep.subr.bf16.mxu0 %v19271_v3  ;;  %v19281_v31 = vld [vmem:[#allocation9 + $0xd8] sm:$0xff]  }
 0x6ba   :  { %16307 = vmatpush3.bf16.msra.mxu1 %v19270_v39  ;;  %16554 = vmatprep.mubr.msk.bf16.mxu1 %vm9278_vm2, %v20200_v23  ;;  %v19283_v23 = vld [vmem:[#allocation9 + $0x158] sm:$0xff]  }
 0x6bb   :  { %13821 = vmatmul.mubr.bf16.vlgmr.msra.gmra.mrb[152].mxu0 %v21148_v47  ;;  %16308 = vmatprep.subr.bf16.mxu1 %v19273_v5  ;;  %v21162_v3 = vld [vmem:[#allocation59_spill] sm:$0xff]  ;;  %v21163_v5 = vld [vmem:[#allocation64_spill] sm:$0xff] }
 0x6bc   :  { %13828 = vmatprep.mubr.bf16.mxu0 %v21149_v57  ;;  %16347 = vmatpush3.bf16.msra.mxu0 %v19272_v22  ;;  %v19308_v39 = vld [vmem:[#allocation9 + $0x198] sm:$0xff]   ;;  %v19309_v22 = vld [vmem:[#allocation9 + $0x1e0] sm:$0xff]  }
 0x6bd   :  { %16348 = vmatprep.subr.bf16.mxu0 %v19275_v7  ;;  %v19330_v7 = vld [vmem:[#allocation9 + $0x218] sm:$0xff]   ;;  %v19310_v47 = vld [vmem:[#allocation9 + $0x1a0] sm:$0xff]  }
 0x6be   :  { %16309 = vmatpush3.bf16.msra.mxu1 %v19274_v0  ;;  %v19333_v0 = vld [vmem:[#allocation9 + $0x260] sm:$0xff]  }
 0x6bf   :  { %16310 = vmatprep.subr.bf16.mxu1 %v19277_v44  ;;  %v19311_v44 = vld [vmem:[#allocation9 + $0x1e8] sm:$0xff]   ;;  %v19334_v57 = vld [vmem:[#allocation9 + $0x220] sm:$0xff]  }
 0x6c0   :  { %16349 = vmatpush3.bf16.msra.mxu0 %v19276_v40  ;;  %v21164_v40 = vld [vmem:[#allocation57_spill] sm:$0xff] }
 0x6c1   :  { %16555 = vmatmul.mubr.msk.bf16.gmra.mrb[148].mxu1 %vm9278_vm2, %v20198_v59  ;;  %16350 = vmatprep.subr.bf16.mxu0 %v19279_v15  ;;  %v19289_v59 = vld [vmem:[#allocation9 + $0xe8] sm:$0xff]  }
 0x6c2   :  { %16311 = vmatpush3.bf16.msra.mxu1 %v19278_v18  ;;  %13885 = vmatprep.mubr.bf16.mxu1 %v21150_v26  ;;  %v19337_v15 = vld [vmem:[#allocation9 + $0x268] sm:$0xff]   ;;  %v21165_v18 = vld [vmem:[#allocation63_spill] sm:$0xff]  ;;  %v19341_v26 = vld [vmem:[#allocation9 + $0x270] sm:$0xff]  }
 0x6c3   :  { %13829 = vmatmul.mubr.bf16.gmra.mrb[156].mxu0 %v21151_v43  ;;  %16312 = vmatprep.subr.bf16.mxu1 %v19281_v31  ;;  %v19312_v31 = vld [vmem:[#allocation9 + $0x1a8] sm:$0xff]   ;;  %v19315_v43 = vld [vmem:[#allocation9 + $0x1f8] sm:$0xff]  }
 0x6c4   :  { %13836 = vmatprep.mubr.bf16.mxu0 %v21152_v16  ;;  %16351 = vmatpush3.bf16.msra.mxu0 %v19280_v20  ;;  %v21166_v20 = vld [vmem:[#allocation68_spill] sm:$0xff]  ;;  %v21167_v16 = vld [vmem:[#allocation61_spill] sm:$0xff] }
 0x6c5   :  { %16352 = vmatprep.subr.bf16.mxu0 %v19283_v23  ;;  %v19338_v23 = vld [vmem:[#allocation9 + $0x228] sm:$0xff]  }
 0x6c6   :  { %16313 = vmatpush3.bf16.msra.mxu1 %v19282_v6  ;;  %v19314_v6 = vld [vmem:[#allocation9 + $0x1b0] sm:$0xff]  }
 0x6c7   :  { %16314 = vmatprep.subr.bf16.mxu1 %v19285_v63  ;;  %v19342_v63 = vld [vmem:[#allocation9 + $0x230] sm:$0xff]  }
 0x6c8   :  { %16353 = vmatpush3.bf16.msra.mxu0 %v19284_v41  ;;  %v19345_v41 = vld [vmem:[#allocation9 + $0x278] sm:$0xff]  }
 0x6c9   :  { %16354 = vmatprep.subr.bf16.mxu0 %v19287_v46  ;;  %v21168_v46 = vld [vmem:[#allocation43_spill] sm:$0xff] }
 0x6ca   :  { %16315 = vmatpush3.bf16.msra.mxu1 %v19286_v38  ;;  %v19316_v38 = vld [vmem:[#allocation9 + $0x1b8] sm:$0xff]  }
 0x6cb   :  { %13837 = vmatmul.mubr.bf16.gmra.mrb[160].mxu0 %v21153_v50  ;;  %16316 = vmatprep.subr.bf16.mxu1 %v19289_v59  ;;  %v19346_v59 = vld [vmem:[#allocation9 + $0x238] sm:$0xff]  }
 0x6cc   :  { %13844 = vmatprep.mubr.bf16.mxu0 %v21154_v55  ;;  %16355 = vmatpush3.bf16.msra.mxu0 %v19288_v28  ;;  %v19320_v28 = vld [vmem:[#allocation9 + $0x280] sm:$0xff]  }
 0x6cd   :  { %16356 = vmatprep.subr.bf16.mxu0 %v19291_v30  ;;  %v19323_v30 = vld [vmem:[#allocation9 + $0x2c8] sm:$0xff]   ;;  %v21170_v50 = vld [vmem:[#allocation67_spill] sm:$0xff] }
 0x6ce   :  { %16317 = vmatpush3.bf16.msra.mxu1 %v19290_v29  ;;  %v21169_v29 = vld [vmem:[#allocation26_spill] sm:$0xff]  ;;  %v20766_v55 = vld [vmem:[#allocation9 + $0x300] sm:$0xff]  }
 0x6cf   :  { %16318 = vmatprep.subr.bf16.mxu1 %v19293_v17  ;;  %v19324_v17 = vld [vmem:[#allocation9 + $0x288] sm:$0xff]  }
 0x6d0   :  { %16357 = vmatpush3.bf16.msra.mxu0 %v19292_v4  ;;  %v19328_v4 = vld [vmem:[#allocation9 + $0x290] sm:$0xff]  }
 0x6d1   :  { %16358 = vmatprep.subr.bf16.mxu0 %v19295_v45  ;;  %v19331_v45 = vld [vmem:[#allocation9 + $0x2d8] sm:$0xff]  }
 0x6d2   :  { %16319 = vmatpush3.bf16.msra.mxu1 %v19294_v60  ;;  %v21171_v60 = vld [vmem:[#allocation65_spill] sm:$0xff] }
 0x6d3   :  { %13845 = vmatmul.mubr.bf16.gmra.mrb[164].mxu0 %v21155_v10  ;;  %16320 = vmatprep.subr.bf16.mxu1 %v19297_v25  ;;  %v21172_v25 = vld [vmem:[#allocation70_spill] sm:$0xff]  ;;  %v19336_v10 = vld [vmem:[#allocation9 + $0x2a0] sm:$0xff]  }
 0x6d4   :  { %16359 = vmatpush3.bf16.msra.mxu0 %v19296_v12  ;;  %13950 = vmatprep.mubr.bf16.mxu0 %v21156_v62  ;;  %v19332_v12 = vld [vmem:[#allocation9 + $0x298] sm:$0xff]  }
 0x6d5   :  { %16360 = vmatprep.subr.bf16.mxu0 %v19299_v13  ;;  %v19335_v13 = vld [vmem:[#allocation9 + $0x2e0] sm:$0xff]  }
 0x6d6   :  { %16321 = vmatpush3.bf16.msra.mxu1 %v19298_v34  ;;  %v20771_v34 = vld [vmem:[#allocation7 + $0x8] sm:$0x1f] }
 0x6d7   :  { %16386 = vmatprep.subr.bf16.mxu1 %v19301_v49  ;;  %v21173_v49 = vld [vmem:[#allocation21_spill] sm:$0xff] }
 0x6d8   :  { %16361 = vmatpush3.bf16.msra.mxu0 %v19300_v53  ;;  %v20775_v62 = vrot.slane %v20771_v34, %v21173_v49  ;;  %v19339_v53 = vld [vmem:[#allocation9 + $0x2e8] sm:$0xff]   ;;  %v19351_v49 = vld [vmem:[#allocation9 + $0x310] sm:$0xff]  }
 0x6d9   :  { %13886 = vmatmul.mubr.bf16.vlgmr.msra.gmra.mrb[152].mxu1 %v21157_v52  ;;  %16426 = vmatprep.subr.bf16.mxu0 %v19317_v14  ;;  %v21174_v14 = vld [vmem:[#allocation23_spill] sm:$0xff]  ;;  %v21176_v52 = vld [vmem:[#allocation69_spill] sm:$0xff] }
 0x6da   :  { %13893 = vmatprep.mubr.bf16.mxu1 %v21158_v48  ;;  %16387 = vmatpush3.bf16.msra.mxu1 %v19302_v19  ;;  %v20779_v19 = vrot.slane %v20771_v34, %v21174_v14 }
 0x6db   :  { %13951 = vmatmul.mubr.bf16.vlgmr.msra.gmra.mrb[168].mxu0 %v21159_v27  ;;  %16388 = vmatprep.subr.bf16.mxu1 %v19303_v36  ;;  %v21175_v36 = vld [vmem:[#allocation22_spill] sm:$0xff]  ;;  %v19340_v27 = vld [vmem:[#allocation9 + $0x2a8] sm:$0xff]  }
 0x6dc   :  { %13958 = vmatprep.mubr.bf16.mxu0 %v21160_v58  ;;  %16427 = vmatpush3.bf16.msra.mxu0 %v19318_v1  ;;  %v20783_v1 = vrot.slane %v20771_v34, %v21175_v36 }
 0x6dd   :  { %16428 = vmatprep.subr.bf16.mxu0 %v19321_v61  ;;  %v21177_v61 = vld [vmem:[#allocation24_spill] sm:$0xff] }
 0x6de   :  { %16389 = vmatpush3.bf16.msra.mxu1 %v19304_v11  ;;  %v20788_v48 = vrot.slane %v20771_v34, %v21177_v61 }
 0x6df   :  { %16390 = vmatprep.subr.bf16.mxu1 %v19305_v2 }
 0x6e0   :  { %16429 = vmatpush3.bf16.msra.mxu0 %v19322_v33 }
 0x6e1   :  { %13894 = vmatmul.mubr.bf16.gmra.mrb[156].mxu1 %v21161_v21  ;;  %16430 = vmatprep.subr.bf16.mxu0 %v19325_v9  ;;  %v19343_v9 = vld [vmem:[#allocation9 + $0x2f0] sm:$0xff]  }
 0x6e2   :  { %13901 = vmatprep.mubr.bf16.mxu1 %v21162_v3  ;;  %16391 = vmatpush3.bf16.msra.mxu1 %v19306_v32 }
 0x6e3   :  { %13959 = vmatmul.mubr.bf16.gmra.mrb[172].mxu0 %v21163_v5  ;;  %16392 = vmatprep.subr.bf16.mxu1 %v19307_v54 }
 0x6e4   :  { %13966 = vmatprep.mubr.bf16.mxu0 %v20593_v35  ;;  %16431 = vmatpush3.bf16.msra.mxu0 %v19326_v56  ;;  %v19313_v35 = vld [vmem:[#allocation9 + $0x1f0] sm:$0xff]  }
 0x6e5   :  { %16432 = vmatprep.subr.bf16.mxu0 %v19329_v42 }
 0x6e6   :  { %16393 = vmatpush3.bf16.msra.mxu1 %v19308_v39 }
 0x6e7   :  { %16394 = vmatprep.subr.bf16.mxu1 %v19309_v22 }
 0x6e8   :  { %16433 = vmatpush3.bf16.msra.mxu0 %v19330_v7 }
 0x6e9   :  { %13902 = vmatmul.mubr.bf16.gmra.mrb[160].mxu1 %v21164_v40  ;;  %16434 = vmatprep.subr.bf16.mxu0 %v19333_v0  ;;  %v19344_v0 = vld [vmem:[#allocation9 + $0x2b0] sm:$0xff]   ;;  %v19347_v40 = vld [vmem:[#allocation9 + $0x2f8] sm:$0xff]  }
 0x6ea   :  { %13909 = vmatprep.mubr.bf16.mxu1 %v21165_v18  ;;  %16395 = vmatpush3.bf16.msra.mxu1 %v19310_v47 }
 0x6eb   :  { %13967 = vmatmul.mubr.bf16.gmra.mrb[176].mxu0 %v21166_v20  ;;  %16396 = vmatprep.subr.bf16.mxu1 %v19311_v44 }
 0x6ec   :  { %13974 = vmatprep.mubr.bf16.mxu0 %v20609_v8  ;;  %16435 = vmatpush3.bf16.msra.mxu0 %v19334_v57  ;;  %v19319_v8 = vld [vmem:[#allocation9 + $0x2c0] sm:$0xff]  }
 0x6ed   :  { %16436 = vmatprep.subr.bf16.mxu0 %v19337_v15 }
 0x6ee   :  { %16397 = vmatpush3.bf16.msra.mxu1 %v19312_v31 }
 0x6ef   :  { %16398 = vmatprep.subr.bf16.mxu1 %v19313_v35 }
 0x6f0   :  { %16437 = vmatpush3.bf16.msra.mxu0 %v19338_v23 }
 0x6f1   :  { %13910 = vmatmul.mubr.bf16.gmra.mrb[164].mxu1 %v21167_v16  ;;  %16438 = vmatprep.subr.bf16.mxu0 %v19341_v26  ;;  %v19348_v16 = vld [vmem:[#allocation9 + $0x2b8] sm:$0xff]  }
 0x6f2   :  { %16399 = vmatpush3.bf16.msra.mxu1 %v19314_v6  ;;  %14015 = vmatprep.mubr.bf16.mxu1 %v21168_v46 }
 0x6f3   :  { %13975 = vmatmul.mubr.bf16.gmra.mrb[180].mxu0 %v20605_v24  ;;  %16400 = vmatprep.subr.bf16.mxu1 %v19315_v43  ;;  %v19327_v24 = vld [vmem:[#allocation9 + $0x2d0] sm:$0xff]  }
 0x6f4   :  { %16439 = vmatpush3.bf16.msra.mxu0 %v19342_v63 }
 0x6f5   :  { %16440 = vmatprep.subr.bf16.mxu0 %v19345_v41 }
 0x6f6   :  { %16401 = vmatpush3.bf16.msra.mxu1 %v19316_v38 }
 0x6f7   :  { %16466 = vmatprep.subr.bf16.mxu1 %v19319_v8 }
 0x6f8   :  { %16441 = vmatpush3.bf16.msra.mxu0 %v19346_v59  ;;  %v19350_v59 = vld [vmem:[#allocation9 + $0x308] sm:$0xff]  }
 0x6f9   :  { %14016 = vmatmul.mubr.bf16.vlgmr.msra.gmra.mrb[168].mxu1 %v21169_v29  ;;  %16558 = vmatprep.subr.bf16.mxu0 %v20766_v55 }
 0x6fa   :  { %14023 = vmatprep.mubr.bf16.mxu1 %v21170_v50  ;;  %16467 = vmatpush3.bf16.msra.mxu1 %v19320_v28 }
 0x6fb   :  { %16468 = vmatprep.subr.bf16.mxu1 %v19323_v30 }
 0x6fe   :  { %16469 = vmatpush3.bf16.msra.mxu1 %v19324_v17 }
 0x6ff   :  { %16470 = vmatprep.subr.bf16.mxu1 %v19327_v24 }
 0x701   :  { %14024 = vmatmul.mubr.bf16.gmra.mrb[172].mxu1 %v21171_v60 }
 0x702   :  { %14031 = vmatprep.mubr.bf16.mxu1 %v21172_v25  ;;  %16471 = vmatpush3.bf16.msra.mxu1 %v19328_v4 }
 0x703   :  { %16472 = vmatprep.subr.bf16.mxu1 %v19331_v45 }
 0x706   :  { %16473 = vmatpush3.bf16.msra.mxu1 %v19332_v12 }
 0x707   :  { %16474 = vmatprep.subr.bf16.mxu1 %v19335_v13 }
 0x709   :  { %14032 = vmatmul.mubr.bf16.gmra.mrb[176].mxu1 %v21176_v52 }
 0x70a   :  { %14039 = vmatprep.mubr.bf16.mxu1 %v20611_v37  ;;  %16475 = vmatpush3.bf16.msra.mxu1 %v19336_v10  ;;  %v11807_v11 = vpop.f32.mrb[80].mxu1 }
 0x70b   :  { %v16662_v2 = vadd.f32 %v11807_v11, %v20775_v62  ;;  %v12318_v58 = vpop.f32.mrb[88].mxu0  ;;  %16476 = vmatprep.subr.bf16.mxu1 %v19339_v53  ;;  %v11809_v33 = vpop.f32.mrb[81].mxu1 }
 0x70c   :  { %v16678_v32 = vadd.f32 %v12318_v58, %v20779_v19  ;;  %v16663_v54 = vadd.f32 %v11809_v33, %v20783_v1  ;;  %v12320_v56 = vpop.f32.mrb[89].mxu0  ;;  %v11811_v21 = vpop.f32.mrb[82].mxu1 }
 0x70d   :  { %v16679_v42 = vadd.f32 %v12320_v56, %v20788_v48  ;;  %v16664_v3 = vadd.f32 %v11811_v21, %v20775_v62  ;;  %v12322_v37 = vpop.f32.mrb[90].mxu0  ;;  %v11813_v39 = vpop.f32.mrb[83].mxu1  ;;  %v12820_v47 = vmax.f32 %v16662_v2, 0.0  ;;  %v19352_v56 = vld [vmem:[#allocation9 + $0x318] sm:$0xff]  }
 0x70e   :  { %16477 = vmatpush3.bf16.msra.mxu1 %v19340_v27  ;;  %v16680_v5 = vadd.f32 %v12322_v37, %v20779_v19  ;;  %v16665_v22 = vadd.f32 %v11813_v39, %v20783_v1  ;;  %v12324_v7 = vpop.f32.mrb[91].mxu0  ;;  %v12822_v15 = vmax.f32 %v16678_v32, 0.0  ;;  %v12821_v18 = vmax.f32 %v16663_v54, 0.0 }
 0x70f   :  { %v12833_v44 = vmax.f32 %v16664_v3, 0.0  ;;  %v16681_v57 = vadd.f32 %v12324_v7, %v20788_v48  ;;  %16478 = vmatprep.subr.bf16.mxu1 %v19343_v9  ;;  %v12823_v35 = vmax.f32 %v16679_v42, 0.0 }
 0x710   :  { %v12835_v31 = vmax.f32 %v16680_v5, 0.0  ;;  %v12834_v20 = vmax.f32 %v16665_v22, 0.0 }
 0x711   :  { %v12924_v23 = vpack.c.bf16 %v12833_v44, %v12820_v47  ;;  %v12836_v26 = vmax.f32 %v16681_v57, 0.0  ;;  %14040 = vmatmul.mubr.bf16.gmra.mrb[180].mxu1 %v20607_v51 }
 0x712   :  { %v12926_v6 = vpack.c.bf16 %v12835_v31, %v12822_v15  ;;  %v12925_v43 = vpack.c.bf16 %v12834_v20, %v12821_v18  ;;  %16479 = vmatpush3.bf16.msra.mxu1 %v19344_v0  ;;  %v11817_v63 = vpop.f32.mrb[84].mxu1 }
 0x713   :  { %v12927_v41 = vpack.c.bf16 %v12836_v26, %v12823_v35  ;;  %v16666_v46 = vadd.f32 %v11817_v63, %v20775_v62  ;;  %v12328_v38 = vpop.f32.mrb[92].mxu0  ;;  %16480 = vmatprep.subr.bf16.mxu1 %v19347_v40  ;;  %v11819_v8 = vpop.f32.mrb[85].mxu1 }
 0x714   :  { %v16682_v28 = vadd.f32 %v12328_v38, %v20779_v19  ;;  %v16667_v30 = vadd.f32 %v11819_v8, %v20783_v1  ;;  %v12330_v29 = vpop.f32.mrb[93].mxu0  ;;  %v11821_v50 = vpop.f32.mrb[86].mxu1  ;;  %14080 = vmatprep.mubr.bf16.mxu0 %v12925_v43 }
 0x715   :  { %v16683_v51 = vadd.f32 %v12330_v29, %v20788_v48  ;;  %v16668_v17 = vadd.f32 %v11821_v50, %v20775_v62  ;;  %v12332_v24 = vpop.f32.mrb[94].mxu0  ;;  %14145 = vmatprep.mubr.bf16.mxu1 %v12927_v41  ;;  %v11823_v4 = vpop.f32.mrb[87].mxu1  ;;  %14081 = vmatmul.mubr.bf16.vlgmr.msra.gmra.mrb[184].mxu0 %v12924_v23  ;;  %v12846_v12 = vmax.f32 %v16666_v46, 0.0 }
 0x716   :  { %16481 = vmatpush3.bf16.msra.mxu1 %v19348_v16  ;;  %v16684_v45 = vadd.f32 %v12332_v24, %v20779_v19  ;;  %v16669_v60 = vadd.f32 %v11823_v4, %v20783_v1  ;;  %v12334_v25 = vpop.f32.mrb[95].mxu0  ;;  %16559 = vmatpush3.bf16.msra.mxu0 %v20766_v55  ;;  %v12848_v53 = vmax.f32 %v16682_v28, 0.0  ;;  %v12847_v14 = vmax.f32 %v16667_v30, 0.0 }
 0x717   :  { %v12859_v13 = vmax.f32 %v16668_v17, 0.0  ;;  %v16685_v10 = vadd.f32 %v12334_v25, %v20788_v48  ;;  %16560 = vmatprep.subr.bf16.mxu0 %v19350_v59  ;;  %v12849_v61 = vmax.f32 %v16683_v51, 0.0 }
 0x718   :  { %v12861_v36 = vmax.f32 %v16684_v45, 0.0  ;;  %v12860_v52 = vmax.f32 %v16669_v60, 0.0 }
 0x719   :  { %v12937_v11 = vpack.c.bf16 %v12859_v13, %v12846_v12  ;;  %v12862_v27 = vmax.f32 %v16685_v10, 0.0  ;;  %14146 = vmatmul.mubr.bf16.vlgmr.msra.gmra.mrb[184].mxu1 %v12926_v6 }
 0x71a   :  { %v12939_v2 = vpack.c.bf16 %v12861_v36, %v12848_v53  ;;  %v12938_v58 = vpack.c.bf16 %v12860_v52, %v12847_v14  ;;  %v11827_v33 = vpop.f32.mrb[88].mxu1  ;;  %16561 = vmatpush3.bf16.msra.mxu0 %v19350_v59 }
 0x71b   :  { %v12940_v9 = vpack.c.bf16 %v12862_v27, %v12849_v61  ;;  %v16670_v55 = vadd.f32 %v11827_v33, %v20775_v62  ;;  %v12338_v32 = vpop.f32.mrb[96].mxu0  ;;  %v11829_v54 = vpop.f32.mrb[89].mxu1  ;;  %16562 = vmatprep.subr.bf16.mxu0 %v19351_v49 }
 0x71c   :  { %v16686_v21 = vadd.f32 %v12338_v32, %v20779_v19  ;;  %v16671_v42 = vadd.f32 %v11829_v54, %v20783_v1  ;;  %v12340_v3 = vpop.f32.mrb[97].mxu0  ;;  %v11831_v37 = vpop.f32.mrb[90].mxu1  ;;  %14088 = vmatprep.mubr.bf16.mxu0 %v12938_v58 }
 0x71d   :  { %v16687_v39 = vadd.f32 %v12340_v3, %v20788_v48  ;;  %v16672_v5 = vadd.f32 %v11831_v37, %v20775_v62  ;;  %v12342_v22 = vpop.f32.mrb[98].mxu0  ;;  %14153 = vmatprep.mubr.bf16.mxu1 %v12940_v9  ;;  %v11833_v7 = vpop.f32.mrb[91].mxu1  ;;  %14089 = vmatmul.mubr.bf16.gmra.mrb[188].mxu0 %v12937_v11  ;;  %v12872_v57 = vmax.f32 %v16670_v55, 0.0 }
 0x71e   :  { %v16688_v0 = vadd.f32 %v12342_v22, %v20779_v19  ;;  %v16673_v47 = vadd.f32 %v11833_v7, %v20783_v1  ;;  %v12344_v44 = vpop.f32.mrb[99].mxu0  ;;  %16563 = vmatpush3.bf16.msra.mxu0 %v19351_v49  ;;  %v12874_v18 = vmax.f32 %v16686_v21, 0.0  ;;  %v12873_v31 = vmax.f32 %v16671_v42, 0.0 }
 0x71f   :  { %v12885_v40 = vmax.f32 %v16672_v5, 0.0  ;;  %v16689_v15 = vadd.f32 %v12344_v44, %v20788_v48  ;;  %16564 = vmatprep.subr.bf16.mxu0 %v19352_v56  ;;  %v12875_v23 = vmax.f32 %v16687_v39, 0.0 }
 0x720   :  { %v12887_v20 = vmax.f32 %v16688_v0, 0.0  ;;  %v12886_v35 = vmax.f32 %v16673_v47, 0.0 }
 0x721   :  { %v12950_v26 = vpack.c.bf16 %v12885_v40, %v12872_v57  ;;  %v12888_v6 = vmax.f32 %v16689_v15, 0.0  ;;  %14154 = vmatmul.mubr.bf16.gmra.mrb[188].mxu1 %v12939_v2  ;;  %v21178_v2 = vld [vmem:[#allocation32_spill] sm:$0xff] }
 0x722   :  { %v12952_v43 = vpack.c.bf16 %v12887_v20, %v12874_v18  ;;  %v12951_v63 = vpack.c.bf16 %v12886_v35, %v12873_v31  ;;  %v11837_v16 = vpop.f32.mrb[92].mxu1  ;;  %16565 = vmatpush3.bf16.msra.mxu0 %v19352_v56 }
 0x723   :  { %v12953_v41 = vpack.c.bf16 %v12888_v6, %v12875_v23  ;;  %v16674_v46 = vadd.f32 %v11837_v16, %v20775_v62  ;;  %v12348_v38 = vpop.f32.mrb[100].mxu0  ;;  %v11839_v8 = vpop.f32.mrb[93].mxu1 }
 0x724   :  { %v16690_v59 = vadd.f32 %v12348_v38, %v20779_v19  ;;  %v16675_v28 = vadd.f32 %v11839_v8, %v20783_v1  ;;  %v12350_v30 = vpop.f32.mrb[101].mxu0  ;;  %v11841_v29 = vpop.f32.mrb[94].mxu1  ;;  %14096 = vmatprep.mubr.bf16.mxu0 %v12951_v63 }
 0x725   :  { %v16691_v50 = vadd.f32 %v12350_v30, %v20788_v48  ;;  %v16676_v51 = vadd.f32 %v11841_v29, %v20775_v62  ;;  %v12352_v17 = vpop.f32.mrb[102].mxu0  ;;  %14161 = vmatprep.mubr.bf16.mxu1 %v12953_v41  ;;  %v11843_v24 = vpop.f32.mrb[95].mxu1  ;;  %14097 = vmatmul.mubr.bf16.gmra.mrb[192].mxu0 %v12950_v26  ;;  %v12898_v25 = vmax.f32 %v16674_v46, 0.0 }
 0x726   :  { %v16692_v4 = vadd.f32 %v12352_v17, %v20779_v19  ;;  %v16677_v45 = vadd.f32 %v11843_v24, %v20783_v1  ;;  %v12354_v60 = vpop.f32.mrb[103].mxu0  ;;  %v12900_v10 = vmax.f32 %v16690_v59, 0.0  ;;  %v12899_v49 = vmax.f32 %v16675_v28, 0.0 }
 0x727   :  { %v12911_v12 = vmax.f32 %v16676_v51, 0.0  ;;  %v16693_v13 = vadd.f32 %v12354_v60, %v20788_v48  ;;  %v12901_v36 = vmax.f32 %v16691_v50, 0.0  ;;  %v20827_v19 = vrot.slane %v20771_v34, %v21178_v2 }
 0x728   :  { %v12913_v53 = vmax.f32 %v16692_v4, 0.0  ;;  %v12912_v14 = vmax.f32 %v16677_v45, 0.0 }
 0x729   :  { %v12963_v52 = vpack.c.bf16 %v12911_v12, %v12898_v25  ;;  %v12914_v62 = vmax.f32 %v16693_v13, 0.0  ;;  %14162 = vmatmul.mubr.bf16.gmra.mrb[192].mxu1 %v12952_v43 }
 0x72a   :  { %v12965_v61 = vpack.c.bf16 %v12913_v53, %v12900_v10  ;;  %v12964_v11 = vpack.c.bf16 %v12912_v14, %v12899_v49  ;;  %v16036_v27 = vpop.f32.mrb[96].mxu1 }
 0x72b   :  { %v12966_v1 = vpack.c.bf16 %v12914_v62, %v12901_v36  ;;  %v16076_v58 = vpop.f32.mrb[104].mxu0  ;;  %v16037_v33 = vpop.f32.mrb[97].mxu1 }
 0x72c   :  { %v16038_v9 = vadd.f32 %v16037_v33, %v16036_v27  ;;  %v16077_v48 = vpop.f32.mrb[105].mxu0  ;;  %v16039_v55 = vpop.f32.mrb[98].mxu1  ;;  %14104 = vmatprep.mubr.bf16.mxu0 %v12964_v11 }
 0x72d   :  { %v16078_v32 = vadd.f32 %v16077_v48, %v16076_v58  ;;  %v16079_v54 = vpop.f32.mrb[106].mxu0  ;;  %14169 = vmatprep.mubr.bf16.mxu1 %v12966_v1  ;;  %v16040_v56 = vpop.f32.mrb[99].mxu1  ;;  %14105 = vmatmul.mubr.bf16.gmra.mrb[196].mxu0 %v12963_v52 }
 0x72e   :  { %v12392_v21 = vadd.f32 %v16038_v9, %v20827_v19  ;;  %v16041_v42 = vadd.f32 %v16040_v56, %v16039_v55  ;;  %v16080_v3 = vpop.f32.mrb[107].mxu0 }
 0x72f   :  { %v16081_v37 = vadd.f32 %v16080_v3, %v16079_v54 }
 0x730   :  { %v12457_v39 = vadd.f32 %v16078_v32, %v12392_v21  ;;  %v12395_v34 = vadd.f32 %v16041_v42, %v20827_v19 }
 0x731   :  { %14170 = vmatmul.mubr.bf16.gmra.mrb[196].mxu1 %v12965_v61 }
 0x732   :  { %v20831_v5 = vadd.f32 %v16081_v37, %v12395_v34  ;;  %v16042_v22 = vpop.f32.mrb[100].mxu1 }
 0x733   :  { %v16082_v7 = vpop.f32.mrb[108].mxu0  ;;  %v16043_v0 = vpop.f32.mrb[101].mxu1 }
 0x734   :  { %v16044_v47 = vadd.f32 %v16043_v0, %v16042_v22  ;;  %v16083_v44 = vpop.f32.mrb[109].mxu0  ;;  %v16045_v57 = vpop.f32.mrb[102].mxu1 }
 0x735   :  { %v16084_v40 = vadd.f32 %v16083_v44, %v16082_v7  ;;  %v16085_v15 = vpop.f32.mrb[110].mxu0  ;;  %v16046_v18 = vpop.f32.mrb[103].mxu1 }
 0x736   :  { %v12400_v31 = vadd.f32 %v16044_v47, %v20827_v19  ;;  %v16047_v20 = vadd.f32 %v16046_v18, %v16045_v57  ;;  %v16086_v35 = vpop.f32.mrb[111].mxu0 }
 0x737   :  { %v16087_v23 = vadd.f32 %v16086_v35, %v16085_v15 }
 0x738   :  { %v12465_v26 = vadd.f32 %v16084_v40, %v12400_v31  ;;  %v12403_v6 = vadd.f32 %v16047_v20, %v20827_v19 }
 0x73a   :  { %v20835_v43 = vadd.f32 %v16087_v23, %v12403_v6  ;;  %v16048_v63 = vpop.f32.mrb[104].mxu1 }
 0x73b   :  { %v16088_v16 = vpop.f32.mrb[112].mxu0  ;;  %v16049_v41 = vpop.f32.mrb[105].mxu1 }
 0x73c   :  { %v16050_v46 = vadd.f32 %v16049_v41, %v16048_v63  ;;  %v16089_v38 = vpop.f32.mrb[113].mxu0  ;;  %v16051_v8 = vpop.f32.mrb[106].mxu1 }
 0x73d   :  { %v16090_v59 = vadd.f32 %v16089_v38, %v16088_v16  ;;  %v16091_v28 = vpop.f32.mrb[114].mxu0  ;;  %v16052_v30 = vpop.f32.mrb[107].mxu1 }
 0x73e   :  { %v12408_v29 = vadd.f32 %v16050_v46, %v20827_v19  ;;  %v16053_v50 = vadd.f32 %v16052_v30, %v16051_v8  ;;  %v16092_v51 = vpop.f32.mrb[115].mxu0 }
 0x73f   :  { %v16093_v17 = vadd.f32 %v16092_v51, %v16091_v28 }
 0x740   :  { %v12473_v24 = vadd.f32 %v16090_v59, %v12408_v29  ;;  %v12411_v4 = vadd.f32 %v16053_v50, %v20827_v19 }
 0x742   :  { %v20839_v45 = vadd.f32 %v16093_v17, %v12411_v4  ;;  %v16054_v60 = vpop.f32.mrb[108].mxu1 }
 0x743   :  { %v16094_v25 = vpop.f32.mrb[116].mxu0  ;;  %v16055_v12 = vpop.f32.mrb[109].mxu1 }
 0x744   :  { %v16056_v13 = vadd.f32 %v16055_v12, %v16054_v60  ;;  %v16095_v10 = vpop.f32.mrb[117].mxu0  ;;  %v16057_v49 = vpop.f32.mrb[110].mxu1 }
 0x745   :  { %v16096_v53 = vadd.f32 %v16095_v10, %v16094_v25  ;;  %v16097_v14 = vpop.f32.mrb[118].mxu0  ;;  %v16058_v36 = vpop.f32.mrb[111].mxu1 }
 0x746   :  { %v12416_v52 = vadd.f32 %v16056_v13, %v20827_v19  ;;  %v16059_v62 = vadd.f32 %v16058_v36, %v16057_v49  ;;  %v16098_v61 = vpop.f32.mrb[119].mxu0 }
 0x747   :  { %v16099_v11 = vadd.f32 %v16098_v61, %v16097_v14 }
 0x748   :  { %v12481_v27 = vadd.f32 %v16096_v53, %v12416_v52  ;;  %v12419_v2 = vadd.f32 %v16059_v62, %v20827_v19 }
 0x74a   :  { %v20843_v1 = vadd.f32 %v16099_v11, %v12419_v2 }
 0x74b   :  { %v16116_v58 = vpop.f32.mrb[112].mxu1 }
 0x74c   :  { %v16156_v33 = vpop.f32.mrb[120].mxu0  ;;  %v16117_v9 = vpop.f32.mrb[113].mxu1 }
 0x74d   :  { %v16118_v48 = vadd.f32 %v16117_v9, %v16116_v58  ;;  %v16157_v55 = vpop.f32.mrb[121].mxu0  ;;  %v16119_v32 = vpop.f32.mrb[114].mxu1 }
 0x74e   :  { %v16158_v54 = vadd.f32 %v16157_v55, %v16156_v33  ;;  %v16159_v56 = vpop.f32.mrb[122].mxu0  ;;  %v16120_v21 = vpop.f32.mrb[115].mxu1 }
 0x74f   :  { %v12522_v42 = vadd.f32 %v16118_v48, %v12457_v39  ;;  %v16121_v3 = vadd.f32 %v16120_v21, %v16119_v32  ;;  %v16160_v37 = vpop.f32.mrb[123].mxu0 }
 0x750   :  { %v16161_v34 = vadd.f32 %v16160_v37, %v16159_v56 }
 0x751   :  { %v12587_v22 = vadd.f32 %v16158_v54, %v12522_v42  ;;  %v12525_v7 = vadd.f32 %v16121_v3, %v20831_v5 }
 0x753   :  { %v12590_v0 = vadd.f32 %v16161_v34, %v12525_v7  ;;  %v16122_v19 = vpop.f32.mrb[116].mxu1 }
 0x754   :  { %v16162_v47 = vpop.f32.mrb[124].mxu0  ;;  %v16123_v44 = vpop.f32.mrb[117].mxu1 }
 0x755   :  { %v16124_v57 = vadd.f32 %v16123_v44, %v16122_v19  ;;  %v16163_v40 = vpop.f32.mrb[125].mxu0  ;;  %v16125_v15 = vpop.f32.mrb[118].mxu1 }
 0x756   :  { %v16164_v18 = vadd.f32 %v16163_v40, %v16162_v47  ;;  %v16165_v31 = vpop.f32.mrb[126].mxu0  ;;  %v16126_v20 = vpop.f32.mrb[119].mxu1 }
 0x757   :  { %v12530_v35 = vadd.f32 %v16124_v57, %v12465_v26  ;;  %v16127_v23 = vadd.f32 %v16126_v20, %v16125_v15  ;;  %v16166_v6 = vpop.f32.mrb[127].mxu0 }
 0x758   :  { %v16167_v39 = vadd.f32 %v16166_v6, %v16165_v31 }
 0x759   :  { %v12595_v63 = vadd.f32 %v16164_v18, %v12530_v35  ;;  %v12533_v16 = vadd.f32 %v16127_v23, %v20835_v43 }
 0x75b   :  { %v12598_v41 = vadd.f32 %v16167_v39, %v12533_v16  ;;  %v16128_v46 = vpop.f32.mrb[120].mxu1 }
 0x75c   :  { %v16168_v5 = vpop.f32.mrb[128].mxu0  ;;  %v16129_v38 = vpop.f32.mrb[121].mxu1 }
 0x75d   :  { %v16130_v8 = vadd.f32 %v16129_v38, %v16128_v46  ;;  %v16169_v59 = vpop.f32.mrb[129].mxu0  ;;  %v16131_v28 = vpop.f32.mrb[122].mxu1 }
 0x75e   :  { %v16170_v30 = vadd.f32 %v16169_v59, %v16168_v5  ;;  %v16171_v29 = vpop.f32.mrb[130].mxu0  ;;  %v16132_v50 = vpop.f32.mrb[123].mxu1 }
 0x75f   :  { %v12538_v51 = vadd.f32 %v16130_v8, %v12473_v24  ;;  %v16133_v17 = vadd.f32 %v16132_v50, %v16131_v28  ;;  %v16172_v4 = vpop.f32.mrb[131].mxu0 }
 0x760   :  { %v16173_v26 = vadd.f32 %v16172_v4, %v16171_v29 }
 0x761   :  { %v12603_v60 = vadd.f32 %v16170_v30, %v12538_v51  ;;  %v12541_v25 = vadd.f32 %v16133_v17, %v20839_v45 }
 0x763   :  { %v12606_v12 = vadd.f32 %v16173_v26, %v12541_v25  ;;  %v16134_v13 = vpop.f32.mrb[124].mxu1 }
 0x764   :  { %v16174_v43 = vpop.f32.mrb[132].mxu0  ;;  %v16135_v10 = vpop.f32.mrb[125].mxu1 }
 0x765   :  { %v16136_v49 = vadd.f32 %v16135_v10, %v16134_v13  ;;  %v16175_v53 = vpop.f32.mrb[133].mxu0  ;;  %v16137_v14 = vpop.f32.mrb[126].mxu1 }
 0x766   :  { %v16176_v36 = vadd.f32 %v16175_v53, %v16174_v43  ;;  %v16177_v52 = vpop.f32.mrb[134].mxu0  ;;  %v16138_v62 = vpop.f32.mrb[127].mxu1 }
 0x767   :  { %v12546_v61 = vadd.f32 %v16136_v49, %v12481_v27  ;;  %v16139_v11 = vadd.f32 %v16138_v62, %v16137_v14  ;;  %v16178_v2 = vpop.f32.mrb[135].mxu0 }
 0x768   :  { %v16179_v24 = vadd.f32 %v16178_v2, %v16177_v52 }
 0x769   :  { %v12611_v58 = vadd.f32 %v16176_v36, %v12546_v61  ;;  %v12549_v33 = vadd.f32 %v16139_v11, %v20843_v1 }
 0x76b   :  { %v20849_v9 = vadd.f32 %v16179_v24, %v12549_v33 }
 0x76c   :  { %v16196_v45 = vpop.f32.mrb[128].mxu1 }
 0x76d   :  { %v16236_v48 = vpop.f32.mrb[136].mxu0  ;;  %v16197_v55 = vpop.f32.mrb[129].mxu1 }
 0x76e   :  { %v16198_v32 = vadd.f32 %v16197_v55, %v16196_v45  ;;  %v16237_v54 = vpop.f32.mrb[137].mxu0  ;;  %v16199_v56 = vpop.f32.mrb[130].mxu1  ;;  %v19354_v45 = vld [vmem:[#allocation12 + $0x8] sm:$0xff]  }
 0x76f   :  { %v16238_v21 = vadd.f32 %v16237_v54, %v16236_v48  ;;  %v16239_v42 = vpop.f32.mrb[138].mxu0  ;;  %v16200_v3 = vpop.f32.mrb[131].mxu1 }
 0x770   :  { %v12652_v37 = vadd.f32 %v16198_v32, %v12587_v22  ;;  %v16201_v34 = vadd.f32 %v16200_v3, %v16199_v56  ;;  %v16240_v27 = vpop.f32.mrb[139].mxu0  ;;  %v19355_v56 = vld [vmem:[#allocation12 + $0x10] sm:$0xff]  }
 0x771   :  { %v16241_v7 = vadd.f32 %v16240_v27, %v16239_v42 }
 0x772   :  { %v12655_v19 = vadd.f32 %v16201_v34, %v12590_v0  ;;  %v12717_v47 = vadd.f32 %v16238_v21, %v12652_v37 }
 0x774   :  { %v16202_v44 = vpop.f32.mrb[132].mxu1  ;;  %v20851_v57 = vadd.f32 %v16241_v7, %v12655_v19 }
 0x775   :  { %v16242_v1 = vpop.f32.mrb[140].mxu0  ;;  %v16203_v40 = vpop.f32.mrb[133].mxu1 }
 0x776   :  { %v16204_v15 = vadd.f32 %v16203_v40, %v16202_v44  ;;  %v16243_v18 = vpop.f32.mrb[141].mxu0  ;;  %v16205_v31 = vpop.f32.mrb[134].mxu1 }
 0x777   :  { %v16244_v20 = vadd.f32 %v16243_v18, %v16242_v1  ;;  %v16245_v35 = vpop.f32.mrb[142].mxu0  ;;  %v16206_v23 = vpop.f32.mrb[135].mxu1  ;;  %v19356_v1 = vld [vmem:[#allocation12 + $0x18] sm:$0xff]  }
 0x778   :  { %v12660_v6 = vadd.f32 %v16204_v15, %v12595_v63  ;;  %v16207_v39 = vadd.f32 %v16206_v23, %v16205_v31  ;;  %v16246_v16 = vpop.f32.mrb[143].mxu0 }
 0x779   :  { %v16247_v22 = vadd.f32 %v16246_v16, %v16245_v35 }
 0x77a   :  { %v12663_v46 = vadd.f32 %v16207_v39, %v12598_v41  ;;  %v12725_v5 = vadd.f32 %v16244_v20, %v12660_v6  ;;  %v19357_v39 = vld [vmem:[#allocation12 + $0x20] sm:$0xff]  }
 0x77c   :  { %v16208_v38 = vpop.f32.mrb[136].mxu1  ;;  %v12728_v0 = vadd.f32 %v16247_v22, %v12663_v46 }
 0x77d   :  { %v16248_v8 = vpop.f32.mrb[144].mxu0  ;;  %v16209_v59 = vpop.f32.mrb[137].mxu1 }
 0x77e   :  { %v16210_v28 = vadd.f32 %v16209_v59, %v16208_v38  ;;  %v16249_v30 = vpop.f32.mrb[145].mxu0  ;;  %v16211_v29 = vpop.f32.mrb[138].mxu1 }
 0x77f   :  { %v16250_v50 = vadd.f32 %v16249_v30, %v16248_v8  ;;  %v16251_v51 = vpop.f32.mrb[146].mxu0  ;;  %v16212_v17 = vpop.f32.mrb[139].mxu1 }
 0x780   :  { %v12668_v4 = vadd.f32 %v16210_v28, %v12603_v60  ;;  %v16213_v26 = vadd.f32 %v16212_v17, %v16211_v29  ;;  %v16252_v25 = vpop.f32.mrb[147].mxu0  ;;  %v19353_v60 = vld [vmem:[#allocation12] sm:$0xff]   ;;  %v19358_v29 = vld [vmem:[#allocation12 + $0x28] sm:$0xff]  }
 0x781   :  { %v16253_v13 = vadd.f32 %v16252_v25, %v16251_v51  ;;  %16574 = vmatprep.subr.bf16.mxu1 %v19353_v60 }
 0x782   :  { %v12671_v63 = vadd.f32 %v16213_v26, %v12606_v12  ;;  %v12733_v43 = vadd.f32 %v16250_v50, %v12668_v4  ;;  %16575 = vmatpush3.bf16.msra.mxu1 %v19353_v60 }
 0x783   :  { %16576 = vmatprep.subr.bf16.mxu1 %v19354_v45 }
 0x784   :  { %v16214_v10 = vpop.f32.mrb[140].mxu1  ;;  %v20853_v49 = vadd.f32 %v16253_v13, %v12671_v63 }
 0x785   :  { %v16254_v41 = vpop.f32.mrb[148].mxu0  ;;  %v16215_v53 = vpop.f32.mrb[141].mxu1 }
 0x786   :  { %v16216_v14 = vadd.f32 %v16215_v53, %v16214_v10  ;;  %v16255_v36 = vpop.f32.mrb[149].mxu0  ;;  %v16217_v52 = vpop.f32.mrb[142].mxu1  ;;  %16577 = vmatpush3.bf16.msra.mxu1 %v19354_v45 }
 0x787   :  { %v16256_v62 = vadd.f32 %v16255_v36, %v16254_v41  ;;  %v16257_v61 = vpop.f32.mrb[150].mxu0  ;;  %v16218_v11 = vpop.f32.mrb[143].mxu1  ;;  %16578 = vmatprep.subr.bf16.mxu1 %v19355_v56 }
 0x788   :  { %v12676_v2 = vadd.f32 %v16216_v14, %v12611_v58  ;;  %v16219_v24 = vadd.f32 %v16218_v11, %v16217_v52  ;;  %v16258_v33 = vpop.f32.mrb[151].mxu0 }
 0x789   :  { %v16259_v48 = vadd.f32 %v16258_v33, %v16257_v61 }
 0x78a   :  { %v12679_v12 = vadd.f32 %v16219_v24, %v20849_v9  ;;  %v12741_v55 = vadd.f32 %v16256_v62, %v12676_v2  ;;  %16579 = vmatpush3.bf16.msra.mxu1 %v19355_v56  ;;  %v20864_v24 = vld [vmem:[#allocation10] ss:$0 sm:$0xff] }
 0x78b   :  { %16580 = vmatprep.subr.bf16.mxu1 %v19356_v1 }
 0x78c   :  { %v16552_v32 = vpop.f32.mrb[144].mxu1  ;;  %v12744_v54 = vadd.f32 %v16259_v48, %v12679_v12 }
 0x78d   :  { %v12790_v21 = vadd.f32 %v16552_v32, %v12725_v5  ;;  %v12781_v42 = vpop.f32.mrb[145].mxu1 }
 0x78e   :  { %v16282_v3 = vpop.f32.mrb[152].mxu0  ;;  %v12782_v37 = vadd.f32 %v12781_v42, %v12717_v47  ;;  %v16553_v34 = vpop.f32.mrb[146].mxu1  ;;  %16581 = vmatpush3.bf16.msra.mxu1 %v19356_v1 }
 0x78f   :  { %v16283_v58 = vpop.f32.mrb[153].mxu0  ;;  %v12793_v27 = vadd.f32 %v16553_v34, %v12728_v0  ;;  %v12784_v7 = vpop.f32.mrb[147].mxu1  ;;  %v12850_v40 = vmax.f32 %v12790_v21, 0.0  ;;  %16582 = vmatprep.subr.bf16.mxu1 %v19357_v39 }
 0x790   :  { %v16284_v19 = vadd.f32 %v16283_v58, %v16282_v3  ;;  %v16285_v44 = vpop.f32.mrb[154].mxu0  ;;  %v12785_v9 = vadd.f32 %v12784_v7, %v20851_v57  ;;  %v12824_v31 = vmax.f32 %v12782_v37, 0.0 }
 0x791   :  { %v12863_v15 = vmax.f32 %v12793_v27, 0.0  ;;  %v16286_v18 = vpop.f32.mrb[155].mxu0 }
 0x792   :  { %v12837_v20 = vmax.f32 %v12785_v9, 0.0  ;;  %v16287_v35 = vadd.f32 %v16286_v18, %v16285_v44  ;;  %16583 = vmatpush3.bf16.msra.mxu1 %v19357_v39  ;;  %v13823_v45 = vadd.f32 %v16284_v19, %v20864_v24 }
 0x793   :  { %v12941_v23 = vpack.c.bf16 %v12863_v15, %v12850_v40  ;;  %16584 = vmatprep.subr.bf16.mxu1 %v19358_v29 }
 0x794   :  { %v12928_v47 = vpack.c.bf16 %v12837_v20, %v12824_v31  ;;  %v16556_v6 = vpop.f32.mrb[148].mxu1  ;;  %v13826_v56 = vadd.f32 %v16287_v35, %v20864_v24 }
 0x795   :  { %v12806_v16 = vadd.f32 %v16556_v6, %v12741_v55  ;;  %v12797_v22 = vpop.f32.mrb[149].mxu1 }
 0x796   :  { %v16288_v46 = vpop.f32.mrb[156].mxu0  ;;  %v12798_v5 = vadd.f32 %v12797_v22, %v12733_v43  ;;  %v16557_v57 = vpop.f32.mrb[150].mxu1  ;;  %16566 = vmatprep.mubr.msk.bf16.mxu0 %vm13775_vm3, %v12928_v47  ;;  %16585 = vmatpush3.bf16.msra.mxu1 %v19358_v29 }
 0x797   :  { %v16289_v38 = vpop.f32.mrb[157].mxu0  ;;  %v12809_v0 = vadd.f32 %v16557_v57, %v12744_v54  ;;  %v12800_v8 = vpop.f32.mrb[151].mxu1  ;;  %16567 = vmatmul.mubr.msk.bf16.vlgmr.msra.gmra.mrb[200].mxu0 %vm13775_vm3, %v12941_v23  ;;  %v12902_v50 = vmax.f32 %v12806_v16, 0.0 }
 0x798   :  { %v16290_v59 = vadd.f32 %v16289_v38, %v16288_v46  ;;  %v16291_v28 = vpop.f32.mrb[158].mxu0  ;;  %v12801_v30 = vadd.f32 %v12800_v8, %v20853_v49  ;;  %v12876_v4 = vmax.f32 %v12798_v5, 0.0 }
 0x799   :  { %v12915_v51 = vmax.f32 %v12809_v0, 0.0  ;;  %v16292_v17 = vpop.f32.mrb[159].mxu0 }
 0x79a   :  { %v12889_v26 = vmax.f32 %v12801_v30, 0.0  ;;  %v16293_v25 = vadd.f32 %v16292_v17, %v16291_v28  ;;  %v13831_v19 = vadd.f32 %v16290_v59, %v20864_v24 }
 0x79b   :  { %v12967_v13 = vpack.c.bf16 %v12915_v51, %v12902_v50 }
 0x79c   :  { %v12954_v63 = vpack.c.bf16 %v12889_v26, %v12876_v4  ;;  %v13834_v35 = vadd.f32 %v16293_v25, %v20864_v24 }
 0x79e   :  { %v16294_v43 = vpop.f32.mrb[160].mxu0  ;;  %16570 = vmatprep.mubr.msk.bf16.mxu0 %vm13775_vm3, %v12954_v63 }
 0x79f   :  { %v16295_v10 = vpop.f32.mrb[161].mxu0  ;;  %16571 = vmatmul.mubr.msk.bf16.gmra.mrb[204].mxu0 %vm13775_vm3, %v12967_v13 }
 0x7a0   :  { %v16296_v49 = vadd.f32 %v16295_v10, %v16294_v43  ;;  %v16297_v41 = vpop.f32.mrb[162].mxu0 }
 0x7a1   :  { %v16298_v53 = vpop.f32.mrb[163].mxu0 }
 0x7a2   :  { %v16299_v14 = vadd.f32 %v16298_v53, %v16297_v41  ;;  %v13839_v8 = vadd.f32 %v16296_v49, %v20864_v24 }
 0x7a4   :  { %v13842_v51 = vadd.f32 %v16299_v14, %v20864_v24 }
 0x7a6   :  { %v16300_v36 = vpop.f32.mrb[164].mxu0 }
 0x7a7   :  { %v16301_v52 = vpop.f32.mrb[165].mxu0 }
 0x7a8   :  { %v16302_v62 = vadd.f32 %v16301_v52, %v16300_v36  ;;  %v16303_v61 = vpop.f32.mrb[166].mxu0 }
 0x7a9   :  { %v16304_v11 = vpop.f32.mrb[167].mxu0 }
 0x7aa   :  { %v20862_v2 = vadd.f32 %v16304_v11, %v16303_v61  ;;  %v13847_v49 = vadd.f32 %v16302_v62, %v20864_v24 }
 0x7ac   :  { %v16322_v33 = vpop.f32.mrb[152].mxu1  ;;  %v13850_v14 = vadd.f32 %v20862_v2, %v20864_v24 }
 0x7ad   :  { %v16323_v60 = vpop.f32.mrb[153].mxu1 }
 0x7ae   :  { %v16324_v48 = vadd.f32 %v16323_v60, %v16322_v33  ;;  %v16362_v12 = vpop.f32.mrb[168].mxu0  ;;  %v16325_v55 = vpop.f32.mrb[154].mxu1 }
 0x7af   :  { %v16363_v32 = vpop.f32.mrb[169].mxu0  ;;  %v16326_v54 = vpop.f32.mrb[155].mxu1 }
 0x7b0   :  { %v13888_v21 = vadd.f32 %v16324_v48, %v13823_v45  ;;  %v16364_v42 = vadd.f32 %v16363_v32, %v16362_v12  ;;  %v16327_v3 = vadd.f32 %v16326_v54, %v16325_v55  ;;  %v16365_v37 = vpop.f32.mrb[170].mxu0 }
 0x7b1   :  { %v16366_v34 = vpop.f32.mrb[171].mxu0 }
 0x7b2   :  { %v20868_v58 = vadd.f32 %v16364_v42, %v13888_v21  ;;  %v13891_v27 = vadd.f32 %v16327_v3, %v13826_v56  ;;  %v16367_v7 = vadd.f32 %v16366_v34, %v16365_v37 }
 0x7b4   :  { %v13956_v44 = vadd.f32 %v16367_v7, %v13891_v27  ;;  %v16328_v9 = vpop.f32.mrb[156].mxu1 }
 0x7b5   :  { %v16329_v1 = vpop.f32.mrb[157].mxu1 }
 0x7b6   :  { %v16330_v40 = vadd.f32 %v16329_v1, %v16328_v9  ;;  %v16368_v15 = vpop.f32.mrb[172].mxu0  ;;  %v16331_v18 = vpop.f32.mrb[158].mxu1 }
 0x7b7   :  { %v16369_v31 = vpop.f32.mrb[173].mxu0  ;;  %v16332_v20 = vpop.f32.mrb[159].mxu1 }
 0x7b8   :  { %v13896_v23 = vadd.f32 %v16330_v40, %v13831_v19  ;;  %v16370_v47 = vadd.f32 %v16369_v31, %v16368_v15  ;;  %v16333_v6 = vadd.f32 %v16332_v20, %v16331_v18  ;;  %v16371_v39 = vpop.f32.mrb[174].mxu0 }
 0x7b9   :  { %v16372_v16 = vpop.f32.mrb[175].mxu0 }
 0x7ba   :  { %v13961_v22 = vadd.f32 %v16370_v47, %v13896_v23  ;;  %v13899_v46 = vadd.f32 %v16333_v6, %v13834_v35  ;;  %v16373_v5 = vadd.f32 %v16372_v16, %v16371_v39 }
 0x7bc   :  { %v13964_v57 = vadd.f32 %v16373_v5, %v13899_v46  ;;  %v16334_v38 = vpop.f32.mrb[160].mxu1 }
 0x7bd   :  { %v16335_v0 = vpop.f32.mrb[161].mxu1 }
 0x7be   :  { %v16336_v59 = vadd.f32 %v16335_v0, %v16334_v38  ;;  %v16374_v28 = vpop.f32.mrb[176].mxu0  ;;  %v16337_v30 = vpop.f32.mrb[162].mxu1 }
 0x7bf   :  { %v16375_v29 = vpop.f32.mrb[177].mxu0  ;;  %v16338_v50 = vpop.f32.mrb[163].mxu1 }
 0x7c0   :  { %v13904_v17 = vadd.f32 %v16336_v59, %v13839_v8  ;;  %v16376_v4 = vadd.f32 %v16375_v29, %v16374_v28  ;;  %v16339_v26 = vadd.f32 %v16338_v50, %v16337_v30  ;;  %v16377_v25 = vpop.f32.mrb[178].mxu0 }
 0x7c1   :  { %v16378_v13 = vpop.f32.mrb[179].mxu0 }
 0x7c2   :  { %v13969_v63 = vadd.f32 %v16376_v4, %v13904_v17  ;;  %v13907_v43 = vadd.f32 %v16339_v26, %v13842_v51  ;;  %v16379_v10 = vadd.f32 %v16378_v13, %v16377_v25  ;;  %v19359_v13 = vld [vmem:[#allocation12 + $0x30] sm:$0xff]  }
 0x7c3   :  { %16586 = vmatprep.subr.bf16.mxu1 %v19359_v13 }
 0x7c4   :  { %v13972_v41 = vadd.f32 %v16379_v10, %v13907_v43  ;;  %v16340_v53 = vpop.f32.mrb[164].mxu1  ;;  %16587 = vmatpush3.bf16.msra.mxu1 %v19359_v13 }
 0x7c5   :  { %v16341_v36 = vpop.f32.mrb[165].mxu1 }
 0x7c6   :  { %v16342_v52 = vadd.f32 %v16341_v36, %v16340_v53  ;;  %v16380_v61 = vpop.f32.mrb[180].mxu0  ;;  %v16343_v11 = vpop.f32.mrb[166].mxu1 }
 0x7c7   :  { %v16381_v33 = vpop.f32.mrb[181].mxu0  ;;  %v16344_v60 = vpop.f32.mrb[167].mxu1 }
 0x7c8   :  { %v13912_v45 = vadd.f32 %v16342_v52, %v13847_v49  ;;  %v16382_v48 = vadd.f32 %v16381_v33, %v16380_v61  ;;  %v16345_v12 = vadd.f32 %v16344_v60, %v16343_v11  ;;  %v16383_v55 = vpop.f32.mrb[182].mxu0  ;;  %v19360_v61 = vld [vmem:[#allocation12 + $0x38] sm:$0xff]  }
 0x7c9   :  { %v16384_v32 = vpop.f32.mrb[183].mxu0  ;;  %16588 = vmatprep.subr.bf16.mxu1 %v19360_v61 }
 0x7ca   :  { %v13977_v54 = vadd.f32 %v16382_v48, %v13912_v45  ;;  %v13915_v56 = vadd.f32 %v16345_v12, %v13850_v14  ;;  %v16385_v21 = vadd.f32 %v16384_v32, %v16383_v55  ;;  %16589 = vmatpush3.bf16.msra.mxu1 %v19360_v61 }
 0x7cc   :  { %v13980_v42 = vadd.f32 %v16385_v21, %v13915_v56  ;;  %v16402_v3 = vpop.f32.mrb[168].mxu1 }
 0x7cd   :  { %v16403_v37 = vpop.f32.mrb[169].mxu1 }
 0x7ce   :  { %v16404_v62 = vadd.f32 %v16403_v37, %v16402_v3  ;;  %v16405_v34 = vpop.f32.mrb[170].mxu1 }
 0x7cf   :  { %v16406_v27 = vpop.f32.mrb[171].mxu1 }
 0x7d0   :  { %v14018_v7 = vadd.f32 %v16404_v62, %v20868_v58  ;;  %v16407_v9 = vadd.f32 %v16406_v27, %v16405_v34 }
 0x7d2   :  { %v14021_v1 = vadd.f32 %v16407_v9, %v13956_v44 }
 0x7d4   :  { %v16408_v19 = vpop.f32.mrb[172].mxu1 }
 0x7d5   :  { %v16409_v2 = vpop.f32.mrb[173].mxu1 }
 0x7d6   :  { %v16410_v24 = vadd.f32 %v16409_v2, %v16408_v19  ;;  %v16411_v40 = vpop.f32.mrb[174].mxu1 }
 0x7d7   :  { %v16412_v15 = vpop.f32.mrb[175].mxu1 }
 0x7d8   :  { %v14026_v18 = vadd.f32 %v16410_v24, %v13961_v22  ;;  %v16413_v31 = vadd.f32 %v16412_v15, %v16411_v40 }
 0x7da   :  { %v14029_v20 = vadd.f32 %v16413_v31, %v13964_v57 }
 0x7dc   :  { %v16414_v35 = vpop.f32.mrb[176].mxu1 }
 0x7dd   :  { %v16415_v23 = vpop.f32.mrb[177].mxu1 }
 0x7de   :  { %v16416_v47 = vadd.f32 %v16415_v23, %v16414_v35  ;;  %v16417_v6 = vpop.f32.mrb[178].mxu1 }
 0x7df   :  { %v16418_v39 = vpop.f32.mrb[179].mxu1 }
 0x7e0   :  { %v14034_v16 = vadd.f32 %v16416_v47, %v13969_v63  ;;  %v16419_v46 = vadd.f32 %v16418_v39, %v16417_v6 }
 0x7e2   :  { %v14037_v5 = vadd.f32 %v16419_v46, %v13972_v41 }
 0x7e4   :  { %v16420_v38 = vpop.f32.mrb[180].mxu1 }
 0x7e5   :  { %v16421_v58 = vpop.f32.mrb[181].mxu1 }
 0x7e6   :  { %v16422_v0 = vadd.f32 %v16421_v58, %v16420_v38  ;;  %v16423_v44 = vpop.f32.mrb[182].mxu1 }
 0x7e7   :  { %v16424_v8 = vpop.f32.mrb[183].mxu1 }
 0x7e8   :  { %v14042_v59 = vadd.f32 %v16422_v0, %v13977_v54  ;;  %v16425_v28 = vadd.f32 %v16424_v8, %v16423_v44  ;;  %v16442_v30 = vpop.f32.mrb[184].mxu0 }
 0x7e9   :  { %v16443_v29 = vpop.f32.mrb[185].mxu0 }
 0x7ea   :  { %v20878_v22 = vadd.f32 %v16425_v28, %v13980_v42  ;;  %v16444_v57 = vadd.f32 %v16443_v29, %v16442_v30  ;;  %v16445_v50 = vpop.f32.mrb[186].mxu0 }
 0x7eb   :  { %v16446_v51 = vpop.f32.mrb[187].mxu0 }
 0x7ec   :  { %v14083_v17 = vadd.f32 %v16444_v57, %v14018_v7  ;;  %v16482_v4 = vpop.f32.mrb[184].mxu1  ;;  %v16447_v26 = vadd.f32 %v16446_v51, %v16445_v50 }
 0x7ed   :  { %v16483_v25 = vpop.f32.mrb[185].mxu1 }
 0x7ee   :  { %v16484_v63 = vadd.f32 %v16483_v25, %v16482_v4  ;;  %v14086_v43 = vadd.f32 %v16447_v26, %v14021_v1  ;;  %v16485_v10 = vpop.f32.mrb[186].mxu1 }
 0x7ef   :  { %v16486_v41 = vpop.f32.mrb[187].mxu1 }
 0x7f0   :  { %v16487_v53 = vadd.f32 %v16486_v41, %v16485_v10  ;;  %v16448_v36 = vpop.f32.mrb[188].mxu0  ;;  %v14148_v49 = vadd.f32 %v16484_v63, %v14083_v17 }
 0x7f1   :  { %v16449_v52 = vpop.f32.mrb[189].mxu0 }
 0x7f2   :  { %v16450_v11 = vadd.f32 %v16449_v52, %v16448_v36  ;;  %v16451_v33 = vpop.f32.mrb[190].mxu0  ;;  %v14151_v60 = vadd.f32 %v16487_v53, %v14086_v43 }
 0x7f3   :  { %v16452_v14 = vpop.f32.mrb[191].mxu0 }
 0x7f4   :  { %v14091_v45 = vadd.f32 %v16450_v11, %v14026_v18  ;;  %v16488_v48 = vpop.f32.mrb[188].mxu1  ;;  %v16453_v12 = vadd.f32 %v16452_v14, %v16451_v33 }
 0x7f5   :  { %v16489_v55 = vpop.f32.mrb[189].mxu1 }
 0x7f6   :  { %v16490_v32 = vadd.f32 %v16489_v55, %v16488_v48  ;;  %v14094_v54 = vadd.f32 %v16453_v12, %v14029_v20  ;;  %v16491_v56 = vpop.f32.mrb[190].mxu1 }
 0x7f7   :  { %v16492_v21 = vpop.f32.mrb[191].mxu1 }
 0x7f8   :  { %v16493_v42 = vadd.f32 %v16492_v21, %v16491_v56  ;;  %v16454_v3 = vpop.f32.mrb[192].mxu0  ;;  %v14156_v37 = vadd.f32 %v16490_v32, %v14091_v45  ;;  %v16001_v21 = vld [vmem:[#allocation13] ss:$0 sm:$0xff] }
 0x7f9   :  { %v16455_v62 = vpop.f32.mrb[193].mxu0 }
 0x7fa   :  { %v16456_v34 = vadd.f32 %v16455_v62, %v16454_v3  ;;  %v16457_v27 = vpop.f32.mrb[194].mxu0  ;;  %v14159_v7 = vadd.f32 %v16493_v42, %v14094_v54 }
 0x7fb   :  { %v16458_v9 = vpop.f32.mrb[195].mxu0 }
 0x7fc   :  { %v14099_v1 = vadd.f32 %v16456_v34, %v14034_v16  ;;  %v16494_v19 = vpop.f32.mrb[192].mxu1  ;;  %v16459_v2 = vadd.f32 %v16458_v9, %v16457_v27 }
 0x7fd   :  { %v16495_v24 = vpop.f32.mrb[193].mxu1 }
 0x7fe   :  { %v16496_v40 = vadd.f32 %v16495_v24, %v16494_v19  ;;  %v14102_v15 = vadd.f32 %v16459_v2, %v14037_v5  ;;  %v16497_v18 = vpop.f32.mrb[194].mxu1 }
 0x7ff   :  { %v16498_v31 = vpop.f32.mrb[195].mxu1 }
 0x800   :  { %v16499_v35 = vadd.f32 %v16498_v31, %v16497_v18  ;;  %v16460_v20 = vpop.f32.mrb[196].mxu0  ;;  %v14164_v23 = vadd.f32 %v16496_v40, %v14099_v1 }
 0x801   :  { %v16461_v47 = vpop.f32.mrb[197].mxu0 }
 0x802   :  { %v16462_v6 = vadd.f32 %v16461_v47, %v16460_v20  ;;  %v16463_v39 = vpop.f32.mrb[198].mxu0  ;;  %v14167_v46 = vadd.f32 %v16499_v35, %v14102_v15 }
 0x803   :  { %v16464_v38 = vpop.f32.mrb[199].mxu0 }
 0x804   :  { %v14107_v58 = vadd.f32 %v16462_v6, %v14042_v59  ;;  %v16500_v0 = vpop.f32.mrb[196].mxu1  ;;  %v16465_v44 = vadd.f32 %v16464_v38, %v16463_v39 }
 0x805   :  { %v16501_v8 = vpop.f32.mrb[197].mxu1 }
 0x806   :  { %v16502_v16 = vadd.f32 %v16501_v8, %v16500_v0  ;;  %v14110_v28 = vadd.f32 %v16465_v44, %v20878_v22  ;;  %v16503_v30 = vpop.f32.mrb[198].mxu1 }
 0x807   :  { %v16504_v29 = vpop.f32.mrb[199].mxu1 }
 0x808   :  { %v16505_v5 = vadd.f32 %v16504_v29, %v16503_v30  ;;  %v14172_v57 = vadd.f32 %v16502_v16, %v14107_v58 }
 0x80a   :  { %v14175_v50 = vadd.f32 %v16505_v5, %v14110_v28 }
 0x86a   :  { %v16568_v51 = vpop.f32.mrb[200].mxu0 }
 0x86b   :  { %v14221_v17 = vadd.f32 %v16568_v51, %v14156_v37  ;;  %v14212_v4 = vpop.f32.mrb[201].mxu0 }
 0x86c   :  { %v14213_v26 = vadd.f32 %v14212_v4, %v14148_v49  ;;  %v16569_v25 = vpop.f32.mrb[202].mxu0 }
 0x86d   :  { %v14224_v13 = vadd.f32 %v16569_v25, %v14159_v7  ;;  %v14215_v63 = vpop.f32.mrb[203].mxu0  ;;  %v14245_v59 = vmax.f32 %v14221_v17, 0.0 }
 0x86e   :  { %v14216_v43 = vadd.f32 %v14215_v63, %v14151_v60  ;;  %v14243_v41 = vmax.f32 %v14213_v26, 0.0 }
 0x86f   :  { %v14246_v10 = vmax.f32 %v14224_v13, 0.0 }
 0x870   :  { %v14244_v53 = vmax.f32 %v14216_v43, 0.0 }
 0x871   :  { %v14252_v36 = vpack.c.bf16 %v14246_v10, %v14245_v59 }
 0x872   :  { %v14251_v52 = vpack.c.bf16 %v14244_v53, %v14243_v41  ;;  %v16572_v22 = vpop.f32.mrb[204].mxu0 }
 0x873   :  { %v14237_v61 = vadd.f32 %v16572_v22, %v14172_v57  ;;  %v14228_v11 = vpop.f32.mrb[205].mxu0 }
 0x874   :  { %v14229_v33 = vadd.f32 %v14228_v11, %v14164_v23  ;;  %v16573_v14 = vpop.f32.mrb[206].mxu0  ;;  %16590 = vmatprep.mubr.bf16.mxu1 %v14251_v52 }
 0x875   :  { %v14240_v45 = vadd.f32 %v16573_v14, %v14175_v50  ;;  %v14231_v48 = vpop.f32.mrb[207].mxu0  ;;  %16591 = vmatmul.mubr.bf16.vlgmr.msra.gmra.mrb[200].mxu1 %v14252_v36  ;;  %v14249_v12 = vmax.f32 %v14237_v61, 0.0 }
 0x876   :  { %v14232_v49 = vadd.f32 %v14231_v48, %v14167_v46  ;;  %v14247_v32 = vmax.f32 %v14229_v33, 0.0 }
 0x877   :  { %v14250_v55 = vmax.f32 %v14240_v45, 0.0 }
 0x878   :  { %v14248_v60 = vmax.f32 %v14232_v49, 0.0 }
 0x879   :  { %v14254_v54 = vpack.c.bf16 %v14250_v55, %v14249_v12 }
 0x87a   :  { %v14253_v56 = vpack.c.bf16 %v14248_v60, %v14247_v32 }
 0x87c   :  { %16594 = vmatprep.mubr.bf16.mxu1 %v14253_v56 }
 0x87d   :  { %16595 = vmatmul.mubr.bf16.gmra.mrb[204].mxu1 %v14254_v54 }
 0x948   :  { %v16592_v42 = vpop.f32.mrb[200].mxu1 }
 0x949   :  { %v14369_v3 = vadd.f32 %v16592_v42, %v16001_v21  ;;  %v14360_v37 = vpop.f32.mrb[201].mxu1 }
 0x94a   :  { %v14361_v62 = vadd.f32 %v16001_v21, %v14360_v37  ;;  %v16593_v34 = vpop.f32.mrb[202].mxu1 }
 0x94b   :  { %14395 = vmax.xlane.f32.xlu1 %v14369_v3  ;;  %v14363_v27 = vpop.f32.mrb[203].mxu1  ;;  %v14372_v7 = vadd.f32 %v16593_v34, %v16001_v21 }
 0x94c   :  { %14391 = vmax.xlane.f32.xlu0 %v14361_v62  ;;  %v14364_v9 = vadd.f32 %v16001_v21, %v14363_v27 }
 0x94f   :  { %14397 = vmax.xlane.f32.xlu1 %v14372_v7 }
 0x950   :  { %v16596_v1 = vpop.f32.mrb[204].mxu1  ;;  %14393 = vmax.xlane.f32.xlu0 %v14364_v9 }
 0x951   :  { %v14376_v19 = vpop.f32.mrb[205].mxu1  ;;  %v14385_v18 = vadd.f32 %v16596_v1, %v16001_v21 }
 0x952   :  { %v14377_v2 = vadd.f32 %v16001_v21, %v14376_v19  ;;  %v16597_v24 = vpop.f32.mrb[206].mxu1 }
 0x953   :  { %v14379_v40 = vpop.f32.mrb[207].mxu1  ;;  %v14388_v31 = vadd.f32 %v16597_v24, %v16001_v21 }
 0x954   :  { %v14380_v15 = vadd.f32 %v16001_v21, %v14379_v40  ;;  %14399 = vmax.xlane.f32.xlu0 %v14377_v2 }
 0x956   :  { %14401 = vmax.xlane.f32.xlu1 %v14380_v15 }
 0x958   :  { %14403 = vmax.xlane.f32.xlu0 %v14385_v18 }
 0x95a   :  { %14405 = vmax.xlane.f32.xlu1 %v14388_v31 }
 0x9d8   :  { %v14396_v35 = vpop.xlane.xlu1 %14395 }
 0x9d9   :  { %v20881_v20 = vsub.f32 %v14369_v3, %v14396_v35  ;;  %v14392_v23 = vpop.xlane.xlu0 %14391 }
 0x9da   :  { %v20883_v47 = vsub.f32 %v14361_v62, %v14392_v23 }
 0x9db   :  { %v14419_v6 = vmul.f32 1.442695, %v20881_v20 }
 0x9dc   :  { %v14415_v39 = vmul.f32 1.442695, %v20883_v47  ;;  %v14398_v46 = vpop.xlane.xlu1 %14397 }
 0x9dd   :  { %19361 = vpow2.f32 %v14419_v6  ;;  %v20887_v38 = vsub.f32 %v14372_v7, %v14398_v46  ;;  %v14394_v58 = vpop.xlane.xlu0 %14393 }
 0x9de   :  { %v20889_v0 = vsub.f32 %v14364_v9, %v14394_v58  ;;  %19363 = vpow2.f32 %v14415_v39 }
 0x9df   :  { %v14421_v44 = vmul.f32 1.442695, %v20887_v38 }
 0x9e0   :  { %v14417_v8 = vmul.f32 1.442695, %v20889_v0 }
 0x9e1   :  { %19365 = vpow2.f32 %v14421_v44  ;;  %v14400_v16 = vpop.xlane.xlu0 %14399 }
 0x9e2   :  { %v20893_v28 = vsub.f32 %v14377_v2, %v14400_v16  ;;  %19367 = vpow2.f32 %v14417_v8 }
 0x9e3   :  { %v14402_v30 = vpop.xlane.xlu1 %14401 }
 0x9e4   :  { %v14423_v29 = vmul.f32 1.442695, %v20893_v28  ;;  %v20896_v5 = vsub.f32 %v14380_v15, %v14402_v30 }
 0x9e5   :  { %v14404_v57 = vpop.xlane.xlu0 %14403 }
 0x9e6   :  { %19369 = vpow2.f32 %v14423_v29  ;;  %v14425_v50 = vmul.f32 1.442695, %v20896_v5  ;;  %v20899_v51 = vsub.f32 %v14385_v18, %v14404_v57 }
 0x9e7   :  { %v19362_v17 = vpop.eup %19361  ;;  %v14406_v4 = vpop.xlane.xlu1 %14405 }
 0x9e8   :  { %19371 = vpow2.f32 %v14425_v50  ;;  %v14427_v26 = vmul.f32 1.442695, %v20899_v51  ;;  %v20902_v25 = vsub.f32 %v14388_v31, %v14406_v4  ;;  %14435 = vadd.xlane.f32.xlu0 %v19362_v17  ;;  %v19364_v13 = vpop.eup %19363 }
 0x9ea   :  { %19373 = vpow2.f32 %v14427_v26  ;;  %v14429_v63 = vmul.f32 1.442695, %v20902_v25 }
 0x9eb   :  { %v19366_v43 = vpop.eup %19365 }
 0x9ec   :  { %19375 = vpow2.f32 %v14429_v63  ;;  %14437 = vadd.xlane.f32.xlu1 %v19366_v43  ;;  %14431 = vadd.xlane.f32.xlu0 %v19364_v13  ;;  %v19368_v59 = vpop.eup %19367 }
 0x9f0   :  { %v19370_v10 = vpop.eup %19369  ;;  %14433 = vadd.xlane.f32.xlu1 %v19368_v59 }
 0x9f1   :  { %14439 = vadd.xlane.f32.xlu0 %v19370_v10 }
 0x9f2   :  { %v19372_v41 = vpop.eup %19371 }
 0x9f4   :  { %v19374_v53 = vpop.eup %19373  ;;  %14441 = vadd.xlane.f32.xlu1 %v19372_v41 }
 0x9f5   :  { %14443 = vadd.xlane.f32.xlu0 %v19374_v53 }
 0x9f6   :  { %v19376_v36 = vpop.eup %19375 }
 0x9f8   :  { %14445 = vadd.xlane.f32.xlu1 %v19376_v36 }
 0xa75   :  { %v14436_v52 = vpop.xlane.xlu0 %14435 }
 0xa76   :  { %19377 = vlog2.f32 %v14436_v52 }
 0xa79   :  { %v14438_v22 = vpop.xlane.xlu1 %14437  ;;  %v14432_v61 = vpop.xlane.xlu0 %14431 }
 0xa7a   :  { %19379 = vlog2.f32 %v14438_v22 }
 0xa7b   :  { %19381 = vlog2.f32 %v14432_v61 }
 0xa7d   :  { %v14434_v11 = vpop.xlane.xlu1 %14433 }
 0xa7e   :  { %19383 = vlog2.f32 %v14434_v11  ;;  %v14440_v33 = vpop.xlane.xlu0 %14439 }
 0xa7f   :  { %19385 = vlog2.f32 %v14440_v33 }
 0xa80   :  { %v19378_v14 = vpop.eup %19377 }
 0xa81   :  { %v14452_v45 = vmul.f32 0.6931472, %v19378_v14  ;;  %v14442_v48 = vpop.xlane.xlu1 %14441 }
 0xa82   :  { %19387 = vlog2.f32 %v14442_v48  ;;  %v14444_v49 = vpop.xlane.xlu0 %14443 }
 0xa83   :  { %v14465_v12 = vsub.f32 %v20881_v20, %v14452_v45  ;;  %19389 = vlog2.f32 %v14444_v49 }
 0xa84   :  { %v19380_v55 = vpop.eup %19379 }
 0xa85   :  { %v19382_v32 = vpop.eup %19381  ;;  %14473 = vst [vmem:[%s20946_s9 + $0x10] sm:$0xff] %v14465_v12  ;;  %v14454_v60 = vmul.f32 0.6931472, %v19380_v55  ;;  %v14446_v54 = vpop.xlane.xlu1 %14445 }
 0xa86   :  { %v14448_v56 = vmul.f32 0.6931472, %v19382_v32  ;;  %19391 = vlog2.f32 %v14446_v54 }
 0xa87   :  { %v14466_v21 = vsub.f32 %v20887_v38, %v14454_v60 }
 0xa88   :  { %v19384_v42 = vpop.eup %19383  ;;  %v14463_v3 = vsub.f32 %v20883_v47, %v14448_v56 }
 0xa89   :  { %v19386_v37 = vpop.eup %19385  ;;  %14474 = vst [vmem:[%s20946_s9 + $0x18] sm:$0xff] %v14466_v21  ;;  %v14450_v62 = vmul.f32 0.6931472, %v19384_v42 }
 0xa8a   :  { %14471 = vst [vmem:[%s20946_s9] sm:$0xff] %v14463_v3  ;;  %v14456_v34 = vmul.f32 0.6931472, %v19386_v37 }
 0xa8b   :  { %v14464_v27 = vsub.f32 %v20889_v0, %v14450_v62 }
 0xa8c   :  { %v19388_v7 = vpop.eup %19387  ;;  %v14467_v9 = vsub.f32 %v20893_v28, %v14456_v34 }
 0xa8d   :  { %v19390_v1 = vpop.eup %19389  ;;  %14472 = vst [vmem:[%s20946_s9 + $0x8] sm:$0xff] %v14464_v27  ;;  %v14458_v19 = vmul.f32 0.6931472, %v19388_v7 }
 0xa8e   :  { %14475 = vst [vmem:[%s20946_s9 + $0x20] sm:$0xff] %v14467_v9  ;;  %v14460_v2 = vmul.f32 0.6931472, %v19390_v1 }
 0xa8f   :  { %v14468_v24 = vsub.f32 %v20896_v5, %v14458_v19 }
 0xa90   :  { %v19392_v40 = vpop.eup %19391  ;;  %v14469_v15 = vsub.f32 %v20899_v51, %v14460_v2 }
 0xa91   :  { %14476 = vst [vmem:[%s20946_s9 + $0x28] sm:$0xff] %v14468_v24  ;;  %v14462_v18 = vmul.f32 0.6931472, %v19392_v40 }
 0xa92   :  { %14477 = vst [vmem:[%s20946_s9 + $0x30] sm:$0xff] %v14469_v15 }
 0xa93   :  { %v14470_v31 = vsub.f32 %v20902_v25, %v14462_v18 }
 0xa95   :  { %14478 = vst [vmem:[%s20946_s9 + $0x38] sm:$0xff] %v14470_v31 }
 0xa96   :  { %14483 = vsyncpa [#allocation3], 1 }
 0xa97   :  { %14484 = vsyncpa [#allocation5], 1 }
 0xa98   :  { %14485 = vsyncpa [#allocation8], 1 }
 0xa99   :  { %14486 = vsyncpa [#allocation11], 1 }
 0xa9a   :  { %14487 = vsyncpa [#allocation14], 1 }

</bundles_post_ra>
